<compile_context>
chip_gen: v7x
topology: tpu7x:2x2x1
jax: 0.10.0
libtpu: 0.0.40
codegen_flags: <defaults>
</compile_context>

<pallas_src>
import functools

import jax
import jax.numpy as jnp
from jax.experimental import pallas as pl
from jax.experimental.pallas import tpu as pltpu


# -----------------------------------------------------------------------------
# Fused kernel: for one batch item, run all four generator applications.
# -----------------------------------------------------------------------------
def _cyclegan_test_kernel(
    xa_ref, xb_ref, w_ab_ref, b_ab_ref, w_ba_ref, b_ba_ref,
    gen_a_ref, gen_b_ref, cyc_a_ref, cyc_b_ref,
    *, n_blocks, W,
):
    # xa_ref / xb_ref : (1, C, HW)   f32, channel-padded inputs (lane-dense)
    # w_*_ref         : (L, C, 9*C)  bf16 packed conv weights per generator
    # b_*_ref         : (L, C, 1)    f32 packed biases
    # outputs         : (1, C, HW)   f32
    C = xa_ref.shape[1]
    HW = xa_ref.shape[2]

    # Column masks emulating zero padding when a flat lane shift crosses a row
    # boundary (hoisted: shared by all 24 convs).
    col = jax.lax.broadcasted_iota(jnp.int32, (1, HW), 1) % W
    mask_l = (col != 0).astype(jnp.float32)       # used when dw == -1
    mask_r = (col != W - 1).astype(jnp.float32)   # used when dw == +1

    # Zero extension of the flattened spatial axis by (W+1) on each side so a
    # tap that walks off the first/last image row reads 0 (hoisted).
    zpad = jnp.zeros((C, W + 1), jnp.float32)

    def conv3x3(h, w_ref, b_ref, li, act, residual=None):
        # h: (C, HW) f32 -> (C, HW) f32
        hp = jnp.concatenate([zpad, h, zpad], axis=1)          # (C, HW+2W+2)
        slabs = []
        for dh in (-1, 0, 1):
            for dw in (-1, 0, 1):
                start = (W + 1) + dh * W + dw                  # static
                s = hp[:, start:start + HW]                    # (C, HW)
                if dw == -1:
                    s = s * mask_l
                elif dw == 1:
                    s = s * mask_r
                slabs.append(s)
        # Single im2col matmul per conv: contraction = 9*C, output lane-dense.
        patches = jnp.concatenate(slabs, axis=0).astype(jnp.bfloat16)  # (9C,HW)
        acc = jnp.dot(w_ref[li], patches,
                      preferred_element_type=jnp.float32)      # (C, HW) f32
        acc = acc + b_ref[li]                                  # (C,1) bcast
        if residual is not None:
            acc = acc + residual                               # fused skip add
        if act == "relu":
            acc = jnp.maximum(acc, 0.0)
        elif act == "tanh":
            acc = jnp.tanh(acc)
        return acc

    def run_generator(x, w_ref, b_ref):
        h = conv3x3(x, w_ref, b_ref, 0, "relu")                # head
        li = 1
        for _ in range(n_blocks):                              # residual blocks
            r = conv3x3(h, w_ref, b_ref, li, "relu")
            h = conv3x3(r, w_ref, b_ref, li + 1, "none", residual=h)
            li += 2
        return conv3x3(h, w_ref, b_ref, li, "tanh")            # tail

    gen_a = run_generator(xb_ref[0], w_ba_ref, b_ba_ref)       # G_BA(input_B)
    gen_b = run_generator(xa_ref[0], w_ab_ref, b_ab_ref)       # G_AB(input_A)
    cyc_a = run_generator(gen_b, w_ba_ref, b_ba_ref)           # G_BA(G_AB(A))
    cyc_b = run_generator(gen_a, w_ab_ref, b_ab_ref)           # G_AB(G_BA(B))

    gen_a_ref[0] = gen_a
    gen_b_ref[0] = gen_b
    cyc_a_ref[0] = cyc_a
    cyc_b_ref[0] = cyc_b


# -----------------------------------------------------------------------------
# Parameter init (matches CycleGAN.init_weights for Conv2d: N(0, 0.02)).
# Weights are HWIO: (3, 3, Cin, Cout); biases zero.
# -----------------------------------------------------------------------------
def init_generator_params(key, cin, cout, cres, n_blocks):
    params = {}
    key, k = jax.random.split(key)
    params["head_w"] = 0.02 * jax.random.normal(k, (3, 3, cin, cres), jnp.float32)
    params["head_b"] = jnp.zeros((cres,), jnp.float32)
    blocks = []
    for _ in range(n_blocks):
        key, k1, k2 = jax.random.split(key, 3)
        blocks.append({
            "w1": 0.02 * jax.random.normal(k1, (3, 3, cres, cres), jnp.float32),
            "b1": jnp.zeros((cres,), jnp.float32),
            "w2": 0.02 * jax.random.normal(k2, (3, 3, cres, cres), jnp.float32),
            "b2": jnp.zeros((cres,), jnp.float32),
        })
    params["blocks"] = blocks
    key, k = jax.random.split(key)
    params["tail_w"] = 0.02 * jax.random.normal(k, (3, 3, cres, cout), jnp.float32)
    params["tail_b"] = jnp.zeros((cout,), jnp.float32)
    return params


def _round_up(x, m):
    return (x + m - 1) // m * m


def _pack_generator_params(params, c_pad):
    """Pack HWIO weights into (L, c_pad, 9*c_pad) bf16 + biases (L, c_pad, 1) f32.

    Contraction-row order matches the kernel's im2col stacking:
    row = (dh_idx*3 + dw_idx) * c_pad + cin.
    """
    def pack_w(w):
        kh, kw, cin, cout = w.shape
        wp = jnp.zeros((kh, kw, c_pad, c_pad), jnp.float32)
        wp = wp.at[:, :, :cin, :cout].set(w)
        return jnp.transpose(wp, (3, 0, 1, 2)).reshape(c_pad, kh * kw * c_pad)

    def pack_b(b):
        bp = jnp.zeros((c_pad, 1), jnp.float32)
        return bp.at[:b.shape[0], 0].set(b)

    ws = [pack_w(params["head_w"])]
    bs = [pack_b(params["head_b"])]
    for blk in params["blocks"]:
        ws += [pack_w(blk["w1"]), pack_w(blk["w2"])]
        bs += [pack_b(blk["b1"]), pack_b(blk["b2"])]
    ws.append(pack_w(params["tail_w"]))
    bs.append(pack_b(params["tail_b"]))
    return jnp.stack(ws).astype(jnp.bfloat16), jnp.stack(bs)


# -----------------------------------------------------------------------------
# CycleGAN inference forward (equivalent of CycleGAN.test()), one pallas_call.
# -----------------------------------------------------------------------------
def cyclegan_test(params_AB, params_BA, input_A_nchw, input_B_nchw):
    N, Cin, H, W = input_A_nchw.shape
    Cout = params_AB["tail_w"].shape[-1]
    Cres = params_AB["head_w"].shape[-1]
    n_blocks = len(params_AB["blocks"])
    HW = H * W
    c_pad = _round_up(max(Cin, Cout, Cres), 8)
    L = 2 + 2 * n_blocks

    w_ab, b_ab = _pack_generator_params(params_AB, c_pad)
    w_ba, b_ba = _pack_generator_params(params_BA, c_pad)

    def to_kernel(x):  # NCHW -> (N, c_pad, HW), channels zero-padded
        x = x.reshape(N, Cin, HW)
        return jnp.pad(x, ((0, 0), (0, c_pad - Cin), (0, 0)))

    xa = to_kernel(input_A_nchw)
    xb = to_kernel(input_B_nchw)

    kern = functools.partial(_cyclegan_test_kernel, n_blocks=n_blocks, W=W)
    img = jax.ShapeDtypeStruct((N, c_pad, HW), jnp.float32)
    img_spec = pl.BlockSpec((1, c_pad, HW), lambda n: (n, 0, 0))
    w_spec = pl.BlockSpec((L, c_pad, 9 * c_pad), lambda n: (0, 0, 0))
    b_spec = pl.BlockSpec((L, c_pad, 1), lambda n: (0, 0, 0))

    gen_a, gen_b, cyc_a, cyc_b = pl.pallas_call(
        kern,
        out_shape=(img, img, img, img),
        grid_spec=pltpu.PrefetchScalarGridSpec(
            num_scalar_prefetch=0,
            grid=(N,),
            in_specs=[img_spec, img_spec, w_spec, b_spec, w_spec, b_spec],
            out_specs=(img_spec, img_spec, img_spec, img_spec),
        ),
        compiler_params=pltpu.CompilerParams(
            dimension_semantics=("parallel",),
        ),
    )(xa, xb, w_ab, b_ab, w_ba, b_ba)

    def from_kernel(y):  # (N, c_pad, HW) -> NCHW with real output channels
        return y[:, :Cout, :].reshape(N, Cout, H, W)

    return (from_kernel(gen_a), from_kernel(gen_b),
            from_kernel(cyc_a), from_kernel(cyc_b))


# -----------------------------------------------------------------------------
# Pure-JAX reference (f32) for a sanity check of the fused kernel.
# -----------------------------------------------------------------------------
def _reference_generator(params, x_nchw):
    def conv(x, w, b):
        y = jax.lax.conv_general_dilated(
            x, w, window_strides=(1, 1), padding="SAME",
            dimension_numbers=("NCHW", "HWIO", "NCHW"))
        return y + b[None, :, None, None]

    h = jax.nn.relu(conv(x_nchw, params["head_w"], params["head_b"]))
    for blk in params["blocks"]:
        r = jax.nn.relu(conv(h, blk["w1"], blk["b1"]))
        r = conv(r, blk["w2"], blk["b2"])
        h = h + r
    return jnp.tanh(conv(h, params["tail_w"], params["tail_b"]))


# TODO(synk): training-side machinery (ImagePool, GANLoss/L1 losses with
# backward(), Adam optimizers, LR schedulers) and the Discriminator (only used
# in the loss paths, never in forward/test) are intentionally not translated.

if __name__ == "__main__":
    # Synthetic opt: g_input_channels=g_output_channels=4,
    # g_residual_block_channels=8, g_num_residual_blocks=2.
    N, C, H, W = 2, 4, 16, 16
    C_RES, N_BLOCKS = 8, 2

    key = jax.random.PRNGKey(0)
    key, kab, kba, ka, kb = jax.random.split(key, 5)

    params_AB = init_generator_params(kab, C, C, C_RES, N_BLOCKS)
    params_BA = init_generator_params(kba, C, C, C_RES, N_BLOCKS)

    input_A = jax.random.normal(ka, (N, C, H, W), jnp.float32)  # NCHW like torch
    input_B = jax.random.normal(kb, (N, C, H, W), jnp.float32)

    fwd = jax.jit(cyclegan_test)
    gen_A, gen_B, cyc_A, cyc_B = fwd(params_AB, params_BA, input_A, input_B)
    jax.block_until_ready((gen_A, gen_B, cyc_A, cyc_B))

    for t in (gen_A, gen_B, cyc_A, cyc_B):
        assert t.shape == (N, C, H, W)

    # Loose numerical check vs. f32 reference (kernel uses bf16 MXU operands;
    # a structural bug would produce errors on the order of the signal itself).
    ref_gen_A = _reference_generator(params_BA, input_B)
    ref_gen_B = _reference_generator(params_AB, input_A)
    ref_cyc_A = _reference_generator(params_BA, ref_gen_B)
    ref_cyc_B = _reference_generator(params_AB, ref_gen_A)
    for got, ref in ((gen_A, ref_gen_A), (gen_B, ref_gen_B),
                     (cyc_A, ref_cyc_A), (cyc_B, ref_cyc_B)):
        err = float(jnp.max(jnp.abs(got - ref)))
        tol = 1e-2 + 2e-2 * float(jnp.max(jnp.abs(ref)))
        assert err <= tol, (err, tol)

    print("KERNEL_OK")
</pallas_src>

<mosaic_0001>
module attributes {stable_mosaic.version = 11 : i64} {
  func.func @_cyclegan_test_kernel(%arg0: i32, %arg1: memref<1x8x256xf32, #tpu.memory_space<vmem>>, %arg2: memref<1x8x256xf32, #tpu.memory_space<vmem>>, %arg3: memref<6x8x72xbf16, #tpu.memory_space<vmem>>, %arg4: memref<6x8x1xf32, #tpu.memory_space<vmem>>, %arg5: memref<6x8x72xbf16, #tpu.memory_space<vmem>>, %arg6: memref<6x8x1xf32, #tpu.memory_space<vmem>>, %arg7: memref<1x8x256xf32, #tpu.memory_space<vmem>>, %arg8: memref<1x8x256xf32, #tpu.memory_space<vmem>>, %arg9: memref<1x8x256xf32, #tpu.memory_space<vmem>>, %arg10: memref<1x8x256xf32, #tpu.memory_space<vmem>>) attributes {dimension_semantics = [#tpu.dimension_semantics<parallel>], iteration_bounds = array<i64: 2>, scalar_prefetch = 0 : i64, scratch_operands = 0 : i64, tpu.core_type = #tpu.core_type<tc>, window_params = [{transform_indices = @transform_0, window_bounds = array<i64: 1, 8, 256>}, {transform_indices = @transform_1, window_bounds = array<i64: 1, 8, 256>}, {pipeline_mode = #tpu.pipeline_mode<synchronous>, transform_indices = @transform_2, window_bounds = array<i64: 6, 8, 72>}, {pipeline_mode = #tpu.pipeline_mode<synchronous>, transform_indices = @transform_3, window_bounds = array<i64: 6, 8, 1>}, {pipeline_mode = #tpu.pipeline_mode<synchronous>, transform_indices = @transform_4, window_bounds = array<i64: 6, 8, 72>}, {pipeline_mode = #tpu.pipeline_mode<synchronous>, transform_indices = @transform_5, window_bounds = array<i64: 6, 8, 1>}, {transform_indices = @transform_6, window_bounds = array<i64: 1, 8, 256>}, {transform_indices = @transform_7, window_bounds = array<i64: 1, 8, 256>}, {transform_indices = @transform_8, window_bounds = array<i64: 1, 8, 256>}, {transform_indices = @transform_9, window_bounds = array<i64: 1, 8, 256>}]} {
    %0 = tpu.iota {dimensions = array<i32: 1>} : vector<1x256xi32>
    %c16_i32 = arith.constant 16 : i32
    %c0_i32 = arith.constant 0 : i32
    %1 = arith.cmpi eq, %c16_i32, %c0_i32 : i32
    %c1_i32 = arith.constant 1 : i32
    %2 = arith.select %1, %c1_i32, %c16_i32 : i32
    %3 = vector.broadcast %2 : i32 to vector<1x256xi32>
    %4 = arith.remsi %0, %3 : vector<1x256xi32>
    %c0_i32_0 = arith.constant 0 : i32
    %5 = vector.broadcast %c0_i32_0 : i32 to vector<1x256xi32>
    %6 = arith.cmpi ne, %4, %5 : vector<1x256xi32>
    %c0_i32_1 = arith.constant 0 : i32
    %7 = vector.broadcast %c0_i32_1 : i32 to vector<1x256xi32>
    %8 = arith.cmpi slt, %4, %7 : vector<1x256xi32>
    %c0_i32_2 = arith.constant 0 : i32
    %9 = arith.cmpi slt, %2, %c0_i32_2 : i32
    %10 = vector.broadcast %9 : i1 to vector<1x256xi1>
    %11 = vector.broadcast %10 : vector<1x256xi1> to vector<1x256xi1>
    %12 = arith.xori %8, %11 : vector<1x256xi1>
    %13 = arith.andi %12, %6 : vector<1x256xi1>
    %14 = vector.broadcast %2 : i32 to vector<1x256xi32>
    %15 = arith.addi %4, %14 : vector<1x256xi32>
    %16 = arith.select %13, %15, %4 : vector<1x256xi1>, vector<1x256xi32>
    %c0_i32_3 = arith.constant 0 : i32
    %17 = vector.broadcast %c0_i32_3 : i32 to vector<1x256xi32>
    %18 = arith.cmpi ne, %16, %17 : vector<1x256xi32>
    %19 = arith.extui %18 : vector<1x256xi1> to vector<1x256xi32>
    %20 = arith.sitofp %19 : vector<1x256xi32> to vector<1x256xf32>
    %c15_i32 = arith.constant 15 : i32
    %21 = vector.broadcast %c15_i32 : i32 to vector<1x256xi32>
    %22 = arith.cmpi ne, %16, %21 : vector<1x256xi32>
    %23 = arith.extui %22 : vector<1x256xi1> to vector<1x256xi32>
    %24 = arith.sitofp %23 : vector<1x256xi32> to vector<1x256xf32>
    %cst = arith.constant 0.000000e+00 : f32
    %25 = vector.broadcast %cst : f32 to vector<8x17xf32>
    %c0 = arith.constant 0 : index
    %c0_4 = arith.constant 0 : index
    %c0_5 = arith.constant 0 : index
    %26 = vector.load %arg2[%c0, %c0_4, %c0_5] : memref<1x8x256xf32, #tpu.memory_space<vmem>>, vector<1x8x256xf32>
    %27 = vector.shape_cast %26 : vector<1x8x256xf32> to vector<8x256xf32>
    %28 = tpu.concatenate %25, %27, %25 in 1 : vector<8x17xf32>, vector<8x256xf32>, vector<8x17xf32> -> vector<8x290xf32>
    %29 = vector.extract_strided_slice %28 {offsets = [0, 0], sizes = [8, 256], strides = [1, 1]} : vector<8x290xf32> to vector<8x256xf32>
    %30 = vector.broadcast %20 : vector<1x256xf32> to vector<8x256xf32>
    %31 = arith.mulf %29, %30 : vector<8x256xf32>
    %32 = vector.extract_strided_slice %28 {offsets = [0, 1], sizes = [8, 256], strides = [1, 1]} : vector<8x290xf32> to vector<8x256xf32>
    %33 = vector.extract_strided_slice %28 {offsets = [0, 2], sizes = [8, 256], strides = [1, 1]} : vector<8x290xf32> to vector<8x256xf32>
    %34 = vector.broadcast %24 : vector<1x256xf32> to vector<8x256xf32>
    %35 = arith.mulf %33, %34 : vector<8x256xf32>
    %36 = vector.extract_strided_slice %28 {offsets = [0, 16], sizes = [8, 256], strides = [1, 1]} : vector<8x290xf32> to vector<8x256xf32>
    %37 = vector.broadcast %20 : vector<1x256xf32> to vector<8x256xf32>
    %38 = arith.mulf %36, %37 : vector<8x256xf32>
    %39 = vector.extract_strided_slice %28 {offsets = [0, 17], sizes = [8, 256], strides = [1, 1]} : vector<8x290xf32> to vector<8x256xf32>
    %40 = vector.extract_strided_slice %28 {offsets = [0, 18], sizes = [8, 256], strides = [1, 1]} : vector<8x290xf32> to vector<8x256xf32>
    %41 = vector.broadcast %24 : vector<1x256xf32> to vector<8x256xf32>
    %42 = arith.mulf %40, %41 : vector<8x256xf32>
    %43 = vector.extract_strided_slice %28 {offsets = [0, 32], sizes = [8, 256], strides = [1, 1]} : vector<8x290xf32> to vector<8x256xf32>
    %44 = vector.broadcast %20 : vector<1x256xf32> to vector<8x256xf32>
    %45 = arith.mulf %43, %44 : vector<8x256xf32>
    %46 = vector.extract_strided_slice %28 {offsets = [0, 33], sizes = [8, 256], strides = [1, 1]} : vector<8x290xf32> to vector<8x256xf32>
    %47 = vector.extract_strided_slice %28 {offsets = [0, 34], sizes = [8, 256], strides = [1, 1]} : vector<8x290xf32> to vector<8x256xf32>
    %48 = vector.broadcast %24 : vector<1x256xf32> to vector<8x256xf32>
    %49 = arith.mulf %47, %48 : vector<8x256xf32>
    %50 = tpu.concatenate %31, %32, %35, %38, %39, %42, %45, %46, %49 in 0 : vector<8x256xf32>, vector<8x256xf32>, vector<8x256xf32>, vector<8x256xf32>, vector<8x256xf32>, vector<8x256xf32>, vector<8x256xf32>, vector<8x256xf32>, vector<8x256xf32> -> vector<72x256xf32>
    %51 = arith.truncf %50 : vector<72x256xf32> to vector<72x256xbf16>
    %c0_6 = arith.constant 0 : index
    %c0_7 = arith.constant 0 : index
    %c0_8 = arith.constant 0 : index
    %52 = vector.load %arg5[%c0_6, %c0_7, %c0_8] : memref<6x8x72xbf16, #tpu.memory_space<vmem>>, vector<1x8x72xbf16>
    %53 = vector.shape_cast %52 : vector<1x8x72xbf16> to vector<8x72xbf16>
    %cst_9 = arith.constant dense<0.000000e+00> : vector<8x256xf32>
    %54 = tpu.matmul %53, %51, %cst_9 {dimension_numbers = #tpu.dot_dimension_numbers<[1], [0], [0], [1], [0, 0, 1, 1], [], []>} : vector<8x72xbf16>, vector<72x256xbf16>, vector<8x256xf32> -> vector<8x256xf32>
    %c0_10 = arith.constant 0 : index
    %c0_11 = arith.constant 0 : index
    %c0_12 = arith.constant 0 : index
    %55 = vector.load %arg6[%c0_10, %c0_11, %c0_12] : memref<6x8x1xf32, #tpu.memory_space<vmem>>, vector<1x8x1xf32>
    %56 = vector.shape_cast %55 : vector<1x8x1xf32> to vector<8x1xf32>
    %57 = vector.broadcast %56 : vector<8x1xf32> to vector<8x256xf32>
    %58 = arith.addf %54, %57 : vector<8x256xf32>
    %cst_13 = arith.constant 0.000000e+00 : f32
    %59 = vector.broadcast %cst_13 : f32 to vector<8x256xf32>
    %60 = arith.maximumf %58, %59 : vector<8x256xf32>
    %61 = tpu.concatenate %25, %60, %25 in 1 : vector<8x17xf32>, vector<8x256xf32>, vector<8x17xf32> -> vector<8x290xf32>
    %62 = vector.extract_strided_slice %61 {offsets = [0, 0], sizes = [8, 256], strides = [1, 1]} : vector<8x290xf32> to vector<8x256xf32>
    %63 = vector.broadcast %20 : vector<1x256xf32> to vector<8x256xf32>
    %64 = arith.mulf %62, %63 : vector<8x256xf32>
    %65 = vector.extract_strided_slice %61 {offsets = [0, 1], sizes = [8, 256], strides = [1, 1]} : vector<8x290xf32> to vector<8x256xf32>
    %66 = vector.extract_strided_slice %61 {offsets = [0, 2], sizes = [8, 256], strides = [1, 1]} : vector<8x290xf32> to vector<8x256xf32>
    %67 = vector.broadcast %24 : vector<1x256xf32> to vector<8x256xf32>
    %68 = arith.mulf %66, %67 : vector<8x256xf32>
    %69 = vector.extract_strided_slice %61 {offsets = [0, 16], sizes = [8, 256], strides = [1, 1]} : vector<8x290xf32> to vector<8x256xf32>
    %70 = vector.broadcast %20 : vector<1x256xf32> to vector<8x256xf32>
    %71 = arith.mulf %69, %70 : vector<8x256xf32>
    %72 = vector.extract_strided_slice %61 {offsets = [0, 17], sizes = [8, 256], strides = [1, 1]} : vector<8x290xf32> to vector<8x256xf32>
    %73 = vector.extract_strided_slice %61 {offsets = [0, 18], sizes = [8, 256], strides = [1, 1]} : vector<8x290xf32> to vector<8x256xf32>
    %74 = vector.broadcast %24 : vector<1x256xf32> to vector<8x256xf32>
    %75 = arith.mulf %73, %74 : vector<8x256xf32>
    %76 = vector.extract_strided_slice %61 {offsets = [0, 32], sizes = [8, 256], strides = [1, 1]} : vector<8x290xf32> to vector<8x256xf32>
    %77 = vector.broadcast %20 : vector<1x256xf32> to vector<8x256xf32>
    %78 = arith.mulf %76, %77 : vector<8x256xf32>
    %79 = vector.extract_strided_slice %61 {offsets = [0, 33], sizes = [8, 256], strides = [1, 1]} : vector<8x290xf32> to vector<8x256xf32>
    %80 = vector.extract_strided_slice %61 {offsets = [0, 34], sizes = [8, 256], strides = [1, 1]} : vector<8x290xf32> to vector<8x256xf32>
    %81 = vector.broadcast %24 : vector<1x256xf32> to vector<8x256xf32>
    %82 = arith.mulf %80, %81 : vector<8x256xf32>
    %83 = tpu.concatenate %64, %65, %68, %71, %72, %75, %78, %79, %82 in 0 : vector<8x256xf32>, vector<8x256xf32>, vector<8x256xf32>, vector<8x256xf32>, vector<8x256xf32>, vector<8x256xf32>, vector<8x256xf32>, vector<8x256xf32>, vector<8x256xf32> -> vector<72x256xf32>
    %84 = arith.truncf %83 : vector<72x256xf32> to vector<72x256xbf16>
    %c1 = arith.constant 1 : index
    %c0_14 = arith.constant 0 : index
    %c0_15 = arith.constant 0 : index
    %85 = vector.load %arg5[%c1, %c0_14, %c0_15] : memref<6x8x72xbf16, #tpu.memory_space<vmem>>, vector<1x8x72xbf16>
    %86 = vector.shape_cast %85 : vector<1x8x72xbf16> to vector<8x72xbf16>
    %cst_16 = arith.constant dense<0.000000e+00> : vector<8x256xf32>
    %87 = tpu.matmul %86, %84, %cst_16 {dimension_numbers = #tpu.dot_dimension_numbers<[1], [0], [0], [1], [0, 0, 1, 1], [], []>} : vector<8x72xbf16>, vector<72x256xbf16>, vector<8x256xf32> -> vector<8x256xf32>
    %c1_17 = arith.constant 1 : index
    %c0_18 = arith.constant 0 : index
    %c0_19 = arith.constant 0 : index
    %88 = vector.load %arg6[%c1_17, %c0_18, %c0_19] : memref<6x8x1xf32, #tpu.memory_space<vmem>>, vector<1x8x1xf32>
    %89 = vector.shape_cast %88 : vector<1x8x1xf32> to vector<8x1xf32>
    %90 = vector.broadcast %89 : vector<8x1xf32> to vector<8x256xf32>
    %91 = arith.addf %87, %90 : vector<8x256xf32>
    %cst_20 = arith.constant 0.000000e+00 : f32
    %92 = vector.broadcast %cst_20 : f32 to vector<8x256xf32>
    %93 = arith.maximumf %91, %92 : vector<8x256xf32>
    %94 = tpu.concatenate %25, %93, %25 in 1 : vector<8x17xf32>, vector<8x256xf32>, vector<8x17xf32> -> vector<8x290xf32>
    %95 = vector.extract_strided_slice %94 {offsets = [0, 0], sizes = [8, 256], strides = [1, 1]} : vector<8x290xf32> to vector<8x256xf32>
    %96 = vector.broadcast %20 : vector<1x256xf32> to vector<8x256xf32>
    %97 = arith.mulf %95, %96 : vector<8x256xf32>
    %98 = vector.extract_strided_slice %94 {offsets = [0, 1], sizes = [8, 256], strides = [1, 1]} : vector<8x290xf32> to vector<8x256xf32>
    %99 = vector.extract_strided_slice %94 {offsets = [0, 2], sizes = [8, 256], strides = [1, 1]} : vector<8x290xf32> to vector<8x256xf32>
    %100 = vector.broadcast %24 : vector<1x256xf32> to vector<8x256xf32>
    %101 = arith.mulf %99, %100 : vector<8x256xf32>
    %102 = vector.extract_strided_slice %94 {offsets = [0, 16], sizes = [8, 256], strides = [1, 1]} : vector<8x290xf32> to vector<8x256xf32>
    %103 = vector.broadcast %20 : vector<1x256xf32> to vector<8x256xf32>
    %104 = arith.mulf %102, %103 : vector<8x256xf32>
    %105 = vector.extract_strided_slice %94 {offsets = [0, 17], sizes = [8, 256], strides = [1, 1]} : vector<8x290xf32> to vector<8x256xf32>
    %106 = vector.extract_strided_slice %94 {offsets = [0, 18], sizes = [8, 256], strides = [1, 1]} : vector<8x290xf32> to vector<8x256xf32>
    %107 = vector.broadcast %24 : vector<1x256xf32> to vector<8x256xf32>
    %108 = arith.mulf %106, %107 : vector<8x256xf32>
    %109 = vector.extract_strided_slice %94 {offsets = [0, 32], sizes = [8, 256], strides = [1, 1]} : vector<8x290xf32> to vector<8x256xf32>
    %110 = vector.broadcast %20 : vector<1x256xf32> to vector<8x256xf32>
    %111 = arith.mulf %109, %110 : vector<8x256xf32>
    %112 = vector.extract_strided_slice %94 {offsets = [0, 33], sizes = [8, 256], strides = [1, 1]} : vector<8x290xf32> to vector<8x256xf32>
    %113 = vector.extract_strided_slice %94 {offsets = [0, 34], sizes = [8, 256], strides = [1, 1]} : vector<8x290xf32> to vector<8x256xf32>
    %114 = vector.broadcast %24 : vector<1x256xf32> to vector<8x256xf32>
    %115 = arith.mulf %113, %114 : vector<8x256xf32>
    %116 = tpu.concatenate %97, %98, %101, %104, %105, %108, %111, %112, %115 in 0 : vector<8x256xf32>, vector<8x256xf32>, vector<8x256xf32>, vector<8x256xf32>, vector<8x256xf32>, vector<8x256xf32>, vector<8x256xf32>, vector<8x256xf32>, vector<8x256xf32> -> vector<72x256xf32>
    %117 = arith.truncf %116 : vector<72x256xf32> to vector<72x256xbf16>
    %c2 = arith.constant 2 : index
    %c0_21 = arith.constant 0 : index
    %c0_22 = arith.constant 0 : index
    %118 = vector.load %arg5[%c2, %c0_21, %c0_22] : memref<6x8x72xbf16, #tpu.memory_space<vmem>>, vector<1x8x72xbf16>
    %119 = vector.shape_cast %118 : vector<1x8x72xbf16> to vector<8x72xbf16>
    %cst_23 = arith.constant dense<0.000000e+00> : vector<8x256xf32>
    %120 = tpu.matmul %119, %117, %cst_23 {dimension_numbers = #tpu.dot_dimension_numbers<[1], [0], [0], [1], [0, 0, 1, 1], [], []>} : vector<8x72xbf16>, vector<72x256xbf16>, vector<8x256xf32> -> vector<8x256xf32>
    %c2_24 = arith.constant 2 : index
    %c0_25 = arith.constant 0 : index
    %c0_26 = arith.constant 0 : index
    %121 = vector.load %arg6[%c2_24, %c0_25, %c0_26] : memref<6x8x1xf32, #tpu.memory_space<vmem>>, vector<1x8x1xf32>
    %122 = vector.shape_cast %121 : vector<1x8x1xf32> to vector<8x1xf32>
    %123 = vector.broadcast %122 : vector<8x1xf32> to vector<8x256xf32>
    %124 = arith.addf %120, %123 : vector<8x256xf32>
    %125 = arith.addf %124, %60 : vector<8x256xf32>
    %126 = tpu.concatenate %25, %125, %25 in 1 : vector<8x17xf32>, vector<8x256xf32>, vector<8x17xf32> -> vector<8x290xf32>
    %127 = vector.extract_strided_slice %126 {offsets = [0, 0], sizes = [8, 256], strides = [1, 1]} : vector<8x290xf32> to vector<8x256xf32>
    %128 = vector.broadcast %20 : vector<1x256xf32> to vector<8x256xf32>
    %129 = arith.mulf %127, %128 : vector<8x256xf32>
    %130 = vector.extract_strided_slice %126 {offsets = [0, 1], sizes = [8, 256], strides = [1, 1]} : vector<8x290xf32> to vector<8x256xf32>
    %131 = vector.extract_strided_slice %126 {offsets = [0, 2], sizes = [8, 256], strides = [1, 1]} : vector<8x290xf32> to vector<8x256xf32>
    %132 = vector.broadcast %24 : vector<1x256xf32> to vector<8x256xf32>
    %133 = arith.mulf %131, %132 : vector<8x256xf32>
    %134 = vector.extract_strided_slice %126 {offsets = [0, 16], sizes = [8, 256], strides = [1, 1]} : vector<8x290xf32> to vector<8x256xf32>
    %135 = vector.broadcast %20 : vector<1x256xf32> to vector<8x256xf32>
    %136 = arith.mulf %134, %135 : vector<8x256xf32>
    %137 = vector.extract_strided_slice %126 {offsets = [0, 17], sizes = [8, 256], strides = [1, 1]} : vector<8x290xf32> to vector<8x256xf32>
    %138 = vector.extract_strided_slice %126 {offsets = [0, 18], sizes = [8, 256], strides = [1, 1]} : vector<8x290xf32> to vector<8x256xf32>
    %139 = vector.broadcast %24 : vector<1x256xf32> to vector<8x256xf32>
    %140 = arith.mulf %138, %139 : vector<8x256xf32>
    %141 = vector.extract_strided_slice %126 {offsets = [0, 32], sizes = [8, 256], strides = [1, 1]} : vector<8x290xf32> to vector<8x256xf32>
    %142 = vector.broadcast %20 : vector<1x256xf32> to vector<8x256xf32>
    %143 = arith.mulf %141, %142 : vector<8x256xf32>
    %144 = vector.extract_strided_slice %126 {offsets = [0, 33], sizes = [8, 256], strides = [1, 1]} : vector<8x290xf32> to vector<8x256xf32>
    %145 = vector.extract_strided_slice %126 {offsets = [0, 34], sizes = [8, 256], strides = [1, 1]} : vector<8x290xf32> to vector<8x256xf32>
    %146 = vector.broadcast %24 : vector<1x256xf32> to vector<8x256xf32>
    %147 = arith.mulf %145, %146 : vector<8x256xf32>
    %148 = tpu.concatenate %129, %130, %133, %136, %137, %140, %143, %144, %147 in 0 : vector<8x256xf32>, vector<8x256xf32>, vector<8x256xf32>, vector<8x256xf32>, vector<8x256xf32>, vector<8x256xf32>, vector<8x256xf32>, vector<8x256xf32>, vector<8x256xf32> -> vector<72x256xf32>
    %149 = arith.truncf %148 : vector<72x256xf32> to vector<72x256xbf16>
    %c3 = arith.constant 3 : index
    %c0_27 = arith.constant 0 : index
    %c0_28 = arith.constant 0 : index
    %150 = vector.load %arg5[%c3, %c0_27, %c0_28] : memref<6x8x72xbf16, #tpu.memory_space<vmem>>, vector<1x8x72xbf16>
    %151 = vector.shape_cast %150 : vector<1x8x72xbf16> to vector<8x72xbf16>
    %cst_29 = arith.constant dense<0.000000e+00> : vector<8x256xf32>
    %152 = tpu.matmul %151, %149, %cst_29 {dimension_numbers = #tpu.dot_dimension_numbers<[1], [0], [0], [1], [0, 0, 1, 1], [], []>} : vector<8x72xbf16>, vector<72x256xbf16>, vector<8x256xf32> -> vector<8x256xf32>
    %c3_30 = arith.constant 3 : index
    %c0_31 = arith.constant 0 : index
    %c0_32 = arith.constant 0 : index
    %153 = vector.load %arg6[%c3_30, %c0_31, %c0_32] : memref<6x8x1xf32, #tpu.memory_space<vmem>>, vector<1x8x1xf32>
    %154 = vector.shape_cast %153 : vector<1x8x1xf32> to vector<8x1xf32>
    %155 = vector.broadcast %154 : vector<8x1xf32> to vector<8x256xf32>
    %156 = arith.addf %152, %155 : vector<8x256xf32>
    %cst_33 = arith.constant 0.000000e+00 : f32
    %157 = vector.broadcast %cst_33 : f32 to vector<8x256xf32>
    %158 = arith.maximumf %156, %157 : vector<8x256xf32>
    %159 = tpu.concatenate %25, %158, %25 in 1 : vector<8x17xf32>, vector<8x256xf32>, vector<8x17xf32> -> vector<8x290xf32>
    %160 = vector.extract_strided_slice %159 {offsets = [0, 0], sizes = [8, 256], strides = [1, 1]} : vector<8x290xf32> to vector<8x256xf32>
    %161 = vector.broadcast %20 : vector<1x256xf32> to vector<8x256xf32>
    %162 = arith.mulf %160, %161 : vector<8x256xf32>
    %163 = vector.extract_strided_slice %159 {offsets = [0, 1], sizes = [8, 256], strides = [1, 1]} : vector<8x290xf32> to vector<8x256xf32>
    %164 = vector.extract_strided_slice %159 {offsets = [0, 2], sizes = [8, 256], strides = [1, 1]} : vector<8x290xf32> to vector<8x256xf32>
    %165 = vector.broadcast %24 : vector<1x256xf32> to vector<8x256xf32>
    %166 = arith.mulf %164, %165 : vector<8x256xf32>
    %167 = vector.extract_strided_slice %159 {offsets = [0, 16], sizes = [8, 256], strides = [1, 1]} : vector<8x290xf32> to vector<8x256xf32>
    %168 = vector.broadcast %20 : vector<1x256xf32> to vector<8x256xf32>
    %169 = arith.mulf %167, %168 : vector<8x256xf32>
    %170 = vector.extract_strided_slice %159 {offsets = [0, 17], sizes = [8, 256], strides = [1, 1]} : vector<8x290xf32> to vector<8x256xf32>
    %171 = vector.extract_strided_slice %159 {offsets = [0, 18], sizes = [8, 256], strides = [1, 1]} : vector<8x290xf32> to vector<8x256xf32>
    %172 = vector.broadcast %24 : vector<1x256xf32> to vector<8x256xf32>
    %173 = arith.mulf %171, %172 : vector<8x256xf32>
    %174 = vector.extract_strided_slice %159 {offsets = [0, 32], sizes = [8, 256], strides = [1, 1]} : vector<8x290xf32> to vector<8x256xf32>
    %175 = vector.broadcast %20 : vector<1x256xf32> to vector<8x256xf32>
    %176 = arith.mulf %174, %175 : vector<8x256xf32>
    %177 = vector.extract_strided_slice %159 {offsets = [0, 33], sizes = [8, 256], strides = [1, 1]} : vector<8x290xf32> to vector<8x256xf32>
    %178 = vector.extract_strided_slice %159 {offsets = [0, 34], sizes = [8, 256], strides = [1, 1]} : vector<8x290xf32> to vector<8x256xf32>
    %179 = vector.broadcast %24 : vector<1x256xf32> to vector<8x256xf32>
    %180 = arith.mulf %178, %179 : vector<8x256xf32>
    %181 = tpu.concatenate %162, %163, %166, %169, %170, %173, %176, %177, %180 in 0 : vector<8x256xf32>, vector<8x256xf32>, vector<8x256xf32>, vector<8x256xf32>, vector<8x256xf32>, vector<8x256xf32>, vector<8x256xf32>, vector<8x256xf32>, vector<8x256xf32> -> vector<72x256xf32>
    %182 = arith.truncf %181 : vector<72x256xf32> to vector<72x256xbf16>
    %c4 = arith.constant 4 : index
    %c0_34 = arith.constant 0 : index
    %c0_35 = arith.constant 0 : index
    %183 = vector.load %arg5[%c4, %c0_34, %c0_35] : memref<6x8x72xbf16, #tpu.memory_space<vmem>>, vector<1x8x72xbf16>
    %184 = vector.shape_cast %183 : vector<1x8x72xbf16> to vector<8x72xbf16>
    %cst_36 = arith.constant dense<0.000000e+00> : vector<8x256xf32>
    %185 = tpu.matmul %184, %182, %cst_36 {dimension_numbers = #tpu.dot_dimension_numbers<[1], [0], [0], [1], [0, 0, 1, 1], [], []>} : vector<8x72xbf16>, vector<72x256xbf16>, vector<8x256xf32> -> vector<8x256xf32>
    %c4_37 = arith.constant 4 : index
    %c0_38 = arith.constant 0 : index
    %c0_39 = arith.constant 0 : index
    %186 = vector.load %arg6[%c4_37, %c0_38, %c0_39] : memref<6x8x1xf32, #tpu.memory_space<vmem>>, vector<1x8x1xf32>
    %187 = vector.shape_cast %186 : vector<1x8x1xf32> to vector<8x1xf32>
    %188 = vector.broadcast %187 : vector<8x1xf32> to vector<8x256xf32>
    %189 = arith.addf %185, %188 : vector<8x256xf32>
    %190 = arith.addf %189, %125 : vector<8x256xf32>
    %191 = tpu.concatenate %25, %190, %25 in 1 : vector<8x17xf32>, vector<8x256xf32>, vector<8x17xf32> -> vector<8x290xf32>
    %192 = vector.extract_strided_slice %191 {offsets = [0, 0], sizes = [8, 256], strides = [1, 1]} : vector<8x290xf32> to vector<8x256xf32>
    %193 = vector.broadcast %20 : vector<1x256xf32> to vector<8x256xf32>
    %194 = arith.mulf %192, %193 : vector<8x256xf32>
    %195 = vector.extract_strided_slice %191 {offsets = [0, 1], sizes = [8, 256], strides = [1, 1]} : vector<8x290xf32> to vector<8x256xf32>
    %196 = vector.extract_strided_slice %191 {offsets = [0, 2], sizes = [8, 256], strides = [1, 1]} : vector<8x290xf32> to vector<8x256xf32>
    %197 = vector.broadcast %24 : vector<1x256xf32> to vector<8x256xf32>
    %198 = arith.mulf %196, %197 : vector<8x256xf32>
    %199 = vector.extract_strided_slice %191 {offsets = [0, 16], sizes = [8, 256], strides = [1, 1]} : vector<8x290xf32> to vector<8x256xf32>
    %200 = vector.broadcast %20 : vector<1x256xf32> to vector<8x256xf32>
    %201 = arith.mulf %199, %200 : vector<8x256xf32>
    %202 = vector.extract_strided_slice %191 {offsets = [0, 17], sizes = [8, 256], strides = [1, 1]} : vector<8x290xf32> to vector<8x256xf32>
    %203 = vector.extract_strided_slice %191 {offsets = [0, 18], sizes = [8, 256], strides = [1, 1]} : vector<8x290xf32> to vector<8x256xf32>
    %204 = vector.broadcast %24 : vector<1x256xf32> to vector<8x256xf32>
    %205 = arith.mulf %203, %204 : vector<8x256xf32>
    %206 = vector.extract_strided_slice %191 {offsets = [0, 32], sizes = [8, 256], strides = [1, 1]} : vector<8x290xf32> to vector<8x256xf32>
    %207 = vector.broadcast %20 : vector<1x256xf32> to vector<8x256xf32>
    %208 = arith.mulf %206, %207 : vector<8x256xf32>
    %209 = vector.extract_strided_slice %191 {offsets = [0, 33], sizes = [8, 256], strides = [1, 1]} : vector<8x290xf32> to vector<8x256xf32>
    %210 = vector.extract_strided_slice %191 {offsets = [0, 34], sizes = [8, 256], strides = [1, 1]} : vector<8x290xf32> to vector<8x256xf32>
    %211 = vector.broadcast %24 : vector<1x256xf32> to vector<8x256xf32>
    %212 = arith.mulf %210, %211 : vector<8x256xf32>
    %213 = tpu.concatenate %194, %195, %198, %201, %202, %205, %208, %209, %212 in 0 : vector<8x256xf32>, vector<8x256xf32>, vector<8x256xf32>, vector<8x256xf32>, vector<8x256xf32>, vector<8x256xf32>, vector<8x256xf32>, vector<8x256xf32>, vector<8x256xf32> -> vector<72x256xf32>
    %214 = arith.truncf %213 : vector<72x256xf32> to vector<72x256xbf16>
    %c5 = arith.constant 5 : index
    %c0_40 = arith.constant 0 : index
    %c0_41 = arith.constant 0 : index
    %215 = vector.load %arg5[%c5, %c0_40, %c0_41] : memref<6x8x72xbf16, #tpu.memory_space<vmem>>, vector<1x8x72xbf16>
    %216 = vector.shape_cast %215 : vector<1x8x72xbf16> to vector<8x72xbf16>
    %cst_42 = arith.constant dense<0.000000e+00> : vector<8x256xf32>
    %217 = tpu.matmul %216, %214, %cst_42 {dimension_numbers = #tpu.dot_dimension_numbers<[1], [0], [0], [1], [0, 0, 1, 1], [], []>} : vector<8x72xbf16>, vector<72x256xbf16>, vector<8x256xf32> -> vector<8x256xf32>
    %c5_43 = arith.constant 5 : index
    %c0_44 = arith.constant 0 : index
    %c0_45 = arith.constant 0 : index
    %218 = vector.load %arg6[%c5_43, %c0_44, %c0_45] : memref<6x8x1xf32, #tpu.memory_space<vmem>>, vector<1x8x1xf32>
    %219 = vector.shape_cast %218 : vector<1x8x1xf32> to vector<8x1xf32>
    %220 = vector.broadcast %219 : vector<8x1xf32> to vector<8x256xf32>
    %221 = arith.addf %217, %220 : vector<8x256xf32>
    %222 = math.tanh %221 : vector<8x256xf32>
    %c0_46 = arith.constant 0 : index
    %c0_47 = arith.constant 0 : index
    %c0_48 = arith.constant 0 : index
    %223 = vector.load %arg1[%c0_46, %c0_47, %c0_48] : memref<1x8x256xf32, #tpu.memory_space<vmem>>, vector<1x8x256xf32>
    %224 = vector.shape_cast %223 : vector<1x8x256xf32> to vector<8x256xf32>
    %225 = tpu.concatenate %25, %224, %25 in 1 : vector<8x17xf32>, vector<8x256xf32>, vector<8x17xf32> -> vector<8x290xf32>
    %226 = vector.extract_strided_slice %225 {offsets = [0, 0], sizes = [8, 256], strides = [1, 1]} : vector<8x290xf32> to vector<8x256xf32>
    %227 = vector.broadcast %20 : vector<1x256xf32> to vector<8x256xf32>
    %228 = arith.mulf %226, %227 : vector<8x256xf32>
    %229 = vector.extract_strided_slice %225 {offsets = [0, 1], sizes = [8, 256], strides = [1, 1]} : vector<8x290xf32> to vector<8x256xf32>
    %230 = vector.extract_strided_slice %225 {offsets = [0, 2], sizes = [8, 256], strides = [1, 1]} : vector<8x290xf32> to vector<8x256xf32>
    %231 = vector.broadcast %24 : vector<1x256xf32> to vector<8x256xf32>
    %232 = arith.mulf %230, %231 : vector<8x256xf32>
    %233 = vector.extract_strided_slice %225 {offsets = [0, 16], sizes = [8, 256], strides = [1, 1]} : vector<8x290xf32> to vector<8x256xf32>
    %234 = vector.broadcast %20 : vector<1x256xf32> to vector<8x256xf32>
    %235 = arith.mulf %233, %234 : vector<8x256xf32>
    %236 = vector.extract_strided_slice %225 {offsets = [0, 17], sizes = [8, 256], strides = [1, 1]} : vector<8x290xf32> to vector<8x256xf32>
    %237 = vector.extract_strided_slice %225 {offsets = [0, 18], sizes = [8, 256], strides = [1, 1]} : vector<8x290xf32> to vector<8x256xf32>
    %238 = vector.broadcast %24 : vector<1x256xf32> to vector<8x256xf32>
    %239 = arith.mulf %237, %238 : vector<8x256xf32>
    %240 = vector.extract_strided_slice %225 {offsets = [0, 32], sizes = [8, 256], strides = [1, 1]} : vector<8x290xf32> to vector<8x256xf32>
    %241 = vector.broadcast %20 : vector<1x256xf32> to vector<8x256xf32>
    %242 = arith.mulf %240, %241 : vector<8x256xf32>
    %243 = vector.extract_strided_slice %225 {offsets = [0, 33], sizes = [8, 256], strides = [1, 1]} : vector<8x290xf32> to vector<8x256xf32>
    %244 = vector.extract_strided_slice %225 {offsets = [0, 34], sizes = [8, 256], strides = [1, 1]} : vector<8x290xf32> to vector<8x256xf32>
    %245 = vector.broadcast %24 : vector<1x256xf32> to vector<8x256xf32>
    %246 = arith.mulf %244, %245 : vector<8x256xf32>
    %247 = tpu.concatenate %228, %229, %232, %235, %236, %239, %242, %243, %246 in 0 : vector<8x256xf32>, vector<8x256xf32>, vector<8x256xf32>, vector<8x256xf32>, vector<8x256xf32>, vector<8x256xf32>, vector<8x256xf32>, vector<8x256xf32>, vector<8x256xf32> -> vector<72x256xf32>
    %248 = arith.truncf %247 : vector<72x256xf32> to vector<72x256xbf16>
    %c0_49 = arith.constant 0 : index
    %c0_50 = arith.constant 0 : index
    %c0_51 = arith.constant 0 : index
    %249 = vector.load %arg3[%c0_49, %c0_50, %c0_51] : memref<6x8x72xbf16, #tpu.memory_space<vmem>>, vector<1x8x72xbf16>
    %250 = vector.shape_cast %249 : vector<1x8x72xbf16> to vector<8x72xbf16>
    %cst_52 = arith.constant dense<0.000000e+00> : vector<8x256xf32>
    %251 = tpu.matmul %250, %248, %cst_52 {dimension_numbers = #tpu.dot_dimension_numbers<[1], [0], [0], [1], [0, 0, 1, 1], [], []>} : vector<8x72xbf16>, vector<72x256xbf16>, vector<8x256xf32> -> vector<8x256xf32>
    %c0_53 = arith.constant 0 : index
    %c0_54 = arith.constant 0 : index
    %c0_55 = arith.constant 0 : index
    %252 = vector.load %arg4[%c0_53, %c0_54, %c0_55] : memref<6x8x1xf32, #tpu.memory_space<vmem>>, vector<1x8x1xf32>
    %253 = vector.shape_cast %252 : vector<1x8x1xf32> to vector<8x1xf32>
    %254 = vector.broadcast %253 : vector<8x1xf32> to vector<8x256xf32>
    %255 = arith.addf %251, %254 : vector<8x256xf32>
    %cst_56 = arith.constant 0.000000e+00 : f32
    %256 = vector.broadcast %cst_56 : f32 to vector<8x256xf32>
    %257 = arith.maximumf %255, %256 : vector<8x256xf32>
    %258 = tpu.concatenate %25, %257, %25 in 1 : vector<8x17xf32>, vector<8x256xf32>, vector<8x17xf32> -> vector<8x290xf32>
    %259 = vector.extract_strided_slice %258 {offsets = [0, 0], sizes = [8, 256], strides = [1, 1]} : vector<8x290xf32> to vector<8x256xf32>
    %260 = vector.broadcast %20 : vector<1x256xf32> to vector<8x256xf32>
    %261 = arith.mulf %259, %260 : vector<8x256xf32>
    %262 = vector.extract_strided_slice %258 {offsets = [0, 1], sizes = [8, 256], strides = [1, 1]} : vector<8x290xf32> to vector<8x256xf32>
    %263 = vector.extract_strided_slice %258 {offsets = [0, 2], sizes = [8, 256], strides = [1, 1]} : vector<8x290xf32> to vector<8x256xf32>
    %264 = vector.broadcast %24 : vector<1x256xf32> to vector<8x256xf32>
    %265 = arith.mulf %263, %264 : vector<8x256xf32>
    %266 = vector.extract_strided_slice %258 {offsets = [0, 16], sizes = [8, 256], strides = [1, 1]} : vector<8x290xf32> to vector<8x256xf32>
    %267 = vector.broadcast %20 : vector<1x256xf32> to vector<8x256xf32>
    %268 = arith.mulf %266, %267 : vector<8x256xf32>
    %269 = vector.extract_strided_slice %258 {offsets = [0, 17], sizes = [8, 256], strides = [1, 1]} : vector<8x290xf32> to vector<8x256xf32>
    %270 = vector.extract_strided_slice %258 {offsets = [0, 18], sizes = [8, 256], strides = [1, 1]} : vector<8x290xf32> to vector<8x256xf32>
    %271 = vector.broadcast %24 : vector<1x256xf32> to vector<8x256xf32>
    %272 = arith.mulf %270, %271 : vector<8x256xf32>
    %273 = vector.extract_strided_slice %258 {offsets = [0, 32], sizes = [8, 256], strides = [1, 1]} : vector<8x290xf32> to vector<8x256xf32>
    %274 = vector.broadcast %20 : vector<1x256xf32> to vector<8x256xf32>
    %275 = arith.mulf %273, %274 : vector<8x256xf32>
    %276 = vector.extract_strided_slice %258 {offsets = [0, 33], sizes = [8, 256], strides = [1, 1]} : vector<8x290xf32> to vector<8x256xf32>
    %277 = vector.extract_strided_slice %258 {offsets = [0, 34], sizes = [8, 256], strides = [1, 1]} : vector<8x290xf32> to vector<8x256xf32>
    %278 = vector.broadcast %24 : vector<1x256xf32> to vector<8x256xf32>
    %279 = arith.mulf %277, %278 : vector<8x256xf32>
    %280 = tpu.concatenate %261, %262, %265, %268, %269, %272, %275, %276, %279 in 0 : vector<8x256xf32>, vector<8x256xf32>, vector<8x256xf32>, vector<8x256xf32>, vector<8x256xf32>, vector<8x256xf32>, vector<8x256xf32>, vector<8x256xf32>, vector<8x256xf32> -> vector<72x256xf32>
    %281 = arith.truncf %280 : vector<72x256xf32> to vector<72x256xbf16>
    %c1_57 = arith.constant 1 : index
    %c0_58 = arith.constant 0 : index
    %c0_59 = arith.constant 0 : index
    %282 = vector.load %arg3[%c1_57, %c0_58, %c0_59] : memref<6x8x72xbf16, #tpu.memory_space<vmem>>, vector<1x8x72xbf16>
    %283 = vector.shape_cast %282 : vector<1x8x72xbf16> to vector<8x72xbf16>
    %cst_60 = arith.constant dense<0.000000e+00> : vector<8x256xf32>
    %284 = tpu.matmul %283, %281, %cst_60 {dimension_numbers = #tpu.dot_dimension_numbers<[1], [0], [0], [1], [0, 0, 1, 1], [], []>} : vector<8x72xbf16>, vector<72x256xbf16>, vector<8x256xf32> -> vector<8x256xf32>
    %c1_61 = arith.constant 1 : index
    %c0_62 = arith.constant 0 : index
    %c0_63 = arith.constant 0 : index
    %285 = vector.load %arg4[%c1_61, %c0_62, %c0_63] : memref<6x8x1xf32, #tpu.memory_space<vmem>>, vector<1x8x1xf32>
    %286 = vector.shape_cast %285 : vector<1x8x1xf32> to vector<8x1xf32>
    %287 = vector.broadcast %286 : vector<8x1xf32> to vector<8x256xf32>
    %288 = arith.addf %284, %287 : vector<8x256xf32>
    %cst_64 = arith.constant 0.000000e+00 : f32
    %289 = vector.broadcast %cst_64 : f32 to vector<8x256xf32>
    %290 = arith.maximumf %288, %289 : vector<8x256xf32>
    %291 = tpu.concatenate %25, %290, %25 in 1 : vector<8x17xf32>, vector<8x256xf32>, vector<8x17xf32> -> vector<8x290xf32>
    %292 = vector.extract_strided_slice %291 {offsets = [0, 0], sizes = [8, 256], strides = [1, 1]} : vector<8x290xf32> to vector<8x256xf32>
    %293 = vector.broadcast %20 : vector<1x256xf32> to vector<8x256xf32>
    %294 = arith.mulf %292, %293 : vector<8x256xf32>
    %295 = vector.extract_strided_slice %291 {offsets = [0, 1], sizes = [8, 256], strides = [1, 1]} : vector<8x290xf32> to vector<8x256xf32>
    %296 = vector.extract_strided_slice %291 {offsets = [0, 2], sizes = [8, 256], strides = [1, 1]} : vector<8x290xf32> to vector<8x256xf32>
    %297 = vector.broadcast %24 : vector<1x256xf32> to vector<8x256xf32>
    %298 = arith.mulf %296, %297 : vector<8x256xf32>
    %299 = vector.extract_strided_slice %291 {offsets = [0, 16], sizes = [8, 256], strides = [1, 1]} : vector<8x290xf32> to vector<8x256xf32>
    %300 = vector.broadcast %20 : vector<1x256xf32> to vector<8x256xf32>
    %301 = arith.mulf %299, %300 : vector<8x256xf32>
    %302 = vector.extract_strided_slice %291 {offsets = [0, 17], sizes = [8, 256], strides = [1, 1]} : vector<8x290xf32> to vector<8x256xf32>
    %303 = vector.extract_strided_slice %291 {offsets = [0, 18], sizes = [8, 256], strides = [1, 1]} : vector<8x290xf32> to vector<8x256xf32>
    %304 = vector.broadcast %24 : vector<1x256xf32> to vector<8x256xf32>
    %305 = arith.mulf %303, %304 : vector<8x256xf32>
    %306 = vector.extract_strided_slice %291 {offsets = [0, 32], sizes = [8, 256], strides = [1, 1]} : vector<8x290xf32> to vector<8x256xf32>
    %307 = vector.broadcast %20 : vector<1x256xf32> to vector<8x256xf32>
    %308 = arith.mulf %306, %307 : vector<8x256xf32>
    %309 = vector.extract_strided_slice %291 {offsets = [0, 33], sizes = [8, 256], strides = [1, 1]} : vector<8x290xf32> to vector<8x256xf32>
    %310 = vector.extract_strided_slice %291 {offsets = [0, 34], sizes = [8, 256], strides = [1, 1]} : vector<8x290xf32> to vector<8x256xf32>
    %311 = vector.broadcast %24 : vector<1x256xf32> to vector<8x256xf32>
    %312 = arith.mulf %310, %311 : vector<8x256xf32>
    %313 = tpu.concatenate %294, %295, %298, %301, %302, %305, %308, %309, %312 in 0 : vector<8x256xf32>, vector<8x256xf32>, vector<8x256xf32>, vector<8x256xf32>, vector<8x256xf32>, vector<8x256xf32>, vector<8x256xf32>, vector<8x256xf32>, vector<8x256xf32> -> vector<72x256xf32>
    %314 = arith.truncf %313 : vector<72x256xf32> to vector<72x256xbf16>
    %c2_65 = arith.constant 2 : index
    %c0_66 = arith.constant 0 : index
    %c0_67 = arith.constant 0 : index
    %315 = vector.load %arg3[%c2_65, %c0_66, %c0_67] : memref<6x8x72xbf16, #tpu.memory_space<vmem>>, vector<1x8x72xbf16>
    %316 = vector.shape_cast %315 : vector<1x8x72xbf16> to vector<8x72xbf16>
    %cst_68 = arith.constant dense<0.000000e+00> : vector<8x256xf32>
    %317 = tpu.matmul %316, %314, %cst_68 {dimension_numbers = #tpu.dot_dimension_numbers<[1], [0], [0], [1], [0, 0, 1, 1], [], []>} : vector<8x72xbf16>, vector<72x256xbf16>, vector<8x256xf32> -> vector<8x256xf32>
    %c2_69 = arith.constant 2 : index
    %c0_70 = arith.constant 0 : index
    %c0_71 = arith.constant 0 : index
    %318 = vector.load %arg4[%c2_69, %c0_70, %c0_71] : memref<6x8x1xf32, #tpu.memory_space<vmem>>, vector<1x8x1xf32>
    %319 = vector.shape_cast %318 : vector<1x8x1xf32> to vector<8x1xf32>
    %320 = vector.broadcast %319 : vector<8x1xf32> to vector<8x256xf32>
    %321 = arith.addf %317, %320 : vector<8x256xf32>
    %322 = arith.addf %321, %257 : vector<8x256xf32>
    %323 = tpu.concatenate %25, %322, %25 in 1 : vector<8x17xf32>, vector<8x256xf32>, vector<8x17xf32> -> vector<8x290xf32>
    %324 = vector.extract_strided_slice %323 {offsets = [0, 0], sizes = [8, 256], strides = [1, 1]} : vector<8x290xf32> to vector<8x256xf32>
    %325 = vector.broadcast %20 : vector<1x256xf32> to vector<8x256xf32>
    %326 = arith.mulf %324, %325 : vector<8x256xf32>
    %327 = vector.extract_strided_slice %323 {offsets = [0, 1], sizes = [8, 256], strides = [1, 1]} : vector<8x290xf32> to vector<8x256xf32>
    %328 = vector.extract_strided_slice %323 {offsets = [0, 2], sizes = [8, 256], strides = [1, 1]} : vector<8x290xf32> to vector<8x256xf32>
    %329 = vector.broadcast %24 : vector<1x256xf32> to vector<8x256xf32>
    %330 = arith.mulf %328, %329 : vector<8x256xf32>
    %331 = vector.extract_strided_slice %323 {offsets = [0, 16], sizes = [8, 256], strides = [1, 1]} : vector<8x290xf32> to vector<8x256xf32>
    %332 = vector.broadcast %20 : vector<1x256xf32> to vector<8x256xf32>
    %333 = arith.mulf %331, %332 : vector<8x256xf32>
    %334 = vector.extract_strided_slice %323 {offsets = [0, 17], sizes = [8, 256], strides = [1, 1]} : vector<8x290xf32> to vector<8x256xf32>
    %335 = vector.extract_strided_slice %323 {offsets = [0, 18], sizes = [8, 256], strides = [1, 1]} : vector<8x290xf32> to vector<8x256xf32>
    %336 = vector.broadcast %24 : vector<1x256xf32> to vector<8x256xf32>
    %337 = arith.mulf %335, %336 : vector<8x256xf32>
    %338 = vector.extract_strided_slice %323 {offsets = [0, 32], sizes = [8, 256], strides = [1, 1]} : vector<8x290xf32> to vector<8x256xf32>
    %339 = vector.broadcast %20 : vector<1x256xf32> to vector<8x256xf32>
    %340 = arith.mulf %338, %339 : vector<8x256xf32>
    %341 = vector.extract_strided_slice %323 {offsets = [0, 33], sizes = [8, 256], strides = [1, 1]} : vector<8x290xf32> to vector<8x256xf32>
    %342 = vector.extract_strided_slice %323 {offsets = [0, 34], sizes = [8, 256], strides = [1, 1]} : vector<8x290xf32> to vector<8x256xf32>
    %343 = vector.broadcast %24 : vector<1x256xf32> to vector<8x256xf32>
    %344 = arith.mulf %342, %343 : vector<8x256xf32>
    %345 = tpu.concatenate %326, %327, %330, %333, %334, %337, %340, %341, %344 in 0 : vector<8x256xf32>, vector<8x256xf32>, vector<8x256xf32>, vector<8x256xf32>, vector<8x256xf32>, vector<8x256xf32>, vector<8x256xf32>, vector<8x256xf32>, vector<8x256xf32> -> vector<72x256xf32>
    %346 = arith.truncf %345 : vector<72x256xf32> to vector<72x256xbf16>
    %c3_72 = arith.constant 3 : index
    %c0_73 = arith.constant 0 : index
    %c0_74 = arith.constant 0 : index
    %347 = vector.load %arg3[%c3_72, %c0_73, %c0_74] : memref<6x8x72xbf16, #tpu.memory_space<vmem>>, vector<1x8x72xbf16>
    %348 = vector.shape_cast %347 : vector<1x8x72xbf16> to vector<8x72xbf16>
    %cst_75 = arith.constant dense<0.000000e+00> : vector<8x256xf32>
    %349 = tpu.matmul %348, %346, %cst_75 {dimension_numbers = #tpu.dot_dimension_numbers<[1], [0], [0], [1], [0, 0, 1, 1], [], []>} : vector<8x72xbf16>, vector<72x256xbf16>, vector<8x256xf32> -> vector<8x256xf32>
    %c3_76 = arith.constant 3 : index
    %c0_77 = arith.constant 0 : index
    %c0_78 = arith.constant 0 : index
    %350 = vector.load %arg4[%c3_76, %c0_77, %c0_78] : memref<6x8x1xf32, #tpu.memory_space<vmem>>, vector<1x8x1xf32>
    %351 = vector.shape_cast %350 : vector<1x8x1xf32> to vector<8x1xf32>
    %352 = vector.broadcast %351 : vector<8x1xf32> to vector<8x256xf32>
    %353 = arith.addf %349, %352 : vector<8x256xf32>
    %cst_79 = arith.constant 0.000000e+00 : f32
    %354 = vector.broadcast %cst_79 : f32 to vector<8x256xf32>
    %355 = arith.maximumf %353, %354 : vector<8x256xf32>
    %356 = tpu.concatenate %25, %355, %25 in 1 : vector<8x17xf32>, vector<8x256xf32>, vector<8x17xf32> -> vector<8x290xf32>
    %357 = vector.extract_strided_slice %356 {offsets = [0, 0], sizes = [8, 256], strides = [1, 1]} : vector<8x290xf32> to vector<8x256xf32>
    %358 = vector.broadcast %20 : vector<1x256xf32> to vector<8x256xf32>
    %359 = arith.mulf %357, %358 : vector<8x256xf32>
    %360 = vector.extract_strided_slice %356 {offsets = [0, 1], sizes = [8, 256], strides = [1, 1]} : vector<8x290xf32> to vector<8x256xf32>
    %361 = vector.extract_strided_slice %356 {offsets = [0, 2], sizes = [8, 256], strides = [1, 1]} : vector<8x290xf32> to vector<8x256xf32>
    %362 = vector.broadcast %24 : vector<1x256xf32> to vector<8x256xf32>
    %363 = arith.mulf %361, %362 : vector<8x256xf32>
    %364 = vector.extract_strided_slice %356 {offsets = [0, 16], sizes = [8, 256], strides = [1, 1]} : vector<8x290xf32> to vector<8x256xf32>
    %365 = vector.broadcast %20 : vector<1x256xf32> to vector<8x256xf32>
    %366 = arith.mulf %364, %365 : vector<8x256xf32>
    %367 = vector.extract_strided_slice %356 {offsets = [0, 17], sizes = [8, 256], strides = [1, 1]} : vector<8x290xf32> to vector<8x256xf32>
    %368 = vector.extract_strided_slice %356 {offsets = [0, 18], sizes = [8, 256], strides = [1, 1]} : vector<8x290xf32> to vector<8x256xf32>
    %369 = vector.broadcast %24 : vector<1x256xf32> to vector<8x256xf32>
    %370 = arith.mulf %368, %369 : vector<8x256xf32>
    %371 = vector.extract_strided_slice %356 {offsets = [0, 32], sizes = [8, 256], strides = [1, 1]} : vector<8x290xf32> to vector<8x256xf32>
    %372 = vector.broadcast %20 : vector<1x256xf32> to vector<8x256xf32>
    %373 = arith.mulf %371, %372 : vector<8x256xf32>
    %374 = vector.extract_strided_slice %356 {offsets = [0, 33], sizes = [8, 256], strides = [1, 1]} : vector<8x290xf32> to vector<8x256xf32>
    %375 = vector.extract_strided_slice %356 {offsets = [0, 34], sizes = [8, 256], strides = [1, 1]} : vector<8x290xf32> to vector<8x256xf32>
    %376 = vector.broadcast %24 : vector<1x256xf32> to vector<8x256xf32>
    %377 = arith.mulf %375, %376 : vector<8x256xf32>
    %378 = tpu.concatenate %359, %360, %363, %366, %367, %370, %373, %374, %377 in 0 : vector<8x256xf32>, vector<8x256xf32>, vector<8x256xf32>, vector<8x256xf32>, vector<8x256xf32>, vector<8x256xf32>, vector<8x256xf32>, vector<8x256xf32>, vector<8x256xf32> -> vector<72x256xf32>
    %379 = arith.truncf %378 : vector<72x256xf32> to vector<72x256xbf16>
    %c4_80 = arith.constant 4 : index
    %c0_81 = arith.constant 0 : index
    %c0_82 = arith.constant 0 : index
    %380 = vector.load %arg3[%c4_80, %c0_81, %c0_82] : memref<6x8x72xbf16, #tpu.memory_space<vmem>>, vector<1x8x72xbf16>
    %381 = vector.shape_cast %380 : vector<1x8x72xbf16> to vector<8x72xbf16>
    %cst_83 = arith.constant dense<0.000000e+00> : vector<8x256xf32>
    %382 = tpu.matmul %381, %379, %cst_83 {dimension_numbers = #tpu.dot_dimension_numbers<[1], [0], [0], [1], [0, 0, 1, 1], [], []>} : vector<8x72xbf16>, vector<72x256xbf16>, vector<8x256xf32> -> vector<8x256xf32>
    %c4_84 = arith.constant 4 : index
    %c0_85 = arith.constant 0 : index
    %c0_86 = arith.constant 0 : index
    %383 = vector.load %arg4[%c4_84, %c0_85, %c0_86] : memref<6x8x1xf32, #tpu.memory_space<vmem>>, vector<1x8x1xf32>
    %384 = vector.shape_cast %383 : vector<1x8x1xf32> to vector<8x1xf32>
    %385 = vector.broadcast %384 : vector<8x1xf32> to vector<8x256xf32>
    %386 = arith.addf %382, %385 : vector<8x256xf32>
    %387 = arith.addf %386, %322 : vector<8x256xf32>
    %388 = tpu.concatenate %25, %387, %25 in 1 : vector<8x17xf32>, vector<8x256xf32>, vector<8x17xf32> -> vector<8x290xf32>
    %389 = vector.extract_strided_slice %388 {offsets = [0, 0], sizes = [8, 256], strides = [1, 1]} : vector<8x290xf32> to vector<8x256xf32>
    %390 = vector.broadcast %20 : vector<1x256xf32> to vector<8x256xf32>
    %391 = arith.mulf %389, %390 : vector<8x256xf32>
    %392 = vector.extract_strided_slice %388 {offsets = [0, 1], sizes = [8, 256], strides = [1, 1]} : vector<8x290xf32> to vector<8x256xf32>
    %393 = vector.extract_strided_slice %388 {offsets = [0, 2], sizes = [8, 256], strides = [1, 1]} : vector<8x290xf32> to vector<8x256xf32>
    %394 = vector.broadcast %24 : vector<1x256xf32> to vector<8x256xf32>
    %395 = arith.mulf %393, %394 : vector<8x256xf32>
    %396 = vector.extract_strided_slice %388 {offsets = [0, 16], sizes = [8, 256], strides = [1, 1]} : vector<8x290xf32> to vector<8x256xf32>
    %397 = vector.broadcast %20 : vector<1x256xf32> to vector<8x256xf32>
    %398 = arith.mulf %396, %397 : vector<8x256xf32>
    %399 = vector.extract_strided_slice %388 {offsets = [0, 17], sizes = [8, 256], strides = [1, 1]} : vector<8x290xf32> to vector<8x256xf32>
    %400 = vector.extract_strided_slice %388 {offsets = [0, 18], sizes = [8, 256], strides = [1, 1]} : vector<8x290xf32> to vector<8x256xf32>
    %401 = vector.broadcast %24 : vector<1x256xf32> to vector<8x256xf32>
    %402 = arith.mulf %400, %401 : vector<8x256xf32>
    %403 = vector.extract_strided_slice %388 {offsets = [0, 32], sizes = [8, 256], strides = [1, 1]} : vector<8x290xf32> to vector<8x256xf32>
    %404 = vector.broadcast %20 : vector<1x256xf32> to vector<8x256xf32>
    %405 = arith.mulf %403, %404 : vector<8x256xf32>
    %406 = vector.extract_strided_slice %388 {offsets = [0, 33], sizes = [8, 256], strides = [1, 1]} : vector<8x290xf32> to vector<8x256xf32>
    %407 = vector.extract_strided_slice %388 {offsets = [0, 34], sizes = [8, 256], strides = [1, 1]} : vector<8x290xf32> to vector<8x256xf32>
    %408 = vector.broadcast %24 : vector<1x256xf32> to vector<8x256xf32>
    %409 = arith.mulf %407, %408 : vector<8x256xf32>
    %410 = tpu.concatenate %391, %392, %395, %398, %399, %402, %405, %406, %409 in 0 : vector<8x256xf32>, vector<8x256xf32>, vector<8x256xf32>, vector<8x256xf32>, vector<8x256xf32>, vector<8x256xf32>, vector<8x256xf32>, vector<8x256xf32>, vector<8x256xf32> -> vector<72x256xf32>
    %411 = arith.truncf %410 : vector<72x256xf32> to vector<72x256xbf16>
    %c5_87 = arith.constant 5 : index
    %c0_88 = arith.constant 0 : index
    %c0_89 = arith.constant 0 : index
    %412 = vector.load %arg3[%c5_87, %c0_88, %c0_89] : memref<6x8x72xbf16, #tpu.memory_space<vmem>>, vector<1x8x72xbf16>
    %413 = vector.shape_cast %412 : vector<1x8x72xbf16> to vector<8x72xbf16>
    %cst_90 = arith.constant dense<0.000000e+00> : vector<8x256xf32>
    %414 = tpu.matmul %413, %411, %cst_90 {dimension_numbers = #tpu.dot_dimension_numbers<[1], [0], [0], [1], [0, 0, 1, 1], [], []>} : vector<8x72xbf16>, vector<72x256xbf16>, vector<8x256xf32> -> vector<8x256xf32>
    %c5_91 = arith.constant 5 : index
    %c0_92 = arith.constant 0 : index
    %c0_93 = arith.constant 0 : index
    %415 = vector.load %arg4[%c5_91, %c0_92, %c0_93] : memref<6x8x1xf32, #tpu.memory_space<vmem>>, vector<1x8x1xf32>
    %416 = vector.shape_cast %415 : vector<1x8x1xf32> to vector<8x1xf32>
    %417 = vector.broadcast %416 : vector<8x1xf32> to vector<8x256xf32>
    %418 = arith.addf %414, %417 : vector<8x256xf32>
    %419 = math.tanh %418 : vector<8x256xf32>
    %420 = tpu.concatenate %25, %419, %25 in 1 : vector<8x17xf32>, vector<8x256xf32>, vector<8x17xf32> -> vector<8x290xf32>
    %421 = vector.extract_strided_slice %420 {offsets = [0, 0], sizes = [8, 256], strides = [1, 1]} : vector<8x290xf32> to vector<8x256xf32>
    %422 = vector.broadcast %20 : vector<1x256xf32> to vector<8x256xf32>
    %423 = arith.mulf %421, %422 : vector<8x256xf32>
    %424 = vector.extract_strided_slice %420 {offsets = [0, 1], sizes = [8, 256], strides = [1, 1]} : vector<8x290xf32> to vector<8x256xf32>
    %425 = vector.extract_strided_slice %420 {offsets = [0, 2], sizes = [8, 256], strides = [1, 1]} : vector<8x290xf32> to vector<8x256xf32>
    %426 = vector.broadcast %24 : vector<1x256xf32> to vector<8x256xf32>
    %427 = arith.mulf %425, %426 : vector<8x256xf32>
    %428 = vector.extract_strided_slice %420 {offsets = [0, 16], sizes = [8, 256], strides = [1, 1]} : vector<8x290xf32> to vector<8x256xf32>
    %429 = vector.broadcast %20 : vector<1x256xf32> to vector<8x256xf32>
    %430 = arith.mulf %428, %429 : vector<8x256xf32>
    %431 = vector.extract_strided_slice %420 {offsets = [0, 17], sizes = [8, 256], strides = [1, 1]} : vector<8x290xf32> to vector<8x256xf32>
    %432 = vector.extract_strided_slice %420 {offsets = [0, 18], sizes = [8, 256], strides = [1, 1]} : vector<8x290xf32> to vector<8x256xf32>
    %433 = vector.broadcast %24 : vector<1x256xf32> to vector<8x256xf32>
    %434 = arith.mulf %432, %433 : vector<8x256xf32>
    %435 = vector.extract_strided_slice %420 {offsets = [0, 32], sizes = [8, 256], strides = [1, 1]} : vector<8x290xf32> to vector<8x256xf32>
    %436 = vector.broadcast %20 : vector<1x256xf32> to vector<8x256xf32>
    %437 = arith.mulf %435, %436 : vector<8x256xf32>
    %438 = vector.extract_strided_slice %420 {offsets = [0, 33], sizes = [8, 256], strides = [1, 1]} : vector<8x290xf32> to vector<8x256xf32>
    %439 = vector.extract_strided_slice %420 {offsets = [0, 34], sizes = [8, 256], strides = [1, 1]} : vector<8x290xf32> to vector<8x256xf32>
    %440 = vector.broadcast %24 : vector<1x256xf32> to vector<8x256xf32>
    %441 = arith.mulf %439, %440 : vector<8x256xf32>
    %442 = tpu.concatenate %423, %424, %427, %430, %431, %434, %437, %438, %441 in 0 : vector<8x256xf32>, vector<8x256xf32>, vector<8x256xf32>, vector<8x256xf32>, vector<8x256xf32>, vector<8x256xf32>, vector<8x256xf32>, vector<8x256xf32>, vector<8x256xf32> -> vector<72x256xf32>
    %443 = arith.truncf %442 : vector<72x256xf32> to vector<72x256xbf16>
    %c0_94 = arith.constant 0 : index
    %c0_95 = arith.constant 0 : index
    %c0_96 = arith.constant 0 : index
    %444 = vector.load %arg5[%c0_94, %c0_95, %c0_96] : memref<6x8x72xbf16, #tpu.memory_space<vmem>>, vector<1x8x72xbf16>
    %445 = vector.shape_cast %444 : vector<1x8x72xbf16> to vector<8x72xbf16>
    %cst_97 = arith.constant dense<0.000000e+00> : vector<8x256xf32>
    %446 = tpu.matmul %445, %443, %cst_97 {dimension_numbers = #tpu.dot_dimension_numbers<[1], [0], [0], [1], [0, 0, 1, 1], [], []>} : vector<8x72xbf16>, vector<72x256xbf16>, vector<8x256xf32> -> vector<8x256xf32>
    %c0_98 = arith.constant 0 : index
    %c0_99 = arith.constant 0 : index
    %c0_100 = arith.constant 0 : index
    %447 = vector.load %arg6[%c0_98, %c0_99, %c0_100] : memref<6x8x1xf32, #tpu.memory_space<vmem>>, vector<1x8x1xf32>
    %448 = vector.shape_cast %447 : vector<1x8x1xf32> to vector<8x1xf32>
    %449 = vector.broadcast %448 : vector<8x1xf32> to vector<8x256xf32>
    %450 = arith.addf %446, %449 : vector<8x256xf32>
    %cst_101 = arith.constant 0.000000e+00 : f32
    %451 = vector.broadcast %cst_101 : f32 to vector<8x256xf32>
    %452 = arith.maximumf %450, %451 : vector<8x256xf32>
    %453 = tpu.concatenate %25, %452, %25 in 1 : vector<8x17xf32>, vector<8x256xf32>, vector<8x17xf32> -> vector<8x290xf32>
    %454 = vector.extract_strided_slice %453 {offsets = [0, 0], sizes = [8, 256], strides = [1, 1]} : vector<8x290xf32> to vector<8x256xf32>
    %455 = vector.broadcast %20 : vector<1x256xf32> to vector<8x256xf32>
    %456 = arith.mulf %454, %455 : vector<8x256xf32>
    %457 = vector.extract_strided_slice %453 {offsets = [0, 1], sizes = [8, 256], strides = [1, 1]} : vector<8x290xf32> to vector<8x256xf32>
    %458 = vector.extract_strided_slice %453 {offsets = [0, 2], sizes = [8, 256], strides = [1, 1]} : vector<8x290xf32> to vector<8x256xf32>
    %459 = vector.broadcast %24 : vector<1x256xf32> to vector<8x256xf32>
    %460 = arith.mulf %458, %459 : vector<8x256xf32>
    %461 = vector.extract_strided_slice %453 {offsets = [0, 16], sizes = [8, 256], strides = [1, 1]} : vector<8x290xf32> to vector<8x256xf32>
    %462 = vector.broadcast %20 : vector<1x256xf32> to vector<8x256xf32>
    %463 = arith.mulf %461, %462 : vector<8x256xf32>
    %464 = vector.extract_strided_slice %453 {offsets = [0, 17], sizes = [8, 256], strides = [1, 1]} : vector<8x290xf32> to vector<8x256xf32>
    %465 = vector.extract_strided_slice %453 {offsets = [0, 18], sizes = [8, 256], strides = [1, 1]} : vector<8x290xf32> to vector<8x256xf32>
    %466 = vector.broadcast %24 : vector<1x256xf32> to vector<8x256xf32>
    %467 = arith.mulf %465, %466 : vector<8x256xf32>
    %468 = vector.extract_strided_slice %453 {offsets = [0, 32], sizes = [8, 256], strides = [1, 1]} : vector<8x290xf32> to vector<8x256xf32>
    %469 = vector.broadcast %20 : vector<1x256xf32> to vector<8x256xf32>
    %470 = arith.mulf %468, %469 : vector<8x256xf32>
    %471 = vector.extract_strided_slice %453 {offsets = [0, 33], sizes = [8, 256], strides = [1, 1]} : vector<8x290xf32> to vector<8x256xf32>
    %472 = vector.extract_strided_slice %453 {offsets = [0, 34], sizes = [8, 256], strides = [1, 1]} : vector<8x290xf32> to vector<8x256xf32>
    %473 = vector.broadcast %24 : vector<1x256xf32> to vector<8x256xf32>
    %474 = arith.mulf %472, %473 : vector<8x256xf32>
    %475 = tpu.concatenate %456, %457, %460, %463, %464, %467, %470, %471, %474 in 0 : vector<8x256xf32>, vector<8x256xf32>, vector<8x256xf32>, vector<8x256xf32>, vector<8x256xf32>, vector<8x256xf32>, vector<8x256xf32>, vector<8x256xf32>, vector<8x256xf32> -> vector<72x256xf32>
    %476 = arith.truncf %475 : vector<72x256xf32> to vector<72x256xbf16>
    %c1_102 = arith.constant 1 : index
    %c0_103 = arith.constant 0 : index
    %c0_104 = arith.constant 0 : index
    %477 = vector.load %arg5[%c1_102, %c0_103, %c0_104] : memref<6x8x72xbf16, #tpu.memory_space<vmem>>, vector<1x8x72xbf16>
    %478 = vector.shape_cast %477 : vector<1x8x72xbf16> to vector<8x72xbf16>
    %cst_105 = arith.constant dense<0.000000e+00> : vector<8x256xf32>
    %479 = tpu.matmul %478, %476, %cst_105 {dimension_numbers = #tpu.dot_dimension_numbers<[1], [0], [0], [1], [0, 0, 1, 1], [], []>} : vector<8x72xbf16>, vector<72x256xbf16>, vector<8x256xf32> -> vector<8x256xf32>
    %c1_106 = arith.constant 1 : index
    %c0_107 = arith.constant 0 : index
    %c0_108 = arith.constant 0 : index
    %480 = vector.load %arg6[%c1_106, %c0_107, %c0_108] : memref<6x8x1xf32, #tpu.memory_space<vmem>>, vector<1x8x1xf32>
    %481 = vector.shape_cast %480 : vector<1x8x1xf32> to vector<8x1xf32>
    %482 = vector.broadcast %481 : vector<8x1xf32> to vector<8x256xf32>
    %483 = arith.addf %479, %482 : vector<8x256xf32>
    %cst_109 = arith.constant 0.000000e+00 : f32
    %484 = vector.broadcast %cst_109 : f32 to vector<8x256xf32>
    %485 = arith.maximumf %483, %484 : vector<8x256xf32>
    %486 = tpu.concatenate %25, %485, %25 in 1 : vector<8x17xf32>, vector<8x256xf32>, vector<8x17xf32> -> vector<8x290xf32>
    %487 = vector.extract_strided_slice %486 {offsets = [0, 0], sizes = [8, 256], strides = [1, 1]} : vector<8x290xf32> to vector<8x256xf32>
    %488 = vector.broadcast %20 : vector<1x256xf32> to vector<8x256xf32>
    %489 = arith.mulf %487, %488 : vector<8x256xf32>
    %490 = vector.extract_strided_slice %486 {offsets = [0, 1], sizes = [8, 256], strides = [1, 1]} : vector<8x290xf32> to vector<8x256xf32>
    %491 = vector.extract_strided_slice %486 {offsets = [0, 2], sizes = [8, 256], strides = [1, 1]} : vector<8x290xf32> to vector<8x256xf32>
    %492 = vector.broadcast %24 : vector<1x256xf32> to vector<8x256xf32>
    %493 = arith.mulf %491, %492 : vector<8x256xf32>
    %494 = vector.extract_strided_slice %486 {offsets = [0, 16], sizes = [8, 256], strides = [1, 1]} : vector<8x290xf32> to vector<8x256xf32>
    %495 = vector.broadcast %20 : vector<1x256xf32> to vector<8x256xf32>
    %496 = arith.mulf %494, %495 : vector<8x256xf32>
    %497 = vector.extract_strided_slice %486 {offsets = [0, 17], sizes = [8, 256], strides = [1, 1]} : vector<8x290xf32> to vector<8x256xf32>
    %498 = vector.extract_strided_slice %486 {offsets = [0, 18], sizes = [8, 256], strides = [1, 1]} : vector<8x290xf32> to vector<8x256xf32>
    %499 = vector.broadcast %24 : vector<1x256xf32> to vector<8x256xf32>
    %500 = arith.mulf %498, %499 : vector<8x256xf32>
    %501 = vector.extract_strided_slice %486 {offsets = [0, 32], sizes = [8, 256], strides = [1, 1]} : vector<8x290xf32> to vector<8x256xf32>
    %502 = vector.broadcast %20 : vector<1x256xf32> to vector<8x256xf32>
    %503 = arith.mulf %501, %502 : vector<8x256xf32>
    %504 = vector.extract_strided_slice %486 {offsets = [0, 33], sizes = [8, 256], strides = [1, 1]} : vector<8x290xf32> to vector<8x256xf32>
    %505 = vector.extract_strided_slice %486 {offsets = [0, 34], sizes = [8, 256], strides = [1, 1]} : vector<8x290xf32> to vector<8x256xf32>
    %506 = vector.broadcast %24 : vector<1x256xf32> to vector<8x256xf32>
    %507 = arith.mulf %505, %506 : vector<8x256xf32>
    %508 = tpu.concatenate %489, %490, %493, %496, %497, %500, %503, %504, %507 in 0 : vector<8x256xf32>, vector<8x256xf32>, vector<8x256xf32>, vector<8x256xf32>, vector<8x256xf32>, vector<8x256xf32>, vector<8x256xf32>, vector<8x256xf32>, vector<8x256xf32> -> vector<72x256xf32>
    %509 = arith.truncf %508 : vector<72x256xf32> to vector<72x256xbf16>
    %c2_110 = arith.constant 2 : index
    %c0_111 = arith.constant 0 : index
    %c0_112 = arith.constant 0 : index
    %510 = vector.load %arg5[%c2_110, %c0_111, %c0_112] : memref<6x8x72xbf16, #tpu.memory_space<vmem>>, vector<1x8x72xbf16>
    %511 = vector.shape_cast %510 : vector<1x8x72xbf16> to vector<8x72xbf16>
    %cst_113 = arith.constant dense<0.000000e+00> : vector<8x256xf32>
    %512 = tpu.matmul %511, %509, %cst_113 {dimension_numbers = #tpu.dot_dimension_numbers<[1], [0], [0], [1], [0, 0, 1, 1], [], []>} : vector<8x72xbf16>, vector<72x256xbf16>, vector<8x256xf32> -> vector<8x256xf32>
    %c2_114 = arith.constant 2 : index
    %c0_115 = arith.constant 0 : index
    %c0_116 = arith.constant 0 : index
    %513 = vector.load %arg6[%c2_114, %c0_115, %c0_116] : memref<6x8x1xf32, #tpu.memory_space<vmem>>, vector<1x8x1xf32>
    %514 = vector.shape_cast %513 : vector<1x8x1xf32> to vector<8x1xf32>
    %515 = vector.broadcast %514 : vector<8x1xf32> to vector<8x256xf32>
    %516 = arith.addf %512, %515 : vector<8x256xf32>
    %517 = arith.addf %516, %452 : vector<8x256xf32>
    %518 = tpu.concatenate %25, %517, %25 in 1 : vector<8x17xf32>, vector<8x256xf32>, vector<8x17xf32> -> vector<8x290xf32>
    %519 = vector.extract_strided_slice %518 {offsets = [0, 0], sizes = [8, 256], strides = [1, 1]} : vector<8x290xf32> to vector<8x256xf32>
    %520 = vector.broadcast %20 : vector<1x256xf32> to vector<8x256xf32>
    %521 = arith.mulf %519, %520 : vector<8x256xf32>
    %522 = vector.extract_strided_slice %518 {offsets = [0, 1], sizes = [8, 256], strides = [1, 1]} : vector<8x290xf32> to vector<8x256xf32>
    %523 = vector.extract_strided_slice %518 {offsets = [0, 2], sizes = [8, 256], strides = [1, 1]} : vector<8x290xf32> to vector<8x256xf32>
    %524 = vector.broadcast %24 : vector<1x256xf32> to vector<8x256xf32>
    %525 = arith.mulf %523, %524 : vector<8x256xf32>
    %526 = vector.extract_strided_slice %518 {offsets = [0, 16], sizes = [8, 256], strides = [1, 1]} : vector<8x290xf32> to vector<8x256xf32>
    %527 = vector.broadcast %20 : vector<1x256xf32> to vector<8x256xf32>
    %528 = arith.mulf %526, %527 : vector<8x256xf32>
    %529 = vector.extract_strided_slice %518 {offsets = [0, 17], sizes = [8, 256], strides = [1, 1]} : vector<8x290xf32> to vector<8x256xf32>
    %530 = vector.extract_strided_slice %518 {offsets = [0, 18], sizes = [8, 256], strides = [1, 1]} : vector<8x290xf32> to vector<8x256xf32>
    %531 = vector.broadcast %24 : vector<1x256xf32> to vector<8x256xf32>
    %532 = arith.mulf %530, %531 : vector<8x256xf32>
    %533 = vector.extract_strided_slice %518 {offsets = [0, 32], sizes = [8, 256], strides = [1, 1]} : vector<8x290xf32> to vector<8x256xf32>
    %534 = vector.broadcast %20 : vector<1x256xf32> to vector<8x256xf32>
    %535 = arith.mulf %533, %534 : vector<8x256xf32>
    %536 = vector.extract_strided_slice %518 {offsets = [0, 33], sizes = [8, 256], strides = [1, 1]} : vector<8x290xf32> to vector<8x256xf32>
    %537 = vector.extract_strided_slice %518 {offsets = [0, 34], sizes = [8, 256], strides = [1, 1]} : vector<8x290xf32> to vector<8x256xf32>
    %538 = vector.broadcast %24 : vector<1x256xf32> to vector<8x256xf32>
    %539 = arith.mulf %537, %538 : vector<8x256xf32>
    %540 = tpu.concatenate %521, %522, %525, %528, %529, %532, %535, %536, %539 in 0 : vector<8x256xf32>, vector<8x256xf32>, vector<8x256xf32>, vector<8x256xf32>, vector<8x256xf32>, vector<8x256xf32>, vector<8x256xf32>, vector<8x256xf32>, vector<8x256xf32> -> vector<72x256xf32>
    %541 = arith.truncf %540 : vector<72x256xf32> to vector<72x256xbf16>
    %c3_117 = arith.constant 3 : index
    %c0_118 = arith.constant 0 : index
    %c0_119 = arith.constant 0 : index
    %542 = vector.load %arg5[%c3_117, %c0_118, %c0_119] : memref<6x8x72xbf16, #tpu.memory_space<vmem>>, vector<1x8x72xbf16>
    %543 = vector.shape_cast %542 : vector<1x8x72xbf16> to vector<8x72xbf16>
    %cst_120 = arith.constant dense<0.000000e+00> : vector<8x256xf32>
    %544 = tpu.matmul %543, %541, %cst_120 {dimension_numbers = #tpu.dot_dimension_numbers<[1], [0], [0], [1], [0, 0, 1, 1], [], []>} : vector<8x72xbf16>, vector<72x256xbf16>, vector<8x256xf32> -> vector<8x256xf32>
    %c3_121 = arith.constant 3 : index
    %c0_122 = arith.constant 0 : index
    %c0_123 = arith.constant 0 : index
    %545 = vector.load %arg6[%c3_121, %c0_122, %c0_123] : memref<6x8x1xf32, #tpu.memory_space<vmem>>, vector<1x8x1xf32>
    %546 = vector.shape_cast %545 : vector<1x8x1xf32> to vector<8x1xf32>
    %547 = vector.broadcast %546 : vector<8x1xf32> to vector<8x256xf32>
    %548 = arith.addf %544, %547 : vector<8x256xf32>
    %cst_124 = arith.constant 0.000000e+00 : f32
    %549 = vector.broadcast %cst_124 : f32 to vector<8x256xf32>
    %550 = arith.maximumf %548, %549 : vector<8x256xf32>
    %551 = tpu.concatenate %25, %550, %25 in 1 : vector<8x17xf32>, vector<8x256xf32>, vector<8x17xf32> -> vector<8x290xf32>
    %552 = vector.extract_strided_slice %551 {offsets = [0, 0], sizes = [8, 256], strides = [1, 1]} : vector<8x290xf32> to vector<8x256xf32>
    %553 = vector.broadcast %20 : vector<1x256xf32> to vector<8x256xf32>
    %554 = arith.mulf %552, %553 : vector<8x256xf32>
    %555 = vector.extract_strided_slice %551 {offsets = [0, 1], sizes = [8, 256], strides = [1, 1]} : vector<8x290xf32> to vector<8x256xf32>
    %556 = vector.extract_strided_slice %551 {offsets = [0, 2], sizes = [8, 256], strides = [1, 1]} : vector<8x290xf32> to vector<8x256xf32>
    %557 = vector.broadcast %24 : vector<1x256xf32> to vector<8x256xf32>
    %558 = arith.mulf %556, %557 : vector<8x256xf32>
    %559 = vector.extract_strided_slice %551 {offsets = [0, 16], sizes = [8, 256], strides = [1, 1]} : vector<8x290xf32> to vector<8x256xf32>
    %560 = vector.broadcast %20 : vector<1x256xf32> to vector<8x256xf32>
    %561 = arith.mulf %559, %560 : vector<8x256xf32>
    %562 = vector.extract_strided_slice %551 {offsets = [0, 17], sizes = [8, 256], strides = [1, 1]} : vector<8x290xf32> to vector<8x256xf32>
    %563 = vector.extract_strided_slice %551 {offsets = [0, 18], sizes = [8, 256], strides = [1, 1]} : vector<8x290xf32> to vector<8x256xf32>
    %564 = vector.broadcast %24 : vector<1x256xf32> to vector<8x256xf32>
    %565 = arith.mulf %563, %564 : vector<8x256xf32>
    %566 = vector.extract_strided_slice %551 {offsets = [0, 32], sizes = [8, 256], strides = [1, 1]} : vector<8x290xf32> to vector<8x256xf32>
    %567 = vector.broadcast %20 : vector<1x256xf32> to vector<8x256xf32>
    %568 = arith.mulf %566, %567 : vector<8x256xf32>
    %569 = vector.extract_strided_slice %551 {offsets = [0, 33], sizes = [8, 256], strides = [1, 1]} : vector<8x290xf32> to vector<8x256xf32>
    %570 = vector.extract_strided_slice %551 {offsets = [0, 34], sizes = [8, 256], strides = [1, 1]} : vector<8x290xf32> to vector<8x256xf32>
    %571 = vector.broadcast %24 : vector<1x256xf32> to vector<8x256xf32>
    %572 = arith.mulf %570, %571 : vector<8x256xf32>
    %573 = tpu.concatenate %554, %555, %558, %561, %562, %565, %568, %569, %572 in 0 : vector<8x256xf32>, vector<8x256xf32>, vector<8x256xf32>, vector<8x256xf32>, vector<8x256xf32>, vector<8x256xf32>, vector<8x256xf32>, vector<8x256xf32>, vector<8x256xf32> -> vector<72x256xf32>
    %574 = arith.truncf %573 : vector<72x256xf32> to vector<72x256xbf16>
    %c4_125 = arith.constant 4 : index
    %c0_126 = arith.constant 0 : index
    %c0_127 = arith.constant 0 : index
    %575 = vector.load %arg5[%c4_125, %c0_126, %c0_127] : memref<6x8x72xbf16, #tpu.memory_space<vmem>>, vector<1x8x72xbf16>
    %576 = vector.shape_cast %575 : vector<1x8x72xbf16> to vector<8x72xbf16>
    %cst_128 = arith.constant dense<0.000000e+00> : vector<8x256xf32>
    %577 = tpu.matmul %576, %574, %cst_128 {dimension_numbers = #tpu.dot_dimension_numbers<[1], [0], [0], [1], [0, 0, 1, 1], [], []>} : vector<8x72xbf16>, vector<72x256xbf16>, vector<8x256xf32> -> vector<8x256xf32>
    %c4_129 = arith.constant 4 : index
    %c0_130 = arith.constant 0 : index
    %c0_131 = arith.constant 0 : index
    %578 = vector.load %arg6[%c4_129, %c0_130, %c0_131] : memref<6x8x1xf32, #tpu.memory_space<vmem>>, vector<1x8x1xf32>
    %579 = vector.shape_cast %578 : vector<1x8x1xf32> to vector<8x1xf32>
    %580 = vector.broadcast %579 : vector<8x1xf32> to vector<8x256xf32>
    %581 = arith.addf %577, %580 : vector<8x256xf32>
    %582 = arith.addf %581, %517 : vector<8x256xf32>
    %583 = tpu.concatenate %25, %582, %25 in 1 : vector<8x17xf32>, vector<8x256xf32>, vector<8x17xf32> -> vector<8x290xf32>
    %584 = vector.extract_strided_slice %583 {offsets = [0, 0], sizes = [8, 256], strides = [1, 1]} : vector<8x290xf32> to vector<8x256xf32>
    %585 = vector.broadcast %20 : vector<1x256xf32> to vector<8x256xf32>
    %586 = arith.mulf %584, %585 : vector<8x256xf32>
    %587 = vector.extract_strided_slice %583 {offsets = [0, 1], sizes = [8, 256], strides = [1, 1]} : vector<8x290xf32> to vector<8x256xf32>
    %588 = vector.extract_strided_slice %583 {offsets = [0, 2], sizes = [8, 256], strides = [1, 1]} : vector<8x290xf32> to vector<8x256xf32>
    %589 = vector.broadcast %24 : vector<1x256xf32> to vector<8x256xf32>
    %590 = arith.mulf %588, %589 : vector<8x256xf32>
    %591 = vector.extract_strided_slice %583 {offsets = [0, 16], sizes = [8, 256], strides = [1, 1]} : vector<8x290xf32> to vector<8x256xf32>
    %592 = vector.broadcast %20 : vector<1x256xf32> to vector<8x256xf32>
    %593 = arith.mulf %591, %592 : vector<8x256xf32>
    %594 = vector.extract_strided_slice %583 {offsets = [0, 17], sizes = [8, 256], strides = [1, 1]} : vector<8x290xf32> to vector<8x256xf32>
    %595 = vector.extract_strided_slice %583 {offsets = [0, 18], sizes = [8, 256], strides = [1, 1]} : vector<8x290xf32> to vector<8x256xf32>
    %596 = vector.broadcast %24 : vector<1x256xf32> to vector<8x256xf32>
    %597 = arith.mulf %595, %596 : vector<8x256xf32>
    %598 = vector.extract_strided_slice %583 {offsets = [0, 32], sizes = [8, 256], strides = [1, 1]} : vector<8x290xf32> to vector<8x256xf32>
    %599 = vector.broadcast %20 : vector<1x256xf32> to vector<8x256xf32>
    %600 = arith.mulf %598, %599 : vector<8x256xf32>
    %601 = vector.extract_strided_slice %583 {offsets = [0, 33], sizes = [8, 256], strides = [1, 1]} : vector<8x290xf32> to vector<8x256xf32>
    %602 = vector.extract_strided_slice %583 {offsets = [0, 34], sizes = [8, 256], strides = [1, 1]} : vector<8x290xf32> to vector<8x256xf32>
    %603 = vector.broadcast %24 : vector<1x256xf32> to vector<8x256xf32>
    %604 = arith.mulf %602, %603 : vector<8x256xf32>
    %605 = tpu.concatenate %586, %587, %590, %593, %594, %597, %600, %601, %604 in 0 : vector<8x256xf32>, vector<8x256xf32>, vector<8x256xf32>, vector<8x256xf32>, vector<8x256xf32>, vector<8x256xf32>, vector<8x256xf32>, vector<8x256xf32>, vector<8x256xf32> -> vector<72x256xf32>
    %606 = arith.truncf %605 : vector<72x256xf32> to vector<72x256xbf16>
    %c5_132 = arith.constant 5 : index
    %c0_133 = arith.constant 0 : index
    %c0_134 = arith.constant 0 : index
    %607 = vector.load %arg5[%c5_132, %c0_133, %c0_134] : memref<6x8x72xbf16, #tpu.memory_space<vmem>>, vector<1x8x72xbf16>
    %608 = vector.shape_cast %607 : vector<1x8x72xbf16> to vector<8x72xbf16>
    %cst_135 = arith.constant dense<0.000000e+00> : vector<8x256xf32>
    %609 = tpu.matmul %608, %606, %cst_135 {dimension_numbers = #tpu.dot_dimension_numbers<[1], [0], [0], [1], [0, 0, 1, 1], [], []>} : vector<8x72xbf16>, vector<72x256xbf16>, vector<8x256xf32> -> vector<8x256xf32>
    %c5_136 = arith.constant 5 : index
    %c0_137 = arith.constant 0 : index
    %c0_138 = arith.constant 0 : index
    %610 = vector.load %arg6[%c5_136, %c0_137, %c0_138] : memref<6x8x1xf32, #tpu.memory_space<vmem>>, vector<1x8x1xf32>
    %611 = vector.shape_cast %610 : vector<1x8x1xf32> to vector<8x1xf32>
    %612 = vector.broadcast %611 : vector<8x1xf32> to vector<8x256xf32>
    %613 = arith.addf %609, %612 : vector<8x256xf32>
    %614 = math.tanh %613 : vector<8x256xf32>
    %615 = tpu.concatenate %25, %222, %25 in 1 : vector<8x17xf32>, vector<8x256xf32>, vector<8x17xf32> -> vector<8x290xf32>
    %616 = vector.extract_strided_slice %615 {offsets = [0, 0], sizes = [8, 256], strides = [1, 1]} : vector<8x290xf32> to vector<8x256xf32>
    %617 = vector.broadcast %20 : vector<1x256xf32> to vector<8x256xf32>
    %618 = arith.mulf %616, %617 : vector<8x256xf32>
    %619 = vector.extract_strided_slice %615 {offsets = [0, 1], sizes = [8, 256], strides = [1, 1]} : vector<8x290xf32> to vector<8x256xf32>
    %620 = vector.extract_strided_slice %615 {offsets = [0, 2], sizes = [8, 256], strides = [1, 1]} : vector<8x290xf32> to vector<8x256xf32>
    %621 = vector.broadcast %24 : vector<1x256xf32> to vector<8x256xf32>
    %622 = arith.mulf %620, %621 : vector<8x256xf32>
    %623 = vector.extract_strided_slice %615 {offsets = [0, 16], sizes = [8, 256], strides = [1, 1]} : vector<8x290xf32> to vector<8x256xf32>
    %624 = vector.broadcast %20 : vector<1x256xf32> to vector<8x256xf32>
    %625 = arith.mulf %623, %624 : vector<8x256xf32>
    %626 = vector.extract_strided_slice %615 {offsets = [0, 17], sizes = [8, 256], strides = [1, 1]} : vector<8x290xf32> to vector<8x256xf32>
    %627 = vector.extract_strided_slice %615 {offsets = [0, 18], sizes = [8, 256], strides = [1, 1]} : vector<8x290xf32> to vector<8x256xf32>
    %628 = vector.broadcast %24 : vector<1x256xf32> to vector<8x256xf32>
    %629 = arith.mulf %627, %628 : vector<8x256xf32>
    %630 = vector.extract_strided_slice %615 {offsets = [0, 32], sizes = [8, 256], strides = [1, 1]} : vector<8x290xf32> to vector<8x256xf32>
    %631 = vector.broadcast %20 : vector<1x256xf32> to vector<8x256xf32>
    %632 = arith.mulf %630, %631 : vector<8x256xf32>
    %633 = vector.extract_strided_slice %615 {offsets = [0, 33], sizes = [8, 256], strides = [1, 1]} : vector<8x290xf32> to vector<8x256xf32>
    %634 = vector.extract_strided_slice %615 {offsets = [0, 34], sizes = [8, 256], strides = [1, 1]} : vector<8x290xf32> to vector<8x256xf32>
    %635 = vector.broadcast %24 : vector<1x256xf32> to vector<8x256xf32>
    %636 = arith.mulf %634, %635 : vector<8x256xf32>
    %637 = tpu.concatenate %618, %619, %622, %625, %626, %629, %632, %633, %636 in 0 : vector<8x256xf32>, vector<8x256xf32>, vector<8x256xf32>, vector<8x256xf32>, vector<8x256xf32>, vector<8x256xf32>, vector<8x256xf32>, vector<8x256xf32>, vector<8x256xf32> -> vector<72x256xf32>
    %638 = arith.truncf %637 : vector<72x256xf32> to vector<72x256xbf16>
    %c0_139 = arith.constant 0 : index
    %c0_140 = arith.constant 0 : index
    %c0_141 = arith.constant 0 : index
    %639 = vector.load %arg3[%c0_139, %c0_140, %c0_141] : memref<6x8x72xbf16, #tpu.memory_space<vmem>>, vector<1x8x72xbf16>
    %640 = vector.shape_cast %639 : vector<1x8x72xbf16> to vector<8x72xbf16>
    %cst_142 = arith.constant dense<0.000000e+00> : vector<8x256xf32>
    %641 = tpu.matmul %640, %638, %cst_142 {dimension_numbers = #tpu.dot_dimension_numbers<[1], [0], [0], [1], [0, 0, 1, 1], [], []>} : vector<8x72xbf16>, vector<72x256xbf16>, vector<8x256xf32> -> vector<8x256xf32>
    %c0_143 = arith.constant 0 : index
    %c0_144 = arith.constant 0 : index
    %c0_145 = arith.constant 0 : index
    %642 = vector.load %arg4[%c0_143, %c0_144, %c0_145] : memref<6x8x1xf32, #tpu.memory_space<vmem>>, vector<1x8x1xf32>
    %643 = vector.shape_cast %642 : vector<1x8x1xf32> to vector<8x1xf32>
    %644 = vector.broadcast %643 : vector<8x1xf32> to vector<8x256xf32>
    %645 = arith.addf %641, %644 : vector<8x256xf32>
    %cst_146 = arith.constant 0.000000e+00 : f32
    %646 = vector.broadcast %cst_146 : f32 to vector<8x256xf32>
    %647 = arith.maximumf %645, %646 : vector<8x256xf32>
    %648 = tpu.concatenate %25, %647, %25 in 1 : vector<8x17xf32>, vector<8x256xf32>, vector<8x17xf32> -> vector<8x290xf32>
    %649 = vector.extract_strided_slice %648 {offsets = [0, 0], sizes = [8, 256], strides = [1, 1]} : vector<8x290xf32> to vector<8x256xf32>
    %650 = vector.broadcast %20 : vector<1x256xf32> to vector<8x256xf32>
    %651 = arith.mulf %649, %650 : vector<8x256xf32>
    %652 = vector.extract_strided_slice %648 {offsets = [0, 1], sizes = [8, 256], strides = [1, 1]} : vector<8x290xf32> to vector<8x256xf32>
    %653 = vector.extract_strided_slice %648 {offsets = [0, 2], sizes = [8, 256], strides = [1, 1]} : vector<8x290xf32> to vector<8x256xf32>
    %654 = vector.broadcast %24 : vector<1x256xf32> to vector<8x256xf32>
    %655 = arith.mulf %653, %654 : vector<8x256xf32>
    %656 = vector.extract_strided_slice %648 {offsets = [0, 16], sizes = [8, 256], strides = [1, 1]} : vector<8x290xf32> to vector<8x256xf32>
    %657 = vector.broadcast %20 : vector<1x256xf32> to vector<8x256xf32>
    %658 = arith.mulf %656, %657 : vector<8x256xf32>
    %659 = vector.extract_strided_slice %648 {offsets = [0, 17], sizes = [8, 256], strides = [1, 1]} : vector<8x290xf32> to vector<8x256xf32>
    %660 = vector.extract_strided_slice %648 {offsets = [0, 18], sizes = [8, 256], strides = [1, 1]} : vector<8x290xf32> to vector<8x256xf32>
    %661 = vector.broadcast %24 : vector<1x256xf32> to vector<8x256xf32>
    %662 = arith.mulf %660, %661 : vector<8x256xf32>
    %663 = vector.extract_strided_slice %648 {offsets = [0, 32], sizes = [8, 256], strides = [1, 1]} : vector<8x290xf32> to vector<8x256xf32>
    %664 = vector.broadcast %20 : vector<1x256xf32> to vector<8x256xf32>
    %665 = arith.mulf %663, %664 : vector<8x256xf32>
    %666 = vector.extract_strided_slice %648 {offsets = [0, 33], sizes = [8, 256], strides = [1, 1]} : vector<8x290xf32> to vector<8x256xf32>
    %667 = vector.extract_strided_slice %648 {offsets = [0, 34], sizes = [8, 256], strides = [1, 1]} : vector<8x290xf32> to vector<8x256xf32>
    %668 = vector.broadcast %24 : vector<1x256xf32> to vector<8x256xf32>
    %669 = arith.mulf %667, %668 : vector<8x256xf32>
    %670 = tpu.concatenate %651, %652, %655, %658, %659, %662, %665, %666, %669 in 0 : vector<8x256xf32>, vector<8x256xf32>, vector<8x256xf32>, vector<8x256xf32>, vector<8x256xf32>, vector<8x256xf32>, vector<8x256xf32>, vector<8x256xf32>, vector<8x256xf32> -> vector<72x256xf32>
    %671 = arith.truncf %670 : vector<72x256xf32> to vector<72x256xbf16>
    %c1_147 = arith.constant 1 : index
    %c0_148 = arith.constant 0 : index
    %c0_149 = arith.constant 0 : index
    %672 = vector.load %arg3[%c1_147, %c0_148, %c0_149] : memref<6x8x72xbf16, #tpu.memory_space<vmem>>, vector<1x8x72xbf16>
    %673 = vector.shape_cast %672 : vector<1x8x72xbf16> to vector<8x72xbf16>
    %cst_150 = arith.constant dense<0.000000e+00> : vector<8x256xf32>
    %674 = tpu.matmul %673, %671, %cst_150 {dimension_numbers = #tpu.dot_dimension_numbers<[1], [0], [0], [1], [0, 0, 1, 1], [], []>} : vector<8x72xbf16>, vector<72x256xbf16>, vector<8x256xf32> -> vector<8x256xf32>
    %c1_151 = arith.constant 1 : index
    %c0_152 = arith.constant 0 : index
    %c0_153 = arith.constant 0 : index
    %675 = vector.load %arg4[%c1_151, %c0_152, %c0_153] : memref<6x8x1xf32, #tpu.memory_space<vmem>>, vector<1x8x1xf32>
    %676 = vector.shape_cast %675 : vector<1x8x1xf32> to vector<8x1xf32>
    %677 = vector.broadcast %676 : vector<8x1xf32> to vector<8x256xf32>
    %678 = arith.addf %674, %677 : vector<8x256xf32>
    %cst_154 = arith.constant 0.000000e+00 : f32
    %679 = vector.broadcast %cst_154 : f32 to vector<8x256xf32>
    %680 = arith.maximumf %678, %679 : vector<8x256xf32>
    %681 = tpu.concatenate %25, %680, %25 in 1 : vector<8x17xf32>, vector<8x256xf32>, vector<8x17xf32> -> vector<8x290xf32>
    %682 = vector.extract_strided_slice %681 {offsets = [0, 0], sizes = [8, 256], strides = [1, 1]} : vector<8x290xf32> to vector<8x256xf32>
    %683 = vector.broadcast %20 : vector<1x256xf32> to vector<8x256xf32>
    %684 = arith.mulf %682, %683 : vector<8x256xf32>
    %685 = vector.extract_strided_slice %681 {offsets = [0, 1], sizes = [8, 256], strides = [1, 1]} : vector<8x290xf32> to vector<8x256xf32>
    %686 = vector.extract_strided_slice %681 {offsets = [0, 2], sizes = [8, 256], strides = [1, 1]} : vector<8x290xf32> to vector<8x256xf32>
    %687 = vector.broadcast %24 : vector<1x256xf32> to vector<8x256xf32>
    %688 = arith.mulf %686, %687 : vector<8x256xf32>
    %689 = vector.extract_strided_slice %681 {offsets = [0, 16], sizes = [8, 256], strides = [1, 1]} : vector<8x290xf32> to vector<8x256xf32>
    %690 = vector.broadcast %20 : vector<1x256xf32> to vector<8x256xf32>
    %691 = arith.mulf %689, %690 : vector<8x256xf32>
    %692 = vector.extract_strided_slice %681 {offsets = [0, 17], sizes = [8, 256], strides = [1, 1]} : vector<8x290xf32> to vector<8x256xf32>
    %693 = vector.extract_strided_slice %681 {offsets = [0, 18], sizes = [8, 256], strides = [1, 1]} : vector<8x290xf32> to vector<8x256xf32>
    %694 = vector.broadcast %24 : vector<1x256xf32> to vector<8x256xf32>
    %695 = arith.mulf %693, %694 : vector<8x256xf32>
    %696 = vector.extract_strided_slice %681 {offsets = [0, 32], sizes = [8, 256], strides = [1, 1]} : vector<8x290xf32> to vector<8x256xf32>
    %697 = vector.broadcast %20 : vector<1x256xf32> to vector<8x256xf32>
    %698 = arith.mulf %696, %697 : vector<8x256xf32>
    %699 = vector.extract_strided_slice %681 {offsets = [0, 33], sizes = [8, 256], strides = [1, 1]} : vector<8x290xf32> to vector<8x256xf32>
    %700 = vector.extract_strided_slice %681 {offsets = [0, 34], sizes = [8, 256], strides = [1, 1]} : vector<8x290xf32> to vector<8x256xf32>
    %701 = vector.broadcast %24 : vector<1x256xf32> to vector<8x256xf32>
    %702 = arith.mulf %700, %701 : vector<8x256xf32>
    %703 = tpu.concatenate %684, %685, %688, %691, %692, %695, %698, %699, %702 in 0 : vector<8x256xf32>, vector<8x256xf32>, vector<8x256xf32>, vector<8x256xf32>, vector<8x256xf32>, vector<8x256xf32>, vector<8x256xf32>, vector<8x256xf32>, vector<8x256xf32> -> vector<72x256xf32>
    %704 = arith.truncf %703 : vector<72x256xf32> to vector<72x256xbf16>
    %c2_155 = arith.constant 2 : index
    %c0_156 = arith.constant 0 : index
    %c0_157 = arith.constant 0 : index
    %705 = vector.load %arg3[%c2_155, %c0_156, %c0_157] : memref<6x8x72xbf16, #tpu.memory_space<vmem>>, vector<1x8x72xbf16>
    %706 = vector.shape_cast %705 : vector<1x8x72xbf16> to vector<8x72xbf16>
    %cst_158 = arith.constant dense<0.000000e+00> : vector<8x256xf32>
    %707 = tpu.matmul %706, %704, %cst_158 {dimension_numbers = #tpu.dot_dimension_numbers<[1], [0], [0], [1], [0, 0, 1, 1], [], []>} : vector<8x72xbf16>, vector<72x256xbf16>, vector<8x256xf32> -> vector<8x256xf32>
    %c2_159 = arith.constant 2 : index
    %c0_160 = arith.constant 0 : index
    %c0_161 = arith.constant 0 : index
    %708 = vector.load %arg4[%c2_159, %c0_160, %c0_161] : memref<6x8x1xf32, #tpu.memory_space<vmem>>, vector<1x8x1xf32>
    %709 = vector.shape_cast %708 : vector<1x8x1xf32> to vector<8x1xf32>
    %710 = vector.broadcast %709 : vector<8x1xf32> to vector<8x256xf32>
    %711 = arith.addf %707, %710 : vector<8x256xf32>
    %712 = arith.addf %711, %647 : vector<8x256xf32>
    %713 = tpu.concatenate %25, %712, %25 in 1 : vector<8x17xf32>, vector<8x256xf32>, vector<8x17xf32> -> vector<8x290xf32>
    %714 = vector.extract_strided_slice %713 {offsets = [0, 0], sizes = [8, 256], strides = [1, 1]} : vector<8x290xf32> to vector<8x256xf32>
    %715 = vector.broadcast %20 : vector<1x256xf32> to vector<8x256xf32>
    %716 = arith.mulf %714, %715 : vector<8x256xf32>
    %717 = vector.extract_strided_slice %713 {offsets = [0, 1], sizes = [8, 256], strides = [1, 1]} : vector<8x290xf32> to vector<8x256xf32>
    %718 = vector.extract_strided_slice %713 {offsets = [0, 2], sizes = [8, 256], strides = [1, 1]} : vector<8x290xf32> to vector<8x256xf32>
    %719 = vector.broadcast %24 : vector<1x256xf32> to vector<8x256xf32>
    %720 = arith.mulf %718, %719 : vector<8x256xf32>
    %721 = vector.extract_strided_slice %713 {offsets = [0, 16], sizes = [8, 256], strides = [1, 1]} : vector<8x290xf32> to vector<8x256xf32>
    %722 = vector.broadcast %20 : vector<1x256xf32> to vector<8x256xf32>
    %723 = arith.mulf %721, %722 : vector<8x256xf32>
    %724 = vector.extract_strided_slice %713 {offsets = [0, 17], sizes = [8, 256], strides = [1, 1]} : vector<8x290xf32> to vector<8x256xf32>
    %725 = vector.extract_strided_slice %713 {offsets = [0, 18], sizes = [8, 256], strides = [1, 1]} : vector<8x290xf32> to vector<8x256xf32>
    %726 = vector.broadcast %24 : vector<1x256xf32> to vector<8x256xf32>
    %727 = arith.mulf %725, %726 : vector<8x256xf32>
    %728 = vector.extract_strided_slice %713 {offsets = [0, 32], sizes = [8, 256], strides = [1, 1]} : vector<8x290xf32> to vector<8x256xf32>
    %729 = vector.broadcast %20 : vector<1x256xf32> to vector<8x256xf32>
    %730 = arith.mulf %728, %729 : vector<8x256xf32>
    %731 = vector.extract_strided_slice %713 {offsets = [0, 33], sizes = [8, 256], strides = [1, 1]} : vector<8x290xf32> to vector<8x256xf32>
    %732 = vector.extract_strided_slice %713 {offsets = [0, 34], sizes = [8, 256], strides = [1, 1]} : vector<8x290xf32> to vector<8x256xf32>
    %733 = vector.broadcast %24 : vector<1x256xf32> to vector<8x256xf32>
    %734 = arith.mulf %732, %733 : vector<8x256xf32>
    %735 = tpu.concatenate %716, %717, %720, %723, %724, %727, %730, %731, %734 in 0 : vector<8x256xf32>, vector<8x256xf32>, vector<8x256xf32>, vector<8x256xf32>, vector<8x256xf32>, vector<8x256xf32>, vector<8x256xf32>, vector<8x256xf32>, vector<8x256xf32> -> vector<72x256xf32>
    %736 = arith.truncf %735 : vector<72x256xf32> to vector<72x256xbf16>
    %c3_162 = arith.constant 3 : index
    %c0_163 = arith.constant 0 : index
    %c0_164 = arith.constant 0 : index
    %737 = vector.load %arg3[%c3_162, %c0_163, %c0_164] : memref<6x8x72xbf16, #tpu.memory_space<vmem>>, vector<1x8x72xbf16>
    %738 = vector.shape_cast %737 : vector<1x8x72xbf16> to vector<8x72xbf16>
    %cst_165 = arith.constant dense<0.000000e+00> : vector<8x256xf32>
    %739 = tpu.matmul %738, %736, %cst_165 {dimension_numbers = #tpu.dot_dimension_numbers<[1], [0], [0], [1], [0, 0, 1, 1], [], []>} : vector<8x72xbf16>, vector<72x256xbf16>, vector<8x256xf32> -> vector<8x256xf32>
    %c3_166 = arith.constant 3 : index
    %c0_167 = arith.constant 0 : index
    %c0_168 = arith.constant 0 : index
    %740 = vector.load %arg4[%c3_166, %c0_167, %c0_168] : memref<6x8x1xf32, #tpu.memory_space<vmem>>, vector<1x8x1xf32>
    %741 = vector.shape_cast %740 : vector<1x8x1xf32> to vector<8x1xf32>
    %742 = vector.broadcast %741 : vector<8x1xf32> to vector<8x256xf32>
    %743 = arith.addf %739, %742 : vector<8x256xf32>
    %cst_169 = arith.constant 0.000000e+00 : f32
    %744 = vector.broadcast %cst_169 : f32 to vector<8x256xf32>
    %745 = arith.maximumf %743, %744 : vector<8x256xf32>
    %746 = tpu.concatenate %25, %745, %25 in 1 : vector<8x17xf32>, vector<8x256xf32>, vector<8x17xf32> -> vector<8x290xf32>
    %747 = vector.extract_strided_slice %746 {offsets = [0, 0], sizes = [8, 256], strides = [1, 1]} : vector<8x290xf32> to vector<8x256xf32>
    %748 = vector.broadcast %20 : vector<1x256xf32> to vector<8x256xf32>
    %749 = arith.mulf %747, %748 : vector<8x256xf32>
    %750 = vector.extract_strided_slice %746 {offsets = [0, 1], sizes = [8, 256], strides = [1, 1]} : vector<8x290xf32> to vector<8x256xf32>
    %751 = vector.extract_strided_slice %746 {offsets = [0, 2], sizes = [8, 256], strides = [1, 1]} : vector<8x290xf32> to vector<8x256xf32>
    %752 = vector.broadcast %24 : vector<1x256xf32> to vector<8x256xf32>
    %753 = arith.mulf %751, %752 : vector<8x256xf32>
    %754 = vector.extract_strided_slice %746 {offsets = [0, 16], sizes = [8, 256], strides = [1, 1]} : vector<8x290xf32> to vector<8x256xf32>
    %755 = vector.broadcast %20 : vector<1x256xf32> to vector<8x256xf32>
    %756 = arith.mulf %754, %755 : vector<8x256xf32>
    %757 = vector.extract_strided_slice %746 {offsets = [0, 17], sizes = [8, 256], strides = [1, 1]} : vector<8x290xf32> to vector<8x256xf32>
    %758 = vector.extract_strided_slice %746 {offsets = [0, 18], sizes = [8, 256], strides = [1, 1]} : vector<8x290xf32> to vector<8x256xf32>
    %759 = vector.broadcast %24 : vector<1x256xf32> to vector<8x256xf32>
    %760 = arith.mulf %758, %759 : vector<8x256xf32>
    %761 = vector.extract_strided_slice %746 {offsets = [0, 32], sizes = [8, 256], strides = [1, 1]} : vector<8x290xf32> to vector<8x256xf32>
    %762 = vector.broadcast %20 : vector<1x256xf32> to vector<8x256xf32>
    %763 = arith.mulf %761, %762 : vector<8x256xf32>
    %764 = vector.extract_strided_slice %746 {offsets = [0, 33], sizes = [8, 256], strides = [1, 1]} : vector<8x290xf32> to vector<8x256xf32>
    %765 = vector.extract_strided_slice %746 {offsets = [0, 34], sizes = [8, 256], strides = [1, 1]} : vector<8x290xf32> to vector<8x256xf32>
    %766 = vector.broadcast %24 : vector<1x256xf32> to vector<8x256xf32>
    %767 = arith.mulf %765, %766 : vector<8x256xf32>
    %768 = tpu.concatenate %749, %750, %753, %756, %757, %760, %763, %764, %767 in 0 : vector<8x256xf32>, vector<8x256xf32>, vector<8x256xf32>, vector<8x256xf32>, vector<8x256xf32>, vector<8x256xf32>, vector<8x256xf32>, vector<8x256xf32>, vector<8x256xf32> -> vector<72x256xf32>
    %769 = arith.truncf %768 : vector<72x256xf32> to vector<72x256xbf16>
    %c4_170 = arith.constant 4 : index
    %c0_171 = arith.constant 0 : index
    %c0_172 = arith.constant 0 : index
    %770 = vector.load %arg3[%c4_170, %c0_171, %c0_172] : memref<6x8x72xbf16, #tpu.memory_space<vmem>>, vector<1x8x72xbf16>
    %771 = vector.shape_cast %770 : vector<1x8x72xbf16> to vector<8x72xbf16>
    %cst_173 = arith.constant dense<0.000000e+00> : vector<8x256xf32>
    %772 = tpu.matmul %771, %769, %cst_173 {dimension_numbers = #tpu.dot_dimension_numbers<[1], [0], [0], [1], [0, 0, 1, 1], [], []>} : vector<8x72xbf16>, vector<72x256xbf16>, vector<8x256xf32> -> vector<8x256xf32>
    %c4_174 = arith.constant 4 : index
    %c0_175 = arith.constant 0 : index
    %c0_176 = arith.constant 0 : index
    %773 = vector.load %arg4[%c4_174, %c0_175, %c0_176] : memref<6x8x1xf32, #tpu.memory_space<vmem>>, vector<1x8x1xf32>
    %774 = vector.shape_cast %773 : vector<1x8x1xf32> to vector<8x1xf32>
    %775 = vector.broadcast %774 : vector<8x1xf32> to vector<8x256xf32>
    %776 = arith.addf %772, %775 : vector<8x256xf32>
    %777 = arith.addf %776, %712 : vector<8x256xf32>
    %778 = tpu.concatenate %25, %777, %25 in 1 : vector<8x17xf32>, vector<8x256xf32>, vector<8x17xf32> -> vector<8x290xf32>
    %779 = vector.extract_strided_slice %778 {offsets = [0, 0], sizes = [8, 256], strides = [1, 1]} : vector<8x290xf32> to vector<8x256xf32>
    %780 = vector.broadcast %20 : vector<1x256xf32> to vector<8x256xf32>
    %781 = arith.mulf %779, %780 : vector<8x256xf32>
    %782 = vector.extract_strided_slice %778 {offsets = [0, 1], sizes = [8, 256], strides = [1, 1]} : vector<8x290xf32> to vector<8x256xf32>
    %783 = vector.extract_strided_slice %778 {offsets = [0, 2], sizes = [8, 256], strides = [1, 1]} : vector<8x290xf32> to vector<8x256xf32>
    %784 = vector.broadcast %24 : vector<1x256xf32> to vector<8x256xf32>
    %785 = arith.mulf %783, %784 : vector<8x256xf32>
    %786 = vector.extract_strided_slice %778 {offsets = [0, 16], sizes = [8, 256], strides = [1, 1]} : vector<8x290xf32> to vector<8x256xf32>
    %787 = vector.broadcast %20 : vector<1x256xf32> to vector<8x256xf32>
    %788 = arith.mulf %786, %787 : vector<8x256xf32>
    %789 = vector.extract_strided_slice %778 {offsets = [0, 17], sizes = [8, 256], strides = [1, 1]} : vector<8x290xf32> to vector<8x256xf32>
    %790 = vector.extract_strided_slice %778 {offsets = [0, 18], sizes = [8, 256], strides = [1, 1]} : vector<8x290xf32> to vector<8x256xf32>
    %791 = vector.broadcast %24 : vector<1x256xf32> to vector<8x256xf32>
    %792 = arith.mulf %790, %791 : vector<8x256xf32>
    %793 = vector.extract_strided_slice %778 {offsets = [0, 32], sizes = [8, 256], strides = [1, 1]} : vector<8x290xf32> to vector<8x256xf32>
    %794 = vector.broadcast %20 : vector<1x256xf32> to vector<8x256xf32>
    %795 = arith.mulf %793, %794 : vector<8x256xf32>
    %796 = vector.extract_strided_slice %778 {offsets = [0, 33], sizes = [8, 256], strides = [1, 1]} : vector<8x290xf32> to vector<8x256xf32>
    %797 = vector.extract_strided_slice %778 {offsets = [0, 34], sizes = [8, 256], strides = [1, 1]} : vector<8x290xf32> to vector<8x256xf32>
    %798 = vector.broadcast %24 : vector<1x256xf32> to vector<8x256xf32>
    %799 = arith.mulf %797, %798 : vector<8x256xf32>
    %800 = tpu.concatenate %781, %782, %785, %788, %789, %792, %795, %796, %799 in 0 : vector<8x256xf32>, vector<8x256xf32>, vector<8x256xf32>, vector<8x256xf32>, vector<8x256xf32>, vector<8x256xf32>, vector<8x256xf32>, vector<8x256xf32>, vector<8x256xf32> -> vector<72x256xf32>
    %801 = arith.truncf %800 : vector<72x256xf32> to vector<72x256xbf16>
    %c5_177 = arith.constant 5 : index
    %c0_178 = arith.constant 0 : index
    %c0_179 = arith.constant 0 : index
    %802 = vector.load %arg3[%c5_177, %c0_178, %c0_179] : memref<6x8x72xbf16, #tpu.memory_space<vmem>>, vector<1x8x72xbf16>
    %803 = vector.shape_cast %802 : vector<1x8x72xbf16> to vector<8x72xbf16>
    %cst_180 = arith.constant dense<0.000000e+00> : vector<8x256xf32>
    %804 = tpu.matmul %803, %801, %cst_180 {dimension_numbers = #tpu.dot_dimension_numbers<[1], [0], [0], [1], [0, 0, 1, 1], [], []>} : vector<8x72xbf16>, vector<72x256xbf16>, vector<8x256xf32> -> vector<8x256xf32>
    %c5_181 = arith.constant 5 : index
    %c0_182 = arith.constant 0 : index
    %c0_183 = arith.constant 0 : index
    %805 = vector.load %arg4[%c5_181, %c0_182, %c0_183] : memref<6x8x1xf32, #tpu.memory_space<vmem>>, vector<1x8x1xf32>
    %806 = vector.shape_cast %805 : vector<1x8x1xf32> to vector<8x1xf32>
    %807 = vector.broadcast %806 : vector<8x1xf32> to vector<8x256xf32>
    %808 = arith.addf %804, %807 : vector<8x256xf32>
    %809 = math.tanh %808 : vector<8x256xf32>
    %c0_184 = arith.constant 0 : index
    %c0_185 = arith.constant 0 : index
    %c0_186 = arith.constant 0 : index
    %810 = vector.load %arg7[%c0_184, %c0_185, %c0_186] : memref<1x8x256xf32, #tpu.memory_space<vmem>>, vector<1x8x256xf32>
    %811 = vector.shape_cast %810 : vector<1x8x256xf32> to vector<8x256xf32>
    %812 = vector.shape_cast %222 : vector<8x256xf32> to vector<1x8x256xf32>
    tpu.vector_store %arg7[%c0_184, %c0_185, %c0_186], %812 {strides = array<i32>} : memref<1x8x256xf32, #tpu.memory_space<vmem>>, vector<1x8x256xf32>,
    %c0_187 = arith.constant 0 : index
    %c0_188 = arith.constant 0 : index
    %c0_189 = arith.constant 0 : index
    %813 = vector.load %arg8[%c0_187, %c0_188, %c0_189] : memref<1x8x256xf32, #tpu.memory_space<vmem>>, vector<1x8x256xf32>
    %814 = vector.shape_cast %813 : vector<1x8x256xf32> to vector<8x256xf32>
    %815 = vector.shape_cast %419 : vector<8x256xf32> to vector<1x8x256xf32>
    tpu.vector_store %arg8[%c0_187, %c0_188, %c0_189], %815 {strides = array<i32>} : memref<1x8x256xf32, #tpu.memory_space<vmem>>, vector<1x8x256xf32>,
    %c0_190 = arith.constant 0 : index
    %c0_191 = arith.constant 0 : index
    %c0_192 = arith.constant 0 : index
    %816 = vector.load %arg9[%c0_190, %c0_191, %c0_192] : memref<1x8x256xf32, #tpu.memory_space<vmem>>, vector<1x8x256xf32>
    %817 = vector.shape_cast %816 : vector<1x8x256xf32> to vector<8x256xf32>
    %818 = vector.shape_cast %614 : vector<8x256xf32> to vector<1x8x256xf32>
    tpu.vector_store %arg9[%c0_190, %c0_191, %c0_192], %818 {strides = array<i32>} : memref<1x8x256xf32, #tpu.memory_space<vmem>>, vector<1x8x256xf32>,
    %c0_193 = arith.constant 0 : index
    %c0_194 = arith.constant 0 : index
    %c0_195 = arith.constant 0 : index
    %819 = vector.load %arg10[%c0_193, %c0_194, %c0_195] : memref<1x8x256xf32, #tpu.memory_space<vmem>>, vector<1x8x256xf32>
    %820 = vector.shape_cast %819 : vector<1x8x256xf32> to vector<8x256xf32>
    %821 = vector.shape_cast %809 : vector<8x256xf32> to vector<1x8x256xf32>
    tpu.vector_store %arg10[%c0_193, %c0_194, %c0_195], %821 {strides = array<i32>} : memref<1x8x256xf32, #tpu.memory_space<vmem>>, vector<1x8x256xf32>,
    return
  }
  func.func @transform_0(%arg0: i32) -> (i32, i32, i32) {
    %c0_i32 = arith.constant 0 : i32
    %c0_i32_0 = arith.constant 0 : i32
    %c0_i32_1 = arith.constant 0 : i32
    return %arg0, %c0_i32, %c0_i32_0 : i32, i32, i32
  }
  func.func @transform_1(%arg0: i32) -> (i32, i32, i32) {
    %c0_i32 = arith.constant 0 : i32
    %c0_i32_0 = arith.constant 0 : i32
    %c0_i32_1 = arith.constant 0 : i32
    return %arg0, %c0_i32, %c0_i32_0 : i32, i32, i32
  }
  func.func @transform_2(%arg0: i32) -> (i32, i32, i32) {
    %c0_i32 = arith.constant 0 : i32
    %c0_i32_0 = arith.constant 0 : i32
    %c0_i32_1 = arith.constant 0 : i32
    %c0_i32_2 = arith.constant 0 : i32
    return %c0_i32, %c0_i32_0, %c0_i32_1 : i32, i32, i32
  }
  func.func @transform_3(%arg0: i32) -> (i32, i32, i32) {
    %c0_i32 = arith.constant 0 : i32
    %c0_i32_0 = arith.constant 0 : i32
    %c0_i32_1 = arith.constant 0 : i32
    %c0_i32_2 = arith.constant 0 : i32
    return %c0_i32, %c0_i32_0, %c0_i32_1 : i32, i32, i32
  }
  func.func @transform_4(%arg0: i32) -> (i32, i32, i32) {
    %c0_i32 = arith.constant 0 : i32
    %c0_i32_0 = arith.constant 0 : i32
    %c0_i32_1 = arith.constant 0 : i32
    %c0_i32_2 = arith.constant 0 : i32
    return %c0_i32, %c0_i32_0, %c0_i32_1 : i32, i32, i32
  }
  func.func @transform_5(%arg0: i32) -> (i32, i32, i32) {
    %c0_i32 = arith.constant 0 : i32
    %c0_i32_0 = arith.constant 0 : i32
    %c0_i32_1 = arith.constant 0 : i32
    %c0_i32_2 = arith.constant 0 : i32
    return %c0_i32, %c0_i32_0, %c0_i32_1 : i32, i32, i32
  }
  func.func @transform_6(%arg0: i32) -> (i32, i32, i32) {
    %c0_i32 = arith.constant 0 : i32
    %c0_i32_0 = arith.constant 0 : i32
    %c0_i32_1 = arith.constant 0 : i32
    return %arg0, %c0_i32, %c0_i32_0 : i32, i32, i32
  }
  func.func @transform_7(%arg0: i32) -> (i32, i32, i32) {
    %c0_i32 = arith.constant 0 : i32
    %c0_i32_0 = arith.constant 0 : i32
    %c0_i32_1 = arith.constant 0 : i32
    return %arg0, %c0_i32, %c0_i32_0 : i32, i32, i32
  }
  func.func @transform_8(%arg0: i32) -> (i32, i32, i32) {
    %c0_i32 = arith.constant 0 : i32
    %c0_i32_0 = arith.constant 0 : i32
    %c0_i32_1 = arith.constant 0 : i32
    return %arg0, %c0_i32, %c0_i32_0 : i32, i32, i32
  }
  func.func @transform_9(%arg0: i32) -> (i32, i32, i32) {
    %c0_i32 = arith.constant 0 : i32
    %c0_i32_0 = arith.constant 0 : i32
    %c0_i32_1 = arith.constant 0 : i32
    return %arg0, %c0_i32, %c0_i32_0 : i32, i32, i32
  }
}

</mosaic_0001>

<bundles_post_ra>
// kernel: cyclegan_test.1
= control target key start
LH: loop header
LB: loop body
LE: loop exit
PB: predicated region body
PF: predicated region fallthrough
CT: control target
= control target key end

     0   :  { %s6538_s30 = smov 0   ;;  %s8521_s0 = inlined_call_operand.vmem [shape: f32[2,8,256], index: 0, kind: input, shape index: {}]   ;;  %s8522_s1 = inlined_call_operand.vmem [shape: f32[2,8,256], index: 1, kind: input, shape index: {}]   ;;  %s8523_s2 = inlined_call_operand.vmem [shape: bf16[6,8,72], index: 2, kind: input, shape index: {}]   ;;  %s8524_s3 = inlined_call_operand.vmem [shape: f32[6,8,1], index: 3, kind: input, shape index: {}]   ;;  %s8525_s4 = inlined_call_operand.vmem [shape: bf16[6,8,72], index: 4, kind: input, shape index: {}]   ;;  %s8526_s5 = inlined_call_operand.vmem [shape: f32[6,8,1], index: 5, kind: input, shape index: {}]   ;;  %s8527_s6 = inlined_call_operand.vmem [shape: f32[2,8,256], index: 6, kind: output, shape index: {0}]   ;;  %s8528_s7 = inlined_call_operand.vmem [shape: f32[2,8,256], index: 7, kind: output, shape index: {1}]   ;;  %s8529_s8 = inlined_call_operand.vmem [shape: f32[2,8,256], index: 8, kind: output, shape index: {2}]   ;;  %s8530_s9 = inlined_call_operand.vmem [shape: f32[2,8,256], index: 9, kind: output, shape index: {3}]  }
   0x1 LB: > { %s5248_s10 = sadd.s32 4294967295, %s6470_s30   ;;  %p5252_p0 = scmp.ge.s32.totalorder %s6470_s30, 1  ;;  %s6470_s30 = sphi %s6538_s30, %s20_s30  }
   0x2   : > { %p304_p1 = scmp.lt.s32.totalorder %s6470_s30, 3 }
   0x4   : > { %p305_p2 = pnand %p5252_p0, %p304_p1 }
   0x5   : > { %p360_p3 = scmp.lt.s32.totalorder (!%p305_p2), %s5248_s10, 1  ;;  %v391_v0 = vlaneseq (!%p305_p2)  ;;  %s6472_s15 = smov (!%p305_p2), 17   ;;  %v6473_v6 = vmov (!%p305_p2), 0.0   ;;  %vm438_vm4 = vcmask (!%p305_p2), 138240   ;;  %vm467_vm5 = vcmask (!%p305_p2), 130048   ;;  %v627_v61 = vld [vmem:[%s8526_s5] sm:$0xff] (!%p305_p2) }
   0x6   : > { %308 = sbr.rel (%p305_p2) target bundleno = 9809 (0x2651), region = 44  ;;  %s6474_s16 = smov (!%p305_p2), 2   ;;  %vm453_vm6 = vcmask (!%p305_p2), 15360   ;;  %vm479_vm7 = vcmask (!%p305_p2), 146432   ;;  %vm491_vm8 = vcmask (!%p305_p2), 261120   ;;  %vm503_vm9 = vcmask (!%p305_p2), 277504  }
   0x7   : > { %v392_v1 = vand.u32 (!%p305_p2), 127, %v391_v0  ;;  %s6475_s17 = smov (!%p305_p2), 18   ;;  %s6476_s18 = smov (!%p305_p2), 16   ;;  %v6486_v58 = vmov (!%p305_p2), 0   ;;  %vm519_vm10 = vcmask (!%p305_p2), 1039360   ;;  %vm547_vm11 = vcmask (!%p305_p2), 916480  }
   0x8   : > { %s6477_s19 = smov (!%p305_p2), 34   ;;  %s6478_s20 = smov (!%p305_p2), 32   ;;  %676 = vmatprep.mubr.bf16.mxu0 (!%p305_p2), %v6486_v58  ;;  %5434 = vset.pattern.permute.xlu1 (!%p305_p2), %v6486_v58  ;;  %vm533_vm12 = vcmask (!%p305_p2), 1031168   ;;  %vm558_vm13 = vcmask (!%p305_p2), 908288   ;;  %vm572_vm14 = vcmask (!%p305_p2), 900096   ;;  %vm597_vm15 = vcmask (!%p305_p2), 777216  }
   0x9   : > { %v393_v2 = vadd.s32 (!%p305_p2), 128, %v392_v1  ;;  %v398_v3 = vand.u32 (!%p305_p2), 15, %v392_v1  ;;  %s6479_s21 = smov (!%p305_p2), 127   ;;  %s6480_s22 = smov (!%p305_p2), 95   ;;  %873 = vmatprep.mubr.bf16.mxu1 (!%p305_p2), %v6486_v58  ;;  %5475 = vset.pattern.permute.xlu0 (!%p305_p2), %v6486_v58 }
   0xa   : > { %s6481_s23 = smov (!%p305_p2), 111   ;;  %s6482_s24 = smov (!%p305_p2), 112  }
   0xb   : > { %v405_v5 = vand.u32 (!%p305_p2), 15, %v393_v2  ;;  %vm418_vm0 = vcmp.ne.s32.totalorder (!%p305_p2), %v398_v3, 0  ;;  %vm424_vm1 = vcmp.ne.s32.totalorder (!%p305_p2), %v398_v3, 15  ;;  %s6483_s25 = smov (!%p305_p2), 110   ;;  %s6484_s26 = smov (!%p305_p2), 126  }
   0xc   : > { %v5267_v7 = vsel (!%p305_p2), %vm424_vm1, 1.0, %v6473_v6  ;;  %v6553_v9 = vsel (!%p305_p2), %vm418_vm0, 1.0, %v6473_v6  ;;  %s6485_s27 = smov (!%p305_p2), 96   ;;  %s6487_s28 = smov (!%p305_p2), 94   ;;  %vm586_vm0 = vcmask (!%p305_p2), 785408   ;;  %vm611_vm1 = vcmask (!%p305_p2), 769024  }
   0xd   : > { %s8532_s10 = smov (!%p360_p3, %s5248_s10), 1  ;;  %vm425_vm2 = vcmp.ne.s32.totalorder %v405_v5, 15  ;;  %vm419_vm3 = vcmp.ne.s32.totalorder %v405_v5, 0 }
   0xe   : > { %s6546_s11 = sshll.u32 %s8532_s10, 4  ;;  %v5268_v10 = vsel %vm425_vm2, 1.0, %v6473_v6  ;;  %v6555_v11 = vsel %vm419_vm3, 1.0, %v6473_v6  ;;  %vm637_vm2 = vcmask 1043456   ;;  %vm633_vm3 = vcmask 588800  }
   0xf   : > { %s369_s14 = scalar_lea.vmem %s8522_s1, %s6546_s11  ;;  %v5369_v12 = vpack.i.bf16 %v5268_v10, %v5267_v7  ;;  %v5374_v13 = vpack.i.bf16 %v6555_v11, %v6553_v9  ;;  %s379_s10 = scalar_lea.vmem %s8528_s7, %s6546_s11 }
  0x10   : > { %v430_v4 = vld [vmem:[%s369_s14] sm:$0xff]  ;;  %v431_v8 = vld [vmem:[%s369_s14 + $0x8] sm:$0xff]  ;;  %s374_s14 = scalar_lea.vmem %s8527_s6, %s6546_s11 }
  0x11   : > { %434 = vrot.lane.b32.xlu0 %v430_v4, %s6472_s15  ;;  %5370 = vrot.lane.b32.xlu1 %v5369_v12, %s6474_s16  ;;  %s384_s16 = scalar_lea.vmem %s8529_s8, %s6546_s11 }
  0x15   : > { %436 = vrot.lane.b32.xlu0 %v431_v8, %s6472_s15  ;;  %5375 = vrot.lane.b32.xlu1 %v5374_v13, %s6476_s18 }
  0x19   : > { %5380 = vrot.lane.b32.xlu0 %v5369_v12, %s6475_s17  ;;  %5385 = vrot.lane.b32.xlu1 %v5374_v13, %s6478_s20 }
  0x1d   : > { %5390 = vrot.lane.b32.xlu0 %v5369_v12, %s6477_s19  ;;  %s364_s19 = scalar_lea.vmem %s8521_s0, %s6546_s11 }
  0x83   : > { %v435_v14 = vpop.permute.xlu0 %434  ;;  %v5371_v19 = vpop.permute.xlu1 %5370 }
  0x84   : > { %v6561_v15 = vsel %vm438_vm4, 0.0, %v435_v14  ;;  %v6579_v25 = vunpack.i.h.bf16 %v5371_v19  ;;  %v6581_v26 = vunpack.i.l.bf16 %v5371_v19 }
  0x85   : > { %513 = vrot.lane.b32.xlu0 %v6561_v15, %s6479_s21  ;;  %v445_v4 = vmul.f32 %v6553_v9, %v6561_v15 }
  0x86   : > { %v6597_v31 = vsel %vm453_vm6, %v6581_v26, %v6579_v25  ;;  %v458_v37 = vmul.f32 %v6581_v26, %v6561_v15 }
  0x87   : > { %v437_v16 = vpop.permute.xlu0 %436  ;;  %v5376_v22 = vpop.permute.xlu1 %5375 }
  0x88   : > { %v6566_v17 = vsel %vm438_vm4, %v435_v14, %v437_v16  ;;  %v6569_v18 = vsel %vm438_vm4, %v437_v16, 0.0  ;;  %v6575_v23 = vunpack.i.h.bf16 %v5376_v22  ;;  %v6577_v24 = vunpack.i.l.bf16 %v5376_v22 }
  0x89   : > { %v5404_v20 = vpack.i.bf16 %v6569_v18, %v6566_v17  ;;  %v459_v38 = vmul.f32 %v6597_v31, %v6566_v17  ;;  %v460_v39 = vmul.f32 %v6579_v25, %v6569_v18  ;;  %v446_v3 = vmul.f32 %v6555_v11, %v6566_v17 }
  0x8a   : > { %v472_v28 = vmul.f32 %v6577_v24, %v6561_v15  ;;  %v6592_v30 = vsel %vm467_vm5, %v6577_v24, %v6575_v23  ;;  %v474_v35 = vmul.f32 %v6575_v23, %v6569_v18 }
  0x8b   : > { %5405 = vrot.lane.b32.xlu0 %v5404_v20, %s6480_s22  ;;  %5395 = vrot.lane.b32.xlu1 %v5404_v20, %s6479_s21  ;;  %v5381_v21 = vpop.permute.xlu0 %5380  ;;  %v5386_v32 = vpop.permute.xlu1 %5385  ;;  %v473_v34 = vmul.f32 %v6592_v30, %v6566_v17  ;;  %v5409_v46 = vpack.i.bf16 %v460_v39, %v459_v38 }
  0x8c   : > { %v6583_v27 = vunpack.i.l.bf16 %v5381_v21  ;;  %v6588_v29 = vunpack.i.h.bf16 %v5381_v21  ;;  %v6618_v40 = vunpack.i.h.bf16 %v5386_v32  ;;  %v6620_v41 = vunpack.i.l.bf16 %v5386_v32 }
  0x8d   : > { %v5414_v43 = vpack.i.bf16 %v474_v35, %v473_v34 }
  0x8e   : > { %v484_v33 = vmul.f32 %v6583_v27, %v6561_v15  ;;  %v6609_v36 = vsel %vm479_vm7, %v6583_v27, %v6588_v29  ;;  %v486_v45 = vmul.f32 %v6588_v29, %v6569_v18  ;;  %v6634_v49 = vsel %vm491_vm8, %v6620_v41, %v6618_v40 }
  0x8f   : > { %5400 = vrot.lane.b32.xlu1 %v5404_v20, %s6481_s23  ;;  %541 = vrot.lane.b32.xlu0 %v472_v28, %s6482_s24  ;;  %v5391_v42 = vpop.permute.xlu0 %5390  ;;  %v485_v44 = vmul.f32 %v6609_v36, %v6566_v17  ;;  %v496_v51 = vmul.f32 %v6620_v41, %v6561_v15  ;;  %v497_v52 = vmul.f32 %v6634_v49, %v6566_v17 }
  0x90   : > { %v6628_v47 = vunpack.i.h.bf16 %v5391_v42  ;;  %v6630_v48 = vunpack.i.l.bf16 %v5391_v42  ;;  %v498_v53 = vmul.f32 %v6618_v40, %v6569_v18 }
  0x91   : > { %v5419_v50 = vpack.i.bf16 %v486_v45, %v485_v44 }
  0x92   : > { %v6646_v54 = vsel %vm503_vm9, %v6630_v48, %v6628_v47  ;;  %v5424_v55 = vpack.i.bf16 %v498_v53, %v497_v52  ;;  %v508_v56 = vmul.f32 %v6630_v48, %v6561_v15  ;;  %v510_v59 = vmul.f32 %v6628_v47, %v6569_v18 }
  0x93   : > { %552 = vrot.lane.b32.xlu1 %v6561_v15, %s6481_s23  ;;  %566 = vrot.lane.b32.xlu0 %v484_v33, %s6483_s25  ;;  %v509_v57 = vmul.f32 %v6646_v54, %v6566_v17 }
  0x95   : > { %v5429_v60 = vpack.i.bf16 %v509_v57, %v508_v56 }
  0x97   : > { %527 = vrot.lane.b32.xlu1 %v458_v37, %s6484_s26  ;;  %5415 = vrot.lane.b32.xlu0 %v5414_v43, %s6482_s24 }
  0x9b   : > { %5410 = vrot.lane.b32.xlu1 %v5409_v46, %s6484_s26  ;;  %5420 = vrot.lane.b32.xlu0 %v5419_v50, %s6483_s25 }
  0x9f   : > { %580 = vrot.lane.b32.xlu1 %v496_v51, %s6485_s27  ;;  %591 = vrot.lane.b32.xlu0 %v6561_v15, %s6480_s22 }
  0xa3   : > { %5425 = vrot.lane.b32.xlu1 %v5424_v55, %s6485_s27  ;;  %609 = vrot.lane.b32.xlu0 %v510_v59, %s6487_s28 }
  0xa7   : > { %5430 = vrot.lane.b32.xlu1 %v5429_v60, %s6487_s28 }
  0xab   : > { %630 = vperm.xlu1 %5434, %v627_v61  }
  0xf7   : > { %v514_v62 = vpop.permute.xlu0 %513 }
  0xfd   : > { %v5396_v63 = vpop.permute.xlu1 %5395  ;;  %v5406_v2 = vpop.permute.xlu0 %5405 }
  0xfe   : > { %v5398_v0 = vunpack.i.h.bf16 %v5396_v63  ;;  %v5397_v1 = vunpack.i.l.bf16 %v5396_v63  ;;  %v5408_v52 = vunpack.i.h.bf16 %v5406_v2  ;;  %v5407_v53 = vunpack.i.l.bf16 %v5406_v2 }
 0x100   : > { %v521_v5 = vsel %vm519_vm10, %v5397_v1, %v5398_v0  ;;  %v520_v6 = vsel %vm519_vm10, %v514_v62, %v5397_v1  ;;  %v599_v0 = vsel %vm597_vm15, %v5407_v53, %v5408_v52 }
 0x101   : > { %v5401_v7 = vpop.permute.xlu1 %5400  ;;  %v617_v8 = vpack.c.bf16 %v521_v5, %v446_v3  ;;  %v616_v10 = vpack.c.bf16 %v520_v6, %v445_v4  ;;  %v542_v12 = vpop.permute.xlu0 %541 }
 0x102   : > { %v5403_v15 = vunpack.i.h.bf16 %v5401_v7  ;;  %v5402_v21 = vunpack.i.l.bf16 %v5401_v7 }
 0x103   : > { %644 = vmatprep.subr.bf16.mxu0 %v617_v8 }
 0x104   : > { %645 = vmatpush1.bf16.msra.mxu0 %v616_v10  ;;  %v560_v45 = vsel %vm558_vm13, %v5402_v21, %v5403_v15 }
 0x105   : > { %v553_v13 = vpop.permute.xlu1 %552  ;;  %v567_v14 = vpop.permute.xlu0 %566 }
 0x106   : > { %v559_v55 = vsel %vm558_vm13, %v553_v13, %v5402_v21 }
 0x109   : > { %v528_v16 = vpop.permute.xlu1 %527  ;;  %v5416_v18 = vpop.permute.xlu0 %5415 }
 0x10a   : > { %v5418_v19 = vunpack.i.h.bf16 %v5416_v18  ;;  %v5417_v20 = vunpack.i.l.bf16 %v5416_v18 }
 0x10c   : > { %v549_v33 = vsel %vm547_vm11, %v5417_v20, %v5418_v19  ;;  %v548_v34 = vsel %vm547_vm11, %v542_v12, %v5417_v20 }
 0x10d   : > { %v5411_v17 = vpop.permute.xlu1 %5410  ;;  %v5421_v32 = vpop.permute.xlu0 %5420 }
 0x10e   : > { %v5413_v22 = vunpack.i.h.bf16 %v5411_v17  ;;  %v5412_v28 = vunpack.i.l.bf16 %v5411_v17  ;;  %v5423_v35 = vunpack.i.h.bf16 %v5421_v32  ;;  %v5422_v37 = vunpack.i.l.bf16 %v5421_v32 }
 0x110   : > { %v535_v38 = vsel %vm533_vm12, %v5412_v28, %v5413_v22  ;;  %v534_v39 = vsel %vm533_vm12, %v528_v16, %v5412_v28  ;;  %v574_v46 = vsel %vm572_vm14, %v5422_v37, %v5423_v35  ;;  %v573_v51 = vsel %vm572_vm14, %v567_v14, %v5422_v37  ;;  %v626_v16 = vld [vmem:[%s8525_s4] sm:$0xf] }
 0x111   : > { %v581_v42 = vpop.permute.xlu1 %580  ;;  %v619_v43 = vpack.c.bf16 %v549_v33, %v535_v38  ;;  %v618_v44 = vpack.c.bf16 %v548_v34, %v534_v39  ;;  %v621_v50 = vpack.c.bf16 %v574_v46, %v560_v45  ;;  %v592_v56 = vpop.permute.xlu0 %591  ;;  %v620_v61 = vpack.c.bf16 %v573_v51, %v559_v55 }
 0x112   : > { %v598_v62 = vsel %vm597_vm15, %v592_v56, %v5407_v53 }
 0x113   : > { %646 = vmatprep.subr.bf16.mxu0 %v619_v43 }
 0x114   : > { %647 = vmatpush1.bf16.msra.mxu0 %v618_v44 }
 0x115   : > { %v5426_v57 = vpop.permute.xlu1 %5425  ;;  %648 = vmatprep.subr.bf16.mxu0 %v621_v50  ;;  %v610_v7 = vpop.permute.xlu0 %609 }
 0x116   : > { %v5428_v59 = vunpack.i.h.bf16 %v5426_v57  ;;  %v5427_v60 = vunpack.i.l.bf16 %v5426_v57 }
 0x118   : > { %649 = vmatpush1.bf16.msra.mxu0 %v620_v61  ;;  %v588_v63 = vsel %vm586_vm0, %v5427_v60, %v5428_v59  ;;  %v587_v1 = vsel %vm586_vm0, %v581_v42, %v5427_v60 }
 0x119   : > { %v5431_v2 = vpop.permute.xlu1 %5430  ;;  %v623_v3 = vpack.c.bf16 %v599_v0, %v588_v63  ;;  %v622_v4 = vpack.c.bf16 %v598_v62, %v587_v1 }
 0x11a   : > { %v5433_v5 = vunpack.i.h.bf16 %v5431_v2  ;;  %v5432_v6 = vunpack.i.l.bf16 %v5431_v2 }
 0x11b   : > { %650 = vmatprep.subr.bf16.mxu0 %v623_v3  ;;  %v5272_v3 = vld [vmem:[%s8526_s5 + $0x8] sm:$0xff] }
 0x11c   : > { %651 = vmatpush1.bf16.msra.mxu0 %v622_v4  ;;  %v613_v8 = vsel %vm611_vm1, %v5433_v5, %v610_v7  ;;  %v612_v10 = vsel %vm611_vm1, %v5432_v6, %v5433_v5 }
 0x11d   : > { %v625_v12 = vpack.c.bf16 %v613_v8, %v613_v8  ;;  %v624_v13 = vpack.c.bf16 %v612_v10, %v612_v10 }
 0x11f   : > { %5269 = vmatprep.subr.msk.bf16.mxu0 %vm637_vm2, %v625_v12  ;;  %v639_v14 = vsel %vm637_vm2, %v624_v13, 0 }
 0x120   : > { %653 = vmatpush1.bf16.msra.mxu0 %v639_v14 }
 0x123   : > { %5270 = vmatmul.mubr.msk.bf16.vlgmr.msra.gmra.mrb[0].mxu0 %vm633_vm3, %v626_v16 }
 0x124   : > { %1070 = vmatprep.mubr.bf16.mxu0 %v6486_v58 }
 0x12a   : > { %v6694_v18 = vpop.permute.xlu1 %630 }
 0x1f6   : > { %v678_v19 = vpop.f32.mrb[0].mxu0 }
 0x1f7   : > { %v6697_v20 = vadd.f32 %v678_v19, %v6694_v18  ;;  %v680_v17 = vpop.f32.mrb[1].mxu0 }
 0x1f8   : > { %v6700_v15 = vadd.f32 %v680_v17, %v6694_v18  ;;  %v682_v21 = vpop.f32.mrb[2].mxu0 }
 0x1f9   : > { %v685_v22 = vmax.f32 %v6697_v20, 0.0  ;;  %v683_v28 = vpop.f32.mrb[3].mxu0 }
 0x1fa   : > { %v686_v32 = vmax.f32 %v6700_v15, 0.0 }
 0x1fb   : > { %689 = vrot.lane.b32.xlu0 %v685_v22, %s6472_s15 }
 0x1fc   : > { %691 = vrot.lane.b32.xlu1 %v686_v32, %s6472_s15 }
 0x26d   : > { %v690_v33 = vpop.permute.xlu0 %689 }
 0x26e   : > { %v697_v34 = vsel %vm438_vm4, 0.0, %v690_v33  ;;  %v692_v35 = vpop.permute.xlu1 %691 }
 0x26f   : > { %v693_v37 = vsel %vm438_vm4, %v690_v33, %v692_v35  ;;  %v698_v38 = vsel %vm438_vm4, %v692_v35, 0.0  ;;  %754 = vrot.lane.b32.xlu0 %v697_v34, %s6481_s23  ;;  %718 = vrot.lane.b32.xlu1 %v697_v34, %s6479_s21  ;;  %v704_v42 = vmul.f32 %v6577_v24, %v697_v34  ;;  %v707_v43 = vmul.f32 %v6583_v27, %v697_v34 }
 0x270   : > { %v5445_v39 = vpack.i.bf16 %v698_v38, %v693_v37  ;;  %v701_v44 = vmul.f32 %v6581_v26, %v697_v34  ;;  %v705_v45 = vmul.f32 %v693_v37, %v6592_v30  ;;  %v706_v46 = vmul.f32 %v6575_v23, %v698_v38 }
 0x271   : > { %v702_v50 = vmul.f32 %v693_v37, %v6597_v31  ;;  %v703_v51 = vmul.f32 %v6579_v25, %v698_v38  ;;  %v708_v55 = vmul.f32 %v693_v37, %v6609_v36  ;;  %v709_v56 = vmul.f32 %v6588_v29, %v698_v38 }
 0x272   : > { %v5455_v52 = vpack.i.bf16 %v706_v46, %v705_v45  ;;  %v710_v59 = vmul.f32 %v6620_v41, %v697_v34  ;;  %v711_v60 = vmul.f32 %v693_v37, %v6634_v49  ;;  %v712_v61 = vmul.f32 %v6618_v40, %v698_v38 }
 0x273   : > { %5446 = vrot.lane.b32.xlu1 %v5445_v39, %s6480_s22  ;;  %5436 = vrot.lane.b32.xlu0 %v5445_v39, %s6479_s21  ;;  %v5450_v53 = vpack.i.bf16 %v703_v51, %v702_v50  ;;  %v5460_v57 = vpack.i.bf16 %v709_v56, %v708_v55  ;;  %v713_v63 = vmul.f32 %v6630_v48, %v697_v34 }
 0x274   : > { %v5465_v62 = vpack.i.bf16 %v712_v61, %v711_v60  ;;  %v714_v0 = vmul.f32 %v693_v37, %v6646_v54  ;;  %v715_v1 = vmul.f32 %v6628_v47, %v698_v38  ;;  %v700_v12 = vmul.f32 %v6555_v11, %v693_v37 }
 0x275   : > { %v699_v13 = vmul.f32 %v6553_v9, %v697_v34 }
 0x276   : > { %v5470_v2 = vpack.i.bf16 %v714_v0, %v713_v63 }
 0x277   : > { %744 = vrot.lane.b32.xlu1 %v704_v42, %s6482_s24  ;;  %5441 = vrot.lane.b32.xlu0 %v5445_v39, %s6481_s23 }
 0x27b   : > { %767 = vrot.lane.b32.xlu1 %v707_v43, %s6483_s25  ;;  %731 = vrot.lane.b32.xlu0 %v701_v44, %s6484_s26 }
 0x27f   : > { %5456 = vrot.lane.b32.xlu1 %v5455_v52, %s6482_s24  ;;  %5451 = vrot.lane.b32.xlu0 %v5450_v53, %s6484_s26 }
 0x283   : > { %5461 = vrot.lane.b32.xlu1 %v5460_v57, %s6483_s25  ;;  %780 = vrot.lane.b32.xlu0 %v710_v59, %s6485_s27 }
 0x287   : > { %790 = vrot.lane.b32.xlu1 %v697_v34, %s6480_s22  ;;  %5466 = vrot.lane.b32.xlu0 %v5465_v62, %s6485_s27 }
 0x28b   : > { %807 = vrot.lane.b32.xlu1 %v715_v1, %s6487_s28  ;;  %5471 = vrot.lane.b32.xlu0 %v5470_v2, %s6487_s28 }
 0x28f   : > { %829 = vperm.xlu0 %5475, %v5272_v3  }
 0x2e1   : > { %v755_v4 = vpop.permute.xlu0 %754  ;;  %v719_v5 = vpop.permute.xlu1 %718 }
 0x2e5   : > { %v5447_v6 = vpop.permute.xlu1 %5446  ;;  %v5437_v7 = vpop.permute.xlu0 %5436 }
 0x2e6   : > { %v5439_v8 = vunpack.i.h.bf16 %v5437_v7  ;;  %v5438_v10 = vunpack.i.l.bf16 %v5437_v7  ;;  %v5449_v61 = vunpack.i.h.bf16 %v5447_v6  ;;  %v5448_v62 = vunpack.i.l.bf16 %v5447_v6 }
 0x2e8   : > { %v725_v14 = vsel %vm519_vm10, %v5438_v10, %v5439_v8  ;;  %v724_v16 = vsel %vm519_vm10, %v719_v5, %v5438_v10 }
 0x2e9   : > { %v745_v19 = vpop.permute.xlu1 %744  ;;  %v5442_v17 = vpop.permute.xlu0 %5441  ;;  %v814_v21 = vpack.c.bf16 %v725_v14, %v700_v12  ;;  %v813_v28 = vpack.c.bf16 %v724_v16, %v699_v13  ;;  %v797_v14 = vsel %vm597_vm15, %v5448_v62, %v5449_v61 }
 0x2ea   : > { %v5444_v45 = vunpack.i.h.bf16 %v5442_v17  ;;  %v5443_v34 = vunpack.i.l.bf16 %v5442_v17 }
 0x2eb   : > { %841 = vmatprep.subr.bf16.mxu1 %v814_v21 }
 0x2ec   : > { %842 = vmatpush1.bf16.msra.mxu1 %v813_v28  ;;  %v761_v63 = vsel %vm558_vm13, %v5443_v34, %v5444_v45  ;;  %v760_v1 = vsel %vm558_vm13, %v755_v4, %v5443_v34 }
 0x2ed   : > { %v768_v33 = vpop.permute.xlu1 %767  ;;  %v732_v35 = vpop.permute.xlu0 %731 }
 0x2f1   : > { %v5457_v38 = vpop.permute.xlu1 %5456  ;;  %v5452_v39 = vpop.permute.xlu0 %5451 }
 0x2f2   : > { %v5459_v42 = vunpack.i.h.bf16 %v5457_v38  ;;  %v5458_v43 = vunpack.i.l.bf16 %v5457_v38  ;;  %v5454_v44 = vunpack.i.h.bf16 %v5452_v39  ;;  %v5453_v37 = vunpack.i.l.bf16 %v5452_v39 }
 0x2f4   : > { %v738_v46 = vsel %vm533_vm12, %v5453_v37, %v5454_v44  ;;  %v751_v50 = vsel %vm547_vm11, %v5458_v43, %v5459_v42  ;;  %v737_v51 = vsel %vm533_vm12, %v732_v35, %v5453_v37  ;;  %v750_v52 = vsel %vm547_vm11, %v745_v19, %v5458_v43  ;;  %v5271_v44 = vld [vmem:[%s8525_s4 + $0x4] sm:$0xf] }
 0x2f5   : > { %v5462_v53 = vpop.permute.xlu1 %5461  ;;  %v781_v55 = vpop.permute.xlu0 %780  ;;  %v816_v56 = vpack.c.bf16 %v751_v50, %v738_v46  ;;  %v815_v57 = vpack.c.bf16 %v750_v52, %v737_v51 }
 0x2f6   : > { %v5464_v59 = vunpack.i.h.bf16 %v5462_v53  ;;  %v5463_v60 = vunpack.i.l.bf16 %v5462_v53 }
 0x2f7   : > { %843 = vmatprep.subr.bf16.mxu1 %v816_v56 }
 0x2f8   : > { %844 = vmatpush1.bf16.msra.mxu1 %v815_v57  ;;  %v774_v0 = vsel %vm572_vm14, %v5463_v60, %v5464_v59  ;;  %v773_v2 = vsel %vm572_vm14, %v768_v33, %v5463_v60 }
 0x2f9   : > { %v791_v3 = vpop.permute.xlu1 %790  ;;  %v5467_v5 = vpop.permute.xlu0 %5466  ;;  %v818_v7 = vpack.c.bf16 %v774_v0, %v761_v63  ;;  %v817_v8 = vpack.c.bf16 %v773_v2, %v760_v1 }
 0x2fa   : > { %v5469_v10 = vunpack.i.h.bf16 %v5467_v5  ;;  %v5468_v12 = vunpack.i.l.bf16 %v5467_v5  ;;  %v796_v13 = vsel %vm597_vm15, %v791_v3, %v5448_v62 }
 0x2fb   : > { %845 = vmatprep.subr.bf16.mxu1 %v818_v7 }
 0x2fc   : > { %846 = vmatpush1.bf16.msra.mxu1 %v817_v8  ;;  %v787_v6 = vsel %vm586_vm0, %v5468_v12, %v5469_v10  ;;  %v786_v16 = vsel %vm586_vm0, %v781_v55, %v5468_v12 }
 0x2fd   : > { %v5472_v19 = vpop.permute.xlu0 %5471  ;;  %v820_v4 = vpack.c.bf16 %v797_v14, %v787_v6  ;;  %v819_v17 = vpack.c.bf16 %v796_v13, %v786_v16  ;;  %v808_v33 = vpop.permute.xlu1 %807 }
 0x2fe   : > { %v5474_v21 = vunpack.i.h.bf16 %v5472_v19  ;;  %v5473_v28 = vunpack.i.l.bf16 %v5472_v19 }
 0x2ff   : > { %847 = vmatprep.subr.bf16.mxu1 %v820_v4 }
 0x300   : > { %848 = vmatpush1.bf16.msra.mxu1 %v819_v17  ;;  %v810_v35 = vsel %vm611_vm1, %v5474_v21, %v808_v33  ;;  %v809_v38 = vsel %vm611_vm1, %v5473_v28, %v5474_v21 }
 0x301   : > { %v822_v39 = vpack.c.bf16 %v810_v35, %v810_v35  ;;  %v821_v42 = vpack.c.bf16 %v809_v38, %v809_v38  ;;  %v5276_v35 = vld [vmem:[%s8526_s5 + $0x10] sm:$0xff] }
 0x303   : > { %5273 = vmatprep.subr.msk.bf16.mxu1 %vm637_vm2, %v822_v39  ;;  %v836_v43 = vsel %vm637_vm2, %v821_v42, 0 }
 0x304   : > { %850 = vmatpush1.bf16.msra.mxu1 %v836_v43 }
 0x307   : > { %5274 = vmatmul.mubr.msk.bf16.vlgmr.msra.gmra.mrb[0].mxu1 %vm633_vm3, %v5271_v44 }
 0x308   : > { %1267 = vmatprep.mubr.bf16.mxu1 %v6486_v58 }
 0x30e   : > { %v6772_v37 = vpop.permute.xlu0 %829 }
 0x3da   : > { %v875_v45 = vpop.f32.mrb[0].mxu1 }
 0x3db   : > { %v876_v34 = vadd.f32 %v875_v45, %v6772_v37  ;;  %v877_v46 = vpop.f32.mrb[1].mxu1 }
 0x3dc   : > { %v879_v50 = vpop.f32.mrb[2].mxu1  ;;  %v878_v52 = vadd.f32 %v877_v46, %v6772_v37 }
 0x3dd   : > { %v882_v51 = vmax.f32 %v876_v34, 0.0  ;;  %v880_v53 = vpop.f32.mrb[3].mxu1 }
 0x3de   : > { %v883_v55 = vmax.f32 %v878_v52, 0.0 }
 0x3df   : > { %886 = vrot.lane.b32.xlu1 %v882_v51, %s6472_s15 }
 0x3e3   : > { %888 = vrot.lane.b32.xlu1 %v883_v55, %s6472_s15 }
 0x451   : > { %v887_v56 = vpop.permute.xlu1 %886 }
 0x452   : > { %v894_v57 = vsel %vm438_vm4, 0.0, %v887_v56 }
 0x453   : > { %951 = vrot.lane.b32.xlu0 %v894_v57, %s6481_s23  ;;  %915 = vrot.lane.b32.xlu1 %v894_v57, %s6479_s21  ;;  %v901_v63 = vmul.f32 %v6577_v24, %v894_v57  ;;  %v904_v0 = vmul.f32 %v6583_v27, %v894_v57  ;;  %v898_v1 = vmul.f32 %v6581_v26, %v894_v57 }
 0x454   : > { %v907_v14 = vmul.f32 %v6620_v41, %v894_v57  ;;  %v910_v21 = vmul.f32 %v6630_v48, %v894_v57  ;;  %v896_v46 = vmul.f32 %v6553_v9, %v894_v57 }
 0x455   : > { %v889_v59 = vpop.permute.xlu1 %888 }
 0x456   : > { %v890_v60 = vsel %vm438_vm4, %v887_v56, %v889_v59  ;;  %v895_v61 = vsel %vm438_vm4, %v889_v59, 0.0 }
 0x457   : > { %v5486_v62 = vpack.i.bf16 %v895_v61, %v890_v60  ;;  %v902_v2 = vmul.f32 %v890_v60, %v6592_v30  ;;  %v903_v3 = vmul.f32 %v6575_v23, %v895_v61  ;;  %v899_v5 = vmul.f32 %v890_v60, %v6597_v31 }
 0x458   : > { %v900_v7 = vmul.f32 %v6579_v25, %v895_v61  ;;  %v905_v12 = vmul.f32 %v890_v60, %v6609_v36  ;;  %v906_v13 = vmul.f32 %v6588_v29, %v895_v61  ;;  %v908_v16 = vmul.f32 %v890_v60, %v6634_v49 }
 0x459   : > { %5487 = vrot.lane.b32.xlu1 %v5486_v62, %s6480_s22  ;;  %5477 = vrot.lane.b32.xlu0 %v5486_v62, %s6479_s21  ;;  %v5496_v8 = vpack.i.bf16 %v903_v3, %v902_v2  ;;  %v909_v19 = vmul.f32 %v6618_v40, %v895_v61  ;;  %v911_v17 = vmul.f32 %v890_v60, %v6646_v54 }
 0x45a   : > { %v5491_v10 = vpack.i.bf16 %v900_v7, %v899_v5  ;;  %v5501_v6 = vpack.i.bf16 %v906_v13, %v905_v12  ;;  %v912_v28 = vmul.f32 %v6628_v47, %v895_v61  ;;  %v897_v34 = vmul.f32 %v6555_v11, %v890_v60 }
 0x45b   : > { %v5506_v4 = vpack.i.bf16 %v909_v19, %v908_v16  ;;  %v5511_v33 = vpack.i.bf16 %v911_v17, %v910_v21 }
 0x45d   : > { %941 = vrot.lane.b32.xlu1 %v901_v63, %s6482_s24  ;;  %5482 = vrot.lane.b32.xlu0 %v5486_v62, %s6481_s23 }
 0x461   : > { %964 = vrot.lane.b32.xlu1 %v904_v0, %s6483_s25  ;;  %928 = vrot.lane.b32.xlu0 %v898_v1, %s6484_s26 }
 0x465   : > { %5497 = vrot.lane.b32.xlu1 %v5496_v8, %s6482_s24  ;;  %5492 = vrot.lane.b32.xlu0 %v5491_v10, %s6484_s26 }
 0x469   : > { %5502 = vrot.lane.b32.xlu1 %v5501_v6, %s6483_s25  ;;  %977 = vrot.lane.b32.xlu0 %v907_v14, %s6485_s27 }
 0x46d   : > { %987 = vrot.lane.b32.xlu1 %v894_v57, %s6480_s22  ;;  %5507 = vrot.lane.b32.xlu0 %v5506_v4, %s6485_s27 }
 0x471   : > { %1004 = vrot.lane.b32.xlu1 %v912_v28, %s6487_s28  ;;  %5512 = vrot.lane.b32.xlu0 %v5511_v33, %s6487_s28 }
 0x475   : > { %1026 = vperm.xlu0 %5475, %v5276_v35  }
 0x4c5   : > { %v952_v38 = vpop.permute.xlu0 %951  ;;  %v916_v39 = vpop.permute.xlu1 %915 }
 0x4cb   : > { %v5478_v42 = vpop.permute.xlu0 %5477  ;;  %v5488_v43 = vpop.permute.xlu1 %5487 }
 0x4cc   : > { %v5480_v44 = vunpack.i.h.bf16 %v5478_v42  ;;  %v5479_v45 = vunpack.i.l.bf16 %v5478_v42  ;;  %v5490_v4 = vunpack.i.h.bf16 %v5488_v43  ;;  %v5489_v17 = vunpack.i.l.bf16 %v5488_v43 }
 0x4ce   : > { %v921_v50 = vsel %vm519_vm10, %v916_v39, %v5479_v45  ;;  %v922_v51 = vsel %vm519_vm10, %v5479_v45, %v5480_v44 }
 0x4cf   : > { %v5483_v52 = vpop.permute.xlu0 %5482  ;;  %v942_v53 = vpop.permute.xlu1 %941  ;;  %v1011_v55 = vpack.c.bf16 %v922_v51, %v897_v34  ;;  %v1010_v56 = vpack.c.bf16 %v921_v50, %v896_v46  ;;  %v994_v51 = vsel %vm597_vm15, %v5489_v17, %v5490_v4 }
 0x4d0   : > { %v5485_v3 = vunpack.i.h.bf16 %v5483_v52  ;;  %v5484_v57 = vunpack.i.l.bf16 %v5483_v52 }
 0x4d1   : > { %1038 = vmatprep.subr.bf16.mxu0 %v1011_v55 }
 0x4d2   : > { %1039 = vmatpush1.bf16.msra.mxu0 %v1010_v56  ;;  %v957_v21 = vsel %vm558_vm13, %v952_v38, %v5484_v57  ;;  %v958_v33 = vsel %vm558_vm13, %v5484_v57, %v5485_v3 }
 0x4d3   : > { %v929_v59 = vpop.permute.xlu0 %928  ;;  %v965_v61 = vpop.permute.xlu1 %964 }
 0x4d7   : > { %v5493_v62 = vpop.permute.xlu0 %5492  ;;  %v5498_v63 = vpop.permute.xlu1 %5497 }
 0x4d8   : > { %v5495_v0 = vunpack.i.h.bf16 %v5493_v62  ;;  %v5494_v1 = vunpack.i.l.bf16 %v5493_v62  ;;  %v5500_v2 = vunpack.i.h.bf16 %v5498_v63  ;;  %v5499_v60 = vunpack.i.l.bf16 %v5498_v63 }
 0x4da   : > { %v934_v5 = vsel %vm533_vm12, %v929_v59, %v5494_v1  ;;  %v947_v7 = vsel %vm547_vm11, %v942_v53, %v5499_v60  ;;  %v935_v8 = vsel %vm533_vm12, %v5494_v1, %v5495_v0  ;;  %v948_v10 = vsel %vm547_vm11, %v5499_v60, %v5500_v2  ;;  %v5275_v60 = vld [vmem:[%s8525_s4 + $0x8] sm:$0xf] }
 0x4db   : > { %v978_v12 = vpop.permute.xlu0 %977  ;;  %v5503_v13 = vpop.permute.xlu1 %5502  ;;  %v1013_v6 = vpack.c.bf16 %v948_v10, %v935_v8  ;;  %v1012_v14 = vpack.c.bf16 %v947_v7, %v934_v5 }
 0x4dc   : > { %v5505_v16 = vunpack.i.h.bf16 %v5503_v13  ;;  %v5504_v19 = vunpack.i.l.bf16 %v5503_v13 }
 0x4dd   : > { %1040 = vmatprep.subr.bf16.mxu0 %v1013_v6 }
 0x4de   : > { %v970_v28 = vsel %vm572_vm14, %v965_v61, %v5504_v19  ;;  %1041 = vmatpush1.bf16.msra.mxu0 %v1012_v14  ;;  %v971_v35 = vsel %vm572_vm14, %v5504_v19, %v5505_v16 }
 0x4df   : > { %v5508_v39 = vpop.permute.xlu0 %5507  ;;  %v988_v42 = vpop.permute.xlu1 %987  ;;  %v1015_v44 = vpack.c.bf16 %v971_v35, %v958_v33  ;;  %v1014_v45 = vpack.c.bf16 %v970_v28, %v957_v21 }
 0x4e0   : > { %v5510_v34 = vunpack.i.h.bf16 %v5508_v39  ;;  %v5509_v46 = vunpack.i.l.bf16 %v5508_v39  ;;  %v993_v43 = vsel %vm597_vm15, %v988_v42, %v5489_v17 }
 0x4e1   : > { %1042 = vmatprep.subr.bf16.mxu0 %v1015_v44 }
 0x4e2   : > { %v983_v50 = vsel %vm586_vm0, %v978_v12, %v5509_v46  ;;  %1043 = vmatpush1.bf16.msra.mxu0 %v1014_v45  ;;  %v984_v38 = vsel %vm586_vm0, %v5509_v46, %v5510_v34 }
 0x4e3   : > { %v1016_v52 = vpack.c.bf16 %v993_v43, %v983_v50  ;;  %v5513_v53 = vpop.permute.xlu0 %5512  ;;  %v1017_v55 = vpack.c.bf16 %v994_v51, %v984_v38  ;;  %v1005_v61 = vpop.permute.xlu1 %1004 }
 0x4e4   : > { %v5515_v56 = vunpack.i.h.bf16 %v5513_v53  ;;  %v5514_v59 = vunpack.i.l.bf16 %v5513_v53 }
 0x4e5   : > { %1044 = vmatprep.subr.bf16.mxu0 %v1017_v55 }
 0x4e6   : > { %v1007_v62 = vsel %vm611_vm1, %v5515_v56, %v1005_v61  ;;  %1045 = vmatpush1.bf16.msra.mxu0 %v1016_v52  ;;  %v1006_v63 = vsel %vm611_vm1, %v5514_v59, %v5515_v56  ;;  %v5280_v56 = vld [vmem:[%s8526_s5 + $0x18] sm:$0xff] }
 0x4e7   : > { %v1019_v0 = vpack.c.bf16 %v1007_v62, %v1007_v62  ;;  %v1018_v1 = vpack.c.bf16 %v1006_v63, %v1006_v63 }
 0x4e9   : > { %5277 = vmatprep.subr.msk.bf16.mxu0 %vm637_vm2, %v1019_v0  ;;  %v1033_v2 = vsel %vm637_vm2, %v1018_v1, 0 }
 0x4ea   : > { %1047 = vmatpush1.bf16.msra.mxu0 %v1033_v2 }
 0x4ed   : > { %5278 = vmatmul.mubr.msk.bf16.vlgmr.msra.gmra.mrb[4].mxu0 %vm633_vm3, %v5275_v60 }
 0x4ee   : > { %1464 = vmatprep.mubr.bf16.mxu0 %v6486_v58 }
 0x4f4   : > { %v6840_v3 = vpop.permute.xlu0 %1026 }
 0x5c0   : > { %v1072_v57 = vpop.f32.mrb[4].mxu0 }
 0x5c1   : > { %v1073_v5 = vadd.f32 %v1072_v57, %v6840_v3  ;;  %v1074_v7 = vpop.f32.mrb[5].mxu0 }
 0x5c2   : > { %v1075_v8 = vadd.f32 %v1074_v7, %v6840_v3  ;;  %v1076_v10 = vpop.f32.mrb[6].mxu0 }
 0x5c3   : > { %v6846_v12 = vadd.f32 %v1073_v5, %v685_v22  ;;  %v1077_v13 = vpop.f32.mrb[7].mxu0 }
 0x5c4   : > { %v6850_v6 = vadd.f32 %v1075_v8, %v686_v32 }
 0x5c5   : > { %1083 = vrot.lane.b32.xlu1 %v6846_v12, %s6472_s15 }
 0x5c6   : > { %1085 = vrot.lane.b32.xlu0 %v6850_v6, %s6472_s15 }
 0x637   : > { %v1084_v14 = vpop.permute.xlu1 %1083 }
 0x638   : > { %v1091_v16 = vsel %vm438_vm4, 0.0, %v1084_v14  ;;  %v1086_v19 = vpop.permute.xlu0 %1085 }
 0x639   : > { %v1087_v4 = vsel %vm438_vm4, %v1084_v14, %v1086_v19  ;;  %v1092_v20 = vsel %vm438_vm4, %v1086_v19, 0.0  ;;  %1148 = vrot.lane.b32.xlu1 %v1091_v16, %s6481_s23  ;;  %1112 = vrot.lane.b32.xlu0 %v1091_v16, %s6479_s21  ;;  %v1098_v22 = vmul.f32 %v6577_v24, %v1091_v16  ;;  %v1101_v32 = vmul.f32 %v6583_v27, %v1091_v16 }
 0x63a   : > { %v5526_v15 = vpack.i.bf16 %v1092_v20, %v1087_v4  ;;  %v1095_v17 = vmul.f32 %v6581_v26, %v1091_v16  ;;  %v1099_v21 = vmul.f32 %v1087_v4, %v6592_v30  ;;  %v1100_v28 = vmul.f32 %v6575_v23, %v1092_v20 }
 0x63b   : > { %v1096_v33 = vmul.f32 %v1087_v4, %v6597_v31  ;;  %v1097_v35 = vmul.f32 %v6579_v25, %v1092_v20  ;;  %v1102_v44 = vmul.f32 %v1087_v4, %v6609_v36  ;;  %v1103_v45 = vmul.f32 %v6588_v29, %v1092_v20 }
 0x63c   : > { %v5536_v39 = vpack.i.bf16 %v1100_v28, %v1099_v21  ;;  %v1104_v46 = vmul.f32 %v6620_v41, %v1091_v16  ;;  %v1105_v50 = vmul.f32 %v1087_v4, %v6634_v49  ;;  %v1106_v43 = vmul.f32 %v6618_v40, %v1092_v20 }
 0x63d   : > { %5527 = vrot.lane.b32.xlu0 %v5526_v15, %s6480_s22  ;;  %5517 = vrot.lane.b32.xlu1 %v5526_v15, %s6479_s21  ;;  %v5531_v42 = vpack.i.bf16 %v1097_v35, %v1096_v33  ;;  %v5541_v34 = vpack.i.bf16 %v1103_v45, %v1102_v44  ;;  %v1107_v51 = vmul.f32 %v6630_v48, %v1091_v16 }
 0x63e   : > { %v5546_v38 = vpack.i.bf16 %v1106_v43, %v1105_v50  ;;  %v1108_v52 = vmul.f32 %v1087_v4, %v6646_v54  ;;  %v1109_v53 = vmul.f32 %v6628_v47, %v1092_v20  ;;  %v1094_v2 = vmul.f32 %v6555_v11, %v1087_v4 }
 0x63f   : > { %v1093_v60 = vmul.f32 %v6553_v9, %v1091_v16 }
 0x640   : > { %v5551_v55 = vpack.i.bf16 %v1108_v52, %v1107_v51 }
 0x641   : > { %1138 = vrot.lane.b32.xlu0 %v1098_v22, %s6482_s24  ;;  %5522 = vrot.lane.b32.xlu1 %v5526_v15, %s6481_s23 }
 0x645   : > { %1161 = vrot.lane.b32.xlu0 %v1101_v32, %s6483_s25  ;;  %1125 = vrot.lane.b32.xlu1 %v1095_v17, %s6484_s26 }
 0x649   : > { %5537 = vrot.lane.b32.xlu0 %v5536_v39, %s6482_s24  ;;  %5532 = vrot.lane.b32.xlu1 %v5531_v42, %s6484_s26 }
 0x64d   : > { %5542 = vrot.lane.b32.xlu0 %v5541_v34, %s6483_s25  ;;  %1174 = vrot.lane.b32.xlu1 %v1104_v46, %s6485_s27 }
 0x651   : > { %1184 = vrot.lane.b32.xlu0 %v1091_v16, %s6480_s22  ;;  %5547 = vrot.lane.b32.xlu1 %v5546_v38, %s6485_s27 }
 0x655   : > { %1201 = vrot.lane.b32.xlu0 %v1109_v53, %s6487_s28  ;;  %5552 = vrot.lane.b32.xlu1 %v5551_v55, %s6487_s28 }
 0x659   : > { %1223 = vperm.xlu1 %5434, %v5280_v56  }
 0x6ab   : > { %v1149_v59 = vpop.permute.xlu1 %1148  ;;  %v1113_v61 = vpop.permute.xlu0 %1112 }
 0x6af   : > { %v5528_v62 = vpop.permute.xlu0 %5527  ;;  %v5518_v63 = vpop.permute.xlu1 %5517 }
 0x6b0   : > { %v5520_v0 = vunpack.i.h.bf16 %v5518_v63  ;;  %v5519_v1 = vunpack.i.l.bf16 %v5518_v63  ;;  %v5530_v43 = vunpack.i.h.bf16 %v5528_v62  ;;  %v5529_v38 = vunpack.i.l.bf16 %v5528_v62 }
 0x6b2   : > { %v1118_v57 = vsel %vm519_vm10, %v1113_v61, %v5519_v1  ;;  %v1119_v5 = vsel %vm519_vm10, %v5519_v1, %v5520_v0 }
 0x6b3   : > { %v1139_v7 = vpop.permute.xlu0 %1138  ;;  %v5523_v8 = vpop.permute.xlu1 %5522  ;;  %v1208_v10 = vpack.c.bf16 %v1119_v5, %v1094_v2  ;;  %v1207_v13 = vpack.c.bf16 %v1118_v57, %v1093_v60  ;;  %v1191_v57 = vsel %vm597_vm15, %v5529_v38, %v5530_v43 }
 0x6b4   : > { %v5525_v21 = vunpack.i.h.bf16 %v5523_v8  ;;  %v5524_v16 = vunpack.i.l.bf16 %v5523_v8 }
 0x6b5   : > { %1235 = vmatprep.subr.bf16.mxu1 %v1208_v10 }
 0x6b6   : > { %1236 = vmatpush1.bf16.msra.mxu1 %v1207_v13  ;;  %v1154_v51 = vsel %vm558_vm13, %v1149_v59, %v5524_v16  ;;  %v1155_v53 = vsel %vm558_vm13, %v5524_v16, %v5525_v21 }
 0x6b7   : > { %v1162_v14 = vpop.permute.xlu0 %1161  ;;  %v1126_v19 = vpop.permute.xlu1 %1125 }
 0x6bb   : > { %v5538_v20 = vpop.permute.xlu0 %5537  ;;  %v5533_v15 = vpop.permute.xlu1 %5532 }
 0x6bc   : > { %v5540_v22 = vunpack.i.h.bf16 %v5538_v20  ;;  %v5539_v32 = vunpack.i.l.bf16 %v5538_v20  ;;  %v5535_v17 = vunpack.i.h.bf16 %v5533_v15  ;;  %v5534_v4 = vunpack.i.l.bf16 %v5533_v15 }
 0x6be   : > { %v1144_v28 = vsel %vm547_vm11, %v1139_v7, %v5539_v32  ;;  %v1131_v33 = vsel %vm533_vm12, %v1126_v19, %v5534_v4  ;;  %v1132_v35 = vsel %vm533_vm12, %v5534_v4, %v5535_v17  ;;  %v1145_v39 = vsel %vm547_vm11, %v5539_v32, %v5540_v22  ;;  %v5279_v17 = vld [vmem:[%s8525_s4 + $0xc] sm:$0xf] }
 0x6bf   : > { %v5543_v42 = vpop.permute.xlu0 %5542  ;;  %v1175_v44 = vpop.permute.xlu1 %1174  ;;  %v1210_v45 = vpack.c.bf16 %v1145_v39, %v1132_v35  ;;  %v1209_v34 = vpack.c.bf16 %v1144_v28, %v1131_v33 }
 0x6c0   : > { %v5545_v46 = vunpack.i.h.bf16 %v5543_v42  ;;  %v5544_v50 = vunpack.i.l.bf16 %v5543_v42 }
 0x6c1   : > { %1237 = vmatprep.subr.bf16.mxu1 %v1210_v45  ;;  %v1672_v45 = vld [vmem:[%s364_s19] sm:$0xff] }
 0x6c2   : > { %v1167_v52 = vsel %vm572_vm14, %v1162_v14, %v5544_v50  ;;  %1238 = vmatpush1.bf16.msra.mxu1 %v1209_v34  ;;  %v1168_v55 = vsel %vm572_vm14, %v5544_v50, %v5545_v46  ;;  %v1673_v34 = vld [vmem:[%s364_s19 + $0x8] sm:$0xff] }
 0x6c3   : > { %v1185_v56 = vpop.permute.xlu0 %1184  ;;  %v5548_v61 = vpop.permute.xlu1 %5547  ;;  %v1212_v63 = vpack.c.bf16 %v1168_v55, %v1155_v53  ;;  %v1211_v0 = vpack.c.bf16 %v1167_v52, %v1154_v51 }
 0x6c4   : > { %v5550_v1 = vunpack.i.h.bf16 %v5548_v61  ;;  %v5549_v2 = vunpack.i.l.bf16 %v5548_v61  ;;  %v1190_v60 = vsel %vm597_vm15, %v1185_v56, %v5529_v38 }
 0x6c5   : > { %1239 = vmatprep.subr.bf16.mxu1 %v1212_v63 }
 0x6c6   : > { %v1180_v62 = vsel %vm586_vm0, %v1175_v44, %v5549_v2  ;;  %1240 = vmatpush1.bf16.msra.mxu1 %v1211_v0  ;;  %v1181_v59 = vsel %vm586_vm0, %v5549_v2, %v5550_v1 }
 0x6c7   : > { %v5553_v5 = vpop.permute.xlu1 %5552  ;;  %v1214_v7 = vpack.c.bf16 %v1191_v57, %v1181_v59  ;;  %v1213_v8 = vpack.c.bf16 %v1190_v60, %v1180_v62  ;;  %v1202_v14 = vpop.permute.xlu0 %1201 }
 0x6c8   : > { %v5555_v10 = vunpack.i.h.bf16 %v5553_v5  ;;  %v5554_v13 = vunpack.i.l.bf16 %v5553_v5 }
 0x6c9   : > { %1241 = vmatprep.subr.bf16.mxu1 %v1214_v7 }
 0x6ca   : > { %1242 = vmatpush1.bf16.msra.mxu1 %v1213_v8  ;;  %v1204_v19 = vsel %vm611_vm1, %v5555_v10, %v1202_v14  ;;  %v1203_v20 = vsel %vm611_vm1, %v5554_v13, %v5555_v10 }
 0x6cb   : > { %v1216_v15 = vpack.c.bf16 %v1204_v19, %v1204_v19  ;;  %v1215_v22 = vpack.c.bf16 %v1203_v20, %v1203_v20 }
 0x6cd   : > { %5281 = vmatprep.subr.msk.bf16.mxu1 %vm637_vm2, %v1216_v15  ;;  %v1230_v32 = vsel %vm637_vm2, %v1215_v22, 0 }
 0x6ce   : > { %1244 = vmatpush1.bf16.msra.mxu1 %v1230_v32 }
 0x6d1   : > { %5282 = vmatmul.mubr.msk.bf16.vlgmr.msra.gmra.mrb[4].mxu1 %vm633_vm3, %v5279_v17 }
 0x6d2   : > { %1661 = vmatprep.mubr.bf16.mxu1 %v6486_v58 }
 0x6d8   : > { %v6918_v4 = vpop.permute.xlu1 %1223 }
 0x7a4   : > { %v1269_v21 = vpop.f32.mrb[4].mxu1 }
 0x7a5   : > { %v1270_v16 = vadd.f32 %v1269_v21, %v6918_v4  ;;  %v1271_v28 = vpop.f32.mrb[5].mxu1 }
 0x7a6   : > { %v1272_v33 = vadd.f32 %v1271_v28, %v6918_v4  ;;  %v1273_v35 = vpop.f32.mrb[6].mxu1 }
 0x7a7   : > { %v1276_v39 = vmax.f32 %v1270_v16, 0.0  ;;  %v1274_v42 = vpop.f32.mrb[7].mxu1 }
 0x7a8   : > { %v1277_v44 = vmax.f32 %v1272_v33, 0.0 }
 0x7a9   : > { %1280 = vrot.lane.b32.xlu0 %v1276_v39, %s6472_s15 }
 0x7aa   : > { %1282 = vrot.lane.b32.xlu1 %v1277_v44, %s6472_s15 }
 0x7ad   : > { %1676 = vrot.lane.b32.xlu0 %v1672_v45, %s6472_s15 }
 0x7ae   : > { %1678 = vrot.lane.b32.xlu1 %v1673_v34, %s6472_s15 }
 0x81b   : > { %v1281_v46 = vpop.permute.xlu0 %1280 }
 0x81c   : > { %v1283_v50 = vpop.permute.xlu1 %1282  ;;  %v6931_v51 = vsel %vm438_vm4, 0.0, %v1281_v46 }
 0x81d   : > { %v6939_v55 = vsel %vm438_vm4, %v1281_v46, %v1283_v50  ;;  %v1289_v56 = vsel %vm438_vm4, %v1283_v50, 0.0  ;;  %v1295_v1 = vmul.f32 %v6577_v24, %v6931_v51  ;;  %v1292_v2 = vmul.f32 %v6581_v26, %v6931_v51 }
 0x81e   : > { %v5566_v61 = vpack.i.bf16 %v1289_v56, %v6939_v55  ;;  %v1298_v59 = vmul.f32 %v6583_v27, %v6931_v51  ;;  %v1301_v57 = vmul.f32 %v6620_v41, %v6931_v51  ;;  %v1296_v5 = vmul.f32 %v6939_v55, %v6592_v30 }
 0x81f   : > { %v1677_v43 = vpop.permute.xlu0 %1676  ;;  %v1297_v7 = vmul.f32 %v6575_v23, %v1289_v56  ;;  %v1293_v8 = vmul.f32 %v6939_v55, %v6597_v31  ;;  %v1294_v10 = vmul.f32 %v6579_v25, %v1289_v56  ;;  %v1299_v13 = vmul.f32 %v6939_v55, %v6609_v36 }
 0x820   : > { %v1679_v38 = vpop.permute.xlu1 %1678  ;;  %v1300_v14 = vmul.f32 %v6588_v29, %v1289_v56  ;;  %v6976_v19 = vsel %vm438_vm4, 0.0, %v1677_v43  ;;  %v1302_v28 = vmul.f32 %v6939_v55, %v6634_v49  ;;  %v1303_v33 = vmul.f32 %v6618_v40, %v1289_v56 }
 0x821   : > { %v6934_v52 = vsel %vm438_vm4, %v1677_v43, %v1679_v38  ;;  %v5601_v20 = vpack.i.bf16 %v1297_v7, %v1296_v5  ;;  %v5591_v15 = vpack.i.bf16 %v1294_v10, %v1293_v8  ;;  %v1685_v22 = vsel %vm438_vm4, %v1679_v38, 0.0  ;;  %v1811_v7 = vld [vmem:[%s8524_s3] sm:$0xff] }
 0x822   : > { %v5561_v53 = vpack.i.bf16 %v6934_v52, %v6931_v51  ;;  %v1692_v63 = vmul.f32 %v6934_v52, %v6592_v30  ;;  %v1689_v0 = vmul.f32 %v6934_v52, %v6597_v31  ;;  %v5606_v32 = vpack.i.bf16 %v1300_v14, %v1299_v13  ;;  %v5284_v8 = vld [vmem:[%s8526_s5 + $0x20] sm:$0xff] }
 0x823   : > { %v1688_v17 = vmul.f32 %v6581_v26, %v6976_v19  ;;  %v5596_v21 = vpack.i.bf16 %v6976_v19, %v1685_v22  ;;  %v1690_v16 = vmul.f32 %v6579_v25, %v1685_v22  ;;  %v5616_v39 = vpack.i.bf16 %v1303_v33, %v1302_v28 }
 0x824   : > { %5562 = vrot.lane.b32.xlu0 %v5561_v53, %s6481_s23  ;;  %5557 = vrot.lane.b32.xlu1 %v5561_v53, %s6479_s21  ;;  %v5586_v60 = vpack.i.bf16 %v1692_v63, %v1295_v1  ;;  %v5581_v62 = vpack.i.bf16 %v1689_v0, %v1292_v2  ;;  %v1304_v42 = vmul.f32 %v6630_v48, %v6931_v51 }
 0x825   : > { %v5611_v35 = vpack.i.bf16 %v1688_v17, %v1690_v16  ;;  %v1305_v44 = vmul.f32 %v6939_v55, %v6646_v54  ;;  %v1306_v45 = vmul.f32 %v6628_v47, %v1289_v56  ;;  %v1691_v46 = vmul.f32 %v6577_v24, %v6976_v19 }
 0x826   : > { %v1693_v50 = vmul.f32 %v6575_v23, %v1685_v22  ;;  %v1695_v38 = vmul.f32 %v6934_v52, %v6609_v36  ;;  %v1696_v53 = vmul.f32 %v6588_v29, %v1685_v22  ;;  %v1694_v56 = vmul.f32 %v6583_v27, %v6976_v19 }
 0x827   : > { %v5621_v34 = vpack.i.bf16 %v1305_v44, %v1304_v42  ;;  %v1698_v63 = vmul.f32 %v6934_v52, %v6634_v49  ;;  %v1699_v0 = vmul.f32 %v6618_v40, %v1685_v22  ;;  %v5646_v1 = vpack.i.bf16 %v1685_v22, %v6934_v52 }
 0x828   : > { %5567 = vrot.lane.b32.xlu0 %v5566_v61, %s6479_s21  ;;  %1381 = vrot.lane.b32.xlu1 %v6931_v51, %s6480_s22  ;;  %v5626_v43 = vpack.i.bf16 %v1691_v46, %v1693_v50  ;;  %v1291_v17 = vmul.f32 %v6555_v11, %v6939_v55 }
 0x829   : > { %v5641_v2 = vpack.i.bf16 %v1699_v0, %v1698_v63 }
 0x82c   : > { %5572 = vrot.lane.b32.xlu0 %v5566_v61, %s6481_s23  ;;  %5577 = vrot.lane.b32.xlu1 %v5566_v61, %s6480_s22  ;;  %v5636_v61 = vpack.i.bf16 %v1696_v53, %v1695_v38 }
 0x830   : > { %5587 = vrot.lane.b32.xlu1 %v5586_v60, %s6482_s24  ;;  %5582 = vrot.lane.b32.xlu0 %v5581_v62, %s6484_s26  ;;  %v1697_v60 = vmul.f32 %v6620_v41, %v6976_v19  ;;  %v1700_v62 = vmul.f32 %v6630_v48, %v6976_v19 }
 0x834   : > { %1358 = vrot.lane.b32.xlu1 %v1298_v59, %s6483_s25  ;;  %1371 = vrot.lane.b32.xlu0 %v1301_v57, %s6485_s27  ;;  %v1701_v59 = vmul.f32 %v6934_v52, %v6646_v54  ;;  %v1702_v57 = vmul.f32 %v6628_v47, %v1685_v22 }
 0x836   : > { %v5651_v5 = vpack.i.bf16 %v1701_v59, %v1700_v62 }
 0x838   : > { %5602 = vrot.lane.b32.xlu1 %v5601_v20, %s6482_s24  ;;  %5592 = vrot.lane.b32.xlu0 %v5591_v15, %s6484_s26 }
 0x83c   : > { %5607 = vrot.lane.b32.xlu1 %v5606_v32, %s6483_s25  ;;  %5597 = vrot.lane.b32.xlu0 %v5596_v21, %s6479_s21 }
 0x840   : > { %5612 = vrot.lane.b32.xlu1 %v5611_v35, %s6484_s26  ;;  %5617 = vrot.lane.b32.xlu0 %v5616_v39, %s6485_s27 }
 0x844   : > { %1398 = vrot.lane.b32.xlu1 %v1306_v45, %s6487_s28  ;;  %5622 = vrot.lane.b32.xlu0 %v5621_v34, %s6487_s28 }
 0x848   : > { %5632 = vrot.lane.b32.xlu1 %v5596_v21, %s6481_s23  ;;  %5627 = vrot.lane.b32.xlu0 %v5626_v43, %s6482_s24  ;;  %v1290_v21 = vmul.f32 %v6553_v9, %v6931_v51 }
 0x84c   : > { %1754 = vrot.lane.b32.xlu1 %v1694_v56, %s6483_s25  ;;  %5637 = vrot.lane.b32.xlu0 %v5636_v61, %s6483_s25 }
 0x850   : > { %5647 = vrot.lane.b32.xlu1 %v5646_v1, %s6480_s22  ;;  %5642 = vrot.lane.b32.xlu0 %v5641_v2, %s6485_s27 }
 0x854   : > { %1777 = vrot.lane.b32.xlu1 %v6976_v19, %s6480_s22  ;;  %1767 = vrot.lane.b32.xlu0 %v1697_v60, %s6485_s27 }
 0x858   : > { %1794 = vrot.lane.b32.xlu1 %v1702_v57, %s6487_s28  ;;  %5652 = vrot.lane.b32.xlu0 %v5651_v5, %s6487_s28 }
 0x85c   : > { %1814 = vperm.xlu1 %5434, %v1811_v7   ;;  %1420 = vperm.xlu0 %5475, %v5284_v8  }
 0x896   : > { %v7035_v10 = vpop.permute.xlu0 %5562  ;;  %v7037_v13 = vpop.permute.xlu1 %5557 }
 0x897   : > { %v5559_v15 = vunpack.i.l.bf16 %v7037_v13  ;;  %v5564_v8 = vunpack.i.l.bf16 %v7035_v10 }
 0x89a   : > { %v5568_v14 = vpop.permute.xlu0 %5567  ;;  %v1382_v20 = vpop.permute.xlu1 %1381 }
 0x89b   : > { %v5570_v22 = vunpack.i.h.bf16 %v5568_v14  ;;  %v5569_v32 = vunpack.i.l.bf16 %v5568_v14 }
 0x89d   : > { %v1315_v16 = vsel %vm519_vm10, %v5559_v15, %v5569_v32  ;;  %v1316_v28 = vsel %vm519_vm10, %v5569_v32, %v5570_v22 }
 0x89e   : > { %v5573_v33 = vpop.permute.xlu0 %5572  ;;  %v5578_v35 = vpop.permute.xlu1 %5577  ;;  %v1405_v39 = vpack.c.bf16 %v1316_v28, %v1291_v17  ;;  %v1404_v42 = vpack.c.bf16 %v1315_v16, %v1290_v21 }
 0x89f   : > { %v5575_v63 = vunpack.i.h.bf16 %v5573_v33  ;;  %v5574_v0 = vunpack.i.l.bf16 %v5573_v33  ;;  %v5580_v22 = vunpack.i.h.bf16 %v5578_v35  ;;  %v5579_v32 = vunpack.i.l.bf16 %v5578_v35 }
 0x8a0   : > { %1432 = vmatprep.subr.bf16.mxu0 %v1405_v39 }
 0x8a1   : > { %1433 = vmatpush1.bf16.msra.mxu0 %v1404_v42  ;;  %v1351_v17 = vsel %vm558_vm13, %v5564_v8, %v5574_v0  ;;  %v1352_v16 = vsel %vm558_vm13, %v5574_v0, %v5575_v63 }
 0x8a2   : > { %v7046_v44 = vpop.permute.xlu1 %5587  ;;  %v7048_v45 = vpop.permute.xlu0 %5582 }
 0x8a3   : > { %v5589_v55 = vunpack.i.l.bf16 %v7046_v44  ;;  %v5584_v51 = vunpack.i.l.bf16 %v7048_v45 }
 0x8a6   : > { %v1359_v34 = vpop.permute.xlu1 %1358  ;;  %v1372_v46 = vpop.permute.xlu0 %1371 }
 0x8aa   : > { %v5603_v50 = vpop.permute.xlu1 %5602  ;;  %v5593_v43 = vpop.permute.xlu0 %5592 }
 0x8ab   : > { %v5605_v38 = vunpack.i.h.bf16 %v5603_v50  ;;  %v5604_v53 = vunpack.i.l.bf16 %v5603_v50  ;;  %v5595_v56 = vunpack.i.h.bf16 %v5593_v43  ;;  %v5594_v61 = vunpack.i.l.bf16 %v5593_v43 }
 0x8ac   : > { %v1387_v43 = vsel %vm597_vm15, %v1382_v20, %v5579_v32 }
 0x8ad   : > { %v1341_v1 = vsel %vm547_vm11, %v5589_v55, %v5604_v53  ;;  %v1328_v2 = vsel %vm533_vm12, %v5584_v51, %v5594_v61  ;;  %v1329_v60 = vsel %vm533_vm12, %v5594_v61, %v5595_v56  ;;  %v1342_v62 = vsel %vm547_vm11, %v5604_v53, %v5605_v38 }
 0x8ae   : > { %v5608_v59 = vpop.permute.xlu1 %5607  ;;  %v5598_v57 = vpop.permute.xlu0 %5597  ;;  %v1407_v5 = vpack.c.bf16 %v1342_v62, %v1329_v60  ;;  %v1406_v7 = vpack.c.bf16 %v1341_v1, %v1328_v2  ;;  %v1388_v53 = vsel %vm597_vm15, %v5579_v32, %v5580_v22  ;;  %v5560_v1 = vunpack.i.h.bf16 %v7037_v13 }
 0x8af   : > { %v5610_v14 = vunpack.i.h.bf16 %v5608_v59  ;;  %v5609_v15 = vunpack.i.l.bf16 %v5608_v59  ;;  %v5599_v35 = vunpack.i.l.bf16 %v5598_v57  ;;  %v5600_v2 = vunpack.i.h.bf16 %v5598_v57 }
 0x8b0   : > { %1434 = vmatprep.subr.bf16.mxu0 %v1407_v5  ;;  %v5590_v5 = vunpack.i.h.bf16 %v7046_v44  ;;  %v1687_v13 = vmul.f32 %v6555_v11, %v6934_v52  ;;  %v1686_v44 = vmul.f32 %v6553_v9, %v6976_v19  ;;  %v5283_v52 = vld [vmem:[%s8525_s4 + $0x10] sm:$0xf] }
 0x8b1   : > { %v1364_v21 = vsel %vm572_vm14, %v1359_v34, %v5609_v15  ;;  %1435 = vmatpush1.bf16.msra.mxu0 %v1406_v7  ;;  %v1365_v28 = vsel %vm572_vm14, %v5609_v15, %v5610_v14  ;;  %v1712_v59 = vsel %vm519_vm10, %v5560_v1, %v5599_v35  ;;  %v1711_v57 = vsel %vm519_vm10, %v5600_v2, %v5560_v1 }
 0x8b2   : > { %v5613_v33 = vpop.permute.xlu1 %5612  ;;  %v5618_v39 = vpop.permute.xlu0 %5617  ;;  %v1409_v42 = vpack.c.bf16 %v1365_v28, %v1352_v16  ;;  %v1408_v55 = vpack.c.bf16 %v1364_v21, %v1351_v17  ;;  %v1801_v16 = vpack.c.bf16 %v1712_v59, %v1687_v13  ;;  %v5585_v28 = vunpack.i.h.bf16 %v7048_v45 }
 0x8b3   : > { %v5620_v51 = vunpack.i.h.bf16 %v5618_v39  ;;  %v5619_v50 = vunpack.i.l.bf16 %v5618_v39  ;;  %v5614_v22 = vunpack.i.l.bf16 %v5613_v33  ;;  %v5615_v39 = vunpack.i.h.bf16 %v5613_v33 }
 0x8b4   : > { %1436 = vmatprep.subr.bf16.mxu0 %v1409_v42  ;;  %v5565_v45 = vunpack.i.h.bf16 %v7035_v10 }
 0x8b5   : > { %v1377_v38 = vsel %vm586_vm0, %v1372_v46, %v5619_v50  ;;  %1437 = vmatpush1.bf16.msra.mxu0 %v1408_v55  ;;  %v1378_v34 = vsel %vm586_vm0, %v5619_v50, %v5620_v51  ;;  %v1725_v19 = vsel %vm533_vm12, %v5585_v28, %v5614_v22 }
 0x8b6   : > { %v1399_v56 = vpop.permute.xlu1 %1398  ;;  %v5623_v61 = vpop.permute.xlu0 %5622  ;;  %v1411_v63 = vpack.c.bf16 %v1388_v53, %v1378_v34  ;;  %v1410_v0 = vpack.c.bf16 %v1387_v43, %v1377_v38  ;;  %v1800_v43 = vpack.c.bf16 %v1711_v57, %v1686_v44  ;;  %v1724_v53 = vsel %vm533_vm12, %v5615_v39, %v5585_v28 }
 0x8b7   : > { %v5625_v60 = vunpack.i.h.bf16 %v5623_v61  ;;  %v5624_v62 = vunpack.i.l.bf16 %v5623_v61 }
 0x8b8   : > { %1438 = vmatprep.subr.bf16.mxu0 %v1411_v63 }
 0x8b9   : > { %1439 = vmatpush1.bf16.msra.mxu0 %v1410_v0  ;;  %v1401_v20 = vsel %vm611_vm1, %v5625_v60, %v1399_v56  ;;  %v1400_v46 = vsel %vm611_vm1, %v5624_v62, %v5625_v60 }
 0x8ba   : > { %v5633_v7 = vpop.permute.xlu1 %5632  ;;  %v5628_v8 = vpop.permute.xlu0 %5627  ;;  %v1413_v14 = vpack.c.bf16 %v1401_v20, %v1401_v20  ;;  %v1412_v15 = vpack.c.bf16 %v1400_v46, %v1400_v46 }
 0x8bb   : > { %v5630_v32 = vunpack.i.h.bf16 %v5628_v8  ;;  %v5629_v17 = vunpack.i.l.bf16 %v5628_v8  ;;  %v5634_v55 = vunpack.i.l.bf16 %v5633_v7  ;;  %v5635_v61 = vunpack.i.h.bf16 %v5633_v7 }
 0x8bc   : > { %5285 = vmatprep.subr.msk.bf16.mxu0 %vm637_vm2, %v1413_v14  ;;  %v1427_v21 = vsel %vm637_vm2, %v1412_v15, 0 }
 0x8bd   : > { %1441 = vmatpush1.bf16.msra.mxu0 %v1427_v21  ;;  %v1738_v42 = vsel %vm547_vm11, %v5590_v5, %v5629_v17  ;;  %v1737_v35 = vsel %vm547_vm11, %v5630_v32, %v5590_v5  ;;  %v1748_v2 = vsel %vm558_vm13, %v5565_v45, %v5634_v55  ;;  %v1747_v7 = vsel %vm558_vm13, %v5635_v61, %v5565_v45 }
 0x8be   : > { %v1755_v51 = vpop.permute.xlu1 %1754  ;;  %v5638_v50 = vpop.permute.xlu0 %5637  ;;  %1826 = vmatprep.subr.bf16.mxu0 %v1801_v16  ;;  %v1803_v33 = vpack.c.bf16 %v1738_v42, %v1725_v19  ;;  %v1802_v1 = vpack.c.bf16 %v1737_v35, %v1724_v53 }
 0x8bf   : > { %v5640_v38 = vunpack.i.h.bf16 %v5638_v50  ;;  %v5639_v34 = vunpack.i.l.bf16 %v5638_v50  ;;  %v1810_v50 = vld [vmem:[%s8523_s2] sm:$0xf] }
 0x8c0   : > { %5286 = vmatmul.mubr.msk.bf16.vlgmr.msra.gmra.mrb[8].mxu0 %vm633_vm3, %v5283_v52 }
 0x8c1   : > { %1827 = vmatpush1.bf16.msra.mxu0 %v1800_v43  ;;  %v1761_v56 = vsel %vm572_vm14, %v5639_v34, %v5640_v38  ;;  %1858 = vmatprep.mubr.bf16.mxu0 %v6486_v58  ;;  %v1760_v46 = vsel %vm572_vm14, %v1755_v51, %v5639_v34 }
 0x8c2   : > { %v5648_v63 = vpop.permute.xlu1 %5647  ;;  %v5643_v0 = vpop.permute.xlu0 %5642  ;;  %1828 = vmatprep.subr.bf16.mxu0 %v1803_v33  ;;  %v1805_v59 = vpack.c.bf16 %v1761_v56, %v1748_v2  ;;  %v1804_v13 = vpack.c.bf16 %v1760_v46, %v1747_v7 }
 0x8c3   : > { %v5650_v60 = vunpack.i.h.bf16 %v5648_v63  ;;  %v5649_v62 = vunpack.i.l.bf16 %v5648_v63  ;;  %v5645_v10 = vunpack.i.h.bf16 %v5643_v0  ;;  %v5644_v20 = vunpack.i.l.bf16 %v5643_v0 }
 0x8c5   : > { %1829 = vmatpush1.bf16.msra.mxu0 %v1802_v1  ;;  %v1774_v5 = vsel %vm586_vm0, %v5644_v20, %v5645_v10  ;;  %v1784_v8 = vsel %vm597_vm15, %v5649_v62, %v5650_v60 }
 0x8c6   : > { %v1778_v14 = vpop.permute.xlu1 %1777  ;;  %v1768_v15 = vpop.permute.xlu0 %1767  ;;  %1830 = vmatprep.subr.bf16.mxu0 %v1805_v59  ;;  %v1807_v32 = vpack.c.bf16 %v1784_v8, %v1774_v5 }
 0x8c7   : > { %v1783_v57 = vsel %vm597_vm15, %v1778_v14, %v5649_v62  ;;  %v1773_v22 = vsel %vm586_vm0, %v1768_v15, %v5644_v20 }
 0x8c8   : > { %v1806_v21 = vpack.c.bf16 %v1783_v57, %v1773_v22 }
 0x8c9   : > { %1831 = vmatpush1.bf16.msra.mxu0 %v1804_v13 }
 0x8ca   : > { %v5653_v17 = vpop.permute.xlu0 %5652  ;;  %1832 = vmatprep.subr.bf16.mxu0 %v1807_v32  ;;  %v1795_v28 = vpop.permute.xlu1 %1794 }
 0x8cb   : > { %v5655_v16 = vunpack.i.h.bf16 %v5653_v17  ;;  %v5654_v44 = vunpack.i.l.bf16 %v5653_v17 }
 0x8cd   : > { %1833 = vmatpush1.bf16.msra.mxu0 %v1806_v21  ;;  %v1797_v39 = vsel %vm611_vm1, %v5655_v16, %v1795_v28  ;;  %v1796_v52 = vsel %vm611_vm1, %v5654_v44, %v5655_v16 }
 0x8ce   : > { %v1809_v42 = vpack.c.bf16 %v1797_v39, %v1797_v39  ;;  %v1808_v55 = vpack.c.bf16 %v1796_v52, %v1796_v52 }
 0x8d0   : > { %5291 = vmatprep.subr.msk.bf16.mxu0 %vm637_vm2, %v1809_v42  ;;  %v1821_v51 = vsel %vm637_vm2, %v1808_v55, 0 }
 0x8d1   : > { %1835 = vmatpush1.bf16.msra.mxu0 %v1821_v51 }
 0x8d4   : > { %5292 = vmatmul.mubr.msk.bf16.vlgmr.msra.gmra.mrb[12].mxu0 %vm633_vm3, %v1810_v50 }
 0x8d5   : > { %2252 = vmatprep.mubr.bf16.mxu0 %v6486_v58 }
 0x8db   : > { %v7105_v43 = vpop.permute.xlu0 %1420  ;;  %v7113_v61 = vpop.permute.xlu1 %1814 }
 0x993   : > { %v1466_v35 = vpop.f32.mrb[8].mxu0 }
 0x994   : > { %v1467_v38 = vadd.f32 %v1466_v35, %v7105_v43  ;;  %v1468_v34 = vpop.f32.mrb[9].mxu0 }
 0x995   : > { %v1469_v19 = vadd.f32 %v1468_v34, %v7105_v43  ;;  %v1470_v45 = vpop.f32.mrb[10].mxu0 }
 0x996   : > { %v1473_v33 = vadd.f32 %v1467_v38, %v6846_v12  ;;  %v1471_v53 = vpop.f32.mrb[11].mxu0 }
 0x997   : > { %v1474_v56 = vadd.f32 %v1469_v19, %v6850_v6 }
 0x998   : > { %1477 = vrot.lane.b32.xlu0 %v1473_v33, %s6472_s15 }
 0x999   : > { %1479 = vrot.lane.b32.xlu1 %v1474_v56, %s6472_s15 }
 0x9a7   : > { %v1860_v63 = vpop.f32.mrb[12].mxu0 }
 0x9a8   : > { %v7116_v0 = vadd.f32 %v1860_v63, %v7113_v61  ;;  %v1862_v1 = vpop.f32.mrb[13].mxu0 }
 0x9a9   : > { %v7119_v2 = vadd.f32 %v1862_v1, %v7113_v61  ;;  %v1864_v60 = vpop.f32.mrb[14].mxu0 }
 0x9aa   : > { %v1867_v12 = vmax.f32 %v7116_v0, 0.0  ;;  %v1865_v62 = vpop.f32.mrb[15].mxu0 }
 0x9ab   : > { %v1868_v6 = vmax.f32 %v7119_v2, 0.0 }
 0x9ac   : > { %1871 = vrot.lane.b32.xlu0 %v1867_v12, %s6472_s15 }
 0x9ad   : > { %1873 = vrot.lane.b32.xlu1 %v1868_v6, %s6472_s15 }
 0xa0a   : > { %v1478_v10 = vpop.permute.xlu0 %1477 }
 0xa0b   : > { %v1480_v20 = vpop.permute.xlu1 %1479  ;;  %v7134_v5 = vsel %vm438_vm4, 0.0, %v1478_v10 }
 0xa0c   : > { %v7130_v46 = vsel %vm438_vm4, %v1478_v10, %v1480_v20  ;;  %v1486_v59 = vsel %vm438_vm4, %v1480_v20, 0.0  ;;  %v1495_v7 = vmul.f32 %v6583_v27, %v7134_v5  ;;  %v1492_v38 = vmul.f32 %v6577_v24, %v7134_v5 }
 0xa0d   : > { %v5666_v8 = vpack.i.bf16 %v1486_v59, %v7130_v46  ;;  %v1493_v14 = vmul.f32 %v7130_v46, %v6592_v30  ;;  %v1494_v15 = vmul.f32 %v6575_v23, %v1486_v59  ;;  %v1490_v13 = vmul.f32 %v7130_v46, %v6597_v31 }
 0xa0e   : > { %v1491_v57 = vmul.f32 %v6579_v25, %v1486_v59  ;;  %v1496_v22 = vmul.f32 %v7130_v46, %v6609_v36  ;;  %v1497_v32 = vmul.f32 %v6588_v29, %v1486_v59  ;;  %v1499_v16 = vmul.f32 %v7130_v46, %v6634_v49 }
 0xa0f   : > { %5667 = vrot.lane.b32.xlu1 %v5666_v8, %s6480_s22  ;;  %5657 = vrot.lane.b32.xlu0 %v5666_v8, %s6479_s21  ;;  %v5676_v17 = vpack.i.bf16 %v1494_v15, %v1493_v14  ;;  %v1500_v44 = vmul.f32 %v6618_v40, %v1486_v59  ;;  %v1489_v34 = vmul.f32 %v6581_v26, %v7134_v5 }
 0xa10   : > { %v5671_v21 = vpack.i.bf16 %v1491_v57, %v1490_v13  ;;  %v5681_v28 = vpack.i.bf16 %v1497_v32, %v1496_v22  ;;  %v1498_v33 = vmul.f32 %v6620_v41, %v7134_v5  ;;  %v1501_v53 = vmul.f32 %v6630_v48, %v7134_v5 }
 0xa11   : > { %v5686_v39 = vpack.i.bf16 %v1500_v44, %v1499_v16  ;;  %v1502_v56 = vmul.f32 %v7130_v46, %v6646_v54  ;;  %v1503_v63 = vmul.f32 %v6628_v47, %v1486_v59 }
 0xa13   : > { %1555 = vrot.lane.b32.xlu1 %v1495_v7, %s6483_s25  ;;  %5662 = vrot.lane.b32.xlu0 %v5666_v8, %s6481_s23  ;;  %v5711_v1 = vpack.i.bf16 %v1502_v56, %v1501_v53 }
 0xa17   : > { %5677 = vrot.lane.b32.xlu1 %v5676_v17, %s6482_s24  ;;  %5672 = vrot.lane.b32.xlu0 %v5671_v21, %s6484_s26 }
 0xa1b   : > { %5682 = vrot.lane.b32.xlu1 %v5681_v28, %s6483_s25  ;;  %5687 = vrot.lane.b32.xlu0 %v5686_v39, %s6485_s27 }
 0xa1e   : > { %v1872_v52 = vpop.permute.xlu0 %1871 }
 0xa1f   : > { %v1874_v42 = vpop.permute.xlu1 %1873  ;;  %v7187_v60 = vsel %vm438_vm4, 0.0, %v1872_v52 }
 0xa20   : > { %v7160_v55 = vsel %vm438_vm4, %v1872_v52, %v1874_v42  ;;  %v1880_v62 = vsel %vm438_vm4, %v1874_v42, 0.0  ;;  %v1889_v20 = vmul.f32 %v6583_v27, %v7187_v60  ;;  %v1892_v59 = vmul.f32 %v6620_v41, %v7187_v60 }
 0xa21   : > { %v5696_v51 = vpack.i.bf16 %v7160_v55, %v7134_v5  ;;  %v1887_v50 = vmul.f32 %v7160_v55, %v6592_v30  ;;  %v1884_v35 = vmul.f32 %v7160_v55, %v6597_v31  ;;  %v5721_v10 = vpack.i.bf16 %v7187_v60, %v1880_v62 }
 0xa22   : > { %v1883_v8 = vmul.f32 %v6581_v26, %v7187_v60  ;;  %v1885_v7 = vmul.f32 %v6579_v25, %v1880_v62  ;;  %v1886_v14 = vmul.f32 %v6577_v24, %v7187_v60  ;;  %v1888_v15 = vmul.f32 %v6575_v23, %v1880_v62 }
 0xa23   : > { %5697 = vrot.lane.b32.xlu0 %v5696_v51, %s6481_s23  ;;  %5692 = vrot.lane.b32.xlu1 %v5696_v51, %s6479_s21  ;;  %v5706_v19 = vpack.i.bf16 %v1887_v50, %v1492_v38  ;;  %v5701_v45 = vpack.i.bf16 %v1884_v35, %v1489_v34  ;;  %v1890_v22 = vmul.f32 %v7160_v55, %v6609_v36  ;;  %v5294_v50 = vld [vmem:[%s8524_s3 + $0x8] sm:$0xff] }
 0xa24   : > { %v5726_v13 = vpack.i.bf16 %v1883_v8, %v1885_v7  ;;  %v5736_v57 = vpack.i.bf16 %v1886_v14, %v1888_v15  ;;  %v1891_v32 = vmul.f32 %v6588_v29, %v1880_v62  ;;  %v5731_v17 = vpack.i.bf16 %v1880_v62, %v7160_v55 }
 0xa25   : > { %v1893_v16 = vmul.f32 %v7160_v55, %v6634_v49  ;;  %v1894_v44 = vmul.f32 %v6618_v40, %v1880_v62  ;;  %v1895_v39 = vmul.f32 %v6630_v48, %v7187_v60  ;;  %v1896_v52 = vmul.f32 %v7160_v55, %v6646_v54 }
 0xa26   : > { %v5741_v21 = vpack.i.bf16 %v1891_v32, %v1890_v22  ;;  %v1897_v42 = vmul.f32 %v6628_v47, %v1880_v62 }
 0xa27   : > { %5707 = vrot.lane.b32.xlu1 %v5706_v19, %s6482_s24  ;;  %5702 = vrot.lane.b32.xlu0 %v5701_v45, %s6484_s26  ;;  %v5746_v28 = vpack.i.bf16 %v1894_v44, %v1893_v16  ;;  %v5751_v51 = vpack.i.bf16 %v1896_v52, %v1895_v39  ;;  %v1488_v45 = vmul.f32 %v6555_v11, %v7130_v46 }
 0xa2b   : > { %1578 = vrot.lane.b32.xlu1 %v7134_v5, %s6480_s22  ;;  %1568 = vrot.lane.b32.xlu0 %v1498_v33, %s6485_s27 }
 0xa2f   : > { %1595 = vrot.lane.b32.xlu1 %v1503_v63, %s6487_s28  ;;  %5712 = vrot.lane.b32.xlu0 %v5711_v1, %s6487_s28 }
 0xa33   : > { %5722 = vrot.lane.b32.xlu1 %v5721_v10, %s6481_s23  ;;  %5717 = vrot.lane.b32.xlu0 %v5721_v10, %s6479_s21 }
 0xa37   : > { %1949 = vrot.lane.b32.xlu1 %v1889_v20, %s6483_s25  ;;  %1962 = vrot.lane.b32.xlu0 %v1892_v59, %s6485_s27 }
 0xa3b   : > { %5727 = vrot.lane.b32.xlu1 %v5726_v13, %s6484_s26  ;;  %5737 = vrot.lane.b32.xlu0 %v5736_v57, %s6482_s24 }
 0xa3f   : > { %5732 = vrot.lane.b32.xlu1 %v5731_v17, %s6480_s22  ;;  %5742 = vrot.lane.b32.xlu0 %v5741_v21, %s6483_s25  ;;  %v1487_v21 = vmul.f32 %v6553_v9, %v7134_v5 }
 0xa43   : > { %1972 = vrot.lane.b32.xlu1 %v7187_v60, %s6480_s22  ;;  %5747 = vrot.lane.b32.xlu0 %v5746_v28, %s6485_s27 }
 0xa47   : > { %1989 = vrot.lane.b32.xlu1 %v1897_v42, %s6487_s28  ;;  %5752 = vrot.lane.b32.xlu0 %v5751_v51, %s6487_s28 }
 0xa4b   : > { %2011 = vperm.xlu0 %5475, %v5294_v50  }
 0xa81   : > { %v5668_v35 = vpop.permute.xlu1 %5667  ;;  %v5658_v38 = vpop.permute.xlu0 %5657 }
 0xa82   : > { %v5660_v34 = vunpack.i.h.bf16 %v5658_v38  ;;  %v5659_v19 = vunpack.i.l.bf16 %v5658_v38 }
 0xa84   : > { %v1513_v33 = vsel %vm519_vm10, %v5659_v19, %v5660_v34 }
 0xa85   : > { %v1556_v53 = vpop.permute.xlu1 %1555  ;;  %v5663_v56 = vpop.permute.xlu0 %5662  ;;  %v1602_v63 = vpack.c.bf16 %v1513_v33, %v1488_v45 }
 0xa86   : > { %v5665_v16 = vunpack.i.h.bf16 %v5663_v56  ;;  %v5664_v28 = vunpack.i.l.bf16 %v5663_v56 }
 0xa87   : > { %1629 = vmatprep.subr.bf16.mxu1 %v1602_v63  ;;  %v5670_v63 = vunpack.i.h.bf16 %v5668_v35 }
 0xa89   : > { %v5678_v1 = vpop.permute.xlu1 %5677  ;;  %v5673_v62 = vpop.permute.xlu0 %5672 }
 0xa8a   : > { %v5680_v59 = vunpack.i.h.bf16 %v5678_v1  ;;  %v5679_v8 = vunpack.i.l.bf16 %v5678_v1  ;;  %v5675_v7 = vunpack.i.h.bf16 %v5673_v62  ;;  %v5674_v14 = vunpack.i.l.bf16 %v5673_v62 }
 0xa8c   : > { %v1526_v57 = vsel %vm533_vm12, %v5674_v14, %v5675_v7  ;;  %v1539_v22 = vsel %vm547_vm11, %v5679_v8, %v5680_v59 }
 0xa8d   : > { %v5683_v10 = vpop.permute.xlu1 %5682  ;;  %v5688_v20 = vpop.permute.xlu0 %5687  ;;  %v1604_v50 = vpack.c.bf16 %v1539_v22, %v1526_v57 }
 0xa8e   : > { %v5685_v32 = vunpack.i.h.bf16 %v5683_v10  ;;  %v5684_v17 = vunpack.i.l.bf16 %v5683_v10  ;;  %v5690_v39 = vunpack.i.h.bf16 %v5688_v20  ;;  %v5689_v38 = vunpack.i.l.bf16 %v5688_v20 }
 0xa8f   : > { %v1549_v20 = vsel %vm558_vm13, %v5664_v28, %v5665_v16 }
 0xa90   : > { %v1562_v5 = vsel %vm572_vm14, %v5684_v17, %v5685_v32  ;;  %v1575_v57 = vsel %vm586_vm0, %v5689_v38, %v5690_v39  ;;  %v1561_v22 = vsel %vm572_vm14, %v1556_v53, %v5684_v17 }
 0xa95   : > { %v7234_v15 = vpop.permute.xlu1 %5692  ;;  %v7236_v13 = vpop.permute.xlu0 %5697 }
 0xa96   : > { %v5694_v46 = vunpack.i.l.bf16 %v7234_v15  ;;  %v5699_v34 = vunpack.i.l.bf16 %v7236_v13 }
 0xa98   : > { %v1512_v44 = vsel %vm519_vm10, %v5694_v46, %v5659_v19  ;;  %v5669_v19 = vunpack.i.l.bf16 %v5668_v35  ;;  %v1548_v7 = vsel %vm558_vm13, %v5699_v34, %v5664_v28  ;;  %v1606_v46 = vpack.c.bf16 %v1562_v5, %v1549_v20 }
 0xa99   : > { %v7244_v52 = vpop.permute.xlu1 %5707  ;;  %v7246_v42 = vpop.permute.xlu0 %5702  ;;  %v1601_v51 = vpack.c.bf16 %v1512_v44, %v1487_v21 }
 0xa9a   : > { %v5709_v45 = vunpack.i.l.bf16 %v7244_v52  ;;  %v5704_v33 = vunpack.i.l.bf16 %v7246_v42  ;;  %v1585_v35 = vsel %vm597_vm15, %v5669_v19, %v5670_v63 }
 0xa9b   : > { %1630 = vmatpush1.bf16.msra.mxu1 %v1601_v51  ;;  %v1608_v21 = vpack.c.bf16 %v1585_v35, %v1575_v57 }
 0xa9c   : > { %v1538_v56 = vsel %vm547_vm11, %v5709_v45, %v5679_v8  ;;  %v1525_v1 = vsel %vm533_vm12, %v5704_v33, %v5674_v14  ;;  %1631 = vmatprep.subr.bf16.mxu1 %v1604_v50  ;;  %v1605_v14 = vpack.c.bf16 %v1561_v22, %v1548_v7  ;;  %v5695_v33 = vunpack.i.h.bf16 %v7234_v15  ;;  %v5287_v15 = vld [vmem:[%s8525_s4 + $0x14] sm:$0xf] }
 0xa9d   : > { %v1579_v62 = vpop.permute.xlu1 %1578  ;;  %v1569_v10 = vpop.permute.xlu0 %1568  ;;  %v1603_v59 = vpack.c.bf16 %v1538_v56, %v1525_v1  ;;  %v1881_v7 = vmul.f32 %v6553_v9, %v7187_v60 }
 0xa9e   : > { %v1584_v44 = vsel %vm597_vm15, %v1579_v62, %v5669_v19  ;;  %v1574_v51 = vsel %vm586_vm0, %v1569_v10, %v5689_v38  ;;  %v1882_v38 = vmul.f32 %v6555_v11, %v7160_v55  ;;  %v5710_v55 = vunpack.i.h.bf16 %v7244_v52 }
 0xa9f   : > { %1632 = vmatpush1.bf16.msra.mxu1 %v1603_v59  ;;  %v1607_v53 = vpack.c.bf16 %v1584_v44, %v1574_v51 }
 0xaa0   : > { %1633 = vmatprep.subr.bf16.mxu1 %v1606_v46  ;;  %v5705_v46 = vunpack.i.h.bf16 %v7246_v42 }
 0xaa1   : > { %v1596_v8 = vpop.permute.xlu1 %1595  ;;  %v5713_v32 = vpop.permute.xlu0 %5712 }
 0xaa2   : > { %v5715_v16 = vunpack.i.h.bf16 %v5713_v32  ;;  %v5714_v50 = vunpack.i.l.bf16 %v5713_v32 }
 0xaa3   : > { %1634 = vmatpush1.bf16.msra.mxu1 %v1605_v14 }
 0xaa4   : > { %1635 = vmatprep.subr.bf16.mxu1 %v1608_v21  ;;  %v1598_v28 = vsel %vm611_vm1, %v5715_v16, %v1596_v8  ;;  %v1597_v39 = vsel %vm611_vm1, %v5714_v50, %v5715_v16  ;;  %v5700_v50 = vunpack.i.h.bf16 %v7236_v13 }
 0xaa5   : > { %v5723_v17 = vpop.permute.xlu1 %5722  ;;  %v5718_v34 = vpop.permute.xlu0 %5717  ;;  %v1610_v45 = vpack.c.bf16 %v1598_v28, %v1598_v28  ;;  %v1609_v56 = vpack.c.bf16 %v1597_v39, %v1597_v39 }
 0xaa6   : > { %v5720_v5 = vunpack.i.h.bf16 %v5718_v34  ;;  %v5719_v63 = vunpack.i.l.bf16 %v5718_v34  ;;  %v5725_v44 = vunpack.i.h.bf16 %v5723_v17  ;;  %v5724_v51 = vunpack.i.l.bf16 %v5723_v17 }
 0xaa7   : > { %1636 = vmatpush1.bf16.msra.mxu1 %v1607_v53  ;;  %v1624_v20 = vsel %vm637_vm2, %v1609_v56, 0 }
 0xaa8   : > { %5289 = vmatprep.subr.msk.bf16.mxu1 %vm637_vm2, %v1610_v45  ;;  %v1907_v19 = vsel %vm519_vm10, %v5695_v33, %v5719_v63  ;;  %v1906_v59 = vsel %vm519_vm10, %v5720_v5, %v5695_v33  ;;  %v1942_v17 = vsel %vm558_vm13, %v5725_v44, %v5700_v50  ;;  %v1943_v5 = vsel %vm558_vm13, %v5700_v50, %v5724_v51 }
 0xaa9   : > { %v1950_v1 = vpop.permute.xlu1 %1949  ;;  %v1963_v62 = vpop.permute.xlu0 %1962  ;;  %v1996_v10 = vpack.c.bf16 %v1907_v19, %v1882_v38  ;;  %v1995_v35 = vpack.c.bf16 %v1906_v59, %v1881_v7 }
 0xaab   : > { %1638 = vmatpush1.bf16.msra.mxu1 %v1624_v20 }
 0xaac   : > { %2023 = vmatprep.subr.bf16.mxu1 %v1996_v10 }
 0xaad   : > { %v5728_v57 = vpop.permute.xlu1 %5727  ;;  %v5738_v22 = vpop.permute.xlu0 %5737 }
 0xaae   : > { %v5730_v8 = vunpack.i.h.bf16 %v5728_v57  ;;  %v5729_v32 = vunpack.i.l.bf16 %v5728_v57  ;;  %v5740_v14 = vunpack.i.h.bf16 %v5738_v22  ;;  %v5739_v21 = vunpack.i.l.bf16 %v5738_v22  ;;  %5290 = vmatmul.mubr.msk.bf16.vlgmr.msra.gmra.mrb[8].mxu1 %vm633_vm3, %v5287_v15 }
 0xaaf   : > { %2024 = vmatpush1.bf16.msra.mxu1 %v1995_v35  ;;  %2055 = vmatprep.mubr.bf16.mxu1 %v6486_v58 }
 0xab0   : > { %v1919_v60 = vsel %vm533_vm12, %v5730_v8, %v5705_v46  ;;  %v1932_v52 = vsel %vm547_vm11, %v5740_v14, %v5710_v55  ;;  %v1920_v42 = vsel %vm533_vm12, %v5705_v46, %v5729_v32  ;;  %v1933_v16 = vsel %vm547_vm11, %v5710_v55, %v5739_v21 }
 0xab1   : > { %v5733_v28 = vpop.permute.xlu1 %5732  ;;  %v5743_v39 = vpop.permute.xlu0 %5742  ;;  %v1998_v53 = vpack.c.bf16 %v1933_v16, %v1920_v42  ;;  %v1997_v34 = vpack.c.bf16 %v1932_v52, %v1919_v60  ;;  %v5293_v42 = vld [vmem:[%s8523_s2 + $0x4] sm:$0xf] }
 0xab2   : > { %v5745_v45 = vunpack.i.h.bf16 %v5743_v39  ;;  %v5744_v33 = vunpack.i.l.bf16 %v5743_v39  ;;  %v5735_v63 = vunpack.i.h.bf16 %v5733_v28  ;;  %v5734_v56 = vunpack.i.l.bf16 %v5733_v28 }
 0xab3   : > { %2025 = vmatprep.subr.bf16.mxu1 %v1998_v53 }
 0xab4   : > { %v1955_v38 = vsel %vm572_vm14, %v1950_v1, %v5744_v33  ;;  %2026 = vmatpush1.bf16.msra.mxu1 %v1997_v34  ;;  %v1956_v19 = vsel %vm572_vm14, %v5744_v33, %v5745_v45  ;;  %v1979_v22 = vsel %vm597_vm15, %v5734_v56, %v5735_v63 }
 0xab5   : > { %v1973_v10 = vpop.permute.xlu1 %1972  ;;  %v5748_v13 = vpop.permute.xlu0 %5747  ;;  %v2000_v59 = vpack.c.bf16 %v1956_v19, %v1943_v5  ;;  %v1999_v20 = vpack.c.bf16 %v1955_v38, %v1942_v17 }
 0xab6   : > { %v5750_v15 = vunpack.i.h.bf16 %v5748_v13  ;;  %v5749_v7 = vunpack.i.l.bf16 %v5748_v13  ;;  %v1978_v55 = vsel %vm597_vm15, %v1973_v10, %v5734_v56 }
 0xab7   : > { %2027 = vmatprep.subr.bf16.mxu1 %v2000_v59 }
 0xab8   : > { %v1968_v46 = vsel %vm586_vm0, %v1963_v62, %v5749_v7  ;;  %2028 = vmatpush1.bf16.msra.mxu1 %v1999_v20  ;;  %v1969_v57 = vsel %vm586_vm0, %v5749_v7, %v5750_v15 }
 0xab9   : > { %v5753_v1 = vpop.permute.xlu0 %5752  ;;  %v2002_v35 = vpack.c.bf16 %v1979_v22, %v1969_v57  ;;  %v2001_v8 = vpack.c.bf16 %v1978_v55, %v1968_v46  ;;  %v1990_v21 = vpop.permute.xlu1 %1989 }
 0xaba   : > { %v5755_v32 = vunpack.i.h.bf16 %v5753_v1  ;;  %v5754_v14 = vunpack.i.l.bf16 %v5753_v1 }
 0xabb   : > { %2029 = vmatprep.subr.bf16.mxu1 %v2002_v35 }
 0xabc   : > { %2030 = vmatpush1.bf16.msra.mxu1 %v2001_v8  ;;  %v1992_v44 = vsel %vm611_vm1, %v5755_v32, %v1990_v21  ;;  %v1991_v51 = vsel %vm611_vm1, %v5754_v14, %v5755_v32 }
 0xabd   : > { %v2004_v60 = vpack.c.bf16 %v1992_v44, %v1992_v44  ;;  %v2003_v52 = vpack.c.bf16 %v1991_v51, %v1991_v51 }
 0xabf   : > { %5295 = vmatprep.subr.msk.bf16.mxu1 %vm637_vm2, %v2004_v60  ;;  %v2018_v62 = vsel %vm637_vm2, %v2003_v52, 0 }
 0xac0   : > { %2032 = vmatpush1.bf16.msra.mxu1 %v2018_v62 }
 0xac3   : > { %5296 = vmatmul.mubr.msk.bf16.vlgmr.msra.gmra.mrb[12].mxu1 %vm633_vm3, %v5293_v42 }
 0xac4   : > { %2449 = vmatprep.mubr.bf16.mxu1 %v6486_v58 }
 0xaca   : > { %v7305_v53 = vpop.permute.xlu0 %2011 }
 0xb81   : > { %v7301_v16 = vpop.f32.mrb[8].mxu1 }
 0xb82   : > { %v7303_v50 = vpop.f32.mrb[9].mxu1 }
 0xb83   : > { %v1667_v28 = vpop.f32.mrb[10].mxu1 }
 0xb84   : > { %v1668_v39 = vpop.f32.mrb[11].mxu1 }
 0xb96   : > { %v2057_v34 = vpop.f32.mrb[12].mxu1 }
 0xb97   : > { %v2058_v45 = vadd.f32 %v2057_v34, %v7305_v53  ;;  %v2059_v33 = vpop.f32.mrb[13].mxu1 }
 0xb98   : > { %v2060_v17 = vadd.f32 %v2059_v33, %v7305_v53  ;;  %v2061_v5 = vpop.f32.mrb[14].mxu1 }
 0xb99   : > { %v2064_v63 = vmax.f32 %v2058_v45, 0.0  ;;  %v2062_v56 = vpop.f32.mrb[15].mxu1  ;;  %v5298_v45 = vld [vmem:[%s8524_s3 + $0x10] sm:$0xff] }
 0xb9a   : > { %v2065_v38 = vmax.f32 %v2060_v17, 0.0 }
 0xb9b   : > { %2068 = vrot.lane.b32.xlu1 %v2064_v63, %s6472_s15 }
 0xb9c   : > { %2070 = vrot.lane.b32.xlu0 %v2065_v38, %s6472_s15 }
 0xc0d   : > { %v2069_v19 = vpop.permute.xlu1 %2068 }
 0xc0e   : > { %v2076_v10 = vsel %vm438_vm4, 0.0, %v2069_v19  ;;  %v2071_v13 = vpop.permute.xlu0 %2070 }
 0xc0f   : > { %v2072_v59 = vsel %vm438_vm4, %v2069_v19, %v2071_v13  ;;  %v2077_v20 = vsel %vm438_vm4, %v2071_v13, 0.0  ;;  %2133 = vrot.lane.b32.xlu1 %v2076_v10, %s6481_s23  ;;  %2097 = vrot.lane.b32.xlu0 %v2076_v10, %s6479_s21  ;;  %v2083_v7 = vmul.f32 %v6577_v24, %v2076_v10  ;;  %v2086_v55 = vmul.f32 %v6583_v27, %v2076_v10 }
 0xc10   : > { %v5766_v15 = vpack.i.bf16 %v2077_v20, %v2072_v59  ;;  %v2080_v46 = vmul.f32 %v6581_v26, %v2076_v10  ;;  %v2084_v57 = vmul.f32 %v2072_v59, %v6592_v30  ;;  %v2085_v22 = vmul.f32 %v6575_v23, %v2077_v20 }
 0xc11   : > { %v2081_v1 = vmul.f32 %v2072_v59, %v6597_v31  ;;  %v2082_v35 = vmul.f32 %v6579_v25, %v2077_v20  ;;  %v2087_v14 = vmul.f32 %v2072_v59, %v6609_v36  ;;  %v2088_v21 = vmul.f32 %v6588_v29, %v2077_v20 }
 0xc12   : > { %v5776_v8 = vpack.i.bf16 %v2085_v22, %v2084_v57  ;;  %v2089_v51 = vmul.f32 %v6620_v41, %v2076_v10  ;;  %v2090_v60 = vmul.f32 %v2072_v59, %v6634_v49  ;;  %v2091_v52 = vmul.f32 %v6618_v40, %v2077_v20 }
 0xc13   : > { %5767 = vrot.lane.b32.xlu0 %v5766_v15, %s6480_s22  ;;  %5757 = vrot.lane.b32.xlu1 %v5766_v15, %s6479_s21  ;;  %v5771_v32 = vpack.i.bf16 %v2082_v35, %v2081_v1  ;;  %v5781_v44 = vpack.i.bf16 %v2088_v21, %v2087_v14  ;;  %v2092_v42 = vmul.f32 %v6630_v48, %v2076_v10 }
 0xc14   : > { %v5786_v62 = vpack.i.bf16 %v2091_v52, %v2090_v60  ;;  %v2093_v28 = vmul.f32 %v2072_v59, %v6646_v54  ;;  %v2094_v39 = vmul.f32 %v6628_v47, %v2077_v20  ;;  %v2079_v19 = vmul.f32 %v6555_v11, %v2072_v59 }
 0xc15   : > { %v2078_v13 = vmul.f32 %v6553_v9, %v2076_v10 }
 0xc16   : > { %v5791_v34 = vpack.i.bf16 %v2093_v28, %v2092_v42 }
 0xc17   : > { %2123 = vrot.lane.b32.xlu0 %v2083_v7, %s6482_s24  ;;  %5762 = vrot.lane.b32.xlu1 %v5766_v15, %s6481_s23 }
 0xc1b   : > { %2146 = vrot.lane.b32.xlu0 %v2086_v55, %s6483_s25  ;;  %2110 = vrot.lane.b32.xlu1 %v2080_v46, %s6484_s26 }
 0xc1f   : > { %5777 = vrot.lane.b32.xlu0 %v5776_v8, %s6482_s24  ;;  %5772 = vrot.lane.b32.xlu1 %v5771_v32, %s6484_s26 }
 0xc23   : > { %5782 = vrot.lane.b32.xlu0 %v5781_v44, %s6483_s25  ;;  %2159 = vrot.lane.b32.xlu1 %v2089_v51, %s6485_s27 }
 0xc27   : > { %2169 = vrot.lane.b32.xlu0 %v2076_v10, %s6480_s22  ;;  %5787 = vrot.lane.b32.xlu1 %v5786_v62, %s6485_s27 }
 0xc2b   : > { %2186 = vrot.lane.b32.xlu0 %v2094_v39, %s6487_s28  ;;  %5792 = vrot.lane.b32.xlu1 %v5791_v34, %s6487_s28 }
 0xc2f   : > { %2208 = vperm.xlu1 %5434, %v5298_v45  }
 0xc81   : > { %v2134_v33 = vpop.permute.xlu1 %2133  ;;  %v2098_v17 = vpop.permute.xlu0 %2097 }
 0xc85   : > { %v5768_v5 = vpop.permute.xlu0 %5767  ;;  %v5758_v63 = vpop.permute.xlu1 %5757 }
 0xc86   : > { %v5760_v56 = vunpack.i.h.bf16 %v5758_v63  ;;  %v5759_v38 = vunpack.i.l.bf16 %v5758_v63  ;;  %v5770_v63 = vunpack.i.h.bf16 %v5768_v5 }
 0xc88   : > { %v2103_v20 = vsel %vm519_vm10, %v2098_v17, %v5759_v38  ;;  %v2104_v15 = vsel %vm519_vm10, %v5759_v38, %v5760_v56  ;;  %v5769_v56 = vunpack.i.l.bf16 %v5768_v5 }
 0xc89   : > { %v2124_v7 = vpop.permute.xlu0 %2123  ;;  %v5763_v55 = vpop.permute.xlu1 %5762  ;;  %v2193_v46 = vpack.c.bf16 %v2104_v15, %v2079_v19  ;;  %v2192_v57 = vpack.c.bf16 %v2103_v20, %v2078_v13 }
 0xc8a   : > { %v5765_v44 = vunpack.i.h.bf16 %v5763_v55  ;;  %v5764_v10 = vunpack.i.l.bf16 %v5763_v55 }
 0xc8b   : > { %2220 = vmatprep.subr.bf16.mxu0 %v2193_v46 }
 0xc8c   : > { %2221 = vmatpush1.bf16.msra.mxu0 %v2192_v57  ;;  %v2139_v38 = vsel %vm558_vm13, %v2134_v33, %v5764_v10  ;;  %v2140_v13 = vsel %vm558_vm13, %v5764_v10, %v5765_v44 }
 0xc8d   : > { %v2147_v22 = vpop.permute.xlu0 %2146  ;;  %v2111_v1 = vpop.permute.xlu1 %2110 }
 0xc91   : > { %v5778_v35 = vpop.permute.xlu0 %5777  ;;  %v5773_v8 = vpop.permute.xlu1 %5772 }
 0xc92   : > { %v5780_v32 = vunpack.i.h.bf16 %v5778_v35  ;;  %v5779_v14 = vunpack.i.l.bf16 %v5778_v35  ;;  %v5775_v21 = vunpack.i.h.bf16 %v5773_v8  ;;  %v5774_v59 = vunpack.i.l.bf16 %v5773_v8 }
 0xc94   : > { %v2129_v51 = vsel %vm547_vm11, %v2124_v7, %v5779_v14  ;;  %v2116_v60 = vsel %vm533_vm12, %v2111_v1, %v5774_v59  ;;  %v2117_v52 = vsel %vm533_vm12, %v5774_v59, %v5775_v21  ;;  %v2130_v62 = vsel %vm547_vm11, %v5779_v14, %v5780_v32 }
 0xc95   : > { %v5783_v42 = vpop.permute.xlu0 %5782  ;;  %v2160_v28 = vpop.permute.xlu1 %2159  ;;  %v2195_v39 = vpack.c.bf16 %v2130_v62, %v2117_v52  ;;  %v2194_v34 = vpack.c.bf16 %v2129_v51, %v2116_v60 }
 0xc96   : > { %v5785_v45 = vunpack.i.h.bf16 %v5783_v42  ;;  %v5784_v17 = vunpack.i.l.bf16 %v5783_v42  ;;  %v5297_v42 = vld [vmem:[%s8523_s2 + $0x8] sm:$0xf] }
 0xc97   : > { %2222 = vmatprep.subr.bf16.mxu0 %v2195_v39 }
 0xc98   : > { %v2152_v19 = vsel %vm572_vm14, %v2147_v22, %v5784_v17  ;;  %2223 = vmatpush1.bf16.msra.mxu0 %v2194_v34  ;;  %v2153_v20 = vsel %vm572_vm14, %v5784_v17, %v5785_v45  ;;  %v2176_v22 = vsel %vm597_vm15, %v5769_v56, %v5770_v63 }
 0xc99   : > { %v2170_v15 = vpop.permute.xlu0 %2169  ;;  %v5788_v7 = vpop.permute.xlu1 %5787  ;;  %v2197_v55 = vpack.c.bf16 %v2153_v20, %v2140_v13  ;;  %v2196_v46 = vpack.c.bf16 %v2152_v19, %v2139_v38 }
 0xc9a   : > { %v5790_v57 = vunpack.i.h.bf16 %v5788_v7  ;;  %v5789_v1 = vunpack.i.l.bf16 %v5788_v7  ;;  %v2175_v35 = vsel %vm597_vm15, %v2170_v15, %v5769_v56 }
 0xc9b   : > { %2224 = vmatprep.subr.bf16.mxu0 %v2197_v55 }
 0xc9c   : > { %v2165_v5 = vsel %vm586_vm0, %v2160_v28, %v5789_v1  ;;  %2225 = vmatpush1.bf16.msra.mxu0 %v2196_v46  ;;  %v2166_v33 = vsel %vm586_vm0, %v5789_v1, %v5790_v57 }
 0xc9d   : > { %v5793_v8 = vpop.permute.xlu1 %5792  ;;  %v2199_v32 = vpack.c.bf16 %v2176_v22, %v2166_v33  ;;  %v2198_v14 = vpack.c.bf16 %v2175_v35, %v2165_v5  ;;  %v2187_v44 = vpop.permute.xlu0 %2186 }
 0xc9e   : > { %v5795_v21 = vunpack.i.h.bf16 %v5793_v8  ;;  %v5794_v59 = vunpack.i.l.bf16 %v5793_v8 }
 0xc9f   : > { %2226 = vmatprep.subr.bf16.mxu0 %v2199_v32 }
 0xca0   : > { %2227 = vmatpush1.bf16.msra.mxu0 %v2198_v14  ;;  %v2189_v10 = vsel %vm611_vm1, %v5795_v21, %v2187_v44  ;;  %v2188_v51 = vsel %vm611_vm1, %v5794_v59, %v5795_v21 }
 0xca1   : > { %v2201_v60 = vpack.c.bf16 %v2189_v10, %v2189_v10  ;;  %v2200_v52 = vpack.c.bf16 %v2188_v51, %v2188_v51 }
 0xca3   : > { %5299 = vmatprep.subr.msk.bf16.mxu0 %vm637_vm2, %v2201_v60  ;;  %v2215_v62 = vsel %vm637_vm2, %v2200_v52, 0 }
 0xca4   : > { %2229 = vmatpush1.bf16.msra.mxu0 %v2215_v62  ;;  %v5302_v62 = vld [vmem:[%s8524_s3 + $0x18] sm:$0xff] }
 0xca7   : > { %5300 = vmatmul.mubr.msk.bf16.vlgmr.msra.gmra.mrb[16].mxu0 %vm633_vm3, %v5297_v42 }
 0xca8   : > { %2646 = vmatprep.mubr.bf16.mxu0 %v6486_v58 }
 0xcae   : > { %v7373_v28 = vpop.permute.xlu1 %2208 }
 0xd7a   : > { %v2254_v39 = vpop.f32.mrb[16].mxu0 }
 0xd7b   : > { %v2255_v34 = vadd.f32 %v2254_v39, %v7373_v28  ;;  %v2256_v45 = vpop.f32.mrb[17].mxu0 }
 0xd7c   : > { %v2257_v17 = vadd.f32 %v2256_v45, %v7373_v28  ;;  %v2258_v63 = vpop.f32.mrb[18].mxu0 }
 0xd7d   : > { %v7379_v56 = vadd.f32 %v2255_v34, %v1867_v12  ;;  %v2259_v38 = vpop.f32.mrb[19].mxu0 }
 0xd7e   : > { %v7383_v19 = vadd.f32 %v2257_v17, %v1868_v6 }
 0xd7f   : > { %2265 = vrot.lane.b32.xlu0 %v7379_v56, %s6472_s15 }
 0xd80   : > { %2267 = vrot.lane.b32.xlu1 %v7383_v19, %s6472_s15 }
 0xdf1   : > { %v2266_v13 = vpop.permute.xlu0 %2265 }
 0xdf2   : > { %v2273_v20 = vsel %vm438_vm4, 0.0, %v2266_v13  ;;  %v2268_v15 = vpop.permute.xlu1 %2267 }
 0xdf3   : > { %v2269_v7 = vsel %vm438_vm4, %v2266_v13, %v2268_v15  ;;  %v2274_v0 = vsel %vm438_vm4, %v2268_v15, 0.0  ;;  %2330 = vrot.lane.b32.xlu0 %v2273_v20, %s6481_s23  ;;  %2294 = vrot.lane.b32.xlu1 %v2273_v20, %s6479_s21  ;;  %v2280_v12 = vmul.f32 %v6577_v24, %v2273_v20  ;;  %v2283_v6 = vmul.f32 %v6583_v27, %v2273_v20 }
 0xdf4   : > { %v5806_v2 = vpack.i.bf16 %v2274_v0, %v2269_v7  ;;  %v2277_v55 = vmul.f32 %v6581_v26, %v2273_v20  ;;  %v2281_v46 = vmul.f32 %v2269_v7, %v6592_v30  ;;  %v2282_v57 = vmul.f32 %v6575_v23, %v2274_v0 }
 0xdf5   : > { %v2278_v1 = vmul.f32 %v2269_v7, %v6597_v31  ;;  %v2279_v35 = vmul.f32 %v6579_v25, %v2274_v0  ;;  %v2284_v22 = vmul.f32 %v2269_v7, %v6609_v36  ;;  %v2285_v8 = vmul.f32 %v6588_v29, %v2274_v0 }
 0xdf6   : > { %v5816_v5 = vpack.i.bf16 %v2282_v57, %v2281_v46  ;;  %v2286_v14 = vmul.f32 %v6620_v41, %v2273_v20  ;;  %v2287_v21 = vmul.f32 %v2269_v7, %v6634_v49  ;;  %v2288_v59 = vmul.f32 %v6618_v40, %v2274_v0 }
 0xdf7   : > { %5807 = vrot.lane.b32.xlu1 %v5806_v2, %s6480_s22  ;;  %5797 = vrot.lane.b32.xlu0 %v5806_v2, %s6479_s21  ;;  %v5811_v33 = vpack.i.bf16 %v2279_v35, %v2278_v1  ;;  %v5821_v32 = vpack.i.bf16 %v2285_v8, %v2284_v22  ;;  %v2289_v10 = vmul.f32 %v6630_v48, %v2273_v20 }
 0xdf8   : > { %v5826_v44 = vpack.i.bf16 %v2288_v59, %v2287_v21  ;;  %v2290_v51 = vmul.f32 %v2269_v7, %v6646_v54  ;;  %v2291_v60 = vmul.f32 %v6628_v47, %v2274_v0  ;;  %v2276_v38 = vmul.f32 %v6555_v11, %v2269_v7 }
 0xdf9   : > { %v2275_v13 = vmul.f32 %v6553_v9, %v2273_v20 }
 0xdfa   : > { %v5831_v52 = vpack.i.bf16 %v2290_v51, %v2289_v10 }
 0xdfb   : > { %2320 = vrot.lane.b32.xlu1 %v2280_v12, %s6482_s24  ;;  %5802 = vrot.lane.b32.xlu0 %v5806_v2, %s6481_s23 }
 0xdff   : > { %2343 = vrot.lane.b32.xlu1 %v2283_v6, %s6483_s25  ;;  %2307 = vrot.lane.b32.xlu0 %v2277_v55, %s6484_s26 }
 0xe03   : > { %5817 = vrot.lane.b32.xlu1 %v5816_v5, %s6482_s24  ;;  %5812 = vrot.lane.b32.xlu0 %v5811_v33, %s6484_s26 }
 0xe07   : > { %5822 = vrot.lane.b32.xlu1 %v5821_v32, %s6483_s25  ;;  %2356 = vrot.lane.b32.xlu0 %v2286_v14, %s6485_s27 }
 0xe0b   : > { %2366 = vrot.lane.b32.xlu1 %v2273_v20, %s6480_s22  ;;  %5827 = vrot.lane.b32.xlu0 %v5826_v44, %s6485_s27 }
 0xe0f   : > { %2383 = vrot.lane.b32.xlu1 %v2291_v60, %s6487_s28  ;;  %5832 = vrot.lane.b32.xlu0 %v5831_v52, %s6487_s28 }
 0xe13   : > { %2405 = vperm.xlu0 %5475, %v5302_v62  }
 0xe65   : > { %v2331_v42 = vpop.permute.xlu0 %2330  ;;  %v2295_v39 = vpop.permute.xlu1 %2294 }
 0xe69   : > { %v5808_v34 = vpop.permute.xlu1 %5807  ;;  %v5798_v45 = vpop.permute.xlu0 %5797 }
 0xe6a   : > { %v5800_v17 = vunpack.i.h.bf16 %v5798_v45  ;;  %v5799_v63 = vunpack.i.l.bf16 %v5798_v45  ;;  %v5809_v45 = vunpack.i.l.bf16 %v5808_v34 }
 0xe6c   : > { %v2300_v15 = vsel %vm519_vm10, %v2295_v39, %v5799_v63  ;;  %v2301_v0 = vsel %vm519_vm10, %v5799_v63, %v5800_v17  ;;  %v5810_v39 = vunpack.i.h.bf16 %v5808_v34 }
 0xe6d   : > { %v2321_v2 = vpop.permute.xlu1 %2320  ;;  %v5803_v12 = vpop.permute.xlu0 %5802  ;;  %v2390_v6 = vpack.c.bf16 %v2301_v0, %v2276_v38  ;;  %v2389_v55 = vpack.c.bf16 %v2300_v15, %v2275_v13 }
 0xe6e   : > { %v5805_v8 = vunpack.i.h.bf16 %v5803_v12  ;;  %v5804_v20 = vunpack.i.l.bf16 %v5803_v12 }
 0xe6f   : > { %2417 = vmatprep.subr.bf16.mxu1 %v2390_v6 }
 0xe70   : > { %2418 = vmatpush1.bf16.msra.mxu1 %v2389_v55  ;;  %v2336_v17 = vsel %vm558_vm13, %v2331_v42, %v5804_v20  ;;  %v2337_v38 = vsel %vm558_vm13, %v5804_v20, %v5805_v8 }
 0xe71   : > { %v2344_v46 = vpop.permute.xlu1 %2343  ;;  %v2308_v57 = vpop.permute.xlu0 %2307 }
 0xe75   : > { %v5818_v1 = vpop.permute.xlu1 %5817  ;;  %v5813_v35 = vpop.permute.xlu0 %5812 }
 0xe76   : > { %v5820_v5 = vunpack.i.h.bf16 %v5818_v1  ;;  %v5819_v33 = vunpack.i.l.bf16 %v5818_v1  ;;  %v5815_v22 = vunpack.i.h.bf16 %v5813_v35  ;;  %v5814_v7 = vunpack.i.l.bf16 %v5813_v35 }
 0xe78   : > { %v2326_v32 = vsel %vm547_vm11, %v2321_v2, %v5819_v33  ;;  %v2313_v14 = vsel %vm533_vm12, %v2308_v57, %v5814_v7  ;;  %v2314_v21 = vsel %vm533_vm12, %v5814_v7, %v5815_v22  ;;  %v2327_v59 = vsel %vm547_vm11, %v5819_v33, %v5820_v5 }
 0xe79   : > { %v5823_v44 = vpop.permute.xlu1 %5822  ;;  %v2357_v10 = vpop.permute.xlu0 %2356  ;;  %v2392_v51 = vpack.c.bf16 %v2327_v59, %v2314_v21  ;;  %v2391_v60 = vpack.c.bf16 %v2326_v32, %v2313_v14  ;;  %v5301_v59 = vld [vmem:[%s8523_s2 + $0xc] sm:$0xf] }
 0xe7a   : > { %v5825_v52 = vunpack.i.h.bf16 %v5823_v44  ;;  %v5824_v62 = vunpack.i.l.bf16 %v5823_v44 }
 0xe7b   : > { %2419 = vmatprep.subr.bf16.mxu1 %v2392_v51 }
 0xe7c   : > { %v2349_v63 = vsel %vm572_vm14, %v2344_v46, %v5824_v62  ;;  %2420 = vmatpush1.bf16.msra.mxu1 %v2391_v60  ;;  %v2350_v13 = vsel %vm572_vm14, %v5824_v62, %v5825_v52  ;;  %v2373_v46 = vsel %vm597_vm15, %v5809_v45, %v5810_v39 }
 0xe7d   : > { %v2367_v15 = vpop.permute.xlu1 %2366  ;;  %v5828_v0 = vpop.permute.xlu0 %5827  ;;  %v2394_v2 = vpack.c.bf16 %v2350_v13, %v2337_v38  ;;  %v2393_v12 = vpack.c.bf16 %v2349_v63, %v2336_v17 }
 0xe7e   : > { %v5830_v6 = vunpack.i.h.bf16 %v5828_v0  ;;  %v5829_v55 = vunpack.i.l.bf16 %v5828_v0  ;;  %v2372_v57 = vsel %vm597_vm15, %v2367_v15, %v5809_v45 }
 0xe7f   : > { %2421 = vmatprep.subr.bf16.mxu1 %v2394_v2 }
 0xe80   : > { %v2362_v34 = vsel %vm586_vm0, %v2357_v10, %v5829_v55  ;;  %2422 = vmatpush1.bf16.msra.mxu1 %v2393_v12  ;;  %v2363_v42 = vsel %vm586_vm0, %v5829_v55, %v5830_v6 }
 0xe81   : > { %v5833_v1 = vpop.permute.xlu0 %5832  ;;  %v2396_v35 = vpack.c.bf16 %v2373_v46, %v2363_v42  ;;  %v2395_v5 = vpack.c.bf16 %v2372_v57, %v2362_v34  ;;  %v2384_v7 = vpop.permute.xlu1 %2383 }
 0xe82   : > { %v5835_v33 = vunpack.i.h.bf16 %v5833_v1  ;;  %v5834_v22 = vunpack.i.l.bf16 %v5833_v1 }
 0xe83   : > { %2423 = vmatprep.subr.bf16.mxu1 %v2396_v35 }
 0xe84   : > { %2424 = vmatpush1.bf16.msra.mxu1 %v2395_v5  ;;  %v2386_v8 = vsel %vm611_vm1, %v5835_v33, %v2384_v7  ;;  %v2385_v20 = vsel %vm611_vm1, %v5834_v22, %v5835_v33 }
 0xe85   : > { %v2398_v32 = vpack.c.bf16 %v2386_v8, %v2386_v8  ;;  %v2397_v14 = vpack.c.bf16 %v2385_v20, %v2385_v20 }
 0xe87   : > { %5303 = vmatprep.subr.msk.bf16.mxu1 %vm637_vm2, %v2398_v32  ;;  %v2412_v21 = vsel %vm637_vm2, %v2397_v14, 0 }
 0xe88   : > { %2426 = vmatpush1.bf16.msra.mxu1 %v2412_v21 }
 0xe8b   : > { %5304 = vmatmul.mubr.msk.bf16.vlgmr.msra.gmra.mrb[16].mxu1 %vm633_vm3, %v5301_v59 }
 0xe8c   : > { %2843 = vmatprep.mubr.bf16.mxu1 %v6486_v58 }
 0xe92   : > { %v7451_v44 = vpop.permute.xlu0 %2405 }
 0xf5e   : > { %v2451_v10 = vpop.f32.mrb[16].mxu1 }
 0xf5f   : > { %v2452_v51 = vadd.f32 %v2451_v10, %v7451_v44  ;;  %v2453_v60 = vpop.f32.mrb[17].mxu1 }
 0xf60   : > { %v2454_v52 = vadd.f32 %v2453_v60, %v7451_v44  ;;  %v2455_v62 = vpop.f32.mrb[18].mxu1 }
 0xf61   : > { %v2458_v39 = vmax.f32 %v2452_v51, 0.0  ;;  %v2456_v45 = vpop.f32.mrb[19].mxu1  ;;  %v5306_v51 = vld [vmem:[%s8524_s3 + $0x20] sm:$0xff] }
 0xf62   : > { %v2459_v17 = vmax.f32 %v2454_v52, 0.0 }
 0xf63   : > { %2462 = vrot.lane.b32.xlu1 %v2458_v39, %s6472_s15 }
 0xf64   : > { %2464 = vrot.lane.b32.xlu0 %v2459_v17, %s6472_s15 }
 0xfd5   : > { %v2463_v63 = vpop.permute.xlu1 %2462 }
 0xfd6   : > { %v2470_v38 = vsel %vm438_vm4, 0.0, %v2463_v63  ;;  %v2465_v13 = vpop.permute.xlu0 %2464 }
 0xfd7   : > { %v2466_v15 = vsel %vm438_vm4, %v2463_v63, %v2465_v13  ;;  %v2471_v0 = vsel %vm438_vm4, %v2465_v13, 0.0  ;;  %2527 = vrot.lane.b32.xlu1 %v2470_v38, %s6481_s23  ;;  %2491 = vrot.lane.b32.xlu0 %v2470_v38, %s6479_s21  ;;  %v2477_v12 = vmul.f32 %v6577_v24, %v2470_v38  ;;  %v2480_v6 = vmul.f32 %v6583_v27, %v2470_v38 }
 0xfd8   : > { %v5846_v2 = vpack.i.bf16 %v2471_v0, %v2466_v15  ;;  %v2474_v55 = vmul.f32 %v6581_v26, %v2470_v38  ;;  %v2478_v57 = vmul.f32 %v2466_v15, %v6592_v30  ;;  %v2479_v34 = vmul.f32 %v6575_v23, %v2471_v0 }
 0xfd9   : > { %v2475_v42 = vmul.f32 %v2466_v15, %v6597_v31  ;;  %v2476_v46 = vmul.f32 %v6579_v25, %v2471_v0  ;;  %v2481_v5 = vmul.f32 %v2466_v15, %v6609_v36  ;;  %v2482_v33 = vmul.f32 %v6588_v29, %v2471_v0 }
 0xfda   : > { %v5856_v1 = vpack.i.bf16 %v2479_v34, %v2478_v57  ;;  %v2483_v7 = vmul.f32 %v6620_v41, %v2470_v38  ;;  %v2484_v8 = vmul.f32 %v2466_v15, %v6634_v49  ;;  %v2485_v20 = vmul.f32 %v6618_v40, %v2471_v0 }
 0xfdb   : > { %5847 = vrot.lane.b32.xlu0 %v5846_v2, %s6480_s22  ;;  %5837 = vrot.lane.b32.xlu1 %v5846_v2, %s6479_s21  ;;  %v5851_v35 = vpack.i.bf16 %v2476_v46, %v2475_v42  ;;  %v5861_v22 = vpack.i.bf16 %v2482_v33, %v2481_v5  ;;  %v2486_v14 = vmul.f32 %v6630_v48, %v2470_v38 }
 0xfdc   : > { %v5866_v32 = vpack.i.bf16 %v2485_v20, %v2484_v8  ;;  %v2487_v21 = vmul.f32 %v2466_v15, %v6646_v54  ;;  %v2488_v59 = vmul.f32 %v6628_v47, %v2471_v0  ;;  %v2473_v63 = vmul.f32 %v6555_v11, %v2466_v15 }
 0xfdd   : > { %v2472_v13 = vmul.f32 %v6553_v9, %v2470_v38 }
 0xfde   : > { %v5871_v10 = vpack.i.bf16 %v2487_v21, %v2486_v14 }
 0xfdf   : > { %2517 = vrot.lane.b32.xlu0 %v2477_v12, %s6482_s24  ;;  %5842 = vrot.lane.b32.xlu1 %v5846_v2, %s6481_s23 }
 0xfe3   : > { %2540 = vrot.lane.b32.xlu0 %v2480_v6, %s6483_s25  ;;  %2504 = vrot.lane.b32.xlu1 %v2474_v55, %s6484_s26 }
 0xfe7   : > { %5857 = vrot.lane.b32.xlu0 %v5856_v1, %s6482_s24  ;;  %5852 = vrot.lane.b32.xlu1 %v5851_v35, %s6484_s26 }
 0xfeb   : > { %5862 = vrot.lane.b32.xlu0 %v5861_v22, %s6483_s25  ;;  %2553 = vrot.lane.b32.xlu1 %v2483_v7, %s6485_s27 }
 0xfef   : > { %2563 = vrot.lane.b32.xlu0 %v2470_v38, %s6480_s22  ;;  %5867 = vrot.lane.b32.xlu1 %v5866_v32, %s6485_s27 }
 0xff3   : > { %2580 = vrot.lane.b32.xlu0 %v2488_v59, %s6487_s28  ;;  %5872 = vrot.lane.b32.xlu1 %v5871_v10, %s6487_s28 }
 0xff7   : > { %2602 = vperm.xlu1 %5434, %v5306_v51  }
0x1049   : > { %v2528_v60 = vpop.permute.xlu1 %2527  ;;  %v2492_v52 = vpop.permute.xlu0 %2491 }
0x104d   : > { %v5848_v62 = vpop.permute.xlu0 %5847  ;;  %v5838_v39 = vpop.permute.xlu1 %5837 }
0x104e   : > { %v5840_v45 = vunpack.i.h.bf16 %v5838_v39  ;;  %v5839_v17 = vunpack.i.l.bf16 %v5838_v39  ;;  %v5850_v39 = vunpack.i.h.bf16 %v5848_v62 }
0x1050   : > { %v2497_v0 = vsel %vm519_vm10, %v2492_v52, %v5839_v17  ;;  %v2498_v2 = vsel %vm519_vm10, %v5839_v17, %v5840_v45  ;;  %v5849_v45 = vunpack.i.l.bf16 %v5848_v62 }
0x1051   : > { %v2518_v12 = vpop.permute.xlu0 %2517  ;;  %v5843_v6 = vpop.permute.xlu1 %5842  ;;  %v2587_v55 = vpack.c.bf16 %v2498_v2, %v2473_v63  ;;  %v2586_v57 = vpack.c.bf16 %v2497_v0, %v2472_v13 }
0x1052   : > { %v5845_v22 = vunpack.i.h.bf16 %v5843_v6  ;;  %v5844_v38 = vunpack.i.l.bf16 %v5843_v6 }
0x1053   : > { %2614 = vmatprep.subr.bf16.mxu0 %v2587_v55 }
0x1054   : > { %2615 = vmatpush1.bf16.msra.mxu0 %v2586_v57  ;;  %v2533_v17 = vsel %vm558_vm13, %v2528_v60, %v5844_v38  ;;  %v2534_v13 = vsel %vm558_vm13, %v5844_v38, %v5845_v22 }
0x1055   : > { %v2541_v34 = vpop.permute.xlu0 %2540  ;;  %v2505_v42 = vpop.permute.xlu1 %2504 }
0x1059   : > { %v5858_v46 = vpop.permute.xlu0 %5857  ;;  %v5853_v1 = vpop.permute.xlu1 %5852 }
0x105a   : > { %v5860_v35 = vunpack.i.h.bf16 %v5858_v46  ;;  %v5859_v5 = vunpack.i.l.bf16 %v5858_v46  ;;  %v5855_v33 = vunpack.i.h.bf16 %v5853_v1  ;;  %v5854_v15 = vunpack.i.l.bf16 %v5853_v1 }
0x105c   : > { %v2523_v7 = vsel %vm547_vm11, %v2518_v12, %v5859_v5  ;;  %v2510_v8 = vsel %vm533_vm12, %v2505_v42, %v5854_v15  ;;  %v2511_v20 = vsel %vm533_vm12, %v5854_v15, %v5855_v33  ;;  %v2524_v32 = vsel %vm547_vm11, %v5859_v5, %v5860_v35 }
0x105d   : > { %v5863_v14 = vpop.permute.xlu0 %5862  ;;  %v2554_v21 = vpop.permute.xlu1 %2553  ;;  %v2589_v59 = vpack.c.bf16 %v2524_v32, %v2511_v20  ;;  %v2588_v10 = vpack.c.bf16 %v2523_v7, %v2510_v8 }
0x105e   : > { %v5865_v51 = vunpack.i.h.bf16 %v5863_v14  ;;  %v5864_v52 = vunpack.i.l.bf16 %v5863_v14  ;;  %v5305_v14 = vld [vmem:[%s8523_s2 + $0x10] sm:$0xf] }
0x105f   : > { %2616 = vmatprep.subr.bf16.mxu0 %v2589_v59 }
0x1060   : > { %v2546_v63 = vsel %vm572_vm14, %v2541_v34, %v5864_v52  ;;  %2617 = vmatpush1.bf16.msra.mxu0 %v2588_v10  ;;  %v2547_v0 = vsel %vm572_vm14, %v5864_v52, %v5865_v51  ;;  %v2570_v34 = vsel %vm597_vm15, %v5849_v45, %v5850_v39 }
0x1061   : > { %v2564_v2 = vpop.permute.xlu0 %2563  ;;  %v5868_v12 = vpop.permute.xlu1 %5867  ;;  %v2591_v6 = vpack.c.bf16 %v2547_v0, %v2534_v13  ;;  %v2590_v55 = vpack.c.bf16 %v2546_v63, %v2533_v17 }
0x1062   : > { %v5870_v57 = vunpack.i.h.bf16 %v5868_v12  ;;  %v5869_v42 = vunpack.i.l.bf16 %v5868_v12  ;;  %v2569_v46 = vsel %vm597_vm15, %v2564_v2, %v5849_v45 }
0x1063   : > { %2618 = vmatprep.subr.bf16.mxu0 %v2591_v6 }
0x1064   : > { %v2559_v62 = vsel %vm586_vm0, %v2554_v21, %v5869_v42  ;;  %2619 = vmatpush1.bf16.msra.mxu0 %v2590_v55  ;;  %v2560_v60 = vsel %vm586_vm0, %v5869_v42, %v5870_v57 }
0x1065   : > { %v5873_v1 = vpop.permute.xlu1 %5872  ;;  %v2593_v35 = vpack.c.bf16 %v2570_v34, %v2560_v60  ;;  %v2592_v5 = vpack.c.bf16 %v2569_v46, %v2559_v62  ;;  %v2581_v22 = vpop.permute.xlu0 %2580 }
0x1066   : > { %v5875_v33 = vunpack.i.h.bf16 %v5873_v1  ;;  %v5874_v15 = vunpack.i.l.bf16 %v5873_v1 }
0x1067   : > { %2620 = vmatprep.subr.bf16.mxu0 %v2593_v35 }
0x1068   : > { %2621 = vmatpush1.bf16.msra.mxu0 %v2592_v5  ;;  %v2583_v38 = vsel %vm611_vm1, %v5875_v33, %v2581_v22  ;;  %v2582_v7 = vsel %vm611_vm1, %v5874_v15, %v5875_v33 }
0x1069   : > { %v2595_v8 = vpack.c.bf16 %v2583_v38, %v2583_v38  ;;  %v2594_v20 = vpack.c.bf16 %v2582_v7, %v2582_v7 }
0x106b   : > { %5307 = vmatprep.subr.msk.bf16.mxu0 %vm637_vm2, %v2595_v8  ;;  %v2609_v32 = vsel %vm637_vm2, %v2594_v20, 0 }
0x106c   : > { %2623 = vmatpush1.bf16.msra.mxu0 %v2609_v32 }
0x106f   : > { %5308 = vmatmul.mubr.msk.bf16.vlgmr.msra.gmra.mrb[20].mxu0 %vm633_vm3, %v5305_v14 }
0x1070   : > { %3028 = vmatprep.mubr.bf16.mxu0 %v6486_v58 }
0x1076   : > { %v7519_v21 = vpop.permute.xlu1 %2602 }
0x1142   : > { %v2648_v59 = vpop.f32.mrb[20].mxu0 }
0x1143   : > { %v2649_v10 = vadd.f32 %v2648_v59, %v7519_v21  ;;  %v2650_v51 = vpop.f32.mrb[21].mxu0  ;;  %v5310_v59 = vld [vmem:[%s8524_s3 + $0x28] sm:$0xff] }
0x1144   : > { %v2651_v52 = vadd.f32 %v2650_v51, %v7519_v21  ;;  %v2652_v39 = vpop.f32.mrb[22].mxu0 }
0x1145   : > { %v2655_v45 = vadd.f32 %v2649_v10, %v7379_v56  ;;  %v2653_v17 = vpop.f32.mrb[23].mxu0 }
0x1146   : > { %v2656_v63 = vadd.f32 %v2651_v52, %v7383_v19 }
0x1147   : > { %2659 = vrot.lane.b32.xlu0 %v2655_v45, %s6472_s15 }
0x1148   : > { %2661 = vrot.lane.b32.xlu1 %v2656_v63, %s6472_s15 }
0x11b9   : > { %v2660_v13 = vpop.permute.xlu0 %2659 }
0x11ba   : > { %v2667_v0 = vsel %vm438_vm4, 0.0, %v2660_v13  ;;  %v2662_v2 = vpop.permute.xlu1 %2661 }
0x11bb   : > { %v2663_v12 = vsel %vm438_vm4, %v2660_v13, %v2662_v2  ;;  %v2668_v6 = vsel %vm438_vm4, %v2662_v2, 0.0  ;;  %2724 = vrot.lane.b32.xlu0 %v2667_v0, %s6481_s23  ;;  %2688 = vrot.lane.b32.xlu1 %v2667_v0, %s6479_s21  ;;  %v2674_v19 = vmul.f32 %v6577_v24, %v2667_v0  ;;  %v2677_v55 = vmul.f32 %v6583_v27, %v2667_v0 }
0x11bc   : > { %v5886_v56 = vpack.i.bf16 %v2668_v6, %v2663_v12  ;;  %v2671_v57 = vmul.f32 %v6581_v26, %v2667_v0  ;;  %v2675_v42 = vmul.f32 %v2663_v12, %v6592_v30  ;;  %v2676_v46 = vmul.f32 %v6575_v23, %v2668_v6 }
0x11bd   : > { %v2672_v62 = vmul.f32 %v2663_v12, %v6597_v31  ;;  %v2673_v60 = vmul.f32 %v6579_v25, %v2668_v6  ;;  %v2678_v35 = vmul.f32 %v2663_v12, %v6609_v36  ;;  %v2679_v5 = vmul.f32 %v6588_v29, %v2668_v6 }
0x11be   : > { %v5896_v34 = vpack.i.bf16 %v2676_v46, %v2675_v42  ;;  %v2680_v15 = vmul.f32 %v6620_v41, %v2667_v0  ;;  %v2681_v22 = vmul.f32 %v2663_v12, %v6634_v49  ;;  %v2682_v38 = vmul.f32 %v6618_v40, %v2668_v6 }
0x11bf   : > { %5887 = vrot.lane.b32.xlu1 %v5886_v56, %s6480_s22  ;;  %5877 = vrot.lane.b32.xlu0 %v5886_v56, %s6479_s21  ;;  %v5891_v1 = vpack.i.bf16 %v2673_v60, %v2672_v62  ;;  %v5901_v33 = vpack.i.bf16 %v2679_v5, %v2678_v35  ;;  %v2683_v8 = vmul.f32 %v6630_v48, %v2667_v0 }
0x11c0   : > { %v5906_v7 = vpack.i.bf16 %v2682_v38, %v2681_v22  ;;  %v2684_v20 = vmul.f32 %v2663_v12, %v6646_v54  ;;  %v2685_v32 = vmul.f32 %v6628_v47, %v2668_v6  ;;  %v2670_v63 = vmul.f32 %v6555_v11, %v2663_v12 }
0x11c1   : > { %v2669_v13 = vmul.f32 %v6553_v9, %v2667_v0 }
0x11c2   : > { %v5911_v14 = vpack.i.bf16 %v2684_v20, %v2683_v8 }
0x11c3   : > { %2714 = vrot.lane.b32.xlu1 %v2674_v19, %s6482_s24  ;;  %5882 = vrot.lane.b32.xlu0 %v5886_v56, %s6481_s23 }
0x11c7   : > { %2737 = vrot.lane.b32.xlu1 %v2677_v55, %s6483_s25  ;;  %2701 = vrot.lane.b32.xlu0 %v2671_v57, %s6484_s26 }
0x11cb   : > { %5897 = vrot.lane.b32.xlu1 %v5896_v34, %s6482_s24  ;;  %5892 = vrot.lane.b32.xlu0 %v5891_v1, %s6484_s26 }
0x11cf   : > { %5902 = vrot.lane.b32.xlu1 %v5901_v33, %s6483_s25  ;;  %2750 = vrot.lane.b32.xlu0 %v2680_v15, %s6485_s27 }
0x11d3   : > { %2760 = vrot.lane.b32.xlu1 %v2667_v0, %s6480_s22  ;;  %5907 = vrot.lane.b32.xlu0 %v5906_v7, %s6485_s27 }
0x11d7   : > { %2777 = vrot.lane.b32.xlu1 %v2685_v32, %s6487_s28  ;;  %5912 = vrot.lane.b32.xlu0 %v5911_v14, %s6487_s28 }
0x11db   : > { %2799 = vperm.xlu0 %5475, %v5310_v59  }
0x122d   : > { %v2725_v10 = vpop.permute.xlu0 %2724  ;;  %v2689_v51 = vpop.permute.xlu1 %2688 }
0x1231   : > { %v5888_v52 = vpop.permute.xlu1 %5887  ;;  %v5878_v39 = vpop.permute.xlu0 %5877 }
0x1232   : > { %v5880_v45 = vunpack.i.h.bf16 %v5878_v39  ;;  %v5879_v17 = vunpack.i.l.bf16 %v5878_v39  ;;  %v5889_v39 = vunpack.i.l.bf16 %v5888_v52 }
0x1234   : > { %v2694_v2 = vsel %vm519_vm10, %v2689_v51, %v5879_v17  ;;  %v2695_v6 = vsel %vm519_vm10, %v5879_v17, %v5880_v45  ;;  %v5890_v51 = vunpack.i.h.bf16 %v5888_v52 }
0x1235   : > { %v2715_v56 = vpop.permute.xlu1 %2714  ;;  %v5883_v19 = vpop.permute.xlu0 %5882  ;;  %v2784_v55 = vpack.c.bf16 %v2695_v6, %v2670_v63  ;;  %v2783_v57 = vpack.c.bf16 %v2694_v2, %v2669_v13 }
0x1236   : > { %v5885_v5 = vunpack.i.h.bf16 %v5883_v19  ;;  %v5884_v0 = vunpack.i.l.bf16 %v5883_v19 }
0x1237   : > { %2811 = vmatprep.subr.bf16.mxu1 %v2784_v55 }
0x1238   : > { %2812 = vmatpush1.bf16.msra.mxu1 %v2783_v57  ;;  %v2730_v45 = vsel %vm558_vm13, %v2725_v10, %v5884_v0  ;;  %v2731_v63 = vsel %vm558_vm13, %v5884_v0, %v5885_v5 }
0x1239   : > { %v2738_v42 = vpop.permute.xlu1 %2737  ;;  %v2702_v46 = vpop.permute.xlu0 %2701 }
0x123d   : > { %v5898_v62 = vpop.permute.xlu1 %5897  ;;  %v5893_v60 = vpop.permute.xlu0 %5892 }
0x123e   : > { %v5900_v34 = vunpack.i.h.bf16 %v5898_v62  ;;  %v5899_v1 = vunpack.i.l.bf16 %v5898_v62  ;;  %v5895_v35 = vunpack.i.h.bf16 %v5893_v60  ;;  %v5894_v12 = vunpack.i.l.bf16 %v5893_v60 }
0x1240   : > { %v2720_v33 = vsel %vm547_vm11, %v2715_v56, %v5899_v1  ;;  %v2707_v15 = vsel %vm533_vm12, %v2702_v46, %v5894_v12  ;;  %v2708_v22 = vsel %vm533_vm12, %v5894_v12, %v5895_v35  ;;  %v2721_v38 = vsel %vm547_vm11, %v5899_v1, %v5900_v34 }
0x1241   : > { %v5903_v7 = vpop.permute.xlu1 %5902  ;;  %v2751_v8 = vpop.permute.xlu0 %2750  ;;  %v2786_v20 = vpack.c.bf16 %v2721_v38, %v2708_v22  ;;  %v2785_v32 = vpack.c.bf16 %v2720_v33, %v2707_v15  ;;  %v5309_v38 = vld [vmem:[%s8523_s2 + $0x14] sm:$0xf] }
0x1242   : > { %v5905_v14 = vunpack.i.h.bf16 %v5903_v7  ;;  %v5904_v59 = vunpack.i.l.bf16 %v5903_v7 }
0x1243   : > { %2813 = vmatprep.subr.bf16.mxu1 %v2786_v20 }
0x1244   : > { %v2743_v17 = vsel %vm572_vm14, %v2738_v42, %v5904_v59  ;;  %2814 = vmatpush1.bf16.msra.mxu1 %v2785_v32  ;;  %v2744_v13 = vsel %vm572_vm14, %v5904_v59, %v5905_v14  ;;  %v2767_v42 = vsel %vm597_vm15, %v5889_v39, %v5890_v51 }
0x1245   : > { %v2761_v2 = vpop.permute.xlu1 %2760  ;;  %v5908_v6 = vpop.permute.xlu0 %5907  ;;  %v2788_v56 = vpack.c.bf16 %v2744_v13, %v2731_v63  ;;  %v2787_v19 = vpack.c.bf16 %v2743_v17, %v2730_v45 }
0x1246   : > { %v5910_v55 = vunpack.i.h.bf16 %v5908_v6  ;;  %v5909_v57 = vunpack.i.l.bf16 %v5908_v6  ;;  %v2766_v46 = vsel %vm597_vm15, %v2761_v2, %v5889_v39 }
0x1247   : > { %2815 = vmatprep.subr.bf16.mxu1 %v2788_v56 }
0x1248   : > { %v2756_v52 = vsel %vm586_vm0, %v2751_v8, %v5909_v57  ;;  %2816 = vmatpush1.bf16.msra.mxu1 %v2787_v19  ;;  %v2757_v10 = vsel %vm586_vm0, %v5909_v57, %v5910_v55 }
0x1249   : > { %v5913_v62 = vpop.permute.xlu0 %5912  ;;  %v2790_v60 = vpack.c.bf16 %v2767_v42, %v2757_v10  ;;  %v2789_v34 = vpack.c.bf16 %v2766_v46, %v2756_v52  ;;  %v2778_v12 = vpop.permute.xlu1 %2777 }
0x124a   : > { %v5915_v1 = vunpack.i.h.bf16 %v5913_v62  ;;  %v5914_v35 = vunpack.i.l.bf16 %v5913_v62 }
0x124b   : > { %2817 = vmatprep.subr.bf16.mxu1 %v2790_v60 }
0x124c   : > { %2818 = vmatpush1.bf16.msra.mxu1 %v2789_v34  ;;  %v2780_v5 = vsel %vm611_vm1, %v5915_v1, %v2778_v12  ;;  %v2779_v0 = vsel %vm611_vm1, %v5914_v35, %v5915_v1 }
0x124d   : > { %v2792_v33 = vpack.c.bf16 %v2780_v5, %v2780_v5  ;;  %v2791_v15 = vpack.c.bf16 %v2779_v0, %v2779_v0 }
0x124f   : > { %5311 = vmatprep.subr.msk.bf16.mxu1 %vm637_vm2, %v2792_v33  ;;  %v2806_v22 = vsel %vm637_vm2, %v2791_v15, 0 }
0x1250   : > { %2820 = vmatpush1.bf16.msra.mxu1 %v2806_v22 }
0x1253   : > { %5312 = vmatmul.mubr.msk.bf16.vlgmr.msra.gmra.mrb[20].mxu1 %vm633_vm3, %v5309_v38 }
0x1254   : > { %3213 = vmatprep.mubr.bf16.mxu1 %v6486_v58 }
0x125a   : > { %v7589_v7 = vpop.permute.xlu0 %2799 }
0x1326   : > { %v2845_v8 = vpop.f32.mrb[20].mxu1 }
0x1327   : > { %v2846_v20 = vadd.f32 %v2845_v8, %v7589_v7  ;;  %v2847_v32 = vpop.f32.mrb[21].mxu1 }
0x1328   : > { %v2848_v14 = vadd.f32 %v2847_v32, %v7589_v7  ;;  %v2849_v59 = vpop.f32.mrb[22].mxu1 }
0x1329   : > { %6436 = vtanh.f32 %v2846_v20  ;;  %v2850_v51 = vpop.f32.mrb[23].mxu1 }
0x132a   : > { %6438 = vtanh.f32 %v2848_v14 }
0x1333   : > { %v6437_v39 = vpop.eup %6436 }
0x1334   : > { %v6439_v45 = vpop.eup %6438  ;;  %5076 = vst [vmem:[%s379_s10] sm:$0xff] %v6437_v39  ;;  %2856 = vrot.lane.b32.xlu1 %v6437_v39, %s6472_s15 }
0x1335   : > { %5077 = vst [vmem:[%s379_s10 + $0x8] sm:$0xff] %v6439_v45  ;;  %2858 = vrot.lane.b32.xlu0 %v6439_v45, %s6472_s15 }
0x13a6   : > { %v2857_v17 = vpop.permute.xlu1 %2856 }
0x13a7   : > { %v2864_v63 = vsel %vm438_vm4, 0.0, %v2857_v17  ;;  %v2859_v13 = vpop.permute.xlu0 %2858 }
0x13a8   : > { %v2860_v2 = vsel %vm438_vm4, %v2857_v17, %v2859_v13  ;;  %v2865_v6 = vsel %vm438_vm4, %v2859_v13, 0.0  ;;  %2921 = vrot.lane.b32.xlu1 %v2864_v63, %s6481_s23  ;;  %2885 = vrot.lane.b32.xlu0 %v2864_v63, %s6479_s21  ;;  %v2871_v19 = vmul.f32 %v6577_v24, %v2864_v63  ;;  %v2874_v55 = vmul.f32 %v6583_v27, %v2864_v63 }
0x13a9   : > { %v5926_v56 = vpack.i.bf16 %v2865_v6, %v2860_v2  ;;  %v2868_v57 = vmul.f32 %v6581_v26, %v2864_v63  ;;  %v2872_v46 = vmul.f32 %v2860_v2, %v6592_v30  ;;  %v2873_v52 = vmul.f32 %v6575_v23, %v2865_v6 }
0x13aa   : > { %v2869_v10 = vmul.f32 %v2860_v2, %v6597_v31  ;;  %v2870_v42 = vmul.f32 %v6579_v25, %v2865_v6  ;;  %v2875_v34 = vmul.f32 %v2860_v2, %v6609_v36  ;;  %v2876_v1 = vmul.f32 %v6588_v29, %v2865_v6 }
0x13ab   : > { %v5936_v62 = vpack.i.bf16 %v2873_v52, %v2872_v46  ;;  %v2877_v12 = vmul.f32 %v6620_v41, %v2864_v63  ;;  %v2878_v5 = vmul.f32 %v2860_v2, %v6634_v49  ;;  %v2879_v0 = vmul.f32 %v6618_v40, %v2865_v6 }
0x13ac   : > { %5927 = vrot.lane.b32.xlu0 %v5926_v56, %s6480_s22  ;;  %5917 = vrot.lane.b32.xlu1 %v5926_v56, %s6479_s21  ;;  %v5931_v60 = vpack.i.bf16 %v2870_v42, %v2869_v10  ;;  %v5941_v35 = vpack.i.bf16 %v2876_v1, %v2875_v34  ;;  %v2880_v15 = vmul.f32 %v6630_v48, %v2864_v63 }
0x13ad   : > { %v5946_v33 = vpack.i.bf16 %v2879_v0, %v2878_v5  ;;  %v2881_v22 = vmul.f32 %v2860_v2, %v6646_v54  ;;  %v2882_v38 = vmul.f32 %v6628_v47, %v2865_v6  ;;  %v2867_v45 = vmul.f32 %v6555_v11, %v2860_v2 }
0x13ae   : > { %v2866_v17 = vmul.f32 %v6553_v9, %v2864_v63 }
0x13af   : > { %v5951_v8 = vpack.i.bf16 %v2881_v22, %v2880_v15 }
0x13b0   : > { %2911 = vrot.lane.b32.xlu0 %v2871_v19, %s6482_s24  ;;  %5922 = vrot.lane.b32.xlu1 %v5926_v56, %s6481_s23 }
0x13b4   : > { %2934 = vrot.lane.b32.xlu0 %v2874_v55, %s6483_s25  ;;  %2898 = vrot.lane.b32.xlu1 %v2868_v57, %s6484_s26 }
0x13b8   : > { %5937 = vrot.lane.b32.xlu0 %v5936_v62, %s6482_s24  ;;  %5932 = vrot.lane.b32.xlu1 %v5931_v60, %s6484_s26 }
0x13bc   : > { %5942 = vrot.lane.b32.xlu0 %v5941_v35, %s6483_s25  ;;  %2947 = vrot.lane.b32.xlu1 %v2877_v12, %s6485_s27 }
0x13c0   : > { %2957 = vrot.lane.b32.xlu0 %v2864_v63, %s6480_s22  ;;  %5947 = vrot.lane.b32.xlu1 %v5946_v33, %s6485_s27 }
0x13c4   : > { %2974 = vrot.lane.b32.xlu0 %v2882_v38, %s6487_s28  ;;  %5952 = vrot.lane.b32.xlu1 %v5951_v8, %s6487_s28 }
0x141a   : > { %v2922_v20 = vpop.permute.xlu1 %2921  ;;  %v2886_v32 = vpop.permute.xlu0 %2885 }
0x141e   : > { %v5928_v14 = vpop.permute.xlu0 %5927  ;;  %v5918_v59 = vpop.permute.xlu1 %5917 }
0x141f   : > { %v5920_v51 = vunpack.i.h.bf16 %v5918_v59  ;;  %v5919_v39 = vunpack.i.l.bf16 %v5918_v59  ;;  %v5930_v59 = vunpack.i.h.bf16 %v5928_v14 }
0x1421   : > { %v2891_v13 = vsel %vm519_vm10, %v2886_v32, %v5919_v39  ;;  %v2892_v56 = vsel %vm519_vm10, %v5919_v39, %v5920_v51  ;;  %v5929_v51 = vunpack.i.l.bf16 %v5928_v14 }
0x1422   : > { %v2912_v6 = vpop.permute.xlu0 %2911  ;;  %v5923_v19 = vpop.permute.xlu1 %5922  ;;  %v2981_v55 = vpack.c.bf16 %v2892_v56, %v2867_v45  ;;  %v2980_v57 = vpack.c.bf16 %v2891_v13, %v2866_v17 }
0x1423   : > { %v5925_v1 = vunpack.i.h.bf16 %v5923_v19  ;;  %v5924_v63 = vunpack.i.l.bf16 %v5923_v19 }
0x1424   : > { %2996 = vmatprep.subr.bf16.mxu0 %v2981_v55 }
0x1425   : > { %2997 = vmatpush1.bf16.msra.mxu0 %v2980_v57  ;;  %v2927_v39 = vsel %vm558_vm13, %v2922_v20, %v5924_v63  ;;  %v2928_v17 = vsel %vm558_vm13, %v5924_v63, %v5925_v1 }
0x1426   : > { %v2935_v46 = vpop.permute.xlu0 %2934  ;;  %v2899_v52 = vpop.permute.xlu1 %2898 }
0x142a   : > { %v5938_v10 = vpop.permute.xlu0 %5937  ;;  %v5933_v42 = vpop.permute.xlu1 %5932 }
0x142b   : > { %v5940_v62 = vunpack.i.h.bf16 %v5938_v10  ;;  %v5939_v60 = vunpack.i.l.bf16 %v5938_v10  ;;  %v5935_v34 = vunpack.i.h.bf16 %v5933_v42  ;;  %v5934_v2 = vunpack.i.l.bf16 %v5933_v42 }
0x142d   : > { %v2917_v35 = vsel %vm547_vm11, %v2912_v6, %v5939_v60  ;;  %v2904_v12 = vsel %vm533_vm12, %v2899_v52, %v5934_v2  ;;  %v2905_v5 = vsel %vm533_vm12, %v5934_v2, %v5935_v34  ;;  %v2918_v0 = vsel %vm547_vm11, %v5939_v60, %v5940_v62 }
0x142e   : > { %v5943_v33 = vpop.permute.xlu0 %5942  ;;  %v2948_v15 = vpop.permute.xlu1 %2947  ;;  %v2983_v22 = vpack.c.bf16 %v2918_v0, %v2905_v5  ;;  %v2982_v38 = vpack.c.bf16 %v2917_v35, %v2904_v12 }
0x142f   : > { %v5945_v8 = vunpack.i.h.bf16 %v5943_v33  ;;  %v5944_v32 = vunpack.i.l.bf16 %v5943_v33  ;;  %v6452_v33 = vld [vmem:[%s8525_s4] sm:$0xf] }
0x1430   : > { %2998 = vmatprep.subr.bf16.mxu0 %v2983_v22 }
0x1431   : > { %v2940_v45 = vsel %vm572_vm14, %v2935_v46, %v5944_v32  ;;  %2999 = vmatpush1.bf16.msra.mxu0 %v2982_v38  ;;  %v2941_v13 = vsel %vm572_vm14, %v5944_v32, %v5945_v8  ;;  %v2964_v46 = vsel %vm597_vm15, %v5929_v51, %v5930_v59 }
0x1432   : > { %v2958_v56 = vpop.permute.xlu0 %2957  ;;  %v5948_v6 = vpop.permute.xlu1 %5947  ;;  %v2985_v19 = vpack.c.bf16 %v2941_v13, %v2928_v17  ;;  %v2984_v55 = vpack.c.bf16 %v2940_v45, %v2927_v39 }
0x1433   : > { %v5950_v57 = vunpack.i.h.bf16 %v5948_v6  ;;  %v5949_v52 = vunpack.i.l.bf16 %v5948_v6  ;;  %v2963_v10 = vsel %vm597_vm15, %v2958_v56, %v5929_v51 }
0x1434   : > { %3000 = vmatprep.subr.bf16.mxu0 %v2985_v19 }
0x1435   : > { %v2953_v14 = vsel %vm586_vm0, %v2948_v15, %v5949_v52  ;;  %3001 = vmatpush1.bf16.msra.mxu0 %v2984_v55  ;;  %v2954_v20 = vsel %vm586_vm0, %v5949_v52, %v5950_v57 }
0x1436   : > { %v5953_v42 = vpop.permute.xlu1 %5952  ;;  %v2987_v62 = vpack.c.bf16 %v2964_v46, %v2954_v20  ;;  %v2986_v60 = vpack.c.bf16 %v2963_v10, %v2953_v14  ;;  %v2975_v1 = vpop.permute.xlu0 %2974 }
0x1437   : > { %v5955_v34 = vunpack.i.h.bf16 %v5953_v42  ;;  %v5954_v2 = vunpack.i.l.bf16 %v5953_v42 }
0x1438   : > { %3002 = vmatprep.subr.bf16.mxu0 %v2987_v62 }
0x1439   : > { %3003 = vmatpush1.bf16.msra.mxu0 %v2986_v60  ;;  %v2977_v63 = vsel %vm611_vm1, %v5955_v34, %v2975_v1  ;;  %v2976_v35 = vsel %vm611_vm1, %v5954_v2, %v5955_v34 }
0x143a   : > { %v2989_v12 = vpack.c.bf16 %v2977_v63, %v2977_v63  ;;  %v2988_v5 = vpack.c.bf16 %v2976_v35, %v2976_v35 }
0x143c   : > { %5313 = vmatprep.subr.msk.bf16.mxu0 %vm637_vm2, %v2989_v12  ;;  %v2991_v0 = vsel %vm637_vm2, %v2988_v5, 0 }
0x143d   : > { %3005 = vmatpush1.bf16.msra.mxu0 %v2991_v0 }
0x1440   : > { %5314 = vmatmul.mubr.msk.bf16.vlgmr.msra.gmra.mrb[24].mxu0 %vm633_vm3, %v6452_v33 }
0x1441   : > { %3398 = vmatprep.mubr.bf16.mxu0 %v6486_v58 }
0x1513   : > { %v3030_v15 = vpop.f32.mrb[24].mxu0 }
0x1514   : > { %v7659_v22 = vadd.f32 %v3030_v15, %v6694_v18  ;;  %v3032_v38 = vpop.f32.mrb[25].mxu0 }
0x1515   : > { %v7662_v8 = vadd.f32 %v3032_v38, %v6694_v18  ;;  %v3034_v32 = vpop.f32.mrb[26].mxu0 }
0x1516   : > { %v3037_v59 = vmax.f32 %v7659_v22, 0.0  ;;  %v3035_v51 = vpop.f32.mrb[27].mxu0 }
0x1517   : > { %v3038_v39 = vmax.f32 %v7662_v8, 0.0 }
0x1518   : > { %3041 = vrot.lane.b32.xlu1 %v3037_v59, %s6472_s15 }
0x1519   : > { %3043 = vrot.lane.b32.xlu0 %v3038_v39, %s6472_s15 }
0x158a   : > { %v3042_v45 = vpop.permute.xlu1 %3041 }
0x158b   : > { %v3049_v17 = vsel %vm438_vm4, 0.0, %v3042_v45  ;;  %v3044_v13 = vpop.permute.xlu0 %3043 }
0x158c   : > { %v3045_v18 = vsel %vm438_vm4, %v3042_v45, %v3044_v13  ;;  %v3050_v56 = vsel %vm438_vm4, %v3044_v13, 0.0  ;;  %3106 = vrot.lane.b32.xlu1 %v3049_v17, %s6481_s23  ;;  %3070 = vrot.lane.b32.xlu0 %v3049_v17, %s6479_s21  ;;  %v3056_v19 = vmul.f32 %v6577_v24, %v3049_v17  ;;  %v3059_v55 = vmul.f32 %v6583_v27, %v3049_v17 }
0x158d   : > { %v5966_v6 = vpack.i.bf16 %v3050_v56, %v3045_v18  ;;  %v3053_v57 = vmul.f32 %v6581_v26, %v3049_v17  ;;  %v3057_v52 = vmul.f32 %v3045_v18, %v6592_v30  ;;  %v3058_v10 = vmul.f32 %v6575_v23, %v3050_v56 }
0x158e   : > { %v3054_v14 = vmul.f32 %v3045_v18, %v6597_v31  ;;  %v3055_v20 = vmul.f32 %v6579_v25, %v3050_v56  ;;  %v3060_v62 = vmul.f32 %v3045_v18, %v6609_v36  ;;  %v3061_v60 = vmul.f32 %v6588_v29, %v3050_v56 }
0x158f   : > { %v5976_v46 = vpack.i.bf16 %v3058_v10, %v3057_v52  ;;  %v3062_v2 = vmul.f32 %v6620_v41, %v3049_v17  ;;  %v3063_v1 = vmul.f32 %v3045_v18, %v6634_v49  ;;  %v3064_v63 = vmul.f32 %v6618_v40, %v3050_v56 }
0x1590   : > { %5967 = vrot.lane.b32.xlu0 %v5966_v6, %s6480_s22  ;;  %5957 = vrot.lane.b32.xlu1 %v5966_v6, %s6479_s21  ;;  %v5971_v42 = vpack.i.bf16 %v3055_v20, %v3054_v14  ;;  %v5981_v34 = vpack.i.bf16 %v3061_v60, %v3060_v62  ;;  %v3065_v12 = vmul.f32 %v6630_v48, %v3049_v17 }
0x1591   : > { %v5986_v35 = vpack.i.bf16 %v3064_v63, %v3063_v1  ;;  %v3066_v5 = vmul.f32 %v3045_v18, %v6646_v54  ;;  %v3067_v0 = vmul.f32 %v6628_v47, %v3050_v56 }
0x1593   : > { %v5991_v33 = vpack.i.bf16 %v3066_v5, %v3065_v12 }
0x1594   : > { %3096 = vrot.lane.b32.xlu0 %v3056_v19, %s6482_s24  ;;  %5962 = vrot.lane.b32.xlu1 %v5966_v6, %s6481_s23  ;;  %v3052_v6 = vmul.f32 %v6555_v11, %v3045_v18  ;;  %v3051_v19 = vmul.f32 %v6553_v9, %v3049_v17 }
0x1598   : > { %3119 = vrot.lane.b32.xlu0 %v3059_v55, %s6483_s25  ;;  %3083 = vrot.lane.b32.xlu1 %v3053_v57, %s6484_s26 }
0x159c   : > { %5977 = vrot.lane.b32.xlu0 %v5976_v46, %s6482_s24  ;;  %5972 = vrot.lane.b32.xlu1 %v5971_v42, %s6484_s26 }
0x15a0   : > { %5982 = vrot.lane.b32.xlu0 %v5981_v34, %s6483_s25  ;;  %3132 = vrot.lane.b32.xlu1 %v3062_v2, %s6485_s27 }
0x15a4   : > { %3142 = vrot.lane.b32.xlu0 %v3049_v17, %s6480_s22  ;;  %5987 = vrot.lane.b32.xlu1 %v5986_v35, %s6485_s27 }
0x15a8   : > { %3159 = vrot.lane.b32.xlu0 %v3067_v0, %s6487_s28  ;;  %5992 = vrot.lane.b32.xlu1 %v5991_v33, %s6487_s28 }
0x15fe   : > { %v3107_v15 = vpop.permute.xlu1 %3106  ;;  %v3071_v38 = vpop.permute.xlu0 %3070 }
0x1602   : > { %v5968_v32 = vpop.permute.xlu0 %5967  ;;  %v5958_v51 = vpop.permute.xlu1 %5957 }
0x1603   : > { %v5960_v45 = vunpack.i.h.bf16 %v5958_v51  ;;  %v5959_v13 = vunpack.i.l.bf16 %v5958_v51 }
0x1605   : > { %v3076_v55 = vsel %vm519_vm10, %v3071_v38, %v5959_v13  ;;  %v3077_v57 = vsel %vm519_vm10, %v5959_v13, %v5960_v45 }
0x1606   : > { %v3097_v56 = vpop.permute.xlu0 %3096  ;;  %v5963_v52 = vpop.permute.xlu1 %5962  ;;  %v3166_v10 = vpack.c.bf16 %v3077_v57, %v3052_v6  ;;  %v3165_v14 = vpack.c.bf16 %v3076_v55, %v3051_v19  ;;  %v5970_v6 = vunpack.i.h.bf16 %v5968_v32  ;;  %v5969_v19 = vunpack.i.l.bf16 %v5968_v32 }
0x1607   : > { %v5965_v1 = vunpack.i.h.bf16 %v5963_v52  ;;  %v5964_v17 = vunpack.i.l.bf16 %v5963_v52 }
0x1608   : > { %3181 = vmatprep.subr.bf16.mxu1 %v3166_v10 }
0x1609   : > { %3182 = vmatpush1.bf16.msra.mxu1 %v3165_v14  ;;  %v3112_v55 = vsel %vm558_vm13, %v3107_v15, %v5964_v17 }
0x160a   : > { %v3120_v20 = vpop.permute.xlu0 %3119  ;;  %v3084_v46 = vpop.permute.xlu1 %3083 }
0x160e   : > { %v5978_v42 = vpop.permute.xlu0 %5977  ;;  %v5973_v62 = vpop.permute.xlu1 %5972 }
0x160f   : > { %v5980_v60 = vunpack.i.h.bf16 %v5978_v42  ;;  %v5979_v34 = vunpack.i.l.bf16 %v5978_v42  ;;  %v5975_v2 = vunpack.i.h.bf16 %v5973_v62  ;;  %v5974_v18 = vunpack.i.l.bf16 %v5973_v62 }
0x1611   : > { %v3102_v63 = vsel %vm547_vm11, %v3097_v56, %v5979_v34  ;;  %v3089_v35 = vsel %vm533_vm12, %v3084_v46, %v5974_v18  ;;  %v3090_v12 = vsel %vm533_vm12, %v5974_v18, %v5975_v2  ;;  %v3103_v5 = vsel %vm547_vm11, %v5979_v34, %v5980_v60 }
0x1612   : > { %v5983_v0 = vpop.permute.xlu0 %5982  ;;  %v3133_v33 = vpop.permute.xlu1 %3132  ;;  %v3168_v38 = vpack.c.bf16 %v3103_v5, %v3090_v12  ;;  %v3167_v51 = vpack.c.bf16 %v3102_v63, %v3089_v35  ;;  %v3113_v56 = vsel %vm558_vm13, %v5964_v17, %v5965_v1 }
0x1613   : > { %v5985_v45 = vunpack.i.h.bf16 %v5983_v0  ;;  %v5984_v13 = vunpack.i.l.bf16 %v5983_v0 }
0x1614   : > { %3183 = vmatprep.subr.bf16.mxu1 %v3168_v38 }
0x1615   : > { %v3125_v57 = vsel %vm572_vm14, %v3120_v20, %v5984_v13  ;;  %3184 = vmatpush1.bf16.msra.mxu1 %v3167_v51  ;;  %v3126_v52 = vsel %vm572_vm14, %v5984_v13, %v5985_v45  ;;  %v3149_v20 = vsel %vm597_vm15, %v5969_v19, %v5970_v6  ;;  %v6453_v51 = vld [vmem:[%s8525_s4 + $0x4] sm:$0xf] }
0x1616   : > { %v3143_v10 = vpop.permute.xlu0 %3142  ;;  %v5988_v14 = vpop.permute.xlu1 %5987  ;;  %v3170_v46 = vpack.c.bf16 %v3126_v52, %v3113_v56  ;;  %v3169_v42 = vpack.c.bf16 %v3125_v57, %v3112_v55 }
0x1617   : > { %v5990_v62 = vunpack.i.h.bf16 %v5988_v14  ;;  %v5989_v60 = vunpack.i.l.bf16 %v5988_v14  ;;  %v3148_v34 = vsel %vm597_vm15, %v3143_v10, %v5969_v19 }
0x1618   : > { %3185 = vmatprep.subr.bf16.mxu1 %v3170_v46 }
0x1619   : > { %v3138_v32 = vsel %vm586_vm0, %v3133_v33, %v5989_v60  ;;  %3186 = vmatpush1.bf16.msra.mxu1 %v3169_v42  ;;  %v3139_v15 = vsel %vm586_vm0, %v5989_v60, %v5990_v62 }
0x161a   : > { %v5993_v2 = vpop.permute.xlu1 %5992  ;;  %v3172_v18 = vpack.c.bf16 %v3149_v20, %v3139_v15  ;;  %v3171_v1 = vpack.c.bf16 %v3148_v34, %v3138_v32  ;;  %v3160_v35 = vpop.permute.xlu0 %3159 }
0x161b   : > { %v5995_v17 = vunpack.i.h.bf16 %v5993_v2  ;;  %v5994_v63 = vunpack.i.l.bf16 %v5993_v2 }
0x161c   : > { %3187 = vmatprep.subr.bf16.mxu1 %v3172_v18 }
0x161d   : > { %3188 = vmatpush1.bf16.msra.mxu1 %v3171_v1  ;;  %v3162_v12 = vsel %vm611_vm1, %v5995_v17, %v3160_v35  ;;  %v3161_v5 = vsel %vm611_vm1, %v5994_v63, %v5995_v17 }
0x161e   : > { %v3174_v0 = vpack.c.bf16 %v3162_v12, %v3162_v12  ;;  %v3173_v38 = vpack.c.bf16 %v3161_v5, %v3161_v5 }
0x1620   : > { %5315 = vmatprep.subr.msk.bf16.mxu1 %vm637_vm2, %v3174_v0  ;;  %v3176_v33 = vsel %vm637_vm2, %v3173_v38, 0 }
0x1621   : > { %3190 = vmatpush1.bf16.msra.mxu1 %v3176_v33 }
0x1624   : > { %5316 = vmatmul.mubr.msk.bf16.vlgmr.msra.gmra.mrb[24].mxu1 %vm633_vm3, %v6453_v51 }
0x1625   : > { %3583 = vmatprep.mubr.bf16.mxu1 %v6486_v58 }
0x16f7   : > { %v3215_v45 = vpop.f32.mrb[24].mxu1 }
0x16f8   : > { %v3216_v13 = vadd.f32 %v3215_v45, %v6772_v37  ;;  %v3217_v6 = vpop.f32.mrb[25].mxu1 }
0x16f9   : > { %v3218_v19 = vadd.f32 %v3217_v6, %v6772_v37  ;;  %v3219_v55 = vpop.f32.mrb[26].mxu1 }
0x16fa   : > { %v3222_v57 = vmax.f32 %v3216_v13, 0.0  ;;  %v3220_v56 = vpop.f32.mrb[27].mxu1 }
0x16fb   : > { %v3223_v52 = vmax.f32 %v3218_v19, 0.0 }
0x16fc   : > { %3226 = vrot.lane.b32.xlu1 %v3222_v57, %s6472_s15 }
0x16fd   : > { %3228 = vrot.lane.b32.xlu0 %v3223_v52, %s6472_s15 }
0x176e   : > { %v3227_v10 = vpop.permute.xlu1 %3226 }
0x176f   : > { %v3234_v14 = vsel %vm438_vm4, 0.0, %v3227_v10  ;;  %v3229_v46 = vpop.permute.xlu0 %3228 }
0x1770   : > { %v3230_v42 = vsel %vm438_vm4, %v3227_v10, %v3229_v46  ;;  %v3235_v62 = vsel %vm438_vm4, %v3229_v46, 0.0  ;;  %3291 = vrot.lane.b32.xlu1 %v3234_v14, %s6481_s23  ;;  %3255 = vrot.lane.b32.xlu0 %v3234_v14, %s6479_s21  ;;  %v3241_v60 = vmul.f32 %v6577_v24, %v3234_v14  ;;  %v3244_v34 = vmul.f32 %v6583_v27, %v3234_v14 }
0x1771   : > { %v6006_v37 = vpack.i.bf16 %v3235_v62, %v3230_v42  ;;  %v3238_v32 = vmul.f32 %v6581_v26, %v3234_v14  ;;  %v3242_v15 = vmul.f32 %v3230_v42, %v6592_v30  ;;  %v3243_v20 = vmul.f32 %v6575_v23, %v3235_v62 }
0x1772   : > { %v3239_v2 = vmul.f32 %v3230_v42, %v6597_v31  ;;  %v3240_v18 = vmul.f32 %v6579_v25, %v3235_v62  ;;  %v3245_v63 = vmul.f32 %v3230_v42, %v6609_v36  ;;  %v3246_v35 = vmul.f32 %v6588_v29, %v3235_v62 }
0x1773   : > { %v6016_v1 = vpack.i.bf16 %v3243_v20, %v3242_v15  ;;  %v3247_v5 = vmul.f32 %v6620_v41, %v3234_v14  ;;  %v3248_v0 = vmul.f32 %v3230_v42, %v6634_v49  ;;  %v3249_v38 = vmul.f32 %v6618_v40, %v3235_v62 }
0x1774   : > { %6007 = vrot.lane.b32.xlu0 %v6006_v37, %s6480_s22  ;;  %5997 = vrot.lane.b32.xlu1 %v6006_v37, %s6479_s21  ;;  %v6011_v17 = vpack.i.bf16 %v3240_v18, %v3239_v2  ;;  %v6021_v12 = vpack.i.bf16 %v3246_v35, %v3245_v63  ;;  %v3250_v51 = vmul.f32 %v6630_v48, %v3234_v14 }
0x1775   : > { %v6026_v33 = vpack.i.bf16 %v3249_v38, %v3248_v0  ;;  %v3251_v45 = vmul.f32 %v3230_v42, %v6646_v54  ;;  %v3252_v13 = vmul.f32 %v6628_v47, %v3235_v62  ;;  %v3237_v46 = vmul.f32 %v6555_v11, %v3230_v42 }
0x1777   : > { %v6031_v6 = vpack.i.bf16 %v3251_v45, %v3250_v51 }
0x1778   : > { %3281 = vrot.lane.b32.xlu0 %v3241_v60, %s6482_s24  ;;  %6002 = vrot.lane.b32.xlu1 %v6006_v37, %s6481_s23  ;;  %v3236_v37 = vmul.f32 %v6553_v9, %v3234_v14 }
0x177c   : > { %3304 = vrot.lane.b32.xlu0 %v3244_v34, %s6483_s25  ;;  %3268 = vrot.lane.b32.xlu1 %v3238_v32, %s6484_s26 }
0x1780   : > { %6017 = vrot.lane.b32.xlu0 %v6016_v1, %s6482_s24  ;;  %6012 = vrot.lane.b32.xlu1 %v6011_v17, %s6484_s26 }
0x1784   : > { %6022 = vrot.lane.b32.xlu0 %v6021_v12, %s6483_s25  ;;  %3317 = vrot.lane.b32.xlu1 %v3247_v5, %s6485_s27 }
0x1788   : > { %3327 = vrot.lane.b32.xlu0 %v3234_v14, %s6480_s22  ;;  %6027 = vrot.lane.b32.xlu1 %v6026_v33, %s6485_s27 }
0x178c   : > { %3344 = vrot.lane.b32.xlu0 %v3252_v13, %s6487_s28  ;;  %6032 = vrot.lane.b32.xlu1 %v6031_v6, %s6487_s28 }
0x17e2   : > { %v3292_v19 = vpop.permute.xlu1 %3291  ;;  %v3256_v55 = vpop.permute.xlu0 %3255 }
0x17e6   : > { %v6008_v57 = vpop.permute.xlu0 %6007  ;;  %v5998_v56 = vpop.permute.xlu1 %5997 }
0x17e7   : > { %v6000_v52 = vunpack.i.h.bf16 %v5998_v56  ;;  %v5999_v10 = vunpack.i.l.bf16 %v5998_v56 }
0x17e9   : > { %v3261_v60 = vsel %vm519_vm10, %v3256_v55, %v5999_v10  ;;  %v3262_v34 = vsel %vm519_vm10, %v5999_v10, %v6000_v52  ;;  %v6010_v10 = vunpack.i.h.bf16 %v6008_v57 }
0x17ea   : > { %v3282_v62 = vpop.permute.xlu0 %3281  ;;  %v6003_v32 = vpop.permute.xlu1 %6002  ;;  %v3351_v15 = vpack.c.bf16 %v3262_v34, %v3237_v46  ;;  %v3350_v20 = vpack.c.bf16 %v3261_v60, %v3236_v37  ;;  %v6009_v46 = vunpack.i.l.bf16 %v6008_v57 }
0x17eb   : > { %v6005_v5 = vunpack.i.h.bf16 %v6003_v32  ;;  %v6004_v14 = vunpack.i.l.bf16 %v6003_v32 }
0x17ec   : > { %3366 = vmatprep.subr.bf16.mxu0 %v3351_v15 }
0x17ed   : > { %3367 = vmatpush1.bf16.msra.mxu0 %v3350_v20  ;;  %v3297_v37 = vsel %vm558_vm13, %v3292_v19, %v6004_v14  ;;  %v3298_v34 = vsel %vm558_vm13, %v6004_v14, %v6005_v5 }
0x17ee   : > { %v3305_v2 = vpop.permute.xlu0 %3304  ;;  %v3269_v18 = vpop.permute.xlu1 %3268 }
0x17f2   : > { %v6018_v1 = vpop.permute.xlu0 %6017  ;;  %v6013_v17 = vpop.permute.xlu1 %6012 }
0x17f3   : > { %v6020_v63 = vunpack.i.h.bf16 %v6018_v1  ;;  %v6019_v35 = vunpack.i.l.bf16 %v6018_v1  ;;  %v6015_v12 = vunpack.i.h.bf16 %v6013_v17  ;;  %v6014_v42 = vunpack.i.l.bf16 %v6013_v17 }
0x17f5   : > { %v3287_v0 = vsel %vm547_vm11, %v3282_v62, %v6019_v35  ;;  %v3274_v38 = vsel %vm533_vm12, %v3269_v18, %v6014_v42  ;;  %v3275_v33 = vsel %vm533_vm12, %v6014_v42, %v6015_v12  ;;  %v3288_v51 = vsel %vm547_vm11, %v6019_v35, %v6020_v63 }
0x17f6   : > { %v6023_v45 = vpop.permute.xlu0 %6022  ;;  %v3318_v13 = vpop.permute.xlu1 %3317  ;;  %v3353_v6 = vpack.c.bf16 %v3288_v51, %v3275_v33  ;;  %v3352_v55 = vpack.c.bf16 %v3287_v0, %v3274_v38 }
0x17f7   : > { %v6025_v56 = vunpack.i.h.bf16 %v6023_v45  ;;  %v6024_v52 = vunpack.i.l.bf16 %v6023_v45 }
0x17f8   : > { %3368 = vmatprep.subr.bf16.mxu0 %v3353_v6  ;;  %v6454_v6 = vld [vmem:[%s8525_s4 + $0x8] sm:$0xf] }
0x17f9   : > { %v3310_v60 = vsel %vm572_vm14, %v3305_v2, %v6024_v52  ;;  %3369 = vmatpush1.bf16.msra.mxu0 %v3352_v55  ;;  %v3311_v62 = vsel %vm572_vm14, %v6024_v52, %v6025_v56  ;;  %v3334_v2 = vsel %vm597_vm15, %v6009_v46, %v6010_v10 }
0x17fa   : > { %v3328_v32 = vpop.permute.xlu0 %3327  ;;  %v6028_v15 = vpop.permute.xlu1 %6027  ;;  %v3355_v20 = vpack.c.bf16 %v3311_v62, %v3298_v34  ;;  %v3354_v18 = vpack.c.bf16 %v3310_v60, %v3297_v37 }
0x17fb   : > { %v6030_v1 = vunpack.i.h.bf16 %v6028_v15  ;;  %v6029_v17 = vunpack.i.l.bf16 %v6028_v15  ;;  %v3333_v63 = vsel %vm597_vm15, %v3328_v32, %v6009_v46 }
0x17fc   : > { %3370 = vmatprep.subr.bf16.mxu0 %v3355_v20 }
0x17fd   : > { %v3323_v57 = vsel %vm586_vm0, %v3318_v13, %v6029_v17  ;;  %3371 = vmatpush1.bf16.msra.mxu0 %v3354_v18  ;;  %v3324_v19 = vsel %vm586_vm0, %v6029_v17, %v6030_v1 }
0x17fe   : > { %v6033_v35 = vpop.permute.xlu1 %6032  ;;  %v3357_v12 = vpack.c.bf16 %v3334_v2, %v3324_v19  ;;  %v3356_v42 = vpack.c.bf16 %v3333_v63, %v3323_v57  ;;  %v3345_v0 = vpop.permute.xlu0 %3344 }
0x17ff   : > { %v6035_v5 = vunpack.i.h.bf16 %v6033_v35  ;;  %v6034_v14 = vunpack.i.l.bf16 %v6033_v35 }
0x1800   : > { %3372 = vmatprep.subr.bf16.mxu0 %v3357_v12 }
0x1801   : > { %3373 = vmatpush1.bf16.msra.mxu0 %v3356_v42  ;;  %v3347_v38 = vsel %vm611_vm1, %v6035_v5, %v3345_v0  ;;  %v3346_v33 = vsel %vm611_vm1, %v6034_v14, %v6035_v5 }
0x1802   : > { %v3359_v51 = vpack.c.bf16 %v3347_v38, %v3347_v38  ;;  %v3358_v45 = vpack.c.bf16 %v3346_v33, %v3346_v33 }
0x1804   : > { %5317 = vmatprep.subr.msk.bf16.mxu0 %vm637_vm2, %v3359_v51  ;;  %v3361_v13 = vsel %vm637_vm2, %v3358_v45, 0 }
0x1805   : > { %3375 = vmatpush1.bf16.msra.mxu0 %v3361_v13  ;;  %v5288_v13 = vld [vmem:[%s8526_s5 + $0x28] sm:$0xff] }
0x1808   : > { %5318 = vmatmul.mubr.msk.bf16.vlgmr.msra.gmra.mrb[28].mxu0 %vm633_vm3, %v6454_v6 }
0x1809   : > { %3768 = vmatprep.mubr.bf16.mxu0 %v6486_v58 }
0x18db   : > { %v3400_v55 = vpop.f32.mrb[28].mxu0 }
0x18dc   : > { %v3401_v56 = vadd.f32 %v3400_v55, %v6840_v3  ;;  %v3402_v52 = vpop.f32.mrb[29].mxu0 }
0x18dd   : > { %v3403_v10 = vadd.f32 %v3402_v52, %v6840_v3  ;;  %v3404_v46 = vpop.f32.mrb[30].mxu0 }
0x18de   : > { %v7798_v37 = vadd.f32 %v3401_v56, %v3037_v59  ;;  %v3405_v60 = vpop.f32.mrb[31].mxu0 }
0x18df   : > { %v7802_v34 = vadd.f32 %v3403_v10, %v3038_v39 }
0x18e0   : > { %3411 = vrot.lane.b32.xlu1 %v7798_v37, %s6472_s15 }
0x18e1   : > { %3413 = vrot.lane.b32.xlu0 %v7802_v34, %s6472_s15 }
0x1952   : > { %v3412_v62 = vpop.permute.xlu1 %3411 }
0x1953   : > { %v3419_v32 = vsel %vm438_vm4, 0.0, %v3412_v62  ;;  %v3414_v3 = vpop.permute.xlu0 %3413 }
0x1954   : > { %v3415_v15 = vsel %vm438_vm4, %v3412_v62, %v3414_v3  ;;  %v3420_v22 = vsel %vm438_vm4, %v3414_v3, 0.0  ;;  %3476 = vrot.lane.b32.xlu1 %v3419_v32, %s6481_s23  ;;  %3440 = vrot.lane.b32.xlu0 %v3419_v32, %s6479_s21  ;;  %v3426_v59 = vmul.f32 %v6577_v24, %v3419_v32  ;;  %v3429_v39 = vmul.f32 %v6583_v27, %v3419_v32 }
0x1955   : > { %v6046_v8 = vpack.i.bf16 %v3420_v22, %v3415_v15  ;;  %v3423_v20 = vmul.f32 %v6581_v26, %v3419_v32  ;;  %v3427_v18 = vmul.f32 %v3415_v15, %v6592_v30  ;;  %v3428_v1 = vmul.f32 %v6575_v23, %v3420_v22 }
0x1956   : > { %v3424_v17 = vmul.f32 %v3415_v15, %v6597_v31  ;;  %v3425_v63 = vmul.f32 %v6579_v25, %v3420_v22  ;;  %v3430_v2 = vmul.f32 %v3415_v15, %v6609_v36  ;;  %v3431_v35 = vmul.f32 %v6588_v29, %v3420_v22 }
0x1957   : > { %v6056_v57 = vpack.i.bf16 %v3428_v1, %v3427_v18  ;;  %v3432_v42 = vmul.f32 %v6620_v41, %v3419_v32  ;;  %v3433_v5 = vmul.f32 %v3415_v15, %v6634_v49  ;;  %v3434_v14 = vmul.f32 %v6618_v40, %v3420_v22 }
0x1958   : > { %6047 = vrot.lane.b32.xlu0 %v6046_v8, %s6480_s22  ;;  %6037 = vrot.lane.b32.xlu1 %v6046_v8, %s6479_s21  ;;  %v6051_v19 = vpack.i.bf16 %v3425_v63, %v3424_v17  ;;  %v6061_v12 = vpack.i.bf16 %v3431_v35, %v3430_v2  ;;  %v3435_v38 = vmul.f32 %v6630_v48, %v3419_v32 }
0x1959   : > { %v6066_v0 = vpack.i.bf16 %v3434_v14, %v3433_v5  ;;  %v3436_v33 = vmul.f32 %v3415_v15, %v6646_v54  ;;  %v3437_v51 = vmul.f32 %v6628_v47, %v3420_v22  ;;  %v3422_v60 = vmul.f32 %v6555_v11, %v3415_v15 }
0x195a   : > { %v3421_v62 = vmul.f32 %v6553_v9, %v3419_v32 }
0x195b   : > { %v6071_v45 = vpack.i.bf16 %v3436_v33, %v3435_v38 }
0x195c   : > { %3466 = vrot.lane.b32.xlu0 %v3426_v59, %s6482_s24  ;;  %6042 = vrot.lane.b32.xlu1 %v6046_v8, %s6481_s23 }
0x1960   : > { %3489 = vrot.lane.b32.xlu0 %v3429_v39, %s6483_s25  ;;  %3453 = vrot.lane.b32.xlu1 %v3423_v20, %s6484_s26 }
0x1964   : > { %6057 = vrot.lane.b32.xlu0 %v6056_v57, %s6482_s24  ;;  %6052 = vrot.lane.b32.xlu1 %v6051_v19, %s6484_s26 }
0x1968   : > { %6062 = vrot.lane.b32.xlu0 %v6061_v12, %s6483_s25  ;;  %3502 = vrot.lane.b32.xlu1 %v3432_v42, %s6485_s27 }
0x196c   : > { %3512 = vrot.lane.b32.xlu0 %v3419_v32, %s6480_s22  ;;  %6067 = vrot.lane.b32.xlu1 %v6066_v0, %s6485_s27 }
0x1970   : > { %3529 = vrot.lane.b32.xlu0 %v3437_v51, %s6487_s28  ;;  %6072 = vrot.lane.b32.xlu1 %v6071_v45, %s6487_s28 }
0x1974   : > { %1617 = vperm.xlu1 %5434, %v5288_v13  }
0x19c6   : > { %v3477_v6 = vpop.permute.xlu1 %3476  ;;  %v3441_v55 = vpop.permute.xlu0 %3440 }
0x19ca   : > { %v6048_v56 = vpop.permute.xlu0 %6047  ;;  %v6038_v52 = vpop.permute.xlu1 %6037 }
0x19cb   : > { %v6040_v10 = vunpack.i.h.bf16 %v6038_v52  ;;  %v6039_v46 = vunpack.i.l.bf16 %v6038_v52  ;;  %v6049_v52 = vunpack.i.l.bf16 %v6048_v56 }
0x19cd   : > { %v3446_v3 = vsel %vm519_vm10, %v3441_v55, %v6039_v46  ;;  %v3447_v22 = vsel %vm519_vm10, %v6039_v46, %v6040_v10  ;;  %v6050_v55 = vunpack.i.h.bf16 %v6048_v56 }
0x19ce   : > { %v3467_v8 = vpop.permute.xlu0 %3466  ;;  %v6043_v59 = vpop.permute.xlu1 %6042  ;;  %v3536_v39 = vpack.c.bf16 %v3447_v22, %v3422_v60  ;;  %v3535_v20 = vpack.c.bf16 %v3446_v3, %v3421_v62 }
0x19cf   : > { %v6045_v35 = vunpack.i.h.bf16 %v6043_v59  ;;  %v6044_v32 = vunpack.i.l.bf16 %v6043_v59 }
0x19d0   : > { %3551 = vmatprep.subr.bf16.mxu1 %v3536_v39 }
0x19d1   : > { %3552 = vmatpush1.bf16.msra.mxu1 %v3535_v20  ;;  %v3482_v10 = vsel %vm558_vm13, %v3477_v6, %v6044_v32  ;;  %v3483_v60 = vsel %vm558_vm13, %v6044_v32, %v6045_v35 }
0x19d2   : > { %v3490_v18 = vpop.permute.xlu0 %3489  ;;  %v3454_v1 = vpop.permute.xlu1 %3453 }
0x19d6   : > { %v6058_v17 = vpop.permute.xlu0 %6057  ;;  %v6053_v63 = vpop.permute.xlu1 %6052 }
0x19d7   : > { %v6060_v57 = vunpack.i.h.bf16 %v6058_v17  ;;  %v6059_v19 = vunpack.i.l.bf16 %v6058_v17  ;;  %v6055_v2 = vunpack.i.h.bf16 %v6053_v63  ;;  %v6054_v15 = vunpack.i.l.bf16 %v6053_v63 }
0x19d9   : > { %v3472_v12 = vsel %vm547_vm11, %v3467_v8, %v6059_v19  ;;  %v3459_v42 = vsel %vm533_vm12, %v3454_v1, %v6054_v15  ;;  %v3460_v5 = vsel %vm533_vm12, %v6054_v15, %v6055_v2  ;;  %v3473_v14 = vsel %vm547_vm11, %v6059_v19, %v6060_v57 }
0x19da   : > { %v6063_v0 = vpop.permute.xlu0 %6062  ;;  %v3503_v38 = vpop.permute.xlu1 %3502  ;;  %v3538_v33 = vpack.c.bf16 %v3473_v14, %v3460_v5  ;;  %v3537_v51 = vpack.c.bf16 %v3472_v12, %v3459_v42  ;;  %v6455_v14 = vld [vmem:[%s8525_s4 + $0xc] sm:$0xf] }
0x19db   : > { %v6065_v45 = vunpack.i.h.bf16 %v6063_v0  ;;  %v6064_v13 = vunpack.i.l.bf16 %v6063_v0 }
0x19dc   : > { %3553 = vmatprep.subr.bf16.mxu1 %v3538_v33 }
0x19dd   : > { %v3495_v46 = vsel %vm572_vm14, %v3490_v18, %v6064_v13  ;;  %3554 = vmatpush1.bf16.msra.mxu1 %v3537_v51  ;;  %v3496_v62 = vsel %vm572_vm14, %v6064_v13, %v6065_v45  ;;  %v3519_v18 = vsel %vm597_vm15, %v6049_v52, %v6050_v55 }
0x19de   : > { %v3513_v3 = vpop.permute.xlu0 %3512  ;;  %v6068_v22 = vpop.permute.xlu1 %6067  ;;  %v3540_v8 = vpack.c.bf16 %v3496_v62, %v3483_v60  ;;  %v3539_v59 = vpack.c.bf16 %v3495_v46, %v3482_v10 }
0x19df   : > { %v6070_v39 = vunpack.i.h.bf16 %v6068_v22  ;;  %v6069_v20 = vunpack.i.l.bf16 %v6068_v22  ;;  %v3518_v1 = vsel %vm597_vm15, %v3513_v3, %v6049_v52 }
0x19e0   : > { %3555 = vmatprep.subr.bf16.mxu1 %v3540_v8 }
0x19e1   : > { %v3508_v56 = vsel %vm586_vm0, %v3503_v38, %v6069_v20  ;;  %3556 = vmatpush1.bf16.msra.mxu1 %v3539_v59  ;;  %v3509_v6 = vsel %vm586_vm0, %v6069_v20, %v6070_v39 }
0x19e2   : > { %v6073_v17 = vpop.permute.xlu1 %6072  ;;  %v3542_v63 = vpack.c.bf16 %v3519_v18, %v3509_v6  ;;  %v3541_v57 = vpack.c.bf16 %v3518_v1, %v3508_v56  ;;  %v3530_v15 = vpop.permute.xlu0 %3529 }
0x19e3   : > { %v6075_v19 = vunpack.i.h.bf16 %v6073_v17  ;;  %v6074_v2 = vunpack.i.l.bf16 %v6073_v17 }
0x19e4   : > { %3557 = vmatprep.subr.bf16.mxu1 %v3542_v63 }
0x19e5   : > { %3558 = vmatpush1.bf16.msra.mxu1 %v3541_v57  ;;  %v3532_v35 = vsel %vm611_vm1, %v6075_v19, %v3530_v15  ;;  %v3531_v32 = vsel %vm611_vm1, %v6074_v2, %v6075_v19 }
0x19e6   : > { %v3544_v12 = vpack.c.bf16 %v3532_v35, %v3532_v35  ;;  %v3543_v42 = vpack.c.bf16 %v3531_v32, %v3531_v32 }
0x19e8   : > { %5319 = vmatprep.subr.msk.bf16.mxu1 %vm637_vm2, %v3544_v12  ;;  %v3546_v5 = vsel %vm637_vm2, %v3543_v42, 0 }
0x19e9   : > { %3560 = vmatpush1.bf16.msra.mxu1 %v3546_v5 }
0x19ec   : > { %5320 = vmatmul.mubr.msk.bf16.vlgmr.msra.gmra.mrb[28].mxu1 %vm633_vm3, %v6455_v14 }
0x19ed   : > { %3953 = vmatprep.mubr.bf16.mxu1 %v6486_v58 }
0x19f3   : > { %v7870_v0 = vpop.permute.xlu1 %1617 }
0x19f4   : > { %v1664_v38 = vadd.f32 %v7301_v16, %v7870_v0  ;;  %v1666_v33 = vadd.f32 %v7303_v50, %v7870_v0 }
0x19f6   : > { %6440 = vtanh.f32 %v1664_v38 }
0x19f7   : > { %6442 = vtanh.f32 %v1666_v33 }
0x1a00   : > { %v6441_v51 = vpop.eup %6440 }
0x1a01   : > { %v6443_v45 = vpop.eup %6442  ;;  %5074 = vst [vmem:[%s374_s14] sm:$0xff] %v6441_v51 }
0x1a02   : > { %5075 = vst [vmem:[%s374_s14 + $0x8] sm:$0xff] %v6443_v45 }
0x1abf   : > { %v3585_v13 = vpop.f32.mrb[28].mxu1 }
0x1ac0   : > { %v3586_v55 = vadd.f32 %v3585_v13, %v6918_v4  ;;  %v3587_v52 = vpop.f32.mrb[29].mxu1 }
0x1ac1   : > { %v3588_v10 = vadd.f32 %v3587_v52, %v6918_v4  ;;  %v3589_v16 = vpop.f32.mrb[30].mxu1 }
0x1ac2   : > { %v3592_v46 = vmax.f32 %v3586_v55, 0.0  ;;  %v3590_v60 = vpop.f32.mrb[31].mxu1 }
0x1ac3   : > { %v3593_v50 = vmax.f32 %v3588_v10, 0.0 }
0x1ac4   : > { %3596 = vrot.lane.b32.xlu0 %v3592_v46, %s6472_s15 }
0x1ac5   : > { %3598 = vrot.lane.b32.xlu1 %v3593_v50, %s6472_s15 }
0x1ac8   : > { %3966 = vrot.lane.b32.xlu0 %v6441_v51, %s6472_s15 }
0x1ac9   : > { %3968 = vrot.lane.b32.xlu1 %v6443_v45, %s6472_s15 }
0x1b36   : > { %v3597_v62 = vpop.permute.xlu0 %3596 }
0x1b37   : > { %v3599_v3 = vpop.permute.xlu1 %3598  ;;  %v7887_v59 = vsel %vm438_vm4, 0.0, %v3597_v62 }
0x1b38   : > { %v7895_v20 = vsel %vm438_vm4, %v3597_v62, %v3599_v3  ;;  %v3605_v1 = vsel %vm438_vm4, %v3599_v3, 0.0  ;;  %v3611_v17 = vmul.f32 %v6577_v24, %v7887_v59  ;;  %v3608_v63 = vmul.f32 %v6581_v26, %v7887_v59 }
0x1b39   : > { %v6086_v56 = vpack.i.bf16 %v3605_v1, %v7895_v20  ;;  %v3614_v2 = vmul.f32 %v6583_v27, %v7887_v59  ;;  %v3617_v15 = vmul.f32 %v6620_v41, %v7887_v59  ;;  %v3612_v35 = vmul.f32 %v7895_v20, %v6592_v30 }
0x1b3a   : > { %v3967_v22 = vpop.permute.xlu0 %3966  ;;  %v3613_v32 = vmul.f32 %v6575_v23, %v3605_v1  ;;  %v3609_v12 = vmul.f32 %v7895_v20, %v6597_v31  ;;  %v3610_v42 = vmul.f32 %v6579_v25, %v3605_v1  ;;  %v3615_v5 = vmul.f32 %v7895_v20, %v6609_v36 }
0x1b3b   : > { %v3969_v8 = vpop.permute.xlu1 %3968  ;;  %v3616_v14 = vmul.f32 %v6588_v29, %v3605_v1  ;;  %v7932_v38 = vsel %vm438_vm4, 0.0, %v3967_v22  ;;  %v3618_v16 = vmul.f32 %v7895_v20, %v6634_v49  ;;  %v3619_v46 = vmul.f32 %v6618_v40, %v3605_v1 }
0x1b3c   : > { %v7890_v4 = vsel %vm438_vm4, %v3967_v22, %v3969_v8  ;;  %v6121_v33 = vpack.i.bf16 %v3613_v32, %v3612_v35  ;;  %v6111_v51 = vpack.i.bf16 %v3610_v42, %v3609_v12  ;;  %v3975_v45 = vsel %vm438_vm4, %v3969_v8, 0.0 }
0x1b3d   : > { %v6081_v39 = vpack.i.bf16 %v7890_v4, %v7887_v59  ;;  %v3982_v6 = vmul.f32 %v7890_v4, %v6592_v30  ;;  %v3979_v18 = vmul.f32 %v7890_v4, %v6597_v31  ;;  %v6126_v13 = vpack.i.bf16 %v3616_v14, %v3615_v5 }
0x1b3e   : > { %v3978_v55 = vmul.f32 %v6581_v26, %v7932_v38  ;;  %v6116_v52 = vpack.i.bf16 %v7932_v38, %v3975_v45  ;;  %v3980_v10 = vmul.f32 %v6579_v25, %v3975_v45  ;;  %v6136_v50 = vpack.i.bf16 %v3619_v46, %v3618_v16 }
0x1b3f   : > { %6082 = vrot.lane.b32.xlu0 %v6081_v39, %s6481_s23  ;;  %6077 = vrot.lane.b32.xlu1 %v6081_v39, %s6479_s21  ;;  %v6106_v57 = vpack.i.bf16 %v3982_v6, %v3611_v17  ;;  %v6101_v19 = vpack.i.bf16 %v3979_v18, %v3608_v63  ;;  %v3620_v62 = vmul.f32 %v6630_v48, %v7887_v59 }
0x1b40   : > { %v6131_v60 = vpack.i.bf16 %v3978_v55, %v3980_v10  ;;  %v3621_v3 = vmul.f32 %v7895_v20, %v6646_v54  ;;  %v3622_v22 = vmul.f32 %v6628_v47, %v3605_v1  ;;  %v3981_v39 = vmul.f32 %v6577_v24, %v7932_v38 }
0x1b41   : > { %v3985_v18 = vmul.f32 %v7890_v4, %v6609_v36  ;;  %v3986_v17 = vmul.f32 %v6588_v29, %v3975_v45  ;;  %v3984_v1 = vmul.f32 %v6583_v27, %v7932_v38  ;;  %v3987_v35 = vmul.f32 %v6620_v41, %v7932_v38 }
0x1b42   : > { %v6141_v8 = vpack.i.bf16 %v3621_v3, %v3620_v62  ;;  %v3990_v32 = vmul.f32 %v6630_v48, %v7932_v38  ;;  %v3991_v12 = vmul.f32 %v7890_v4, %v6646_v54  ;;  %v3992_v42 = vmul.f32 %v6628_v47, %v3975_v45 }
0x1b43   : > { %6087 = vrot.lane.b32.xlu0 %v6086_v56, %s6479_s21  ;;  %3697 = vrot.lane.b32.xlu1 %v7887_v59, %s6480_s22  ;;  %v6156_v63 = vpack.i.bf16 %v3986_v17, %v3985_v18  ;;  %v3607_v16 = vmul.f32 %v6555_v11, %v7895_v20 }
0x1b44   : > { %v6171_v5 = vpack.i.bf16 %v3991_v12, %v3990_v32 }
0x1b47   : > { %6092 = vrot.lane.b32.xlu0 %v6086_v56, %s6481_s23  ;;  %6097 = vrot.lane.b32.xlu1 %v6086_v56, %s6480_s22  ;;  %v3983_v56 = vmul.f32 %v6575_v23, %v3975_v45 }
0x1b49   : > { %v6146_v6 = vpack.i.bf16 %v3981_v39, %v3983_v56 }
0x1b4b   : > { %6107 = vrot.lane.b32.xlu1 %v6106_v57, %s6482_s24  ;;  %6102 = vrot.lane.b32.xlu0 %v6101_v19, %s6484_s26  ;;  %v3988_v57 = vmul.f32 %v7890_v4, %v6634_v49  ;;  %v3989_v19 = vmul.f32 %v6618_v40, %v3975_v45 }
0x1b4f   : > { %3674 = vrot.lane.b32.xlu1 %v3614_v2, %s6483_s25  ;;  %3687 = vrot.lane.b32.xlu0 %v3617_v15, %s6485_s27  ;;  %v6166_v2 = vpack.i.bf16 %v3975_v45, %v7890_v4  ;;  %v6161_v15 = vpack.i.bf16 %v3989_v19, %v3988_v57  ;;  %v3606_v45 = vmul.f32 %v6553_v9, %v7887_v59 }
0x1b53   : > { %6122 = vrot.lane.b32.xlu1 %v6121_v33, %s6482_s24  ;;  %6112 = vrot.lane.b32.xlu0 %v6111_v51, %s6484_s26 }
0x1b57   : > { %6127 = vrot.lane.b32.xlu1 %v6126_v13, %s6483_s25  ;;  %6117 = vrot.lane.b32.xlu0 %v6116_v52, %s6479_s21 }
0x1b5b   : > { %6132 = vrot.lane.b32.xlu1 %v6131_v60, %s6484_s26  ;;  %6137 = vrot.lane.b32.xlu0 %v6136_v50, %s6485_s27 }
0x1b5f   : > { %3714 = vrot.lane.b32.xlu1 %v3622_v22, %s6487_s28  ;;  %6142 = vrot.lane.b32.xlu0 %v6141_v8, %s6487_s28 }
0x1b63   : > { %6152 = vrot.lane.b32.xlu1 %v6116_v52, %s6481_s23  ;;  %6147 = vrot.lane.b32.xlu0 %v6146_v6, %s6482_s24 }
0x1b67   : > { %4044 = vrot.lane.b32.xlu1 %v3984_v1, %s6483_s25  ;;  %6157 = vrot.lane.b32.xlu0 %v6156_v63, %s6483_s25 }
0x1b6b   : > { %6167 = vrot.lane.b32.xlu1 %v6166_v2, %s6480_s22  ;;  %6162 = vrot.lane.b32.xlu0 %v6161_v15, %s6485_s27 }
0x1b6f   : > { %4067 = vrot.lane.b32.xlu1 %v7932_v38, %s6480_s22  ;;  %4057 = vrot.lane.b32.xlu0 %v3987_v35, %s6485_s27 }
0x1b73   : > { %4084 = vrot.lane.b32.xlu1 %v3992_v42, %s6487_s28  ;;  %6172 = vrot.lane.b32.xlu0 %v6171_v5, %s6487_s28 }
0x1bb1   : > { %v7985_v14 = vpop.permute.xlu0 %6082  ;;  %v7987_v33 = vpop.permute.xlu1 %6077 }
0x1bb2   : > { %v6079_v55 = vunpack.i.l.bf16 %v7987_v33 }
0x1bb5   : > { %v6088_v51 = vpop.permute.xlu0 %6087  ;;  %v3698_v13 = vpop.permute.xlu1 %3697 }
0x1bb6   : > { %v6090_v52 = vunpack.i.h.bf16 %v6088_v51  ;;  %v6089_v10 = vunpack.i.l.bf16 %v6088_v51 }
0x1bb8   : > { %v3631_v46 = vsel %vm519_vm10, %v6079_v55, %v6089_v10  ;;  %v3632_v60 = vsel %vm519_vm10, %v6089_v10, %v6090_v52  ;;  %v6084_v10 = vunpack.i.l.bf16 %v7985_v14 }
0x1bb9   : > { %v6093_v50 = vpop.permute.xlu0 %6092  ;;  %v6098_v62 = vpop.permute.xlu1 %6097  ;;  %v3721_v3 = vpack.c.bf16 %v3632_v60, %v3607_v16  ;;  %v3720_v22 = vpack.c.bf16 %v3631_v46, %v3606_v45 }
0x1bba   : > { %v6095_v2 = vunpack.i.h.bf16 %v6093_v50  ;;  %v6094_v15 = vunpack.i.l.bf16 %v6093_v50  ;;  %v6100_v46 = vunpack.i.h.bf16 %v6098_v62  ;;  %v6099_v60 = vunpack.i.l.bf16 %v6098_v62 }
0x1bbb   : > { %3736 = vmatprep.subr.bf16.mxu0 %v3721_v3 }
0x1bbc   : > { %3737 = vmatpush1.bf16.msra.mxu0 %v3720_v22  ;;  %v3667_v50 = vsel %vm558_vm13, %v6084_v10, %v6094_v15  ;;  %v3668_v22 = vsel %vm558_vm13, %v6094_v15, %v6095_v2 }
0x1bbd   : > { %v7996_v8 = vpop.permute.xlu1 %6107  ;;  %v7998_v39 = vpop.permute.xlu0 %6102 }
0x1bbe   : > { %v6109_v20 = vunpack.i.l.bf16 %v7996_v8  ;;  %v6104_v59 = vunpack.i.l.bf16 %v7998_v39 }
0x1bc1   : > { %v3675_v56 = vpop.permute.xlu1 %3674  ;;  %v3688_v6 = vpop.permute.xlu0 %3687 }
0x1bc5   : > { %v6123_v18 = vpop.permute.xlu1 %6122  ;;  %v6113_v17 = vpop.permute.xlu0 %6112 }
0x1bc6   : > { %v6125_v1 = vunpack.i.h.bf16 %v6123_v18  ;;  %v6124_v63 = vunpack.i.l.bf16 %v6123_v18  ;;  %v6115_v57 = vunpack.i.h.bf16 %v6113_v17  ;;  %v6114_v19 = vunpack.i.l.bf16 %v6113_v17 }
0x1bc8   : > { %v3657_v35 = vsel %vm547_vm11, %v6109_v20, %v6124_v63  ;;  %v3644_v32 = vsel %vm533_vm12, %v6104_v59, %v6114_v19  ;;  %v3645_v12 = vsel %vm533_vm12, %v6114_v19, %v6115_v57  ;;  %v3658_v42 = vsel %vm547_vm11, %v6124_v63, %v6125_v1 }
0x1bc9   : > { %v6128_v5 = vpop.permute.xlu1 %6127  ;;  %v6118_v51 = vpop.permute.xlu0 %6117  ;;  %v3723_v55 = vpack.c.bf16 %v3658_v42, %v3645_v12  ;;  %v3722_v52 = vpack.c.bf16 %v3657_v35, %v3644_v32  ;;  %v3703_v19 = vsel %vm597_vm15, %v3698_v13, %v6099_v60  ;;  %v3704_v32 = vsel %vm597_vm15, %v6099_v60, %v6100_v46 }
0x1bca   : > { %v6130_v16 = vunpack.i.h.bf16 %v6128_v5  ;;  %v6129_v45 = vunpack.i.l.bf16 %v6128_v5  ;;  %v6119_v62 = vunpack.i.l.bf16 %v6118_v51  ;;  %v6080_v5 = vunpack.i.h.bf16 %v7987_v33 }
0x1bcb   : > { %3738 = vmatprep.subr.bf16.mxu0 %v3723_v55  ;;  %v6120_v55 = vunpack.i.h.bf16 %v6118_v51  ;;  %v3977_v33 = vmul.f32 %v6555_v11, %v7890_v4 }
0x1bcc   : > { %v3680_v3 = vsel %vm572_vm14, %v3675_v56, %v6129_v45  ;;  %3739 = vmatpush1.bf16.msra.mxu0 %v3722_v52  ;;  %v3681_v20 = vsel %vm572_vm14, %v6129_v45, %v6130_v16  ;;  %v4002_v16 = vsel %vm519_vm10, %v6080_v5, %v6119_v62  ;;  %v6110_v45 = vunpack.i.h.bf16 %v7996_v8 }
0x1bcd   : > { %v6133_v59 = vpop.permute.xlu1 %6132  ;;  %v6138_v18 = vpop.permute.xlu0 %6137  ;;  %v3725_v17 = vpack.c.bf16 %v3681_v20, %v3668_v22  ;;  %v3724_v1 = vpack.c.bf16 %v3680_v3, %v3667_v50  ;;  %v4001_v51 = vsel %vm519_vm10, %v6120_v55, %v6080_v5  ;;  %v3976_v8 = vmul.f32 %v6553_v9, %v7932_v38  ;;  %v6456_v38 = vld [vmem:[%s8525_s4 + $0x10] sm:$0xf] }
0x1bce   : > { %v6140_v63 = vunpack.i.h.bf16 %v6138_v18  ;;  %v6139_v57 = vunpack.i.l.bf16 %v6138_v18  ;;  %v6134_v22 = vunpack.i.l.bf16 %v6133_v59 }
0x1bcf   : > { %3740 = vmatprep.subr.bf16.mxu0 %v3725_v17 }
0x1bd0   : > { %v3693_v35 = vsel %vm586_vm0, %v3688_v6, %v6139_v57  ;;  %3741 = vmatpush1.bf16.msra.mxu0 %v3724_v1  ;;  %v3694_v56 = vsel %vm586_vm0, %v6139_v57, %v6140_v63  ;;  %v4091_v1 = vpack.c.bf16 %v4002_v16, %v3977_v33  ;;  %v6105_v63 = vunpack.i.h.bf16 %v7998_v39 }
0x1bd1   : > { %v3715_v2 = vpop.permute.xlu1 %3714  ;;  %v6143_v15 = vpop.permute.xlu0 %6142  ;;  %v3727_v12 = vpack.c.bf16 %v3704_v32, %v3694_v56  ;;  %v3726_v42 = vpack.c.bf16 %v3703_v19, %v3693_v35  ;;  %v6135_v57 = vunpack.i.h.bf16 %v6133_v59  ;;  %v4090_v56 = vpack.c.bf16 %v4001_v51, %v3976_v8 }
0x1bd2   : > { %v6145_v52 = vunpack.i.h.bf16 %v6143_v15  ;;  %v6144_v10 = vunpack.i.l.bf16 %v6143_v15 }
0x1bd3   : > { %3742 = vmatprep.subr.bf16.mxu0 %v3727_v12  ;;  %v4015_v12 = vsel %vm533_vm12, %v6105_v63, %v6134_v22  ;;  %v4014_v59 = vsel %vm533_vm12, %v6135_v57, %v6105_v63 }
0x1bd4   : > { %3743 = vmatpush1.bf16.msra.mxu0 %v3726_v42  ;;  %v3717_v13 = vsel %vm611_vm1, %v6145_v52, %v3715_v2  ;;  %v3716_v6 = vsel %vm611_vm1, %v6144_v10, %v6145_v52  ;;  %v6085_v42 = vunpack.i.h.bf16 %v7985_v14 }
0x1bd5   : > { %v6153_v46 = vpop.permute.xlu1 %6152  ;;  %v6148_v60 = vpop.permute.xlu0 %6147  ;;  %v3729_v50 = vpack.c.bf16 %v3717_v13, %v3717_v13  ;;  %v3728_v3 = vpack.c.bf16 %v3716_v6, %v3716_v6 }
0x1bd6   : > { %v6150_v20 = vunpack.i.h.bf16 %v6148_v60  ;;  %v6149_v18 = vunpack.i.l.bf16 %v6148_v60  ;;  %v6154_v4 = vunpack.i.l.bf16 %v6153_v46  ;;  %v6155_v55 = vunpack.i.h.bf16 %v6153_v46 }
0x1bd7   : > { %5321 = vmatprep.subr.msk.bf16.mxu0 %vm637_vm2, %v3729_v50  ;;  %v3731_v17 = vsel %vm637_vm2, %v3728_v3, 0 }
0x1bd8   : > { %3745 = vmatpush1.bf16.msra.mxu0 %v3731_v17  ;;  %v4028_v19 = vsel %vm547_vm11, %v6110_v45, %v6149_v18  ;;  %v4027_v32 = vsel %vm547_vm11, %v6150_v20, %v6110_v45  ;;  %v4038_v14 = vsel %vm558_vm13, %v6085_v42, %v6154_v4  ;;  %v4037_v46 = vsel %vm558_vm13, %v6155_v55, %v6085_v42 }
0x1bd9   : > { %v4045_v62 = vpop.permute.xlu1 %4044  ;;  %v6158_v35 = vpop.permute.xlu0 %6157  ;;  %4106 = vmatprep.subr.bf16.mxu0 %v4091_v1  ;;  %v4093_v39 = vpack.c.bf16 %v4028_v19, %v4015_v12  ;;  %v4092_v13 = vpack.c.bf16 %v4027_v32, %v4014_v59  ;;  %v6457_v12 = vld [vmem:[%s8523_s2] sm:$0xf] }
0x1bda   : > { %v6160_v2 = vunpack.i.h.bf16 %v6158_v35  ;;  %v6159_v15 = vunpack.i.l.bf16 %v6158_v35 }
0x1bdb   : > { %5322 = vmatmul.mubr.msk.bf16.vlgmr.msra.gmra.mrb[32].mxu0 %vm633_vm3, %v6456_v38 }
0x1bdc   : > { %4107 = vmatpush1.bf16.msra.mxu0 %v4090_v56  ;;  %v4051_v5 = vsel %vm572_vm14, %v6159_v15, %v6160_v2  ;;  %4138 = vmatprep.mubr.bf16.mxu0 %v6486_v58  ;;  %v4050_v50 = vsel %vm572_vm14, %v4045_v62, %v6159_v15 }
0x1bdd   : > { %v6168_v52 = vpop.permute.xlu1 %6167  ;;  %v6163_v10 = vpop.permute.xlu0 %6162  ;;  %4108 = vmatprep.subr.bf16.mxu0 %v4093_v39  ;;  %v4095_v3 = vpack.c.bf16 %v4051_v5, %v4038_v14  ;;  %v4094_v18 = vpack.c.bf16 %v4050_v50, %v4037_v46 }
0x1bde   : > { %v6170_v6 = vunpack.i.h.bf16 %v6168_v52  ;;  %v6169_v16 = vunpack.i.l.bf16 %v6168_v52  ;;  %v6165_v45 = vunpack.i.h.bf16 %v6163_v10  ;;  %v6164_v60 = vunpack.i.l.bf16 %v6163_v10 }
0x1be0   : > { %4109 = vmatpush1.bf16.msra.mxu0 %v4092_v13  ;;  %v4064_v33 = vsel %vm586_vm0, %v6164_v60, %v6165_v45  ;;  %v4074_v51 = vsel %vm597_vm15, %v6169_v16, %v6170_v6 }
0x1be1   : > { %v4068_v22 = vpop.permute.xlu1 %4067  ;;  %v4058_v20 = vpop.permute.xlu0 %4057  ;;  %4110 = vmatprep.subr.bf16.mxu0 %v4095_v3  ;;  %v4097_v8 = vpack.c.bf16 %v4074_v51, %v4064_v33 }
0x1be2   : > { %v4073_v17 = vsel %vm597_vm15, %v4068_v22, %v6169_v16  ;;  %v4063_v1 = vsel %vm586_vm0, %v4058_v20, %v6164_v60 }
0x1be3   : > { %v4096_v57 = vpack.c.bf16 %v4073_v17, %v4063_v1 }
0x1be4   : > { %4111 = vmatpush1.bf16.msra.mxu0 %v4094_v18 }
0x1be5   : > { %v6173_v63 = vpop.permute.xlu0 %6172  ;;  %4112 = vmatprep.subr.bf16.mxu0 %v4097_v8  ;;  %v4085_v62 = vpop.permute.xlu1 %4084 }
0x1be6   : > { %v6175_v19 = vunpack.i.h.bf16 %v6173_v63  ;;  %v6174_v4 = vunpack.i.l.bf16 %v6173_v63 }
0x1be8   : > { %4113 = vmatpush1.bf16.msra.mxu0 %v4096_v57  ;;  %v4087_v35 = vsel %vm611_vm1, %v6175_v19, %v4085_v62  ;;  %v4086_v56 = vsel %vm611_vm1, %v6174_v4, %v6175_v19 }
0x1be9   : > { %v4099_v32 = vpack.c.bf16 %v4087_v35, %v4087_v35  ;;  %v4098_v2 = vpack.c.bf16 %v4086_v56, %v4086_v56 }
0x1beb   : > { %5325 = vmatprep.subr.msk.bf16.mxu0 %vm637_vm2, %v4099_v32  ;;  %v4101_v15 = vsel %vm637_vm2, %v4098_v2, 0 }
0x1bec   : > { %4115 = vmatpush1.bf16.msra.mxu0 %v4101_v15 }
0x1bef   : > { %5326 = vmatmul.mubr.msk.bf16.vlgmr.msra.gmra.mrb[36].mxu0 %vm633_vm3, %v6457_v12 }
0x1bf0   : > { %4508 = vmatprep.mubr.bf16.mxu0 %v6486_v58 }
0x1cae   : > { %v3770_v42 = vpop.f32.mrb[32].mxu0 }
0x1caf   : > { %v3771_v38 = vadd.f32 %v3770_v42, %v7105_v43  ;;  %v3772_v39 = vpop.f32.mrb[33].mxu0 }
0x1cb0   : > { %v3773_v59 = vadd.f32 %v3772_v39, %v7105_v43  ;;  %v3774_v5 = vpop.f32.mrb[34].mxu0 }
0x1cb1   : > { %v3777_v55 = vadd.f32 %v3771_v38, %v7798_v37  ;;  %v3775_v52 = vpop.f32.mrb[35].mxu0 }
0x1cb2   : > { %v3778_v10 = vadd.f32 %v3773_v59, %v7802_v34 }
0x1cb3   : > { %3781 = vrot.lane.b32.xlu0 %v3777_v55, %s6472_s15 }
0x1cb4   : > { %3783 = vrot.lane.b32.xlu1 %v3778_v10, %s6472_s15 }
0x1cc2   : > { %v4140_v13 = vpop.f32.mrb[36].mxu0 }
0x1cc3   : > { %v8062_v14 = vadd.f32 %v4140_v13, %v7113_v61  ;;  %v4142_v6 = vpop.f32.mrb[37].mxu0 }
0x1cc4   : > { %v8065_v16 = vadd.f32 %v4142_v6, %v7113_v61  ;;  %v4144_v45 = vpop.f32.mrb[38].mxu0 }
0x1cc5   : > { %v4147_v43 = vmax.f32 %v8062_v14, 0.0  ;;  %v4145_v60 = vpop.f32.mrb[39].mxu0 }
0x1cc6   : > { %v4148_v37 = vmax.f32 %v8065_v16, 0.0 }
0x1cc7   : > { %4151 = vrot.lane.b32.xlu0 %v4147_v43, %s6472_s15 }
0x1cc8   : > { %4153 = vrot.lane.b32.xlu1 %v4148_v37, %s6472_s15 }
0x1d25   : > { %v3782_v34 = vpop.permute.xlu0 %3781 }
0x1d26   : > { %v3784_v50 = vpop.permute.xlu1 %3783  ;;  %v8080_v33 = vsel %vm438_vm4, 0.0, %v3782_v34 }
0x1d27   : > { %v8076_v3 = vsel %vm438_vm4, %v3782_v34, %v3784_v50  ;;  %v3790_v61 = vsel %vm438_vm4, %v3784_v50, 0.0  ;;  %v3799_v46 = vmul.f32 %v6583_v27, %v8080_v33  ;;  %v3796_v38 = vmul.f32 %v6577_v24, %v8080_v33 }
0x1d28   : > { %v6186_v51 = vpack.i.bf16 %v3790_v61, %v8076_v3  ;;  %v3797_v22 = vmul.f32 %v8076_v3, %v6592_v30  ;;  %v3798_v20 = vmul.f32 %v6575_v23, %v3790_v61  ;;  %v3794_v18 = vmul.f32 %v8076_v3, %v6597_v31 }
0x1d29   : > { %v3795_v17 = vmul.f32 %v6579_v25, %v3790_v61  ;;  %v3800_v1 = vmul.f32 %v8076_v3, %v6609_v36  ;;  %v3801_v8 = vmul.f32 %v6588_v29, %v3790_v61  ;;  %v3803_v19 = vmul.f32 %v8076_v3, %v6634_v49 }
0x1d2a   : > { %6187 = vrot.lane.b32.xlu1 %v6186_v51, %s6480_s22  ;;  %6177 = vrot.lane.b32.xlu0 %v6186_v51, %s6479_s21  ;;  %v6196_v63 = vpack.i.bf16 %v3798_v20, %v3797_v22  ;;  %v3804_v4 = vmul.f32 %v6618_v40, %v3790_v61  ;;  %v3793_v39 = vmul.f32 %v6581_v26, %v8080_v33 }
0x1d2b   : > { %v6191_v57 = vpack.i.bf16 %v3795_v17, %v3794_v18  ;;  %v6201_v62 = vpack.i.bf16 %v3801_v8, %v3800_v1  ;;  %v3802_v55 = vmul.f32 %v6620_v41, %v8080_v33  ;;  %v3805_v52 = vmul.f32 %v6630_v48, %v8080_v33 }
0x1d2c   : > { %v6206_v35 = vpack.i.bf16 %v3804_v4, %v3803_v19  ;;  %v3806_v10 = vmul.f32 %v8076_v3, %v6646_v54  ;;  %v3807_v13 = vmul.f32 %v6628_v47, %v3790_v61 }
0x1d2e   : > { %3859 = vrot.lane.b32.xlu1 %v3799_v46, %s6483_s25  ;;  %6182 = vrot.lane.b32.xlu0 %v6186_v51, %s6481_s23  ;;  %v6231_v6 = vpack.i.bf16 %v3806_v10, %v3805_v52 }
0x1d32   : > { %6197 = vrot.lane.b32.xlu1 %v6196_v63, %s6482_s24  ;;  %6192 = vrot.lane.b32.xlu0 %v6191_v57, %s6484_s26 }
0x1d36   : > { %6202 = vrot.lane.b32.xlu1 %v6201_v62, %s6483_s25  ;;  %6207 = vrot.lane.b32.xlu0 %v6206_v35, %s6485_s27 }
0x1d39   : > { %v4152_v56 = vpop.permute.xlu0 %4151 }
0x1d3a   : > { %v4154_v32 = vpop.permute.xlu1 %4153  ;;  %v8133_v45 = vsel %vm438_vm4, 0.0, %v4152_v56 }
0x1d3b   : > { %v8106_v2 = vsel %vm438_vm4, %v4152_v56, %v4154_v32  ;;  %v4160_v60 = vsel %vm438_vm4, %v4154_v32, 0.0  ;;  %v4169_v50 = vmul.f32 %v6583_v27, %v8133_v45  ;;  %v4172_v61 = vmul.f32 %v6620_v41, %v8133_v45 }
0x1d3c   : > { %v6216_v15 = vpack.i.bf16 %v8106_v2, %v8080_v33  ;;  %v4167_v12 = vmul.f32 %v8106_v2, %v6592_v30  ;;  %v4164_v42 = vmul.f32 %v8106_v2, %v6597_v31  ;;  %v6241_v34 = vpack.i.bf16 %v8133_v45, %v4160_v60 }
0x1d3d   : > { %v4163_v51 = vmul.f32 %v6581_v26, %v8133_v45  ;;  %v4165_v46 = vmul.f32 %v6579_v25, %v4160_v60  ;;  %v4166_v22 = vmul.f32 %v6577_v24, %v8133_v45  ;;  %v4168_v20 = vmul.f32 %v6575_v23, %v4160_v60 }
0x1d3e   : > { %6217 = vrot.lane.b32.xlu0 %v6216_v15, %s6481_s23  ;;  %6212 = vrot.lane.b32.xlu1 %v6216_v15, %s6479_s21  ;;  %v6226_v59 = vpack.i.bf16 %v4167_v12, %v3796_v38  ;;  %v6221_v5 = vpack.i.bf16 %v4164_v42, %v3793_v39  ;;  %v4170_v1 = vmul.f32 %v8106_v2, %v6609_v36 }
0x1d3f   : > { %v6246_v18 = vpack.i.bf16 %v4163_v51, %v4165_v46  ;;  %v6256_v17 = vpack.i.bf16 %v4166_v22, %v4168_v20  ;;  %v4171_v8 = vmul.f32 %v6588_v29, %v4160_v60  ;;  %v6251_v63 = vpack.i.bf16 %v4160_v60, %v8106_v2 }
0x1d40   : > { %v4173_v19 = vmul.f32 %v8106_v2, %v6634_v49  ;;  %v4174_v4 = vmul.f32 %v6618_v40, %v4160_v60  ;;  %v4175_v35 = vmul.f32 %v6630_v48, %v8133_v45  ;;  %v4176_v56 = vmul.f32 %v8106_v2, %v6646_v54 }
0x1d41   : > { %v6261_v57 = vpack.i.bf16 %v4171_v8, %v4170_v1  ;;  %v4177_v32 = vmul.f32 %v6628_v47, %v4160_v60 }
0x1d42   : > { %6227 = vrot.lane.b32.xlu1 %v6226_v59, %s6482_s24  ;;  %6222 = vrot.lane.b32.xlu0 %v6221_v5, %s6484_s26  ;;  %v6266_v62 = vpack.i.bf16 %v4174_v4, %v4173_v19  ;;  %v6271_v15 = vpack.i.bf16 %v4176_v56, %v4175_v35  ;;  %v3792_v59 = vmul.f32 %v6555_v11, %v8076_v3 }
0x1d46   : > { %3882 = vrot.lane.b32.xlu1 %v8080_v33, %s6480_s22  ;;  %3872 = vrot.lane.b32.xlu0 %v3802_v55, %s6485_s27 }
0x1d4a   : > { %3899 = vrot.lane.b32.xlu1 %v3807_v13, %s6487_s28  ;;  %6232 = vrot.lane.b32.xlu0 %v6231_v6, %s6487_s28 }
0x1d4e   : > { %6242 = vrot.lane.b32.xlu1 %v6241_v34, %s6481_s23  ;;  %6237 = vrot.lane.b32.xlu0 %v6241_v34, %s6479_s21 }
0x1d52   : > { %4229 = vrot.lane.b32.xlu1 %v4169_v50, %s6483_s25  ;;  %4242 = vrot.lane.b32.xlu0 %v4172_v61, %s6485_s27 }
0x1d56   : > { %6247 = vrot.lane.b32.xlu1 %v6246_v18, %s6484_s26  ;;  %6257 = vrot.lane.b32.xlu0 %v6256_v17, %s6482_s24 }
0x1d5a   : > { %6252 = vrot.lane.b32.xlu1 %v6251_v63, %s6480_s22  ;;  %6262 = vrot.lane.b32.xlu0 %v6261_v57, %s6483_s25  ;;  %v3791_v63 = vmul.f32 %v6553_v9, %v8080_v33 }
0x1d5e   : > { %4252 = vrot.lane.b32.xlu1 %v8133_v45, %s6480_s22  ;;  %6267 = vrot.lane.b32.xlu0 %v6266_v62, %s6485_s27 }
0x1d62   : > { %4269 = vrot.lane.b32.xlu1 %v4177_v32, %s6487_s28  ;;  %6272 = vrot.lane.b32.xlu0 %v6271_v15, %s6487_s28 }
0x1d9c   : > { %v6188_v12 = vpop.permute.xlu1 %6187  ;;  %v6178_v42 = vpop.permute.xlu0 %6177 }
0x1d9d   : > { %v6180_v38 = vunpack.i.h.bf16 %v6178_v42  ;;  %v6179_v39 = vunpack.i.l.bf16 %v6178_v42 }
0x1d9f   : > { %v3817_v5 = vsel %vm519_vm10, %v6179_v39, %v6180_v38 }
0x1da0   : > { %v3860_v55 = vpop.permute.xlu1 %3859  ;;  %v6183_v52 = vpop.permute.xlu0 %6182  ;;  %v3906_v10 = vpack.c.bf16 %v3817_v5, %v3792_v59 }
0x1da1   : > { %v6185_v57 = vunpack.i.h.bf16 %v6183_v52  ;;  %v6184_v4 = vunpack.i.l.bf16 %v6183_v52 }
0x1da2   : > { %3921 = vmatprep.subr.bf16.mxu1 %v3906_v10  ;;  %v6190_v10 = vunpack.i.h.bf16 %v6188_v12 }
0x1da4   : > { %v6198_v13 = vpop.permute.xlu1 %6197  ;;  %v6193_v6 = vpop.permute.xlu0 %6192 }
0x1da5   : > { %v6200_v50 = vunpack.i.h.bf16 %v6198_v13  ;;  %v6199_v61 = vunpack.i.l.bf16 %v6198_v13  ;;  %v6195_v51 = vunpack.i.h.bf16 %v6193_v6  ;;  %v6194_v46 = vunpack.i.l.bf16 %v6193_v6 }
0x1da7   : > { %v3830_v18 = vsel %vm533_vm12, %v6194_v46, %v6195_v51  ;;  %v3843_v17 = vsel %vm547_vm11, %v6199_v61, %v6200_v50 }
0x1da8   : > { %v6203_v60 = vpop.permute.xlu1 %6202  ;;  %v6208_v34 = vpop.permute.xlu0 %6207  ;;  %v3908_v15 = vpack.c.bf16 %v3843_v17, %v3830_v18 }
0x1da9   : > { %v6205_v1 = vunpack.i.h.bf16 %v6203_v60  ;;  %v6204_v8 = vunpack.i.l.bf16 %v6203_v60  ;;  %v6210_v62 = vunpack.i.h.bf16 %v6208_v34  ;;  %v6209_v42 = vunpack.i.l.bf16 %v6208_v34 }
0x1daa   : > { %v3853_v34 = vsel %vm558_vm13, %v6184_v4, %v6185_v57 }
0x1dab   : > { %v3866_v33 = vsel %vm572_vm14, %v6204_v8, %v6205_v1  ;;  %v3879_v18 = vsel %vm586_vm0, %v6209_v42, %v6210_v62  ;;  %v3865_v17 = vsel %vm572_vm14, %v3860_v55, %v6204_v8 }
0x1db0   : > { %v8177_v22 = vpop.permute.xlu1 %6212  ;;  %v8179_v20 = vpop.permute.xlu0 %6217 }
0x1db1   : > { %v6214_v3 = vunpack.i.l.bf16 %v8177_v22  ;;  %v6219_v38 = vunpack.i.l.bf16 %v8179_v20 }
0x1db3   : > { %v3816_v19 = vsel %vm519_vm10, %v6214_v3, %v6179_v39  ;;  %v6189_v39 = vunpack.i.l.bf16 %v6188_v12  ;;  %v3852_v51 = vsel %vm558_vm13, %v6219_v38, %v6184_v4  ;;  %v3910_v3 = vpack.c.bf16 %v3866_v33, %v3853_v34 }
0x1db4   : > { %v3905_v35 = vpack.c.bf16 %v3816_v19, %v3791_v63  ;;  %v8187_v56 = vpop.permute.xlu1 %6227  ;;  %v8189_v32 = vpop.permute.xlu0 %6222 }
0x1db5   : > { %v6229_v59 = vunpack.i.l.bf16 %v8187_v56  ;;  %v6224_v5 = vunpack.i.l.bf16 %v8189_v32  ;;  %v3889_v12 = vsel %vm597_vm15, %v6189_v39, %v6190_v10 }
0x1db6   : > { %3922 = vmatpush1.bf16.msra.mxu1 %v3905_v35  ;;  %v3912_v63 = vpack.c.bf16 %v3889_v12, %v3879_v18 }
0x1db7   : > { %v3842_v52 = vsel %vm547_vm11, %v6229_v59, %v6199_v61  ;;  %v3829_v13 = vsel %vm533_vm12, %v6224_v5, %v6194_v46  ;;  %3923 = vmatprep.subr.bf16.mxu1 %v3908_v15  ;;  %v3909_v61 = vpack.c.bf16 %v3865_v17, %v3852_v51  ;;  %v6215_v5 = vunpack.i.h.bf16 %v8177_v22 }
0x1db8   : > { %v3907_v6 = vpack.c.bf16 %v3842_v52, %v3829_v13  ;;  %v3883_v60 = vpop.permute.xlu1 %3882  ;;  %v3873_v50 = vpop.permute.xlu0 %3872  ;;  %v4161_v22 = vmul.f32 %v6553_v9, %v8133_v45  ;;  %v6230_v51 = vunpack.i.h.bf16 %v8187_v56 }
0x1db9   : > { %v3888_v19 = vsel %vm597_vm15, %v3883_v60, %v6189_v39  ;;  %v3878_v35 = vsel %vm586_vm0, %v3873_v50, %v6209_v42  ;;  %v4162_v42 = vmul.f32 %v6555_v11, %v8106_v2  ;;  %v6225_v2 = vunpack.i.h.bf16 %v8189_v32 }
0x1dba   : > { %3924 = vmatpush1.bf16.msra.mxu1 %v3907_v6  ;;  %v3911_v55 = vpack.c.bf16 %v3888_v19, %v3878_v35 }
0x1dbb   : > { %3925 = vmatprep.subr.bf16.mxu1 %v3910_v3 }
0x1dbc   : > { %v3900_v1 = vpop.permute.xlu1 %3899  ;;  %v6233_v46 = vpop.permute.xlu0 %6232 }
0x1dbd   : > { %v6235_v57 = vunpack.i.h.bf16 %v6233_v46  ;;  %v6234_v15 = vunpack.i.l.bf16 %v6233_v46 }
0x1dbe   : > { %3926 = vmatpush1.bf16.msra.mxu1 %v3909_v61 }
0x1dbf   : > { %v3902_v4 = vsel %vm611_vm1, %v6235_v57, %v3900_v1  ;;  %3927 = vmatprep.subr.bf16.mxu1 %v3912_v63  ;;  %v3901_v62 = vsel %vm611_vm1, %v6234_v15, %v6235_v57  ;;  %v6458_v63 = vld [vmem:[%s8525_s4 + $0x14] sm:$0xf]  ;;  %v6220_v15 = vunpack.i.h.bf16 %v8179_v20 }
0x1dc0   : > { %v3914_v8 = vpack.c.bf16 %v3902_v4, %v3902_v4  ;;  %v6243_v38 = vpop.permute.xlu1 %6242  ;;  %v6238_v59 = vpop.permute.xlu0 %6237  ;;  %v3913_v52 = vpack.c.bf16 %v3901_v62, %v3901_v62 }
0x1dc1   : > { %v6240_v33 = vunpack.i.h.bf16 %v6238_v59  ;;  %v6239_v10 = vunpack.i.l.bf16 %v6238_v59  ;;  %v6245_v45 = vunpack.i.h.bf16 %v6243_v38  ;;  %v6244_v19 = vunpack.i.l.bf16 %v6243_v38 }
0x1dc2   : > { %3928 = vmatpush1.bf16.msra.mxu1 %v3911_v55  ;;  %v3916_v34 = vsel %vm637_vm2, %v3913_v52, 0 }
0x1dc3   : > { %5323 = vmatprep.subr.msk.bf16.mxu1 %vm637_vm2, %v3914_v8  ;;  %v4187_v39 = vsel %vm519_vm10, %v6215_v5, %v6239_v10  ;;  %v4186_v50 = vsel %vm519_vm10, %v6240_v33, %v6215_v5  ;;  %v4222_v38 = vsel %vm558_vm13, %v6245_v45, %v6220_v15  ;;  %v4223_v33 = vsel %vm558_vm13, %v6220_v15, %v6244_v19 }
0x1dc4   : > { %v4230_v13 = vpop.permute.xlu1 %4229  ;;  %v4243_v6 = vpop.permute.xlu0 %4242  ;;  %v4276_v60 = vpack.c.bf16 %v4187_v39, %v4162_v42  ;;  %v4275_v3 = vpack.c.bf16 %v4186_v50, %v4161_v22 }
0x1dc6   : > { %3930 = vmatpush1.bf16.msra.mxu1 %v3916_v34 }
0x1dc7   : > { %4291 = vmatprep.subr.bf16.mxu1 %v4276_v60 }
0x1dc8   : > { %v6248_v18 = vpop.permute.xlu1 %6247  ;;  %v6258_v17 = vpop.permute.xlu0 %6257 }
0x1dc9   : > { %v6250_v12 = vunpack.i.h.bf16 %v6248_v18  ;;  %v6249_v61 = vunpack.i.l.bf16 %v6248_v18  ;;  %v6260_v1 = vunpack.i.h.bf16 %v6258_v17  ;;  %v6259_v46 = vunpack.i.l.bf16 %v6258_v17  ;;  %5324 = vmatmul.mubr.msk.bf16.vlgmr.msra.gmra.mrb[32].mxu1 %vm633_vm3, %v6458_v63 }
0x1dca   : > { %4292 = vmatpush1.bf16.msra.mxu1 %v4275_v3  ;;  %4323 = vmatprep.mubr.bf16.mxu1 %v6486_v58 }
0x1dcb   : > { %v4199_v56 = vsel %vm533_vm12, %v6250_v12, %v6225_v2  ;;  %v4212_v32 = vsel %vm547_vm11, %v6260_v1, %v6230_v51  ;;  %v4200_v35 = vsel %vm533_vm12, %v6225_v2, %v6249_v61  ;;  %v4213_v57 = vsel %vm547_vm11, %v6230_v51, %v6259_v46 }
0x1dcc   : > { %v4277_v4 = vpack.c.bf16 %v4212_v32, %v4199_v56  ;;  %v6253_v62 = vpop.permute.xlu1 %6252  ;;  %v6263_v55 = vpop.permute.xlu0 %6262  ;;  %v4278_v8 = vpack.c.bf16 %v4213_v57, %v4200_v35  ;;  %v6459_v35 = vld [vmem:[%s8523_s2 + $0x4] sm:$0xf] }
0x1dcd   : > { %v6265_v59 = vunpack.i.h.bf16 %v6263_v55  ;;  %v6264_v5 = vunpack.i.l.bf16 %v6263_v55  ;;  %v6255_v10 = vunpack.i.h.bf16 %v6253_v62  ;;  %v6254_v52 = vunpack.i.l.bf16 %v6253_v62 }
0x1dce   : > { %4293 = vmatprep.subr.bf16.mxu1 %v4278_v8 }
0x1dcf   : > { %v4235_v42 = vsel %vm572_vm14, %v4230_v13, %v6264_v5  ;;  %4294 = vmatpush1.bf16.msra.mxu1 %v4277_v4  ;;  %v4236_v39 = vsel %vm572_vm14, %v6264_v5, %v6265_v59  ;;  %v4259_v17 = vsel %vm597_vm15, %v6254_v52, %v6255_v10 }
0x1dd0   : > { %v4279_v60 = vpack.c.bf16 %v4235_v42, %v4222_v38  ;;  %v4253_v20 = vpop.permute.xlu1 %4252  ;;  %v6268_v50 = vpop.permute.xlu0 %6267  ;;  %v4280_v34 = vpack.c.bf16 %v4236_v39, %v4223_v33 }
0x1dd1   : > { %v6270_v22 = vunpack.i.h.bf16 %v6268_v50  ;;  %v6269_v51 = vunpack.i.l.bf16 %v6268_v50  ;;  %v4258_v2 = vsel %vm597_vm15, %v4253_v20, %v6254_v52 }
0x1dd2   : > { %4295 = vmatprep.subr.bf16.mxu1 %v4280_v34 }
0x1dd3   : > { %v4248_v3 = vsel %vm586_vm0, %v4243_v6, %v6269_v51  ;;  %4296 = vmatpush1.bf16.msra.mxu1 %v4279_v60  ;;  %v4249_v18 = vsel %vm586_vm0, %v6269_v51, %v6270_v22 }
0x1dd4   : > { %v4281_v13 = vpack.c.bf16 %v4258_v2, %v4248_v3  ;;  %v6273_v12 = vpop.permute.xlu0 %6272  ;;  %v4282_v61 = vpack.c.bf16 %v4259_v17, %v4249_v18  ;;  %v4270_v63 = vpop.permute.xlu1 %4269 }
0x1dd5   : > { %v6275_v1 = vunpack.i.h.bf16 %v6273_v12  ;;  %v6274_v46 = vunpack.i.l.bf16 %v6273_v12 }
0x1dd6   : > { %4297 = vmatprep.subr.bf16.mxu1 %v4282_v61 }
0x1dd7   : > { %v4272_v45 = vsel %vm611_vm1, %v6275_v1, %v4270_v63  ;;  %4298 = vmatpush1.bf16.msra.mxu1 %v4281_v13  ;;  %v4271_v19 = vsel %vm611_vm1, %v6274_v46, %v6275_v1 }
0x1dd8   : > { %v4284_v56 = vpack.c.bf16 %v4272_v45, %v4272_v45  ;;  %v4283_v6 = vpack.c.bf16 %v4271_v19, %v4271_v19 }
0x1dda   : > { %5327 = vmatprep.subr.msk.bf16.mxu1 %vm637_vm2, %v4284_v56  ;;  %v4286_v32 = vsel %vm637_vm2, %v4283_v6, 0 }
0x1ddb   : > { %4300 = vmatpush1.bf16.msra.mxu1 %v4286_v32 }
0x1dde   : > { %5328 = vmatmul.mubr.msk.bf16.vlgmr.msra.gmra.mrb[36].mxu1 %vm633_vm3, %v6459_v35 }
0x1ddf   : > { %4693 = vmatprep.mubr.bf16.mxu1 %v6486_v58 }
0x1e9c   : > { %v3955_v57 = vpop.f32.mrb[32].mxu1 }
0x1e9d   : > { %v3956_v15 = vadd.f32 %v3955_v57, %v7870_v0  ;;  %v3957_v4 = vpop.f32.mrb[33].mxu1 }
0x1e9e   : > { %v3958_v62 = vadd.f32 %v3957_v4, %v7870_v0  ;;  %v3959_v55 = vpop.f32.mrb[34].mxu1 }
0x1e9f   : > { %6444 = vtanh.f32 %v3956_v15  ;;  %v3960_v8 = vpop.f32.mrb[35].mxu1 }
0x1ea0   : > { %6446 = vtanh.f32 %v3958_v62 }
0x1ea9   : > { %v6445_v59 = vpop.eup %6444 }
0x1eaa   : > { %v6447_v5 = vpop.eup %6446  ;;  %5078 = vst [vmem:[%s384_s16] sm:$0xff] %v6445_v59 }
0x1eab   : > { %5079 = vst [vmem:[%s384_s16 + $0x8] sm:$0xff] %v6447_v5 }
0x1eb1   : > { %v4325_v38 = vpop.f32.mrb[36].mxu1 }
0x1eb2   : > { %v4326_v33 = vadd.f32 %v4325_v38, %v7305_v53  ;;  %v4327_v10 = vpop.f32.mrb[37].mxu1 }
0x1eb3   : > { %v4328_v52 = vadd.f32 %v4327_v10, %v7305_v53  ;;  %v4329_v42 = vpop.f32.mrb[38].mxu1 }
0x1eb4   : > { %v4332_v0 = vmax.f32 %v4326_v33, 0.0  ;;  %v4330_v39 = vpop.f32.mrb[39].mxu1 }
0x1eb5   : > { %v4333_v60 = vmax.f32 %v4328_v52, 0.0 }
0x1eb6   : > { %4336 = vrot.lane.b32.xlu0 %v4332_v0, %s6472_s15 }
0x1eb7   : > { %4338 = vrot.lane.b32.xlu1 %v4333_v60, %s6472_s15 }
0x1f28   : > { %v4337_v20 = vpop.permute.xlu0 %4336 }
0x1f29   : > { %v4344_v50 = vsel %vm438_vm4, 0.0, %v4337_v20  ;;  %v4339_v34 = vpop.permute.xlu1 %4338 }
0x1f2a   : > { %v4340_v22 = vsel %vm438_vm4, %v4337_v20, %v4339_v34  ;;  %v4345_v51 = vsel %vm438_vm4, %v4339_v34, 0.0  ;;  %4401 = vrot.lane.b32.xlu0 %v4344_v50, %s6481_s23  ;;  %4365 = vrot.lane.b32.xlu1 %v4344_v50, %s6479_s21  ;;  %v4351_v2 = vmul.f32 %v6577_v24, %v4344_v50  ;;  %v4354_v3 = vmul.f32 %v6583_v27, %v4344_v50 }
0x1f2b   : > { %v6286_v53 = vpack.i.bf16 %v4345_v51, %v4340_v22  ;;  %v4348_v18 = vmul.f32 %v6581_v26, %v4344_v50  ;;  %v4352_v17 = vmul.f32 %v4340_v22, %v6592_v30  ;;  %v4353_v13 = vmul.f32 %v6575_v23, %v4345_v51 }
0x1f2c   : > { %v4349_v12 = vmul.f32 %v4340_v22, %v6597_v31  ;;  %v4350_v61 = vmul.f32 %v6579_v25, %v4345_v51  ;;  %v4355_v63 = vmul.f32 %v4340_v22, %v6609_v36  ;;  %v4356_v45 = vmul.f32 %v6588_v29, %v4345_v51 }
0x1f2d   : > { %v6296_v1 = vpack.i.bf16 %v4353_v13, %v4352_v17  ;;  %v4357_v56 = vmul.f32 %v6620_v41, %v4344_v50  ;;  %v4358_v6 = vmul.f32 %v4340_v22, %v6634_v49  ;;  %v4359_v32 = vmul.f32 %v6618_v40, %v4345_v51 }
0x1f2e   : > { %6287 = vrot.lane.b32.xlu1 %v6286_v53, %s6480_s22  ;;  %6277 = vrot.lane.b32.xlu0 %v6286_v53, %s6479_s21  ;;  %v6291_v46 = vpack.i.bf16 %v4350_v61, %v4349_v12  ;;  %v6301_v19 = vpack.i.bf16 %v4356_v45, %v4355_v63  ;;  %v4360_v57 = vmul.f32 %v6630_v48, %v4344_v50 }
0x1f2f   : > { %v6306_v35 = vpack.i.bf16 %v4359_v32, %v4358_v6  ;;  %v4361_v15 = vmul.f32 %v4340_v22, %v6646_v54  ;;  %v4362_v4 = vmul.f32 %v6628_v47, %v4345_v51  ;;  %v4346_v10 = vmul.f32 %v6553_v9, %v4344_v50 }
0x1f30   : > { %v4347_v52 = vmul.f32 %v6555_v11, %v4340_v22 }
0x1f31   : > { %v6311_v62 = vpack.i.bf16 %v4361_v15, %v4360_v57 }
0x1f32   : > { %4391 = vrot.lane.b32.xlu1 %v4351_v2, %s6482_s24  ;;  %6282 = vrot.lane.b32.xlu0 %v6286_v53, %s6481_s23 }
0x1f36   : > { %4414 = vrot.lane.b32.xlu1 %v4354_v3, %s6483_s25  ;;  %4378 = vrot.lane.b32.xlu0 %v4348_v18, %s6484_s26 }
0x1f3a   : > { %6297 = vrot.lane.b32.xlu1 %v6296_v1, %s6482_s24  ;;  %6292 = vrot.lane.b32.xlu0 %v6291_v46, %s6484_s26 }
0x1f3e   : > { %6302 = vrot.lane.b32.xlu1 %v6301_v19, %s6483_s25  ;;  %4427 = vrot.lane.b32.xlu0 %v4357_v56, %s6485_s27 }
0x1f42   : > { %4437 = vrot.lane.b32.xlu1 %v4344_v50, %s6480_s22  ;;  %6307 = vrot.lane.b32.xlu0 %v6306_v35, %s6485_s27 }
0x1f46   : > { %4454 = vrot.lane.b32.xlu1 %v4362_v4, %s6487_s28  ;;  %6312 = vrot.lane.b32.xlu0 %v6311_v62, %s6487_s28 }
0x1f9c   : > { %v4402_v55 = vpop.permute.xlu0 %4401  ;;  %v4366_v8 = vpop.permute.xlu1 %4365 }
0x1fa0   : > { %v6288_v59 = vpop.permute.xlu1 %6287  ;;  %v6278_v5 = vpop.permute.xlu0 %6277 }
0x1fa1   : > { %v6280_v38 = vunpack.i.h.bf16 %v6278_v5  ;;  %v6279_v33 = vunpack.i.l.bf16 %v6278_v5  ;;  %v6290_v57 = vunpack.i.h.bf16 %v6288_v59  ;;  %v6289_v15 = vunpack.i.l.bf16 %v6288_v59 }
0x1fa3   : > { %v4371_v42 = vsel %vm519_vm10, %v4366_v8, %v6279_v33  ;;  %v4372_v0 = vsel %vm519_vm10, %v6279_v33, %v6280_v38 }
0x1fa4   : > { %v4460_v39 = vpack.c.bf16 %v4371_v42, %v4346_v10  ;;  %v4392_v60 = vpop.permute.xlu1 %4391  ;;  %v6283_v20 = vpop.permute.xlu0 %6282  ;;  %v4461_v34 = vpack.c.bf16 %v4372_v0, %v4347_v52 }
0x1fa5   : > { %v6285_v12 = vunpack.i.h.bf16 %v6283_v20  ;;  %v6284_v22 = vunpack.i.l.bf16 %v6283_v20 }
0x1fa6   : > { %4476 = vmatprep.subr.bf16.mxu0 %v4461_v34 }
0x1fa7   : > { %4477 = vmatpush1.bf16.msra.mxu0 %v4460_v39  ;;  %v4407_v4 = vsel %vm558_vm13, %v4402_v55, %v6284_v22  ;;  %v4408_v8 = vsel %vm558_vm13, %v6284_v22, %v6285_v12  ;;  %v6460_v22 = vld [vmem:[%s8523_s2 + $0x8] sm:$0xf] }
0x1fa8   : > { %v4415_v51 = vpop.permute.xlu1 %4414  ;;  %v4379_v53 = vpop.permute.xlu0 %4378 }
0x1fac   : > { %v6298_v2 = vpop.permute.xlu1 %6297  ;;  %v6293_v3 = vpop.permute.xlu0 %6292 }
0x1fad   : > { %v6300_v18 = vunpack.i.h.bf16 %v6298_v2  ;;  %v6299_v17 = vunpack.i.l.bf16 %v6298_v2  ;;  %v6295_v13 = vunpack.i.h.bf16 %v6293_v3  ;;  %v6294_v50 = vunpack.i.l.bf16 %v6293_v3 }
0x1faf   : > { %v4397_v61 = vsel %vm547_vm11, %v4392_v60, %v6299_v17  ;;  %v4384_v1 = vsel %vm533_vm12, %v4379_v53, %v6294_v50  ;;  %v4385_v46 = vsel %vm533_vm12, %v6294_v50, %v6295_v13  ;;  %v4398_v63 = vsel %vm547_vm11, %v6299_v17, %v6300_v18 }
0x1fb0   : > { %v4462_v45 = vpack.c.bf16 %v4397_v61, %v4384_v1  ;;  %v6303_v19 = vpop.permute.xlu1 %6302  ;;  %v4428_v56 = vpop.permute.xlu0 %4427  ;;  %v4463_v6 = vpack.c.bf16 %v4398_v63, %v4385_v46  ;;  %v4444_v60 = vsel %vm597_vm15, %v6289_v15, %v6290_v57 }
0x1fb1   : > { %v6305_v32 = vunpack.i.h.bf16 %v6303_v19  ;;  %v6304_v35 = vunpack.i.l.bf16 %v6303_v19 }
0x1fb2   : > { %4478 = vmatprep.subr.bf16.mxu0 %v4463_v6 }
0x1fb3   : > { %v4420_v62 = vsel %vm572_vm14, %v4415_v51, %v6304_v35  ;;  %4479 = vmatpush1.bf16.msra.mxu0 %v4462_v45  ;;  %v4421_v5 = vsel %vm572_vm14, %v6304_v35, %v6305_v32 }
0x1fb4   : > { %v4464_v38 = vpack.c.bf16 %v4420_v62, %v4407_v4  ;;  %v4438_v33 = vpop.permute.xlu1 %4437  ;;  %v6308_v10 = vpop.permute.xlu0 %6307  ;;  %v4465_v52 = vpack.c.bf16 %v4421_v5, %v4408_v8 }
0x1fb5   : > { %v6310_v42 = vunpack.i.h.bf16 %v6308_v10  ;;  %v6309_v0 = vunpack.i.l.bf16 %v6308_v10  ;;  %v4443_v39 = vsel %vm597_vm15, %v4438_v33, %v6289_v15 }
0x1fb6   : > { %4480 = vmatprep.subr.bf16.mxu0 %v4465_v52 }
0x1fb7   : > { %v4433_v59 = vsel %vm586_vm0, %v4428_v56, %v6309_v0  ;;  %4481 = vmatpush1.bf16.msra.mxu0 %v4464_v38  ;;  %v4434_v55 = vsel %vm586_vm0, %v6309_v0, %v6310_v42 }
0x1fb8   : > { %v4466_v20 = vpack.c.bf16 %v4443_v39, %v4433_v59  ;;  %v6313_v34 = vpop.permute.xlu0 %6312  ;;  %v4467_v51 = vpack.c.bf16 %v4444_v60, %v4434_v55  ;;  %v4455_v3 = vpop.permute.xlu1 %4454 }
0x1fb9   : > { %v6315_v53 = vunpack.i.h.bf16 %v6313_v34  ;;  %v6314_v2 = vunpack.i.l.bf16 %v6313_v34 }
0x1fba   : > { %4482 = vmatprep.subr.bf16.mxu0 %v4467_v51 }
0x1fbb   : > { %v4457_v18 = vsel %vm611_vm1, %v6315_v53, %v4455_v3  ;;  %4483 = vmatpush1.bf16.msra.mxu0 %v4466_v20  ;;  %v4456_v17 = vsel %vm611_vm1, %v6314_v2, %v6315_v53 }
0x1fbc   : > { %v4469_v13 = vpack.c.bf16 %v4457_v18, %v4457_v18  ;;  %v4468_v50 = vpack.c.bf16 %v4456_v17, %v4456_v17 }
0x1fbe   : > { %5329 = vmatprep.subr.msk.bf16.mxu0 %vm637_vm2, %v4469_v13  ;;  %v4471_v12 = vsel %vm637_vm2, %v4468_v50, 0 }
0x1fbf   : > { %4485 = vmatpush1.bf16.msra.mxu0 %v4471_v12 }
0x1fc2   : > { %5330 = vmatmul.mubr.msk.bf16.vlgmr.msra.gmra.mrb[40].mxu0 %vm633_vm3, %v6460_v22 }
0x1fc3   : > { %4878 = vmatprep.mubr.bf16.mxu0 %v6486_v58 }
0x2095   : > { %v4510_v61 = vpop.f32.mrb[40].mxu0 }
0x2096   : > { %v4511_v1 = vadd.f32 %v4510_v61, %v7373_v28  ;;  %v4512_v46 = vpop.f32.mrb[41].mxu0 }
0x2097   : > { %v4513_v63 = vadd.f32 %v4512_v46, %v7373_v28  ;;  %v4514_v45 = vpop.f32.mrb[42].mxu0 }
0x2098   : > { %v8317_v19 = vadd.f32 %v4511_v1, %v4147_v43  ;;  %v4515_v56 = vpop.f32.mrb[43].mxu0 }
0x2099   : > { %v8321_v6 = vadd.f32 %v4513_v63, %v4148_v37 }
0x209a   : > { %4521 = vrot.lane.b32.xlu0 %v8317_v19, %s6472_s15 }
0x209b   : > { %4523 = vrot.lane.b32.xlu1 %v8321_v6, %s6472_s15 }
0x210c   : > { %v4522_v32 = vpop.permute.xlu0 %4521 }
0x210d   : > { %v4529_v35 = vsel %vm438_vm4, 0.0, %v4522_v32  ;;  %v4524_v28 = vpop.permute.xlu1 %4523 }
0x210e   : > { %v4525_v57 = vsel %vm438_vm4, %v4522_v32, %v4524_v28  ;;  %v4530_v14 = vsel %vm438_vm4, %v4524_v28, 0.0  ;;  %4586 = vrot.lane.b32.xlu0 %v4529_v35, %s6481_s23  ;;  %4550 = vrot.lane.b32.xlu1 %v4529_v35, %s6479_s21  ;;  %v4536_v43 = vmul.f32 %v6577_v24, %v4529_v35  ;;  %v4539_v37 = vmul.f32 %v6583_v27, %v4529_v35 }
0x210f   : > { %v6326_v16 = vpack.i.bf16 %v4530_v14, %v4525_v57  ;;  %v4533_v15 = vmul.f32 %v6581_v26, %v4529_v35  ;;  %v4537_v4 = vmul.f32 %v4525_v57, %v6592_v30  ;;  %v4538_v62 = vmul.f32 %v6575_v23, %v4530_v14 }
0x2110   : > { %v4534_v8 = vmul.f32 %v4525_v57, %v6597_v31  ;;  %v4535_v5 = vmul.f32 %v6579_v25, %v4530_v14  ;;  %v4540_v10 = vmul.f32 %v4525_v57, %v6609_v36  ;;  %v4541_v52 = vmul.f32 %v6588_v29, %v4530_v14 }
0x2111   : > { %v6336_v38 = vpack.i.bf16 %v4538_v62, %v4537_v4  ;;  %v4542_v0 = vmul.f32 %v6620_v41, %v4529_v35  ;;  %v4543_v39 = vmul.f32 %v4525_v57, %v6634_v49  ;;  %v4544_v59 = vmul.f32 %v6618_v40, %v4530_v14 }
0x2112   : > { %6327 = vrot.lane.b32.xlu1 %v6326_v16, %s6480_s22  ;;  %6317 = vrot.lane.b32.xlu0 %v6326_v16, %s6479_s21  ;;  %v6331_v33 = vpack.i.bf16 %v4535_v5, %v4534_v8  ;;  %v6341_v42 = vpack.i.bf16 %v4541_v52, %v4540_v10  ;;  %v4545_v60 = vmul.f32 %v6630_v48, %v4529_v35 }
0x2113   : > { %v6346_v55 = vpack.i.bf16 %v4544_v59, %v4543_v39  ;;  %v4546_v20 = vmul.f32 %v4525_v57, %v6646_v54  ;;  %v4547_v34 = vmul.f32 %v6628_v47, %v4530_v14  ;;  %v4531_v50 = vmul.f32 %v6553_v9, %v4529_v35 }
0x2114   : > { %v4532_v12 = vmul.f32 %v6555_v11, %v4525_v57 }
0x2115   : > { %v6351_v51 = vpack.i.bf16 %v4546_v20, %v4545_v60 }
0x2116   : > { %4576 = vrot.lane.b32.xlu1 %v4536_v43, %s6482_s24  ;;  %6322 = vrot.lane.b32.xlu0 %v6326_v16, %s6481_s23 }
0x211a   : > { %4599 = vrot.lane.b32.xlu1 %v4539_v37, %s6483_s25  ;;  %4563 = vrot.lane.b32.xlu0 %v4533_v15, %s6484_s26 }
0x211e   : > { %6337 = vrot.lane.b32.xlu1 %v6336_v38, %s6482_s24  ;;  %6332 = vrot.lane.b32.xlu0 %v6331_v33, %s6484_s26 }
0x2122   : > { %6342 = vrot.lane.b32.xlu1 %v6341_v42, %s6483_s25  ;;  %4612 = vrot.lane.b32.xlu0 %v4542_v0, %s6485_s27 }
0x2126   : > { %4622 = vrot.lane.b32.xlu1 %v4529_v35, %s6480_s22  ;;  %6347 = vrot.lane.b32.xlu0 %v6346_v55, %s6485_s27 }
0x212a   : > { %4639 = vrot.lane.b32.xlu1 %v4547_v34, %s6487_s28  ;;  %6352 = vrot.lane.b32.xlu0 %v6351_v51, %s6487_s28 }
0x2180   : > { %v4587_v53 = vpop.permute.xlu0 %4586  ;;  %v4551_v2 = vpop.permute.xlu1 %4550 }
0x2184   : > { %v6328_v3 = vpop.permute.xlu1 %6327  ;;  %v6318_v18 = vpop.permute.xlu0 %6317 }
0x2185   : > { %v6320_v17 = vunpack.i.h.bf16 %v6318_v18  ;;  %v6319_v13 = vunpack.i.l.bf16 %v6318_v18  ;;  %v6330_v39 = vunpack.i.h.bf16 %v6328_v3  ;;  %v6329_v59 = vunpack.i.l.bf16 %v6328_v3 }
0x2187   : > { %v4556_v22 = vsel %vm519_vm10, %v4551_v2, %v6319_v13  ;;  %v4557_v61 = vsel %vm519_vm10, %v6319_v13, %v6320_v17 }
0x2188   : > { %v4645_v1 = vpack.c.bf16 %v4556_v22, %v4531_v50  ;;  %v4577_v46 = vpop.permute.xlu1 %4576  ;;  %v6323_v63 = vpop.permute.xlu0 %6322  ;;  %v4646_v45 = vpack.c.bf16 %v4557_v61, %v4532_v12  ;;  %v4629_v22 = vsel %vm597_vm15, %v6329_v59, %v6330_v39 }
0x2189   : > { %v6325_v15 = vunpack.i.h.bf16 %v6323_v63  ;;  %v6324_v57 = vunpack.i.l.bf16 %v6323_v63 }
0x218a   : > { %4661 = vmatprep.subr.bf16.mxu1 %v4646_v45 }
0x218b   : > { %4662 = vmatpush1.bf16.msra.mxu1 %v4645_v1  ;;  %v4592_v55 = vsel %vm558_vm13, %v4587_v53, %v6324_v57  ;;  %v4593_v20 = vsel %vm558_vm13, %v6324_v57, %v6325_v15 }
0x218c   : > { %v4600_v56 = vpop.permute.xlu1 %4599  ;;  %v4564_v32 = vpop.permute.xlu0 %4563 }
0x2190   : > { %v6338_v28 = vpop.permute.xlu1 %6337  ;;  %v6333_v14 = vpop.permute.xlu0 %6332 }
0x2191   : > { %v6340_v16 = vunpack.i.h.bf16 %v6338_v28  ;;  %v6339_v43 = vunpack.i.l.bf16 %v6338_v28  ;;  %v6335_v37 = vunpack.i.h.bf16 %v6333_v14  ;;  %v6334_v35 = vunpack.i.l.bf16 %v6333_v14 }
0x2193   : > { %v4582_v4 = vsel %vm547_vm11, %v4577_v46, %v6339_v43  ;;  %v4569_v62 = vsel %vm533_vm12, %v4564_v32, %v6334_v35  ;;  %v4570_v8 = vsel %vm533_vm12, %v6334_v35, %v6335_v37  ;;  %v4583_v5 = vsel %vm547_vm11, %v6339_v43, %v6340_v16  ;;  %v6461_v37 = vld [vmem:[%s8523_s2 + $0xc] sm:$0xf] }
0x2194   : > { %v4647_v38 = vpack.c.bf16 %v4582_v4, %v4569_v62  ;;  %v6343_v33 = vpop.permute.xlu1 %6342  ;;  %v4613_v10 = vpop.permute.xlu0 %4612  ;;  %v4648_v52 = vpack.c.bf16 %v4583_v5, %v4570_v8 }
0x2195   : > { %v6345_v42 = vunpack.i.h.bf16 %v6343_v33  ;;  %v6344_v0 = vunpack.i.l.bf16 %v6343_v33 }
0x2196   : > { %4663 = vmatprep.subr.bf16.mxu1 %v4648_v52 }
0x2197   : > { %v4605_v60 = vsel %vm572_vm14, %v4600_v56, %v6344_v0  ;;  %4664 = vmatpush1.bf16.msra.mxu1 %v4647_v38  ;;  %v4606_v34 = vsel %vm572_vm14, %v6344_v0, %v6345_v42 }
0x2198   : > { %v4649_v51 = vpack.c.bf16 %v4605_v60, %v4592_v55  ;;  %v4623_v2 = vpop.permute.xlu1 %4622  ;;  %v6348_v18 = vpop.permute.xlu0 %6347  ;;  %v4650_v17 = vpack.c.bf16 %v4606_v34, %v4593_v20 }
0x2199   : > { %v6350_v13 = vunpack.i.h.bf16 %v6348_v18  ;;  %v6349_v50 = vunpack.i.l.bf16 %v6348_v18  ;;  %v4628_v12 = vsel %vm597_vm15, %v4623_v2, %v6329_v59 }
0x219a   : > { %4665 = vmatprep.subr.bf16.mxu1 %v4650_v17 }
0x219b   : > { %v4618_v3 = vsel %vm586_vm0, %v4613_v10, %v6349_v50  ;;  %4666 = vmatpush1.bf16.msra.mxu1 %v4649_v51  ;;  %v4619_v53 = vsel %vm586_vm0, %v6349_v50, %v6350_v13 }
0x219c   : > { %v4651_v61 = vpack.c.bf16 %v4628_v12, %v4618_v3  ;;  %v6353_v1 = vpop.permute.xlu0 %6352  ;;  %v4652_v46 = vpack.c.bf16 %v4629_v22, %v4619_v53  ;;  %v4640_v56 = vpop.permute.xlu1 %4639 }
0x219d   : > { %v6355_v63 = vunpack.i.h.bf16 %v6353_v1  ;;  %v6354_v45 = vunpack.i.l.bf16 %v6353_v1 }
0x219e   : > { %4667 = vmatprep.subr.bf16.mxu1 %v4652_v46 }
0x219f   : > { %v4642_v32 = vsel %vm611_vm1, %v6355_v63, %v4640_v56  ;;  %4668 = vmatpush1.bf16.msra.mxu1 %v4651_v61  ;;  %v4641_v28 = vsel %vm611_vm1, %v6354_v45, %v6355_v63 }
0x21a0   : > { %v4654_v14 = vpack.c.bf16 %v4642_v32, %v4642_v32  ;;  %v4653_v16 = vpack.c.bf16 %v4641_v28, %v4641_v28 }
0x21a2   : > { %5331 = vmatprep.subr.msk.bf16.mxu1 %vm637_vm2, %v4654_v14  ;;  %v4656_v43 = vsel %vm637_vm2, %v4653_v16, 0 }
0x21a3   : > { %4670 = vmatpush1.bf16.msra.mxu1 %v4656_v43 }
0x21a6   : > { %5332 = vmatmul.mubr.msk.bf16.vlgmr.msra.gmra.mrb[40].mxu1 %vm633_vm3, %v6461_v37 }
0x21a7   : > { %5063 = vmatprep.mubr.bf16.mxu1 %v6486_v58 }
0x2279   : > { %v4695_v35 = vpop.f32.mrb[40].mxu1 }
0x227a   : > { %v4696_v15 = vadd.f32 %v4695_v35, %v7451_v44  ;;  %v4697_v57 = vpop.f32.mrb[41].mxu1 }
0x227b   : > { %v4698_v4 = vadd.f32 %v4697_v57, %v7451_v44  ;;  %v4699_v62 = vpop.f32.mrb[42].mxu1 }
0x227c   : > { %v4702_v8 = vmax.f32 %v4696_v15, 0.0  ;;  %v4700_v5 = vpop.f32.mrb[43].mxu1 }
0x227d   : > { %v4703_v38 = vmax.f32 %v4698_v4, 0.0 }
0x227e   : > { %4706 = vrot.lane.b32.xlu0 %v4702_v8, %s6472_s15 }
0x227f   : > { %4708 = vrot.lane.b32.xlu1 %v4703_v38, %s6472_s15 }
0x22f0   : > { %v4707_v33 = vpop.permute.xlu0 %4706 }
0x22f1   : > { %v4714_v10 = vsel %vm438_vm4, 0.0, %v4707_v33  ;;  %v4709_v52 = vpop.permute.xlu1 %4708 }
0x22f2   : > { %v4710_v58 = vsel %vm438_vm4, %v4707_v33, %v4709_v52  ;;  %v4715_v42 = vsel %vm438_vm4, %v4709_v52, 0.0  ;;  %4771 = vrot.lane.b32.xlu0 %v4714_v10, %s6481_s23  ;;  %4735 = vrot.lane.b32.xlu1 %v4714_v10, %s6479_s21  ;;  %v4721_v0 = vmul.f32 %v6577_v24, %v4714_v10  ;;  %v4724_v39 = vmul.f32 %v6583_v27, %v4714_v10 }
0x22f3   : > { %v6366_v44 = vpack.i.bf16 %v4715_v42, %v4710_v58  ;;  %v4718_v59 = vmul.f32 %v6581_v26, %v4714_v10  ;;  %v4722_v55 = vmul.f32 %v4710_v58, %v6592_v30  ;;  %v4723_v60 = vmul.f32 %v6575_v23, %v4715_v42 }
0x22f4   : > { %v4719_v20 = vmul.f32 %v4710_v58, %v6597_v31  ;;  %v4720_v34 = vmul.f32 %v6579_v25, %v4715_v42  ;;  %v4725_v18 = vmul.f32 %v4710_v58, %v6609_v36  ;;  %v4726_v17 = vmul.f32 %v6588_v29, %v4715_v42 }
0x22f5   : > { %v6376_v51 = vpack.i.bf16 %v4723_v60, %v4722_v55  ;;  %v4727_v50 = vmul.f32 %v6620_v41, %v4714_v10  ;;  %v4728_v12 = vmul.f32 %v4710_v58, %v6634_v49  ;;  %v4729_v3 = vmul.f32 %v6618_v40, %v4715_v42 }
0x22f6   : > { %6367 = vrot.lane.b32.xlu1 %v6366_v44, %s6480_s22  ;;  %6357 = vrot.lane.b32.xlu0 %v6366_v44, %s6479_s21  ;;  %v6371_v2 = vpack.i.bf16 %v4720_v34, %v4719_v20  ;;  %v6381_v13 = vpack.i.bf16 %v4726_v17, %v4725_v18  ;;  %v4730_v22 = vmul.f32 %v6630_v48, %v4714_v10 }
0x22f7   : > { %v6386_v53 = vpack.i.bf16 %v4729_v3, %v4728_v12  ;;  %v4731_v61 = vmul.f32 %v4710_v58, %v6646_v54  ;;  %v4732_v1 = vmul.f32 %v6628_v47, %v4715_v42  ;;  %v4716_v16 = vmul.f32 %v6553_v9, %v4714_v10 }
0x22f8   : > { %v4717_v43 = vmul.f32 %v6555_v11, %v4710_v58 }
0x22f9   : > { %v6391_v46 = vpack.i.bf16 %v4731_v61, %v4730_v22 }
0x22fa   : > { %4761 = vrot.lane.b32.xlu1 %v4721_v0, %s6482_s24  ;;  %6362 = vrot.lane.b32.xlu0 %v6366_v44, %s6481_s23 }
0x22fe   : > { %4784 = vrot.lane.b32.xlu1 %v4724_v39, %s6483_s25  ;;  %4748 = vrot.lane.b32.xlu0 %v4718_v59, %s6484_s26 }
0x2302   : > { %6377 = vrot.lane.b32.xlu1 %v6376_v51, %s6482_s24  ;;  %6372 = vrot.lane.b32.xlu0 %v6371_v2, %s6484_s26 }
0x2306   : > { %6382 = vrot.lane.b32.xlu1 %v6381_v13, %s6483_s25  ;;  %4797 = vrot.lane.b32.xlu0 %v4727_v50, %s6485_s27 }
0x230a   : > { %4807 = vrot.lane.b32.xlu1 %v4714_v10, %s6480_s22  ;;  %6387 = vrot.lane.b32.xlu0 %v6386_v53, %s6485_s27 }
0x230e   : > { %4824 = vrot.lane.b32.xlu1 %v4732_v1, %s6487_s28  ;;  %6392 = vrot.lane.b32.xlu0 %v6391_v46, %s6487_s28 }
0x2364   : > { %v4772_v63 = vpop.permute.xlu0 %4771  ;;  %v4736_v45 = vpop.permute.xlu1 %4735 }
0x2368   : > { %v6368_v56 = vpop.permute.xlu1 %6367  ;;  %v6358_v32 = vpop.permute.xlu0 %6357 }
0x2369   : > { %v6360_v28 = vunpack.i.h.bf16 %v6358_v32  ;;  %v6359_v14 = vunpack.i.l.bf16 %v6358_v32  ;;  %v6370_v13 = vunpack.i.h.bf16 %v6368_v56  ;;  %v6369_v50 = vunpack.i.l.bf16 %v6368_v56 }
0x236b   : > { %v4741_v37 = vsel %vm519_vm10, %v4736_v45, %v6359_v14  ;;  %v4742_v35 = vsel %vm519_vm10, %v6359_v14, %v6360_v28 }
0x236c   : > { %v4830_v15 = vpack.c.bf16 %v4741_v37, %v4716_v16  ;;  %v4762_v57 = vpop.permute.xlu1 %4761  ;;  %v6363_v4 = vpop.permute.xlu0 %6362  ;;  %v4831_v62 = vpack.c.bf16 %v4742_v35, %v4717_v43  ;;  %v4814_v16 = vsel %vm597_vm15, %v6369_v50, %v6370_v13 }
0x236d   : > { %v6365_v0 = vunpack.i.h.bf16 %v6363_v4  ;;  %v6364_v58 = vunpack.i.l.bf16 %v6363_v4 }
0x236e   : > { %4846 = vmatprep.subr.bf16.mxu0 %v4831_v62 }
0x236f   : > { %4847 = vmatpush1.bf16.msra.mxu0 %v4830_v15  ;;  %v4777_v12 = vsel %vm558_vm13, %v4772_v63, %v6364_v58  ;;  %v4778_v53 = vsel %vm558_vm13, %v6364_v58, %v6365_v0 }
0x2370   : > { %v4785_v8 = vpop.permute.xlu1 %4784  ;;  %v4749_v5 = vpop.permute.xlu0 %4748 }
0x2374   : > { %v6378_v38 = vpop.permute.xlu1 %6377  ;;  %v6373_v33 = vpop.permute.xlu0 %6372 }
0x2375   : > { %v6380_v52 = vunpack.i.h.bf16 %v6378_v38  ;;  %v6379_v42 = vunpack.i.l.bf16 %v6378_v38  ;;  %v6375_v44 = vunpack.i.h.bf16 %v6373_v33  ;;  %v6374_v10 = vunpack.i.l.bf16 %v6373_v33 }
0x2377   : > { %v4767_v39 = vsel %vm547_vm11, %v4762_v57, %v6379_v42  ;;  %v4754_v59 = vsel %vm533_vm12, %v4749_v5, %v6374_v10  ;;  %v4755_v55 = vsel %vm533_vm12, %v6374_v10, %v6375_v44  ;;  %v4768_v60 = vsel %vm547_vm11, %v6379_v42, %v6380_v52  ;;  %v6462_v52 = vld [vmem:[%s8523_s2 + $0x10] sm:$0xf] }
0x2378   : > { %v4832_v20 = vpack.c.bf16 %v4767_v39, %v4754_v59  ;;  %v6383_v34 = vpop.permute.xlu1 %6382  ;;  %v4798_v51 = vpop.permute.xlu0 %4797  ;;  %v4833_v2 = vpack.c.bf16 %v4768_v60, %v4755_v55 }
0x2379   : > { %v6385_v18 = vunpack.i.h.bf16 %v6383_v34  ;;  %v6384_v17 = vunpack.i.l.bf16 %v6383_v34 }
0x237a   : > { %4848 = vmatprep.subr.bf16.mxu0 %v4833_v2 }
0x237b   : > { %v4790_v3 = vsel %vm572_vm14, %v4785_v8, %v6384_v17  ;;  %4849 = vmatpush1.bf16.msra.mxu0 %v4832_v20  ;;  %v4791_v22 = vsel %vm572_vm14, %v6384_v17, %v6385_v18 }
0x237c   : > { %v4834_v61 = vpack.c.bf16 %v4790_v3, %v4777_v12  ;;  %v4808_v1 = vpop.permute.xlu1 %4807  ;;  %v6388_v46 = vpop.permute.xlu0 %6387  ;;  %v4835_v45 = vpack.c.bf16 %v4791_v22, %v4778_v53 }
0x237d   : > { %v6390_v32 = vunpack.i.h.bf16 %v6388_v46  ;;  %v6389_v28 = vunpack.i.l.bf16 %v6388_v46  ;;  %v4813_v14 = vsel %vm597_vm15, %v4808_v1, %v6369_v50 }
0x237e   : > { %4850 = vmatprep.subr.bf16.mxu0 %v4835_v45 }
0x237f   : > { %v4803_v56 = vsel %vm586_vm0, %v4798_v51, %v6389_v28  ;;  %4851 = vmatpush1.bf16.msra.mxu0 %v4834_v61  ;;  %v4804_v63 = vsel %vm586_vm0, %v6389_v28, %v6390_v32 }
0x2380   : > { %v4836_v43 = vpack.c.bf16 %v4813_v14, %v4803_v56  ;;  %v6393_v37 = vpop.permute.xlu0 %6392  ;;  %v4837_v35 = vpack.c.bf16 %v4814_v16, %v4804_v63  ;;  %v4825_v4 = vpop.permute.xlu1 %4824 }
0x2381   : > { %v6395_v15 = vunpack.i.h.bf16 %v6393_v37  ;;  %v6394_v57 = vunpack.i.l.bf16 %v6393_v37 }
0x2382   : > { %4852 = vmatprep.subr.bf16.mxu0 %v4837_v35 }
0x2383   : > { %v4827_v62 = vsel %vm611_vm1, %v6395_v15, %v4825_v4  ;;  %4853 = vmatpush1.bf16.msra.mxu0 %v4836_v43  ;;  %v4826_v8 = vsel %vm611_vm1, %v6394_v57, %v6395_v15 }
0x2384   : > { %v4839_v5 = vpack.c.bf16 %v4827_v62, %v4827_v62  ;;  %v4838_v38 = vpack.c.bf16 %v4826_v8, %v4826_v8 }
0x2386   : > { %5333 = vmatprep.subr.msk.bf16.mxu0 %vm637_vm2, %v4839_v5  ;;  %v4841_v33 = vsel %vm637_vm2, %v4838_v38, 0 }
0x2387   : > { %4855 = vmatpush1.bf16.msra.mxu0 %v4841_v33 }
0x238a   : > { %5334 = vmatmul.mubr.msk.bf16.vlgmr.msra.gmra.mrb[44].mxu0 %vm633_vm3, %v6462_v52 }
0x245d   : > { %v4880_v42 = vpop.f32.mrb[44].mxu0 }
0x245e   : > { %v4881_v44 = vadd.f32 %v4880_v42, %v7519_v21  ;;  %v4882_v10 = vpop.f32.mrb[45].mxu0 }
0x245f   : > { %v4883_v0 = vadd.f32 %v4882_v10, %v7519_v21  ;;  %v4884_v58 = vpop.f32.mrb[46].mxu0 }
0x2460   : > { %v4887_v39 = vadd.f32 %v4881_v44, %v8317_v19  ;;  %v4885_v59 = vpop.f32.mrb[47].mxu0 }
0x2461   : > { %v4888_v55 = vadd.f32 %v4883_v0, %v8321_v6 }
0x2462   : > { %4891 = vrot.lane.b32.xlu0 %v4887_v39, %s6472_s15 }
0x2463   : > { %4893 = vrot.lane.b32.xlu1 %v4888_v55, %s6472_s15 }
0x24d4   : > { %v4892_v60 = vpop.permute.xlu0 %4891 }
0x24d5   : > { %v4899_v20 = vsel %vm438_vm4, 0.0, %v4892_v60  ;;  %v4894_v34 = vpop.permute.xlu1 %4893 }
0x24d6   : > { %v4895_v51 = vsel %vm438_vm4, %v4892_v60, %v4894_v34  ;;  %v4900_v2 = vsel %vm438_vm4, %v4894_v34, 0.0  ;;  %4956 = vrot.lane.b32.xlu0 %v4899_v20, %s6481_s23  ;;  %4920 = vrot.lane.b32.xlu1 %v4899_v20, %s6479_s21  ;;  %v4906_v19 = vmul.f32 %v6577_v24, %v4899_v20  ;;  %v4909_v6 = vmul.f32 %v6583_v27, %v4899_v20 }
0x24d7   : > { %v6406_v21 = vpack.i.bf16 %v4900_v2, %v4895_v51  ;;  %v4903_v18 = vmul.f32 %v6581_v26, %v4899_v20  ;;  %v4907_v17 = vmul.f32 %v4895_v51, %v6592_v30  ;;  %v4908_v13 = vmul.f32 %v6575_v23, %v4900_v2 }
0x24d8   : > { %v4904_v50 = vmul.f32 %v4895_v51, %v6597_v31  ;;  %v4905_v12 = vmul.f32 %v6579_v25, %v4900_v2  ;;  %v4910_v53 = vmul.f32 %v4895_v51, %v6609_v36  ;;  %v4911_v27 = vmul.f32 %v6588_v29, %v4900_v2 }
0x24d9   : > { %v6416_v24 = vpack.i.bf16 %v4908_v13, %v4907_v17  ;;  %v4912_v23 = vmul.f32 %v6620_v41, %v4899_v20  ;;  %v4913_v30 = vmul.f32 %v4895_v51, %v6634_v49  ;;  %v4914_v25 = vmul.f32 %v6618_v40, %v4900_v2 }
0x24da   : > { %6407 = vrot.lane.b32.xlu1 %v6406_v21, %s6480_s22  ;;  %6397 = vrot.lane.b32.xlu0 %v6406_v21, %s6479_s21  ;;  %v6411_v3 = vpack.i.bf16 %v4905_v12, %v4904_v50  ;;  %v6421_v26 = vpack.i.bf16 %v4911_v27, %v4910_v53  ;;  %v4915_v36 = vmul.f32 %v6630_v48, %v4899_v20 }
0x24db   : > { %v6426_v31 = vpack.i.bf16 %v4914_v25, %v4913_v30  ;;  %v4916_v29 = vmul.f32 %v4895_v51, %v6646_v54  ;;  %v4917_v22 = vmul.f32 %v6628_v47, %v4900_v2  ;;  %v4901_v48 = vmul.f32 %v6553_v9, %v4899_v20 }
0x24dc   : > { %v4902_v54 = vmul.f32 %v6555_v11, %v4895_v51 }
0x24dd   : > { %v6431_v41 = vpack.i.bf16 %v4916_v29, %v4915_v36 }
0x24de   : > { %4946 = vrot.lane.b32.xlu1 %v4906_v19, %s6482_s24  ;;  %6402 = vrot.lane.b32.xlu0 %v6406_v21, %s6481_s23 }
0x24e2   : > { %4969 = vrot.lane.b32.xlu1 %v4909_v6, %s6483_s25  ;;  %4933 = vrot.lane.b32.xlu0 %v4903_v18, %s6484_s26 }
0x24e6   : > { %6417 = vrot.lane.b32.xlu1 %v6416_v24, %s6482_s24  ;;  %6412 = vrot.lane.b32.xlu0 %v6411_v3, %s6484_s26  ;;  %s389_s24 = scalar_lea.vmem %s8530_s9, %s6546_s11 }
0x24ea   : > { %6422 = vrot.lane.b32.xlu1 %v6421_v26, %s6483_s25  ;;  %4982 = vrot.lane.b32.xlu0 %v4912_v23, %s6485_s27 }
0x24ee   : > { %4992 = vrot.lane.b32.xlu1 %v4899_v20, %s6480_s22  ;;  %6427 = vrot.lane.b32.xlu0 %v6426_v31, %s6485_s27 }
0x24f2   : > { %5009 = vrot.lane.b32.xlu1 %v4917_v22, %s6487_s28  ;;  %6432 = vrot.lane.b32.xlu0 %v6431_v41, %s6487_s28  ;;  %v6463_v22 = vld [vmem:[%s8523_s2 + $0x14] sm:$0xf] }
0x2548   : > { %v4957_v40 = vpop.permute.xlu0 %4956  ;;  %v4921_v49 = vpop.permute.xlu1 %4920 }
0x254c   : > { %v6408_v61 = vpop.permute.xlu1 %6407  ;;  %v6398_v1 = vpop.permute.xlu0 %6397 }
0x254d   : > { %v6400_v46 = vunpack.i.h.bf16 %v6398_v1  ;;  %v6399_v45 = vunpack.i.l.bf16 %v6398_v1  ;;  %v6410_v39 = vunpack.i.h.bf16 %v6408_v61  ;;  %v6409_v59 = vunpack.i.l.bf16 %v6408_v61 }
0x254f   : > { %v4926_v32 = vsel %vm519_vm10, %v4921_v49, %v6399_v45  ;;  %v4927_v28 = vsel %vm519_vm10, %v6399_v45, %v6400_v46  ;;  %v4999_v12 = vsel %vm597_vm15, %v6409_v59, %v6410_v39 }
0x2550   : > { %v5015_v47 = vpack.c.bf16 %v4926_v32, %v4901_v48  ;;  %v4947_v14 = vpop.permute.xlu1 %4946  ;;  %v6403_v56 = vpop.permute.xlu0 %6402  ;;  %v5016_v63 = vpack.c.bf16 %v4927_v28, %v4902_v54 }
0x2551   : > { %v6405_v62 = vunpack.i.h.bf16 %v6403_v56  ;;  %v6404_v11 = vunpack.i.l.bf16 %v6403_v56 }
0x2552   : > { %5031 = vmatprep.subr.bf16.mxu1 %v5016_v63 }
0x2553   : > { %5032 = vmatpush1.bf16.msra.mxu1 %v5015_v47  ;;  %v4962_v55 = vsel %vm558_vm13, %v4957_v40, %v6404_v11  ;;  %v4963_v20 = vsel %vm558_vm13, %v6404_v11, %v6405_v62 }
0x2554   : > { %v4970_v16 = vpop.permute.xlu1 %4969  ;;  %v4934_v43 = vpop.permute.xlu0 %4933 }
0x2558   : > { %v6418_v37 = vpop.permute.xlu1 %6417  ;;  %v6413_v35 = vpop.permute.xlu0 %6412 }
0x2559   : > { %v6420_v15 = vunpack.i.h.bf16 %v6418_v37  ;;  %v6419_v57 = vunpack.i.l.bf16 %v6418_v37  ;;  %v6415_v4 = vunpack.i.h.bf16 %v6413_v35  ;;  %v6414_v9 = vunpack.i.l.bf16 %v6413_v35 }
0x255b   : > { %v4952_v8 = vsel %vm547_vm11, %v4947_v14, %v6419_v57  ;;  %v4939_v5 = vsel %vm533_vm12, %v4934_v43, %v6414_v9  ;;  %v4940_v38 = vsel %vm533_vm12, %v6414_v9, %v6415_v4  ;;  %v4953_v33 = vsel %vm547_vm11, %v6419_v57, %v6420_v15 }
0x255c   : > { %v5017_v52 = vpack.c.bf16 %v4952_v8, %v4939_v5  ;;  %v6423_v42 = vpop.permute.xlu1 %6422  ;;  %v4983_v44 = vpop.permute.xlu0 %4982  ;;  %v5018_v10 = vpack.c.bf16 %v4953_v33, %v4940_v38 }
0x255d   : > { %v6425_v0 = vunpack.i.h.bf16 %v6423_v42  ;;  %v6424_v58 = vunpack.i.l.bf16 %v6423_v42 }
0x255e   : > { %5033 = vmatprep.subr.bf16.mxu1 %v5018_v10 }
0x255f   : > { %v4975_v60 = vsel %vm572_vm14, %v4970_v16, %v6424_v58  ;;  %5034 = vmatpush1.bf16.msra.mxu1 %v5017_v52  ;;  %v4976_v34 = vsel %vm572_vm14, %v6424_v58, %v6425_v0 }
0x2560   : > { %v5019_v51 = vpack.c.bf16 %v4975_v60, %v4962_v55  ;;  %v4993_v2 = vpop.permute.xlu1 %4992  ;;  %v6428_v21 = vpop.permute.xlu0 %6427  ;;  %v5020_v19 = vpack.c.bf16 %v4976_v34, %v4963_v20 }
0x2561   : > { %v6430_v6 = vunpack.i.h.bf16 %v6428_v21  ;;  %v6429_v18 = vunpack.i.l.bf16 %v6428_v21  ;;  %v4998_v17 = vsel %vm597_vm15, %v4993_v2, %v6409_v59 }
0x2562   : > { %5035 = vmatprep.subr.bf16.mxu1 %v5020_v19 }
0x2563   : > { %v4988_v13 = vsel %vm586_vm0, %v4983_v44, %v6429_v18  ;;  %5036 = vmatpush1.bf16.msra.mxu1 %v5019_v51  ;;  %v4989_v50 = vsel %vm586_vm0, %v6429_v18, %v6430_v6 }
0x2564   : > { %v5021_v24 = vpack.c.bf16 %v4998_v17, %v4988_v13  ;;  %v6433_v3 = vpop.permute.xlu0 %6432  ;;  %v5022_v53 = vpack.c.bf16 %v4999_v12, %v4989_v50  ;;  %v5010_v23 = vpop.permute.xlu1 %5009 }
0x2565   : > { %v6435_v27 = vunpack.i.h.bf16 %v6433_v3  ;;  %v6434_v26 = vunpack.i.l.bf16 %v6433_v3 }
0x2566   : > { %5037 = vmatprep.subr.bf16.mxu1 %v5022_v53 }
0x2567   : > { %v5012_v30 = vsel %vm611_vm1, %v6435_v27, %v5010_v23  ;;  %v5011_v25 = vsel %vm611_vm1, %v6434_v26, %v6435_v27  ;;  %5038 = vmatpush1.bf16.msra.mxu1 %v5021_v24 }
0x2568   : > { %v5024_v31 = vpack.c.bf16 %v5012_v30, %v5012_v30  ;;  %v5023_v36 = vpack.c.bf16 %v5011_v25, %v5011_v25 }
0x256a   : > { %5335 = vmatprep.subr.msk.bf16.mxu1 %vm637_vm2, %v5024_v31  ;;  %v5026_v29 = vsel %vm637_vm2, %v5023_v36, 0 }
0x256b   : > { %5040 = vmatpush1.bf16.msra.mxu1 %v5026_v29 }
0x256e   : > { %5336 = vmatmul.mubr.msk.bf16.vlgmr.msra.gmra.mrb[44].mxu1 %vm633_vm3, %v6463_v22 }
0x2641   : > { %v5065_v41 = vpop.f32.mrb[44].mxu1 }
0x2642   : > { %v5066_v40 = vadd.f32 %v5065_v41, %v7589_v7  ;;  %v5067_v49 = vpop.f32.mrb[45].mxu1 }
0x2643   : > { %v5068_v61 = vadd.f32 %v5067_v49, %v7589_v7  ;;  %v5069_v1 = vpop.f32.mrb[46].mxu1 }
0x2644   : > { %6448 = vtanh.f32 %v5066_v40  ;;  %v5070_v46 = vpop.f32.mrb[47].mxu1 }
0x2645   : > { %6450 = vtanh.f32 %v5068_v61 }
0x264e   : > { %v6449_v45 = vpop.eup %6448 }
0x264f   : > { %v6451_v48 = vpop.eup %6450  ;;  %5080 = vst [vmem:[%s389_s24] sm:$0xff] %v6449_v45 }
0x2650   : > { %5081 = vst [vmem:[%s389_s24 + $0x8] sm:$0xff] %v6451_v48 }
0x2651 PF: > { %s20_s30 = sadd.s32 1, %s6470_s30  }
0x2652   : > { %p17_p4 = scmp.ge.s32.totalorder %s20_s30, 4  }
0x2654   :  { %19 = sbr.rel (!%p17_p4) target bundleno = 1 (0x1), region = 133 }

</bundles_post_ra>
